<compile_context>
chip_gen: v6e
topology: v6e:2x2x1
jax: 0.10.0
libtpu: 0.0.40
codegen_flags: <defaults>
</compile_context>

<pallas_src>
import functools

import jax
import jax.numpy as jnp
from jax.experimental import pallas as pl
from jax.experimental.pallas import tpu as pltpu


def mfr_kernel(
    xT_ref,                                  # (D, TN)  feature-major activations
    filtw_ref, filtb_ref,                    # fused x-only filter matmul (2*(L+1)*D, D) / (2*(L+1)*D, 1)
    linw_ref, linb_ref,                      # gating linear        (L, D, D) / (L, D, 1)
    ca1w_ref, ca1b_ref, ca2w_ref, ca2b_ref,  # channel attention
    o1w_ref, o1b_ref, o2w_ref,               # out_linear MLP head
    out_ref,                                 # (TN, out_dim)  sample-major output block
    *, n_layers: int,
):
    xT = xT_ref[...]                                     # (D, TN) f32, lane-dense
    D = xT.shape[0]
    F = n_layers + 1
    FD = F * D
    tn, out_dim = out_ref.shape

    # One wide MXU push for every matmul that depends only on x:
    #   rows [0, FD)    = freq parts  (first filter, then per-layer filters)
    #   rows [FD, 2*FD) = scale parts (same order)
    pre = jnp.dot(filtw_ref[...], xT, preferred_element_type=jnp.float32) + filtb_ref[...]

    def gabor(f):
        # [R7] cos/exp applied lazily per 32-row chunk (aligned sublane slices of
        # `pre`), so transcendental work interleaves with the per-layer MXU matmuls.
        freq = pre[f * D:(f + 1) * D]
        scal = pre[FD + f * D:FD + (f + 1) * D]
        return jnp.cos(freq) * jnp.exp(-(scal * scal))

    # z = first_filter(x) + x
    z = gabor(0) + xT

    out_acc = jnp.zeros((out_dim, tn), jnp.float32)      # feature-major: lane-dense adds

    for l in range(n_layers):                            # static unroll (n_layers small)
        filtered = gabor(l + 1)                          # filter_l(x)

        # new_z = linear(z) * filtered_input
        new_z = (jnp.dot(linw_ref[l], z, preferred_element_type=jnp.float32)
                 + linb_ref[l]) * filtered

        # channel attention: new_z * sigmoid(W2 relu(W1 new_z + b1) + b2)
        # [R9] kept on the MXU (not the rank-1 VPU form) for exact numerical parity
        # with the reference; flip after a bundle dump shows MXU latency on this chain.
        h = jnp.dot(ca1w_ref[l], new_z, preferred_element_type=jnp.float32) + ca1b_ref[l]
        h = jnp.maximum(h, 0.0)
        y = jax.nn.sigmoid(
            jnp.dot(ca2w_ref[l], h, preferred_element_type=jnp.float32) + ca2b_ref[l])

        # out_linear(ca + x): Linear -> LeakyReLU(0.01) -> Linear (no bias)
        t = new_z * y + xT
        h1 = jnp.dot(o1w_ref[l], t, preferred_element_type=jnp.float32) + o1b_ref[l]
        h1 = jnp.where(h1 > 0, h1, 0.01 * h1)
        out_acc = out_acc + jnp.dot(o2w_ref[l], h1, preferred_element_type=jnp.float32)

        z = new_z

    # [R4] one small in-kernel transpose (32 x TN -> TN x 32, XLU slot is idle here)
    # so the kernel writes the (N, out_dim) output directly; no wrapper-side
    # transpose / extra HBM pass over the result.
    out_ref[...] = out_acc.T


def prepare_kernel_weights(p, n_layers):
    """Repack (in,out)-layout params into the (out,in) / fused slabs the kernel uses."""
    def t_stacked(w):                         # (L, in, out) -> (L, out, in)
        return jnp.swapaxes(w, 1, 2)

    freq_w = [p["fwf"]] + [p["lwf"][l] for l in range(n_layers)]
    scal_w = [p["fws"]] + [p["lws"][l] for l in range(n_layers)]
    freq_b = [p["fbf"]] + [p["lbf"][l] for l in range(n_layers)]
    scal_b = [p["fbs"]] + [p["lbs"][l] for l in range(n_layers)]
    filt_w = jnp.concatenate(freq_w + scal_w, axis=1).T   # (2*(L+1)*D, D)
    filt_b = jnp.concatenate(freq_b + scal_b, axis=1).T   # (2*(L+1)*D, 1)

    return [
        filt_w, filt_b,
        t_stacked(p["linw"]), t_stacked(p["linb"]),
        t_stacked(p["ca1w"]), t_stacked(p["ca1b"]),
        t_stacked(p["ca2w"]), t_stacked(p["ca2b"]),
        t_stacked(p["o1w"]), t_stacked(p["o1b"]),
        t_stacked(p["o2w"]),
    ]


def _auto_tile_n(n_rows, cap=4096):
    """Largest lane-aligned divisor of n_rows (<= cap), preferring grid >= 2.

    [R1] big tiles amortise the ~0.35 us/step pipeline overhead; [R2] grid >= 2 keeps
    both v7x TensorCores busy through the "parallel" grid axis; single-TC chips lose
    nothing from two steps.
    """
    best = None
    t = 128
    while t <= min(n_rows, cap):
        if n_rows % t == 0:
            if n_rows // t >= 2:
                best = t
            elif best is None:
                best = t
        t += 128
    return best if best is not None else n_rows


def mfr_forward(x, params, *, n_layers, out_dim, tile_n=None):
    N, D = x.shape
    if tile_n is None:
        tile_n = _auto_tile_n(N)
    assert N % tile_n == 0, "N must be divisible by tile_n"
    assert tile_n % 128 == 0 or tile_n == N, "tile_n should be lane-aligned (x128)"

    # [R4 - input side] one wrapper-level transpose so activations enter the kernel
    # feature-major (D on sublanes, samples on lanes): every elementwise slab and
    # every residual add stays lane-dense.  Kept in the wrapper (exact + guaranteed
    # lowering); x traffic is tiny relative to the kernel's compute.
    xT = x.T                                   # (D, N)
    weights = prepare_kernel_weights(params, n_layers)

    def full_spec(shape):
        nd = len(shape)
        return pl.BlockSpec(shape, lambda i, _nd=nd: (0,) * _nd)

    in_specs = [pl.BlockSpec((D, tile_n), lambda i: (0, i))]
    in_specs += [full_spec(w.shape) for w in weights]

    # Advisory cost estimate: transcendental-heavy (cos/exp per Gabor, exp in sigmoid).
    Dr = D // 8
    mid = D // 2
    F = n_layers + 1
    flops = 2 * N * (D * (2 * F * D)
                     + n_layers * (D * D + D * Dr + Dr * D + D * mid + mid * out_dim))
    transcendentals = N * (2 * F * D + n_layers * D)
    bytes_accessed = 4 * (N * D + N * out_dim + sum(int(w.size) for w in weights))

    kernel = functools.partial(mfr_kernel, n_layers=n_layers)

    out = pl.pallas_call(
        kernel,
        out_shape=jax.ShapeDtypeStruct((N, out_dim), jnp.float32),
        grid=(N // tile_n,),
        in_specs=in_specs,
        out_specs=pl.BlockSpec((tile_n, out_dim), lambda i: (i, 0)),
        compiler_params=pltpu.CompilerParams(dimension_semantics=("parallel",)),
        # [R3] vmem_limit_bytes left at the default: at tile_n <= 4096 total VMEM use
        # is ~8-10 MB, inside even v5e's 16 MiB scoped default. Set it explicitly
        # before pushing tile_n past ~8K columns (esp. on v7x's 64 MiB physical VMEM).
        cost_estimate=pl.CostEstimate(flops=flops,
                                      transcendentals=transcendentals,
                                      bytes_accessed=bytes_accessed),
    )(xT, *weights)
    return out                                 # (N, out_dim)


# ---------------------------------------------------------------------------
# Deterministic parameter construction (synthetic; mirrors module shapes).
# Weights here are in (in, out) layout so the reference is plain `x @ W + b`.
# ---------------------------------------------------------------------------
def _linear_init(key, fan_in, fan_out, bias=True):
    k1, k2 = jax.random.split(key)
    bound = 1.0 / jnp.sqrt(fan_in)
    w = jax.random.uniform(k1, (fan_in, fan_out), jnp.float32, -bound, bound)
    b = (jax.random.uniform(k2, (1, fan_out), jnp.float32, -bound, bound)
         if bias else None)
    return w, b


def make_mfr_params(key, in_dim, out_dim, n_layers, feats_dim,
                    omega0=10.0, scale0=10.0, reduction=8):
    assert in_dim == feats_dim, "MFR forward requires in_dim == feats_dim (x + z add)"
    D, mid, Dr = feats_dim, feats_dim // 2, feats_dim // reduction
    keys = iter(jax.random.split(key, 64))

    # first RealGabor filter (fold omega0 / scale0 into weights & biases)
    fwf, fbf = _linear_init(next(keys), in_dim, D)
    fws, fbs = _linear_init(next(keys), in_dim, D)
    p = {
        "fwf": fwf * omega0, "fbf": fbf * omega0,
        "fws": fws * scale0, "fbs": fbs * scale0,
    }

    def stack(make_one):
        ws, bs = [], []
        for _ in range(n_layers):
            w, b = make_one(next(keys))
            ws.append(w)
            if b is not None:
                bs.append(b)
        return jnp.stack(ws), (jnp.stack(bs) if bs else None)

    p["lwf"], p["lbf"] = stack(lambda k: tuple(a * omega0 for a in _linear_init(k, D, D)))
    p["lws"], p["lbs"] = stack(lambda k: tuple(a * scale0 for a in _linear_init(k, D, D)))
    p["linw"], p["linb"] = stack(lambda k: _linear_init(k, D, D))
    p["ca1w"], p["ca1b"] = stack(lambda k: _linear_init(k, D, Dr))
    p["ca2w"], p["ca2b"] = stack(lambda k: _linear_init(k, Dr, D))
    p["o1w"], p["o1b"] = stack(lambda k: _linear_init(k, D, mid))
    p["o2w"], _ = stack(lambda k: _linear_init(k, mid, out_dim, bias=False))
    return p


# ---------------------------------------------------------------------------
# Pure-JAX reference (same math, for correctness check).
# ---------------------------------------------------------------------------
def mfr_reference(x, p, n_layers):
    def rg(x, wf, bf, ws, bs):
        return jnp.cos(x @ wf + bf) * jnp.exp(-((x @ ws + bs) ** 2))

    z = rg(x, p["fwf"], p["fbf"], p["fws"], p["fbs"]) + x
    out = 0.0
    for l in range(n_layers):
        filt = rg(x, p["lwf"][l], p["lbf"][l], p["lws"][l], p["lbs"][l])
        new_z = (z @ p["linw"][l] + p["linb"][l]) * filt
        h = jnp.maximum(new_z @ p["ca1w"][l] + p["ca1b"][l], 0.0)
        y = jax.nn.sigmoid(h @ p["ca2w"][l] + p["ca2b"][l])
        t = new_z * y + x
        h1 = t @ p["o1w"][l] + p["o1b"][l]
        h1 = jnp.where(h1 > 0, h1, 0.01 * h1)
        out = out + h1 @ p["o2w"][l]
        z = new_z
    return out


if __name__ == "__main__":
    in_dim = feats_dim = 32
    out_dim = 32
    n_layers = 2
    N = 1024          # sample points (rows of x); auto tile_n -> 512, grid = 2

    key = jax.random.PRNGKey(0)
    kx, kp = jax.random.split(key)
    x = jax.random.normal(kx, (N, in_dim), jnp.float32)
    params = make_mfr_params(kp, in_dim, out_dim, n_layers, feats_dim)

    fwd = jax.jit(functools.partial(mfr_forward, n_layers=n_layers, out_dim=out_dim))
    out = jax.block_until_ready(fwd(x, params))

    ref = mfr_reference(x, params, n_layers)
    assert out.shape == (N, out_dim)
    assert jnp.allclose(out, ref, rtol=1e-4, atol=2e-4), "mismatch vs JAX reference"
    print("KERNEL_OK")
</pallas_src>

<mosaic_0001>
module attributes {stable_mosaic.version = 11 : i64} {
  func.func @mfr_kernel(%arg0: i32, %arg1: memref<32x512xf32, #tpu.memory_space<vmem>>, %arg2: memref<192x32xf32, #tpu.memory_space<vmem>>, %arg3: memref<192x1xf32, #tpu.memory_space<vmem>>, %arg4: memref<2x32x32xf32, #tpu.memory_space<vmem>>, %arg5: memref<2x32x1xf32, #tpu.memory_space<vmem>>, %arg6: memref<2x4x32xf32, #tpu.memory_space<vmem>>, %arg7: memref<2x4x1xf32, #tpu.memory_space<vmem>>, %arg8: memref<2x32x4xf32, #tpu.memory_space<vmem>>, %arg9: memref<2x32x1xf32, #tpu.memory_space<vmem>>, %arg10: memref<2x16x32xf32, #tpu.memory_space<vmem>>, %arg11: memref<2x16x1xf32, #tpu.memory_space<vmem>>, %arg12: memref<2x32x16xf32, #tpu.memory_space<vmem>>, %arg13: memref<512x32xf32, #tpu.memory_space<vmem>>) attributes {dimension_semantics = [#tpu.dimension_semantics<parallel>], iteration_bounds = array<i64: 2>, scalar_prefetch = 0 : i64, scratch_operands = 0 : i64, tpu.core_type = #tpu.core_type<tc>, window_params = [{transform_indices = @transform_0, window_bounds = array<i64: 32, 512>}, {pipeline_mode = #tpu.pipeline_mode<synchronous>, transform_indices = @transform_1, window_bounds = array<i64: 192, 32>}, {pipeline_mode = #tpu.pipeline_mode<synchronous>, transform_indices = @transform_2, window_bounds = array<i64: 192, 1>}, {pipeline_mode = #tpu.pipeline_mode<synchronous>, transform_indices = @transform_3, window_bounds = array<i64: 2, 32, 32>}, {pipeline_mode = #tpu.pipeline_mode<synchronous>, transform_indices = @transform_4, window_bounds = array<i64: 2, 32, 1>}, {pipeline_mode = #tpu.pipeline_mode<synchronous>, transform_indices = @transform_5, window_bounds = array<i64: 2, 4, 32>}, {pipeline_mode = #tpu.pipeline_mode<synchronous>, transform_indices = @transform_6, window_bounds = array<i64: 2, 4, 1>}, {pipeline_mode = #tpu.pipeline_mode<synchronous>, transform_indices = @transform_7, window_bounds = array<i64: 2, 32, 4>}, {pipeline_mode = #tpu.pipeline_mode<synchronous>, transform_indices = @transform_8, window_bounds = array<i64: 2, 32, 1>}, {pipeline_mode = #tpu.pipeline_mode<synchronous>, transform_indices = @transform_9, window_bounds = array<i64: 2, 16, 32>}, {pipeline_mode = #tpu.pipeline_mode<synchronous>, transform_indices = @transform_10, window_bounds = array<i64: 2, 16, 1>}, {pipeline_mode = #tpu.pipeline_mode<synchronous>, transform_indices = @transform_11, window_bounds = array<i64: 2, 32, 16>}, {transform_indices = @transform_12, window_bounds = array<i64: 512, 32>}]} {
    %c0 = arith.constant 0 : index
    %c0_0 = arith.constant 0 : index
    %0 = vector.load %arg1[%c0, %c0_0] : memref<32x512xf32, #tpu.memory_space<vmem>>, vector<32x512xf32>
    %c0_1 = arith.constant 0 : index
    %c0_2 = arith.constant 0 : index
    %1 = vector.load %arg2[%c0_1, %c0_2] : memref<192x32xf32, #tpu.memory_space<vmem>>, vector<192x32xf32>
    %cst = arith.constant dense<0.000000e+00> : vector<192x512xf32>
    %2 = tpu.matmul %1, %0, %cst {dimension_numbers = #tpu.dot_dimension_numbers<[1], [0], [0], [1], [0, 0, 1, 1], [], []>} : vector<192x32xf32>, vector<32x512xf32>, vector<192x512xf32> -> vector<192x512xf32>
    %c0_3 = arith.constant 0 : index
    %c0_4 = arith.constant 0 : index
    %3 = vector.load %arg3[%c0_3, %c0_4] : memref<192x1xf32, #tpu.memory_space<vmem>>, vector<192x1xf32>
    %4 = vector.broadcast %3 : vector<192x1xf32> to vector<192x512xf32>
    %5 = arith.addf %2, %4 : vector<192x512xf32>
    %6 = vector.extract_strided_slice %5 {offsets = [0, 0], sizes = [32, 512], strides = [1, 1]} : vector<192x512xf32> to vector<32x512xf32>
    %7 = vector.extract_strided_slice %5 {offsets = [96, 0], sizes = [32, 512], strides = [1, 1]} : vector<192x512xf32> to vector<32x512xf32>
    %8 = math.cos %6 : vector<32x512xf32>
    %9 = arith.mulf %7, %7 : vector<32x512xf32>
    %cst_5 = arith.constant 0.000000e+00 : f32
    %10 = vector.broadcast %cst_5 : f32 to vector<32x512xf32>
    %11 = arith.subf %10, %9 : vector<32x512xf32>
    %12 = math.exp %11 : vector<32x512xf32>
    %13 = arith.mulf %8, %12 : vector<32x512xf32>
    %14 = arith.addf %13, %0 : vector<32x512xf32>
    %cst_6 = arith.constant 0.000000e+00 : f32
    %15 = vector.broadcast %cst_6 : f32 to vector<32x512xf32>
    %16 = vector.extract_strided_slice %5 {offsets = [32, 0], sizes = [32, 512], strides = [1, 1]} : vector<192x512xf32> to vector<32x512xf32>
    %17 = vector.extract_strided_slice %5 {offsets = [128, 0], sizes = [32, 512], strides = [1, 1]} : vector<192x512xf32> to vector<32x512xf32>
    %18 = math.cos %16 : vector<32x512xf32>
    %19 = arith.mulf %17, %17 : vector<32x512xf32>
    %cst_7 = arith.constant 0.000000e+00 : f32
    %20 = vector.broadcast %cst_7 : f32 to vector<32x512xf32>
    %21 = arith.subf %20, %19 : vector<32x512xf32>
    %22 = math.exp %21 : vector<32x512xf32>
    %23 = arith.mulf %18, %22 : vector<32x512xf32>
    %c0_8 = arith.constant 0 : index
    %c0_9 = arith.constant 0 : index
    %c0_10 = arith.constant 0 : index
    %24 = vector.load %arg4[%c0_8, %c0_9, %c0_10] : memref<2x32x32xf32, #tpu.memory_space<vmem>>, vector<1x32x32xf32>
    %25 = vector.shape_cast %24 : vector<1x32x32xf32> to vector<32x32xf32>
    %cst_11 = arith.constant dense<0.000000e+00> : vector<32x512xf32>
    %26 = tpu.matmul %25, %14, %cst_11 {dimension_numbers = #tpu.dot_dimension_numbers<[1], [0], [0], [1], [0, 0, 1, 1], [], []>} : vector<32x32xf32>, vector<32x512xf32>, vector<32x512xf32> -> vector<32x512xf32>
    %c0_12 = arith.constant 0 : index
    %c0_13 = arith.constant 0 : index
    %c0_14 = arith.constant 0 : index
    %27 = vector.load %arg5[%c0_12, %c0_13, %c0_14] : memref<2x32x1xf32, #tpu.memory_space<vmem>>, vector<1x32x1xf32>
    %28 = vector.shape_cast %27 : vector<1x32x1xf32> to vector<32x1xf32>
    %29 = vector.broadcast %28 : vector<32x1xf32> to vector<32x512xf32>
    %30 = arith.addf %26, %29 : vector<32x512xf32>
    %31 = arith.mulf %30, %23 : vector<32x512xf32>
    %c0_15 = arith.constant 0 : index
    %c0_16 = arith.constant 0 : index
    %c0_17 = arith.constant 0 : index
    %32 = vector.load %arg6[%c0_15, %c0_16, %c0_17] : memref<2x4x32xf32, #tpu.memory_space<vmem>>, vector<1x4x32xf32>
    %33 = vector.shape_cast %32 : vector<1x4x32xf32> to vector<4x32xf32>
    %cst_18 = arith.constant dense<0.000000e+00> : vector<4x512xf32>
    %34 = tpu.matmul %33, %31, %cst_18 {dimension_numbers = #tpu.dot_dimension_numbers<[1], [0], [0], [1], [0, 0, 1, 1], [], []>} : vector<4x32xf32>, vector<32x512xf32>, vector<4x512xf32> -> vector<4x512xf32>
    %c0_19 = arith.constant 0 : index
    %c0_20 = arith.constant 0 : index
    %c0_21 = arith.constant 0 : index
    %35 = vector.load %arg7[%c0_19, %c0_20, %c0_21] : memref<2x4x1xf32, #tpu.memory_space<vmem>>, vector<1x4x1xf32>
    %36 = vector.shape_cast %35 : vector<1x4x1xf32> to vector<4x1xf32>
    %37 = vector.broadcast %36 : vector<4x1xf32> to vector<4x512xf32>
    %38 = arith.addf %34, %37 : vector<4x512xf32>
    %cst_22 = arith.constant 0.000000e+00 : f32
    %39 = vector.broadcast %cst_22 : f32 to vector<4x512xf32>
    %40 = arith.maximumf %38, %39 : vector<4x512xf32>
    %c0_23 = arith.constant 0 : index
    %c0_24 = arith.constant 0 : index
    %c0_25 = arith.constant 0 : index
    %41 = vector.load %arg8[%c0_23, %c0_24, %c0_25] : memref<2x32x4xf32, #tpu.memory_space<vmem>>, vector<1x32x4xf32>
    %42 = vector.shape_cast %41 : vector<1x32x4xf32> to vector<32x4xf32>
    %cst_26 = arith.constant dense<0.000000e+00> : vector<32x512xf32>
    %43 = tpu.matmul %42, %40, %cst_26 {dimension_numbers = #tpu.dot_dimension_numbers<[1], [0], [0], [1], [0, 0, 1, 1], [], []>} : vector<32x4xf32>, vector<4x512xf32>, vector<32x512xf32> -> vector<32x512xf32>
    %c0_27 = arith.constant 0 : index
    %c0_28 = arith.constant 0 : index
    %c0_29 = arith.constant 0 : index
    %44 = vector.load %arg9[%c0_27, %c0_28, %c0_29] : memref<2x32x1xf32, #tpu.memory_space<vmem>>, vector<1x32x1xf32>
    %45 = vector.shape_cast %44 : vector<1x32x1xf32> to vector<32x1xf32>
    %46 = vector.broadcast %45 : vector<32x1xf32> to vector<32x512xf32>
    %47 = arith.addf %43, %46 : vector<32x512xf32>
    %48 = arith.negf %47 : vector<32x512xf32>
    %49 = math.exp %48 : vector<32x512xf32>
    %cst_30 = arith.constant 1.000000e+00 : f32
    %50 = vector.broadcast %cst_30 : f32 to vector<32x512xf32>
    %51 = arith.addf %50, %49 : vector<32x512xf32>
    %52 = arith.divf %50, %51 : vector<32x512xf32>
    %53 = arith.mulf %31, %52 : vector<32x512xf32>
    %54 = arith.addf %53, %0 : vector<32x512xf32>
    %c0_31 = arith.constant 0 : index
    %c0_32 = arith.constant 0 : index
    %c0_33 = arith.constant 0 : index
    %55 = vector.load %arg10[%c0_31, %c0_32, %c0_33] : memref<2x16x32xf32, #tpu.memory_space<vmem>>, vector<1x16x32xf32>
    %56 = vector.shape_cast %55 : vector<1x16x32xf32> to vector<16x32xf32>
    %cst_34 = arith.constant dense<0.000000e+00> : vector<16x512xf32>
    %57 = tpu.matmul %56, %54, %cst_34 {dimension_numbers = #tpu.dot_dimension_numbers<[1], [0], [0], [1], [0, 0, 1, 1], [], []>} : vector<16x32xf32>, vector<32x512xf32>, vector<16x512xf32> -> vector<16x512xf32>
    %c0_35 = arith.constant 0 : index
    %c0_36 = arith.constant 0 : index
    %c0_37 = arith.constant 0 : index
    %58 = vector.load %arg11[%c0_35, %c0_36, %c0_37] : memref<2x16x1xf32, #tpu.memory_space<vmem>>, vector<1x16x1xf32>
    %59 = vector.shape_cast %58 : vector<1x16x1xf32> to vector<16x1xf32>
    %60 = vector.broadcast %59 : vector<16x1xf32> to vector<16x512xf32>
    %61 = arith.addf %57, %60 : vector<16x512xf32>
    %cst_38 = arith.constant 0.000000e+00 : f32
    %62 = vector.broadcast %cst_38 : f32 to vector<16x512xf32>
    %63 = arith.cmpf ogt, %61, %62 : vector<16x512xf32>
    %cst_39 = arith.constant 0.00999999977 : f32
    %64 = vector.broadcast %cst_39 : f32 to vector<16x512xf32>
    %65 = arith.mulf %64, %61 : vector<16x512xf32>
    %66 = arith.select %63, %61, %65 : vector<16x512xi1>, vector<16x512xf32>
    %c0_40 = arith.constant 0 : index
    %c0_41 = arith.constant 0 : index
    %c0_42 = arith.constant 0 : index
    %67 = vector.load %arg12[%c0_40, %c0_41, %c0_42] : memref<2x32x16xf32, #tpu.memory_space<vmem>>, vector<1x32x16xf32>
    %68 = vector.shape_cast %67 : vector<1x32x16xf32> to vector<32x16xf32>
    %cst_43 = arith.constant dense<0.000000e+00> : vector<32x512xf32>
    %69 = tpu.matmul %68, %66, %cst_43 {dimension_numbers = #tpu.dot_dimension_numbers<[1], [0], [0], [1], [0, 0, 1, 1], [], []>} : vector<32x16xf32>, vector<16x512xf32>, vector<32x512xf32> -> vector<32x512xf32>
    %70 = arith.addf %15, %69 : vector<32x512xf32>
    %71 = vector.extract_strided_slice %5 {offsets = [64, 0], sizes = [32, 512], strides = [1, 1]} : vector<192x512xf32> to vector<32x512xf32>
    %72 = vector.extract_strided_slice %5 {offsets = [160, 0], sizes = [32, 512], strides = [1, 1]} : vector<192x512xf32> to vector<32x512xf32>
    %73 = math.cos %71 : vector<32x512xf32>
    %74 = arith.mulf %72, %72 : vector<32x512xf32>
    %cst_44 = arith.constant 0.000000e+00 : f32
    %75 = vector.broadcast %cst_44 : f32 to vector<32x512xf32>
    %76 = arith.subf %75, %74 : vector<32x512xf32>
    %77 = math.exp %76 : vector<32x512xf32>
    %78 = arith.mulf %73, %77 : vector<32x512xf32>
    %c1 = arith.constant 1 : index
    %c0_45 = arith.constant 0 : index
    %c0_46 = arith.constant 0 : index
    %79 = vector.load %arg4[%c1, %c0_45, %c0_46] : memref<2x32x32xf32, #tpu.memory_space<vmem>>, vector<1x32x32xf32>
    %80 = vector.shape_cast %79 : vector<1x32x32xf32> to vector<32x32xf32>
    %cst_47 = arith.constant dense<0.000000e+00> : vector<32x512xf32>
    %81 = tpu.matmul %80, %31, %cst_47 {dimension_numbers = #tpu.dot_dimension_numbers<[1], [0], [0], [1], [0, 0, 1, 1], [], []>} : vector<32x32xf32>, vector<32x512xf32>, vector<32x512xf32> -> vector<32x512xf32>
    %c1_48 = arith.constant 1 : index
    %c0_49 = arith.constant 0 : index
    %c0_50 = arith.constant 0 : index
    %82 = vector.load %arg5[%c1_48, %c0_49, %c0_50] : memref<2x32x1xf32, #tpu.memory_space<vmem>>, vector<1x32x1xf32>
    %83 = vector.shape_cast %82 : vector<1x32x1xf32> to vector<32x1xf32>
    %84 = vector.broadcast %83 : vector<32x1xf32> to vector<32x512xf32>
    %85 = arith.addf %81, %84 : vector<32x512xf32>
    %86 = arith.mulf %85, %78 : vector<32x512xf32>
    %c1_51 = arith.constant 1 : index
    %c0_52 = arith.constant 0 : index
    %c0_53 = arith.constant 0 : index
    %87 = vector.load %arg6[%c1_51, %c0_52, %c0_53] : memref<2x4x32xf32, #tpu.memory_space<vmem>>, vector<1x4x32xf32>
    %88 = vector.shape_cast %87 : vector<1x4x32xf32> to vector<4x32xf32>
    %cst_54 = arith.constant dense<0.000000e+00> : vector<4x512xf32>
    %89 = tpu.matmul %88, %86, %cst_54 {dimension_numbers = #tpu.dot_dimension_numbers<[1], [0], [0], [1], [0, 0, 1, 1], [], []>} : vector<4x32xf32>, vector<32x512xf32>, vector<4x512xf32> -> vector<4x512xf32>
    %c1_55 = arith.constant 1 : index
    %c0_56 = arith.constant 0 : index
    %c0_57 = arith.constant 0 : index
    %90 = vector.load %arg7[%c1_55, %c0_56, %c0_57] : memref<2x4x1xf32, #tpu.memory_space<vmem>>, vector<1x4x1xf32>
    %91 = vector.shape_cast %90 : vector<1x4x1xf32> to vector<4x1xf32>
    %92 = vector.broadcast %91 : vector<4x1xf32> to vector<4x512xf32>
    %93 = arith.addf %89, %92 : vector<4x512xf32>
    %cst_58 = arith.constant 0.000000e+00 : f32
    %94 = vector.broadcast %cst_58 : f32 to vector<4x512xf32>
    %95 = arith.maximumf %93, %94 : vector<4x512xf32>
    %c1_59 = arith.constant 1 : index
    %c0_60 = arith.constant 0 : index
    %c0_61 = arith.constant 0 : index
    %96 = vector.load %arg8[%c1_59, %c0_60, %c0_61] : memref<2x32x4xf32, #tpu.memory_space<vmem>>, vector<1x32x4xf32>
    %97 = vector.shape_cast %96 : vector<1x32x4xf32> to vector<32x4xf32>
    %cst_62 = arith.constant dense<0.000000e+00> : vector<32x512xf32>
    %98 = tpu.matmul %97, %95, %cst_62 {dimension_numbers = #tpu.dot_dimension_numbers<[1], [0], [0], [1], [0, 0, 1, 1], [], []>} : vector<32x4xf32>, vector<4x512xf32>, vector<32x512xf32> -> vector<32x512xf32>
    %c1_63 = arith.constant 1 : index
    %c0_64 = arith.constant 0 : index
    %c0_65 = arith.constant 0 : index
    %99 = vector.load %arg9[%c1_63, %c0_64, %c0_65] : memref<2x32x1xf32, #tpu.memory_space<vmem>>, vector<1x32x1xf32>
    %100 = vector.shape_cast %99 : vector<1x32x1xf32> to vector<32x1xf32>
    %101 = vector.broadcast %100 : vector<32x1xf32> to vector<32x512xf32>
    %102 = arith.addf %98, %101 : vector<32x512xf32>
    %103 = arith.negf %102 : vector<32x512xf32>
    %104 = math.exp %103 : vector<32x512xf32>
    %cst_66 = arith.constant 1.000000e+00 : f32
    %105 = vector.broadcast %cst_66 : f32 to vector<32x512xf32>
    %106 = arith.addf %105, %104 : vector<32x512xf32>
    %107 = arith.divf %105, %106 : vector<32x512xf32>
    %108 = arith.mulf %86, %107 : vector<32x512xf32>
    %109 = arith.addf %108, %0 : vector<32x512xf32>
    %c1_67 = arith.constant 1 : index
    %c0_68 = arith.constant 0 : index
    %c0_69 = arith.constant 0 : index
    %110 = vector.load %arg10[%c1_67, %c0_68, %c0_69] : memref<2x16x32xf32, #tpu.memory_space<vmem>>, vector<1x16x32xf32>
    %111 = vector.shape_cast %110 : vector<1x16x32xf32> to vector<16x32xf32>
    %cst_70 = arith.constant dense<0.000000e+00> : vector<16x512xf32>
    %112 = tpu.matmul %111, %109, %cst_70 {dimension_numbers = #tpu.dot_dimension_numbers<[1], [0], [0], [1], [0, 0, 1, 1], [], []>} : vector<16x32xf32>, vector<32x512xf32>, vector<16x512xf32> -> vector<16x512xf32>
    %c1_71 = arith.constant 1 : index
    %c0_72 = arith.constant 0 : index
    %c0_73 = arith.constant 0 : index
    %113 = vector.load %arg11[%c1_71, %c0_72, %c0_73] : memref<2x16x1xf32, #tpu.memory_space<vmem>>, vector<1x16x1xf32>
    %114 = vector.shape_cast %113 : vector<1x16x1xf32> to vector<16x1xf32>
    %115 = vector.broadcast %114 : vector<16x1xf32> to vector<16x512xf32>
    %116 = arith.addf %112, %115 : vector<16x512xf32>
    %cst_74 = arith.constant 0.000000e+00 : f32
    %117 = vector.broadcast %cst_74 : f32 to vector<16x512xf32>
    %118 = arith.cmpf ogt, %116, %117 : vector<16x512xf32>
    %cst_75 = arith.constant 0.00999999977 : f32
    %119 = vector.broadcast %cst_75 : f32 to vector<16x512xf32>
    %120 = arith.mulf %119, %116 : vector<16x512xf32>
    %121 = arith.select %118, %116, %120 : vector<16x512xi1>, vector<16x512xf32>
    %c1_76 = arith.constant 1 : index
    %c0_77 = arith.constant 0 : index
    %c0_78 = arith.constant 0 : index
    %122 = vector.load %arg12[%c1_76, %c0_77, %c0_78] : memref<2x32x16xf32, #tpu.memory_space<vmem>>, vector<1x32x16xf32>
    %123 = vector.shape_cast %122 : vector<1x32x16xf32> to vector<32x16xf32>
    %cst_79 = arith.constant dense<0.000000e+00> : vector<32x512xf32>
    %124 = tpu.matmul %123, %121, %cst_79 {dimension_numbers = #tpu.dot_dimension_numbers<[1], [0], [0], [1], [0, 0, 1, 1], [], []>} : vector<32x16xf32>, vector<16x512xf32>, vector<32x512xf32> -> vector<32x512xf32>
    %125 = arith.addf %70, %124 : vector<32x512xf32>
    %126 = tpu.transpose %125, [1, 0] : vector<32x512xf32> -> vector<512x32xf32>
    %c0_80 = arith.constant 0 : index
    %c0_81 = arith.constant 0 : index
    %127 = vector.load %arg13[%c0_80, %c0_81] : memref<512x32xf32, #tpu.memory_space<vmem>>, vector<512x32xf32>
    tpu.vector_store %arg13[%c0_80, %c0_81], %126 {strides = array<i32>} : memref<512x32xf32, #tpu.memory_space<vmem>>, vector<512x32xf32>,
    return
  }
  func.func @transform_0(%arg0: i32) -> (i32, i32) {
    %c0_i32 = arith.constant 0 : i32
    %c0_i32_0 = arith.constant 0 : i32
    return %c0_i32, %arg0 : i32, i32
  }
  func.func @transform_1(%arg0: i32) -> (i32, i32) {
    %c0_i32 = arith.constant 0 : i32
    %c0_i32_0 = arith.constant 0 : i32
    %c0_i32_1 = arith.constant 0 : i32
    return %c0_i32, %c0_i32_0 : i32, i32
  }
  func.func @transform_2(%arg0: i32) -> (i32, i32) {
    %c0_i32 = arith.constant 0 : i32
    %c0_i32_0 = arith.constant 0 : i32
    %c0_i32_1 = arith.constant 0 : i32
    return %c0_i32, %c0_i32_0 : i32, i32
  }
  func.func @transform_3(%arg0: i32) -> (i32, i32, i32) {
    %c0_i32 = arith.constant 0 : i32
    %c0_i32_0 = arith.constant 0 : i32
    %c0_i32_1 = arith.constant 0 : i32
    %c0_i32_2 = arith.constant 0 : i32
    return %c0_i32, %c0_i32_0, %c0_i32_1 : i32, i32, i32
  }
  func.func @transform_4(%arg0: i32) -> (i32, i32, i32) {
    %c0_i32 = arith.constant 0 : i32
    %c0_i32_0 = arith.constant 0 : i32
    %c0_i32_1 = arith.constant 0 : i32
    %c0_i32_2 = arith.constant 0 : i32
    return %c0_i32, %c0_i32_0, %c0_i32_1 : i32, i32, i32
  }
  func.func @transform_5(%arg0: i32) -> (i32, i32, i32) {
    %c0_i32 = arith.constant 0 : i32
    %c0_i32_0 = arith.constant 0 : i32
    %c0_i32_1 = arith.constant 0 : i32
    %c0_i32_2 = arith.constant 0 : i32
    return %c0_i32, %c0_i32_0, %c0_i32_1 : i32, i32, i32
  }
  func.func @transform_6(%arg0: i32) -> (i32, i32, i32) {
    %c0_i32 = arith.constant 0 : i32
    %c0_i32_0 = arith.constant 0 : i32
    %c0_i32_1 = arith.constant 0 : i32
    %c0_i32_2 = arith.constant 0 : i32
    return %c0_i32, %c0_i32_0, %c0_i32_1 : i32, i32, i32
  }
  func.func @transform_7(%arg0: i32) -> (i32, i32, i32) {
    %c0_i32 = arith.constant 0 : i32
    %c0_i32_0 = arith.constant 0 : i32
    %c0_i32_1 = arith.constant 0 : i32
    %c0_i32_2 = arith.constant 0 : i32
    return %c0_i32, %c0_i32_0, %c0_i32_1 : i32, i32, i32
  }
  func.func @transform_8(%arg0: i32) -> (i32, i32, i32) {
    %c0_i32 = arith.constant 0 : i32
    %c0_i32_0 = arith.constant 0 : i32
    %c0_i32_1 = arith.constant 0 : i32
    %c0_i32_2 = arith.constant 0 : i32
    return %c0_i32, %c0_i32_0, %c0_i32_1 : i32, i32, i32
  }
  func.func @transform_9(%arg0: i32) -> (i32, i32, i32) {
    %c0_i32 = arith.constant 0 : i32
    %c0_i32_0 = arith.constant 0 : i32
    %c0_i32_1 = arith.constant 0 : i32
    %c0_i32_2 = arith.constant 0 : i32
    return %c0_i32, %c0_i32_0, %c0_i32_1 : i32, i32, i32
  }
  func.func @transform_10(%arg0: i32) -> (i32, i32, i32) {
    %c0_i32 = arith.constant 0 : i32
    %c0_i32_0 = arith.constant 0 : i32
    %c0_i32_1 = arith.constant 0 : i32
    %c0_i32_2 = arith.constant 0 : i32
    return %c0_i32, %c0_i32_0, %c0_i32_1 : i32, i32, i32
  }
  func.func @transform_11(%arg0: i32) -> (i32, i32, i32) {
    %c0_i32 = arith.constant 0 : i32
    %c0_i32_0 = arith.constant 0 : i32
    %c0_i32_1 = arith.constant 0 : i32
    %c0_i32_2 = arith.constant 0 : i32
    return %c0_i32, %c0_i32_0, %c0_i32_1 : i32, i32, i32
  }
  func.func @transform_12(%arg0: i32) -> (i32, i32) {
    %c0_i32 = arith.constant 0 : i32
    %c0_i32_0 = arith.constant 0 : i32
    return %arg0, %c0_i32 : i32, i32
  }
}

</mosaic_0001>

<bundles_post_ra>
// kernel: mfr_forward.1
= control target key start
LH: loop header
LB: loop body
LE: loop exit
PB: predicated region body
PF: predicated region fallthrough
CT: control target
= control target key end

     0   :  { %s10054_s21 = smov 0   ;;  %s10056_s22 = smov 0   ;;  %s18339_s0 = inlined_call_operand.vmem [shape: f32[32,1024], index: 0, kind: input, shape index: {}]   ;;  %s18340_s1 = inlined_call_operand.vmem [shape: f32[192,32], index: 1, kind: input, shape index: {}]   ;;  %s18341_s2 = inlined_call_operand.vmem [shape: f32[192,1], index: 2, kind: input, shape index: {}]   ;;  %s18342_s3 = inlined_call_operand.vmem [shape: f32[2,32,32], index: 3, kind: input, shape index: {}]   ;;  %s18343_s4 = inlined_call_operand.vmem [shape: f32[2,32,1], index: 4, kind: input, shape index: {}]   ;;  %s18344_s5 = inlined_call_operand.vmem [shape: f32[2,4,32], index: 5, kind: input, shape index: {}]   ;;  %s18345_s6 = inlined_call_operand.vmem [shape: f32[2,4,1], index: 6, kind: input, shape index: {}]   ;;  %s18346_s7 = inlined_call_operand.vmem [shape: f32[2,32,4], index: 7, kind: input, shape index: {}]   ;;  %s18347_s8 = inlined_call_operand.vmem [shape: f32[2,32,1], index: 8, kind: input, shape index: {}]   ;;  %s18348_s9 = inlined_call_operand.vmem [shape: f32[2,16,32], index: 9, kind: input, shape index: {}]   ;;  %s18349_s10 = inlined_call_operand.vmem [shape: f32[2,16,1], index: 10, kind: input, shape index: {}]   ;;  %s18350_s11 = inlined_call_operand.vmem [shape: f32[2,32,16], index: 11, kind: input, shape index: {}]   ;;  %s18351_s12 = inlined_call_operand.vmem [shape: f32[1024,32], index: 12, kind: output, shape index: {}]  }
   0x1   :  { %s10058_s23 = smov 0  }
   0x2 LB: > { %s8887_s24 = sadd.s32 4294967295, %s9979_s23   ;;  %s10071_s25 = sadd.s32 1, %s9979_s23   ;;  %s9979_s23 = sphi %s10058_s23, %s19789_s23   ;;  %s9975_s22 = sphi %s10056_s22, %s19788_s22   ;;  %s9971_s21 = sphi %s10054_s21, %s19787_s21  }
   0x3   : > { %s26_s26 = ssub.s32 %s9979_s23, %s10071_s25  ;;  %s29_s27 = sadd.s32 1, %s9975_s22 }
   0x4   : > { %p27_p0 = scmp.eq.s32.totalorder %s26_s26, 0  ;;  %p36_p1 = scmp.ne.s32.totalorder %s9975_s22, %s9971_s21 }
   0x5   : > { %p37_p2 = scmp.eq.s32.totalorder %s9979_s23, 0  ;;  %p8890_p4 = scmp.ge.s32.totalorder %s9979_s23, 2 }
   0x6   : > { %s10080_s28 = scalar_select %p27_p0, %s9975_s22, %s29_s27  }
   0x7   : > { %p38_p3 = por %p37_p2, %p36_p1  ;;  %352 = sbr.rel (%p8890_p4) target bundleno = 24 (0x18), region = 60 }
   0xc   : > { %355 = sbr.rel (!%p38_p3) target bundleno = 24 (0x18), region = 64  ;;  %s357_s29 = sand.u32 (%p38_p3), 1, %s9975_s22  }
   0xd   : > { %s9266_s30 = sshll.u32 (%p38_p3), %s9979_s23, 5  ;;  %s8891_s13 = sshll.u32 (%p38_p3), %s357_s29, 7 }
   0xe   : > { %s10088_s16 = scalar_lea.vmem (%p38_p3), %s18339_s0, %s9266_s30  ;;  %s359_s17 = scalar_lea.vmem (%p38_p3), [#allocation2], %s8891_s13 }
   0xf   : > { %v375_v0 = vld [vmem:[%s10088_s16] sm:$0xff] (%p38_p3)  ;;  %v377_v1 = vld [vmem:[%s10088_s16 + $0x8] sm:$0xff] (%p38_p3)  ;;  %v379_v2 = vld [vmem:[%s10088_s16 + $0x10] sm:$0xff] (%p38_p3) }
  0x10   : > { %376 = vst [vmem:[%s359_s17] sm:$0xff] (%p38_p3), %v375_v0  ;;  %378 = vst [vmem:[%s359_s17 + $0x8] sm:$0xff] (%p38_p3), %v377_v1  ;;  %v381_v3 = vld [vmem:[%s10088_s16 + $0x18] sm:$0xff] (%p38_p3)  ;;  %v383_v4 = vld [vmem:[%s10088_s16 + $0x40] sm:$0xff] (%p38_p3) }
  0x11   : > { %380 = vst [vmem:[%s359_s17 + $0x10] sm:$0xff] %v379_v2  ;;  %v385_v5 = vld [vmem:[%s10088_s16 + $0x48] sm:$0xff]  ;;  %382 = vst [vmem:[%s359_s17 + $0x18] sm:$0xff] %v381_v3  ;;  %v387_v6 = vld [vmem:[%s10088_s16 + $0x50] sm:$0xff] }
  0x12   : > { %384 = vst [vmem:[%s359_s17 + $0x20] sm:$0xff] %v383_v4  ;;  %386 = vst [vmem:[%s359_s17 + $0x28] sm:$0xff] %v385_v5  ;;  %v389_v7 = vld [vmem:[%s10088_s16 + $0x58] sm:$0xff]  ;;  %v391_v8 = vld [vmem:[%s10088_s16 + $0x80] sm:$0xff] }
  0x13   : > { %388 = vst [vmem:[%s359_s17 + $0x30] sm:$0xff] %v387_v6  ;;  %390 = vst [vmem:[%s359_s17 + $0x38] sm:$0xff] %v389_v7  ;;  %v393_v9 = vld [vmem:[%s10088_s16 + $0x88] sm:$0xff]  ;;  %v395_v10 = vld [vmem:[%s10088_s16 + $0x90] sm:$0xff] }
  0x14   : > { %392 = vst [vmem:[%s359_s17 + $0x40] sm:$0xff] %v391_v8  ;;  %v397_v11 = vld [vmem:[%s10088_s16 + $0x98] sm:$0xff]  ;;  %394 = vst [vmem:[%s359_s17 + $0x48] sm:$0xff] %v393_v9  ;;  %v399_v12 = vld [vmem:[%s10088_s16 + $0xc0] sm:$0xff] }
  0x15   : > { %396 = vst [vmem:[%s359_s17 + $0x50] sm:$0xff] %v395_v10  ;;  %398 = vst [vmem:[%s359_s17 + $0x58] sm:$0xff] %v397_v11  ;;  %v401_v13 = vld [vmem:[%s10088_s16 + $0xc8] sm:$0xff]  ;;  %v403_v14 = vld [vmem:[%s10088_s16 + $0xd0] sm:$0xff] }
  0x16   : > { %400 = vst [vmem:[%s359_s17 + $0x60] sm:$0xff] %v399_v12  ;;  %402 = vst [vmem:[%s359_s17 + $0x68] sm:$0xff] %v401_v13  ;;  %v405_v15 = vld [vmem:[%s10088_s16 + $0xd8] sm:$0xff] }
  0x17   : > { %404 = vst [vmem:[%s359_s17 + $0x70] sm:$0xff] %v403_v14  ;;  %406 = vst [vmem:[%s359_s17 + $0x78] sm:$0xff] %v405_v15 }
  0x18 PF: > { %p8894_p5 = scmp.ge.s32.totalorder %s9979_s23, 1  ;;  %p411_p6 = scmp.lt.s32.totalorder %s9979_s23, 3 }
  0x1a   : > { %p412_p7 = pnand %p8894_p5, %p411_p6 }
  0x1c   : > { %415 = sbr.rel (%p412_p7) target bundleno = 2941 (0xb7d), region = 87 }
  0x21   : > { %s418_s18 = sand.u32 1, %s9971_s21   ;;  %v509_v16 = vld [vmem:[%s18341_s2 + $0x18] sm:$0xff]  ;;  %v9981_v17 = vmov 0   ;;  %v18352_v18 = vmov 0.0   ;;  %v508_v33 = vld [vmem:[%s18341_s2 + $0x10] sm:$0xff]  ;;  %v482_v36 = vld [vmem:[%s18340_s1] sm:$0xff] }
  0x22   : > { %s8895_s26 = sshll.u32 %s418_s18, 7  ;;  %9491 = vset.pattern.permute.xlu0 %v9981_v17  ;;  %787 = vmatprep.mubr.f32.mxu0 %v18352_v18  ;;  %vm18489_vm0 = vcmask 261120   ;;  %v521_v37 = vld [vmem:[%s18341_s2 + $0x78] sm:$0xff]  ;;  %v483_v38 = vld [vmem:[%s18340_s1 + $0x8] sm:$0xff]  ;;  %v506_v40 = vld [vmem:[%s18341_s2] sm:$0xff]  ;;  %s8896_s14 = sshll.u32 %s8887_s24, 6 }
  0x23   : > { %547 = vperm.xlu0 %9491, %v509_v16   ;;  %996 = vmatprep.mubr.f32.mxu1 %v18352_v18  ;;  %s10114_s27 = scalar_lea.vmem [#allocation2], %s8895_s26  ;;  %v507_v39 = vld [vmem:[%s18341_s2 + $0x8] sm:$0xff]  ;;  %v484_v42 = vld [vmem:[%s18340_s1 + $0x10] sm:$0xff]  ;;  %v513_v44 = vld [vmem:[%s18341_s2 + $0x38] sm:$0xff]  ;;  %p461_p8 = scmp.lt.s32.totalorder %s8896_s14, 127 }
  0x24   : > { %v479_v19 = vld [vmem:[%s10114_s27 + $0x68] sm:$0xff]  ;;  %v481_v20 = vld [vmem:[%s10114_s27 + $0x78] sm:$0xff]  ;;  %v478_v21 = vld [vmem:[%s10114_s27 + $0x60] sm:$0xff]  ;;  %9492 = vset.pattern.permute.xlu1 %v9981_v17 }
  0x25   : > { %747 = vmatprep.subr.mxu0 %v479_v19  ;;  %956 = vmatprep.subr.mxu1 %v481_v20  ;;  %v480_v22 = vld [vmem:[%s10114_s27 + $0x70] sm:$0xff]  ;;  %v475_v23 = vld [vmem:[%s10114_s27 + $0x48] sm:$0xff]  ;;  %v477_v24 = vld [vmem:[%s10114_s27 + $0x58] sm:$0xff]  ;;  %s19791_s14 = smov (!%p461_p8, %s8896_s14), 127 }
  0x26   : > { %748 = vmatpush1.msra.mxu0 %v478_v21  ;;  %957 = vmatpush1.msra.mxu1 %v480_v22  ;;  %v474_v25 = vld [vmem:[%s10114_s27 + $0x40] sm:$0xff]  ;;  %v476_v26 = vld [vmem:[%s10114_s27 + $0x50] sm:$0xff]  ;;  %v471_v27 = vld [vmem:[%s10114_s27 + $0x28] sm:$0xff]  ;;  %s8897_s15 = sshll.u32 %s19791_s14, 3 }
  0x27   : > { %749 = vmatprep.subr.mxu0 %v475_v23  ;;  %958 = vmatprep.subr.mxu1 %v477_v24  ;;  %v473_v28 = vld [vmem:[%s10114_s27 + $0x38] sm:$0xff]  ;;  %v470_v29 = vld [vmem:[%s10114_s27 + $0x20] sm:$0xff]  ;;  %v472_v30 = vld [vmem:[%s10114_s27 + $0x30] sm:$0xff]  ;;  %s18199_s18 = scalar_lea.vmem %s18351_s12, %s8897_s15 }
  0x28   : > { %750 = vmatpush1.msra.mxu0 %v474_v25  ;;  %959 = vmatpush1.msra.mxu1 %v476_v26  ;;  %v467_v31 = vld [vmem:[%s10114_s27 + $0x8] sm:$0xff]  ;;  %v469_v32 = vld [vmem:[%s10114_s27 + $0x18] sm:$0xff]  ;;  %v466_v34 = vld [vmem:[%s10114_s27] sm:$0xff] }
  0x29   : > { %751 = vmatprep.subr.mxu0 %v471_v27  ;;  %960 = vmatprep.subr.mxu1 %v473_v28  ;;  %v468_v35 = vld [vmem:[%s10114_s27 + $0x10] sm:$0xff]  ;;  %v519_v41 = vld [vmem:[%s18341_s2 + $0x68] sm:$0xff]  ;;  %v485_v45 = vld [vmem:[%s18340_s1 + $0x18] sm:$0xff] }
  0x2a   : > { %752 = vmatpush1.msra.mxu0 %v470_v29  ;;  %961 = vmatpush1.msra.mxu1 %v472_v30  ;;  %v520_v43 = vld [vmem:[%s18341_s2 + $0x70] sm:$0xff]  ;;  %v518_v46 = vld [vmem:[%s18341_s2 + $0x60] sm:$0xff]  ;;  %v511_v47 = vld [vmem:[%s18341_s2 + $0x28] sm:$0xff] }
  0x2b   : > { %753 = vmatprep.subr.mxu0 %v467_v31  ;;  %962 = vmatprep.subr.mxu1 %v469_v32  ;;  %v486_v48 = vld [vmem:[%s18340_s1 + $0x20] sm:$0xff]  ;;  %v512_v49 = vld [vmem:[%s18341_s2 + $0x30] sm:$0xff]  ;;  %v525_v50 = vld [vmem:[%s18341_s2 + $0x98] sm:$0xff] }
  0x2c   : > { %542 = vperm.xlu0 %9491, %v508_v33   ;;  %754 = vmatpush1.msra.mxu0 %v466_v34  ;;  %v487_v51 = vld [vmem:[%s18340_s1 + $0x28] sm:$0xff]  ;;  %v510_v52 = vld [vmem:[%s18341_s2 + $0x20] sm:$0xff]  ;;  %v488_v54 = vld [vmem:[%s18340_s1 + $0x30] sm:$0xff] }
  0x2d   : > { %963 = vmatpush1.msra.mxu1 %v468_v35  ;;  %8898 = vmatmul.mubr.msk.f32.vlgmr.msra.gmra.mxu0 %vm18489_vm0, %v482_v36  ;;  %v523_v53 = vld [vmem:[%s18341_s2 + $0x88] sm:$0xff]  ;;  %v524_v55 = vld [vmem:[%s18341_s2 + $0x90] sm:$0xff]  ;;  %v4620_v56 = vld [vmem:[%s18343_s4 + $0x18] sm:$0xff] }
  0x2e   : > { %8922 = vmatmul.mubr.msk.f32.vlgmr.msra.gmra.mxu1 %vm18489_vm0, %v482_v36  ;;  %793 = vmatprep.mubr.f32.mxu0 %v18352_v18  ;;  %v489_v57 = vld [vmem:[%s18340_s1 + $0x38] sm:$0xff]  ;;  %v522_v58 = vld [vmem:[%s18341_s2 + $0x80] sm:$0xff]  ;;  %v4618_v59 = vld [vmem:[%s18343_s4 + $0x8] sm:$0xff] }
  0x2f   : > { %1002 = vmatprep.mubr.f32.mxu1 %v18352_v18  ;;  %537 = vperm.xlu1 %9492, %v507_v39   ;;  %v490_v60 = vld [vmem:[%s18340_s1 + $0x40] sm:$0xff]  ;;  %v4619_v61 = vld [vmem:[%s18343_s4 + $0x10] sm:$0xff]  ;;  %v491_v63 = vld [vmem:[%s18340_s1 + $0x48] sm:$0xff] }
  0x30   : > { %607 = vperm.xlu0 %9491, %v521_v37   ;;  %v4848_v62 = vld [vmem:[%s18345_s6] sm:$0xf]  ;;  %v5009_v1 = vld [vmem:[%s18347_s8 + $0x10] sm:$0xff]  ;;  %v5010_v3 = vld [vmem:[%s18347_s8 + $0x18] sm:$0xff] }
  0x31   : > { %8899 = vmatmul.mubr.msk.f32.gmra.mxu0 %vm18489_vm0, %v483_v38  ;;  %v4617_v0 = vld [vmem:[%s18343_s4] sm:$0xff]  ;;  %v492_v2 = vld [vmem:[%s18340_s1 + $0x50] sm:$0xff]  ;;  %v493_v5 = vld [vmem:[%s18340_s1 + $0x58] sm:$0xff] }
  0x32   : > { %8923 = vmatmul.mubr.msk.f32.gmra.mxu1 %vm18489_vm0, %v483_v38  ;;  %799 = vmatprep.mubr.f32.mxu0 %v18352_v18  ;;  %v5007_v4 = vld [vmem:[%s18347_s8] sm:$0xff]  ;;  %v5008_v6 = vld [vmem:[%s18347_s8 + $0x8] sm:$0xff]  ;;  %v516_v7 = vld [vmem:[%s18341_s2 + $0x50] sm:$0xff] }
  0x33   : > { %1008 = vmatprep.mubr.f32.mxu1 %v18352_v18  ;;  %532 = vperm.xlu1 %9492, %v506_v40   ;;  %v494_v8 = vld [vmem:[%s18340_s1 + $0x60] sm:$0xff]  ;;  %v517_v9 = vld [vmem:[%s18341_s2 + $0x58] sm:$0xff]  ;;  %v495_v11 = vld [vmem:[%s18340_s1 + $0x68] sm:$0xff] }
  0x34   : > { %597 = vperm.xlu0 %9491, %v519_v41   ;;  %v514_v10 = vld [vmem:[%s18341_s2 + $0x40] sm:$0xff]  ;;  %v515_v12 = vld [vmem:[%s18341_s2 + $0x48] sm:$0xff]  ;;  %v528_v13 = vld [vmem:[%s18341_s2 + $0xb0] sm:$0xff] }
  0x35   : > { %8900 = vmatmul.mubr.msk.f32.gmra.mxu0 %vm18489_vm0, %v484_v42  ;;  %v496_v14 = vld [vmem:[%s18340_s1 + $0x70] sm:$0xff]  ;;  %v529_v15 = vld [vmem:[%s18341_s2 + $0xb8] sm:$0xff]  ;;  %v526_v16 = vld [vmem:[%s18341_s2 + $0xa0] sm:$0xff] }
  0x36   : > { %8924 = vmatmul.mubr.msk.f32.gmra.mxu1 %vm18489_vm0, %v484_v42  ;;  %805 = vmatprep.mubr.f32.mxu0 %v18352_v18  ;;  %v497_v17 = vld [vmem:[%s18340_s1 + $0x78] sm:$0xff]  ;;  %v527_v19 = vld [vmem:[%s18341_s2 + $0xa8] sm:$0xff]  ;;  %v9186_v20 = vld [vmem:[%s18343_s4 + $0x30] sm:$0xff] }
  0x37   : > { %1014 = vmatprep.mubr.f32.mxu1 %v18352_v18  ;;  %602 = vperm.xlu1 %9492, %v520_v43   ;;  %v498_v21 = vld [vmem:[%s18340_s1 + $0x80] sm:$0xff]  ;;  %v9187_v22 = vld [vmem:[%s18343_s4 + $0x38] sm:$0xff]  ;;  %v499_v24 = vld [vmem:[%s18340_s1 + $0x88] sm:$0xff] }
  0x38   : > { %567 = vperm.xlu0 %9491, %v513_v44   ;;  %v9184_v23 = vld [vmem:[%s18343_s4 + $0x20] sm:$0xff]  ;;  %v9185_v25 = vld [vmem:[%s18343_s4 + $0x28] sm:$0xff]  ;;  %v9207_v26 = vld [vmem:[%s18347_s8 + $0x38] sm:$0xff] }
  0x39   : > { %8901 = vmatmul.mubr.msk.f32.gmra.mxu0 %vm18489_vm0, %v485_v45  ;;  %v500_v27 = vld [vmem:[%s18340_s1 + $0x90] sm:$0xff]  ;;  %v9197_v28 = vld [vmem:[%s18345_s6 + $0x4] sm:$0xf]  ;;  %v9205_v29 = vld [vmem:[%s18347_s8 + $0x28] sm:$0xff] }
  0x3a   : > { %8925 = vmatmul.mubr.msk.f32.gmra.mxu1 %vm18489_vm0, %v485_v45  ;;  %811 = vmatprep.mubr.f32.mxu0 %v18352_v18  ;;  %v501_v30 = vld [vmem:[%s18340_s1 + $0x98] sm:$0xff]  ;;  %v9206_v31 = vld [vmem:[%s18347_s8 + $0x30] sm:$0xff]  ;;  %v502_v33 = vld [vmem:[%s18340_s1 + $0xa0] sm:$0xff] }
  0x3b   : > { %1020 = vmatprep.mubr.f32.mxu1 %v18352_v18  ;;  %592 = vperm.xlu1 %9492, %v518_v46   ;;  %v9239_v32 = vld [vmem:[%s18349_s10 + $0x18] sm:$0xff]  ;;  %v9204_v34 = vld [vmem:[%s18347_s8 + $0x20] sm:$0xff]  ;;  %v5366_v35 = vld [vmem:[%s18349_s10 + $0x8] sm:$0xff] }
  0x3c   : > { %557 = vperm.xlu0 %9491, %v511_v47   ;;  %v503_v36 = vld [vmem:[%s18340_s1 + $0xa8] sm:$0xff]  ;;  %v9238_v37 = vld [vmem:[%s18349_s10 + $0x10] sm:$0xff]  ;;  %v5365_v39 = vld [vmem:[%s18349_s10] sm:$0xff] }
  0x3d   : > { %8902 = vmatmul.mubr.msk.f32.gmra.mxu0 %vm18489_vm0, %v486_v48  ;;  %v504_v38 = vld [vmem:[%s18340_s1 + $0xb0] sm:$0xff]  ;;  %v505_v40 = vld [vmem:[%s18340_s1 + $0xb8] sm:$0xff] }
  0x3e   : > { %8926 = vmatmul.mubr.msk.f32.gmra.mxu1 %vm18489_vm0, %v486_v48  ;;  %817 = vmatprep.mubr.f32.mxu0 %v18352_v18 }
  0x3f   : > { %1026 = vmatprep.mubr.f32.mxu1 %v18352_v18  ;;  %562 = vperm.xlu1 %9492, %v512_v49  }
  0x40   : > { %627 = vperm.xlu0 %9491, %v525_v50  }
  0x41   : > { %8903 = vmatmul.mubr.msk.f32.gmra.mxu0 %vm18489_vm0, %v487_v51 }
  0x42   : > { %8927 = vmatmul.mubr.msk.f32.gmra.mxu1 %vm18489_vm0, %v487_v51  ;;  %823 = vmatprep.mubr.f32.mxu0 %v18352_v18 }
  0x43   : > { %1032 = vmatprep.mubr.f32.mxu1 %v18352_v18  ;;  %552 = vperm.xlu1 %9492, %v510_v52  }
  0x44   : > { %617 = vperm.xlu0 %9491, %v523_v53  }
  0x45   : > { %8904 = vmatmul.mubr.msk.f32.gmra.mxu0 %vm18489_vm0, %v488_v54 }
  0x46   : > { %8928 = vmatmul.mubr.msk.f32.gmra.mxu1 %vm18489_vm0, %v488_v54  ;;  %829 = vmatprep.mubr.f32.mxu0 %v18352_v18 }
  0x47   : > { %1038 = vmatprep.mubr.f32.mxu1 %v18352_v18  ;;  %622 = vperm.xlu1 %9492, %v524_v55  }
  0x48   : > { %4638 = vperm.xlu0 %9491, %v4620_v56  }
  0x49   : > { %8905 = vmatmul.mubr.msk.f32.gmra.mxu0 %vm18489_vm0, %v489_v57 }
  0x4a   : > { %8929 = vmatmul.mubr.msk.f32.gmra.mxu1 %vm18489_vm0, %v489_v57  ;;  %835 = vmatprep.mubr.f32.mxu0 %v18352_v18 }
  0x4b   : > { %1044 = vmatprep.mubr.f32.mxu1 %v18352_v18  ;;  %612 = vperm.xlu1 %9492, %v522_v58  }
  0x4c   : > { %4628 = vperm.xlu0 %9491, %v4618_v59  }
  0x4d   : > { %8906 = vmatmul.mubr.msk.f32.gmra.mxu0 %vm18489_vm0, %v490_v60 }
  0x4e   : > { %8930 = vmatmul.mubr.msk.f32.gmra.mxu1 %vm18489_vm0, %v490_v60  ;;  %841 = vmatprep.mubr.f32.mxu0 %v18352_v18 }
  0x4f   : > { %1050 = vmatprep.mubr.f32.mxu1 %v18352_v18  ;;  %4633 = vperm.xlu1 %9492, %v4619_v61  }
  0x50   : > { %4851 = vperm.xlu0 %9491, %v4848_v62   ;;  %v18363_v62 = vmov 920167782  }
  0x51   : > { %8907 = vmatmul.mubr.msk.f32.gmra.mxu0 %vm18489_vm0, %v491_v63 }
  0x52   : > { %8931 = vmatmul.mubr.msk.f32.gmra.mxu1 %vm18489_vm0, %v491_v63  ;;  %847 = vmatprep.mubr.f32.mxu0 %v18352_v18 }
  0x53   : > { %1056 = vmatprep.mubr.f32.mxu1 %v18352_v18  ;;  %4623 = vperm.xlu1 %9492, %v4617_v0   ;;  %v18360_v0 = vmov 1326507024  }
  0x54   : > { %5023 = vperm.xlu0 %9491, %v5009_v1  }
  0x55   : > { %8908 = vmatmul.mubr.msk.f32.gmra.mxu0 %vm18489_vm0, %v492_v2 }
  0x56   : > { %8932 = vmatmul.mubr.msk.f32.gmra.mxu1 %vm18489_vm0, %v492_v2  ;;  %853 = vmatprep.mubr.f32.mxu0 %v18352_v18 }
  0x57   : > { %1062 = vmatprep.mubr.f32.mxu1 %v18352_v18  ;;  %5028 = vperm.xlu1 %9492, %v5010_v3  }
  0x58   : > { %5013 = vperm.xlu0 %9491, %v5007_v4   ;;  %v18377_v4 = vmov 2102212464  }
  0x59   : > { %8909 = vmatmul.mubr.msk.f32.gmra.mxu0 %vm18489_vm0, %v493_v5 }
  0x5a   : > { %8933 = vmatmul.mubr.msk.f32.gmra.mxu1 %vm18489_vm0, %v493_v5  ;;  %859 = vmatprep.mubr.f32.mxu0 %v18352_v18 }
  0x5b   : > { %1068 = vmatprep.mubr.f32.mxu1 %v18352_v18  ;;  %5018 = vperm.xlu1 %9492, %v5008_v6  }
  0x5c   : > { %582 = vperm.xlu0 %9491, %v516_v7   ;;  %v18365_v7 = vmov 2475754826  }
  0x5d   : > { %8910 = vmatmul.mubr.msk.f32.gmra.mxu0 %vm18489_vm0, %v494_v8 }
  0x5e   : > { %8934 = vmatmul.mubr.msk.f32.gmra.mxu1 %vm18489_vm0, %v494_v8  ;;  %865 = vmatprep.mubr.f32.mxu0 %v18352_v18 }
  0x5f   : > { %1074 = vmatprep.mubr.f32.mxu1 %v18352_v18  ;;  %587 = vperm.xlu1 %9492, %v517_v9   ;;  %v18368_v9 = vmov 2131351028  }
  0x60   : > { %572 = vperm.xlu0 %9491, %v514_v10  }
  0x61   : > { %8911 = vmatmul.mubr.msk.f32.gmra.mxu0 %vm18489_vm0, %v495_v11 }
  0x62   : > { %8935 = vmatmul.mubr.msk.f32.gmra.mxu1 %vm18489_vm0, %v495_v11  ;;  %871 = vmatprep.mubr.f32.mxu0 %v18352_v18 }
  0x63   : > { %1080 = vmatprep.mubr.f32.mxu1 %v18352_v18  ;;  %577 = vperm.xlu1 %9492, %v515_v12  }
  0x64   : > { %642 = vperm.xlu0 %9491, %v528_v13  }
  0x65   : > { %8912 = vmatmul.mubr.msk.f32.gmra.mxu0 %vm18489_vm0, %v496_v14 }
  0x66   : > { %8936 = vmatmul.mubr.msk.f32.gmra.mxu1 %vm18489_vm0, %v496_v14  ;;  %877 = vmatprep.mubr.f32.mxu0 %v18352_v18 }
  0x67   : > { %1086 = vmatprep.mubr.f32.mxu1 %v18352_v18  ;;  %647 = vperm.xlu1 %9492, %v529_v15  }
  0x68   : > { %632 = vperm.xlu0 %9491, %v526_v16   ;;  %v18357_v16 = vmov 683565275  }
  0x69   : > { %8913 = vmatmul.mubr.msk.f32.gmra.mxu0 %vm18489_vm0, %v497_v17 }
  0x6a   : > { %8937 = vmatmul.mubr.msk.f32.gmra.mxu1 %vm18489_vm0, %v497_v17  ;;  %883 = vmatprep.mubr.f32.mxu0 %v18352_v18 }
  0x6b   : > { %1092 = vmatprep.mubr.f32.mxu1 %v18352_v18  ;;  %637 = vperm.xlu1 %9492, %v527_v19  }
  0x6c   : > { %7315 = vperm.xlu0 %9491, %v9186_v20  }
  0x6d   : > { %8914 = vmatmul.mubr.msk.f32.gmra.mxu0 %vm18489_vm0, %v498_v21 }
  0x6e   : > { %8938 = vmatmul.mubr.msk.f32.gmra.mxu1 %vm18489_vm0, %v498_v21  ;;  %889 = vmatprep.mubr.f32.mxu0 %v18352_v18 }
  0x6f   : > { %1098 = vmatprep.mubr.f32.mxu1 %v18352_v18  ;;  %7320 = vperm.xlu1 %9492, %v9187_v22  }
  0x70   : > { %7305 = vperm.xlu0 %9491, %v9184_v23  }
  0x71   : > { %8915 = vmatmul.mubr.msk.f32.gmra.mxu0 %vm18489_vm0, %v499_v24 }
  0x72   : > { %8939 = vmatmul.mubr.msk.f32.gmra.mxu1 %vm18489_vm0, %v499_v24  ;;  %895 = vmatprep.mubr.f32.mxu0 %v18352_v18 }
  0x73   : > { %1104 = vmatprep.mubr.f32.mxu1 %v18352_v18  ;;  %7310 = vperm.xlu1 %9492, %v9185_v25  }
  0x74   : > { %7714 = vperm.xlu0 %9491, %v9207_v26  }
  0x75   : > { %8916 = vmatmul.mubr.msk.f32.gmra.mxu0 %vm18489_vm0, %v500_v27 }
  0x76   : > { %8940 = vmatmul.mubr.msk.f32.gmra.mxu1 %vm18489_vm0, %v500_v27  ;;  %901 = vmatprep.mubr.f32.mxu0 %v18352_v18 }
  0x77   : > { %1110 = vmatprep.mubr.f32.mxu1 %v18352_v18  ;;  %7535 = vperm.xlu1 %9492, %v9197_v28  }
  0x78   : > { %7704 = vperm.xlu0 %9491, %v9205_v29  }
  0x79   : > { %8917 = vmatmul.mubr.msk.f32.gmra.mxu0 %vm18489_vm0, %v501_v30 }
  0x7a   : > { %8941 = vmatmul.mubr.msk.f32.gmra.mxu1 %vm18489_vm0, %v501_v30  ;;  %907 = vmatprep.mubr.f32.mxu0 %v18352_v18 }
  0x7b   : > { %1116 = vmatprep.mubr.f32.mxu1 %v18352_v18  ;;  %7709 = vperm.xlu1 %9492, %v9206_v31  }
  0x7c   : > { %8060 = vperm.xlu0 %9491, %v9239_v32  }
  0x7d   : > { %8918 = vmatmul.mubr.msk.f32.gmra.mxu0 %vm18489_vm0, %v502_v33 }
  0x7e   : > { %8942 = vmatmul.mubr.msk.f32.gmra.mxu1 %vm18489_vm0, %v502_v33  ;;  %913 = vmatprep.mubr.f32.mxu0 %v18352_v18 }
  0x7f   : > { %1122 = vmatprep.mubr.f32.mxu1 %v18352_v18  ;;  %7699 = vperm.xlu1 %9492, %v9204_v34  }
  0x80   : > { %5374 = vperm.xlu0 %9491, %v5366_v35  }
  0x81   : > { %8919 = vmatmul.mubr.msk.f32.gmra.mxu0 %vm18489_vm0, %v503_v36 }
  0x82   : > { %8943 = vmatmul.mubr.msk.f32.gmra.mxu1 %vm18489_vm0, %v503_v36  ;;  %919 = vmatprep.mubr.f32.mxu0 %v18352_v18 }
  0x83   : > { %1128 = vmatprep.mubr.f32.mxu1 %v18352_v18  ;;  %8055 = vperm.xlu1 %9492, %v9238_v37  }
  0x85   : > { %8920 = vmatmul.mubr.msk.f32.gmra.mxu0 %vm18489_vm0, %v504_v38 }
  0x86   : > { %8944 = vmatmul.mubr.msk.f32.gmra.mxu1 %vm18489_vm0, %v504_v38  ;;  %925 = vmatprep.mubr.f32.mxu0 %v18352_v18 }
  0x87   : > { %1134 = vmatprep.mubr.f32.mxu1 %v18352_v18  ;;  %5369 = vperm.xlu1 %9492, %v5365_v39  }
  0x89   : > { %8921 = vmatmul.mubr.msk.f32.gmra.mxu0 %vm18489_vm0, %v505_v40 }
  0x8a   : > { %8945 = vmatmul.mubr.msk.f32.gmra.mxu1 %vm18489_vm0, %v505_v40  ;;  %4717 = vmatprep.mubr.f32.mxu0 %v18352_v18 }
  0x8b   : > { %4806 = vmatprep.mubr.f32.mxu1 %v18352_v18 }
  0xaa   : > { %v10435_v41 = vpop.permute.xlu1 %537 }
  0xae   : > { %v10437_v43 = vpop.permute.xlu1 %532 }
  0xed   : > { %v789_v42 = vpop.f32.mrf.mxu0 }
  0xee   : > { %v10440_v44 = vadd.f32 %v789_v42, %v10437_v43  ;;  %v998_v47 = vpop.f32.mrf.mxu1 }
  0xef   : > { %v10444_v49 = vadd.f32 %v998_v47, %v10437_v43  ;;  %v791_v55 = vpop.f32.mrf.mxu0 }
  0xf0   : > { %18806 = vst [vmem:[#allocation3_spill] sm:$0xff] %v10440_v44  ;;  %v1144_v45 = vand.u32 2139095040, %v10440_v44  ;;  %v10448_v58 = vadd.f32 %v791_v55, %v10437_v43  ;;  %v1141_v61 = vand.u32 2147483647, %v10440_v44 }
  0xf1   : > { %18807 = vst [vmem:[#allocation4_spill] sm:$0xff] %v10444_v49  ;;  %v1350_v51 = vand.u32 2139095040, %v10444_v49  ;;  %v1347_v35 = vand.u32 2147483647, %v10444_v49 }
  0xf2   : > { %v1145_v46 = vshrl.u32 %v1144_v45, 23  ;;  %18808 = vst [vmem:[#allocation5_spill] sm:$0xff] %v10448_v58  ;;  %v1247_v60 = vand.u32 2139095040, %v10448_v58  ;;  %v1148_v13 = vand.u32 8388607, %v1141_v61 }
  0xf3   : > { %v1351_v52 = vshrl.u32 %v1350_v51, 23 }
  0xf4   : > { %v8946_v48 = vadd.s32 4294967169, %v1145_v46  ;;  %v1248_v6 = vshrl.u32 %v1247_v60, 23  ;;  %v1149_v27 = vor.u32 8388608, %v1148_v13 }
  0xf5   : > { %v8954_v54 = vadd.s32 4294967169, %v1351_v52 }
  0xf6   : > { %v1151_v50 = vadd.s32 1, %v8946_v48  ;;  %v8950_v22 = vadd.s32 4294967169, %v1248_v6  ;;  %v1189_v36 = vshll.u32 %v1149_v27, 8 }
  0xf7   : > { %v1357_v57 = vadd.s32 1, %v8954_v54  ;;  %v1000_v54 = vpop.f32.mrf.mxu1 }
  0xf8   : > { %vm1152_vm1 = vcmp.gt.s32.totalorder %v1151_v50, 0  ;;  %v1254_v32 = vadd.s32 1, %v8950_v22  ;;  %v10524_v6 = vadd.f32 %v1000_v54, %v10437_v43 }
  0xf9   : > { %v1153_v53 = vsel %vm1152_vm1, %v1151_v50, 0  ;;  %vm1358_vm2 = vcmp.gt.s32.totalorder %v1357_v57, 0 }
  0xfa   : > { %v1155_v56 = vand.u32 31, %v1153_v53  ;;  %v1359_v2 = vsel %vm1358_vm2, %v1357_v57, 0  ;;  %v10458_v3 = vshrl.u32 %v1153_v53, 5  ;;  %vm1255_vm7 = vcmp.gt.s32.totalorder %v1254_v32, 0  ;;  %18809 = vst [vmem:[#allocation6_spill] sm:$0xff] %v10524_v6 }
  0xfb   : > { %v1361_v15 = vand.u32 31, %v1359_v2  ;;  %v10497_v40 = vshrl.u32 %v1359_v2, 5  ;;  %v1354_v57 = vand.u32 8388607, %v1347_v35 }
  0xfc   : > { %v10450_v59 = vsub.s32 32, %v1155_v56  ;;  %v1167_v5 = vshll.u32 %v18377_v4, %v1155_v56  ;;  %v1170_v12 = vshll.u32 %v18363_v62, %v1155_v56  ;;  %v1158_v17 = vshll.u32 %v18357_v16, %v1155_v56 }
  0xfd   : > { %v1161_v19 = vshll.u32 %v18365_v7, %v1155_v56  ;;  %v1164_v20 = vshll.u32 %v18368_v9, %v1155_v56  ;;  %vm1176_vm3 = vcmp.lt.s32.totalorder %v10458_v3, 4  ;;  %v10478_v29 = vsub.s32 32, %v1361_v15 }
  0xfe   : > { %v1168_v63 = vshrl.u32 %v18363_v62, %v10450_v59  ;;  %v1171_v1 = vshrl.u32 %v18360_v0, %v10450_v59  ;;  %v1159_v8 = vshrl.u32 %v18365_v7, %v10450_v59  ;;  %v1162_v10 = vshrl.u32 %v18368_v9, %v10450_v59 }
  0xff   : > { %v1165_v11 = vshrl.u32 %v18377_v4, %v10450_v59  ;;  %vm1173_vm4 = vcmp.lt.s32.totalorder %v10458_v3, 1  ;;  %vm1175_vm5 = vcmp.lt.s32.totalorder %v10458_v3, 3  ;;  %vm1174_vm6 = vcmp.lt.s32.totalorder %v10458_v3, 2 }
 0x100   : > { %v1169_v14 = vor.u32 %v1168_v63, %v1167_v5  ;;  %v1172_v21 = vor.u32 %v1171_v1, %v1170_v12  ;;  %v1160_v23 = vor.u32 %v1159_v8, %v1158_v17  ;;  %v1163_v24 = vor.u32 %v1162_v10, %v1161_v19 }
 0x101   : > { %v1166_v25 = vor.u32 %v1165_v11, %v1164_v20  ;;  %v1373_v37 = vshll.u32 %v18377_v4, %v1361_v15  ;;  %v1374_v38 = vshrl.u32 %v18363_v62, %v10478_v29  ;;  %v1376_v42 = vshll.u32 %v18363_v62, %v1361_v15 }
 0x102   : > { %v1182_v26 = vsel %vm1176_vm3, %v1169_v14, 920167782  ;;  %v1186_v28 = vsel %vm1176_vm3, %v1172_v21, 1326507024  ;;  %v1181_v30 = vsel %vm1173_vm4, %v1160_v23, %v1163_v24  ;;  %v1377_v45 = vshrl.u32 %v18360_v0, %v10478_v29 }
 0x103   : > { %v1183_v31 = vsel %vm1175_vm5, %v1166_v25, %v1182_v26  ;;  %v1185_v33 = vsel %vm1173_vm4, %v1163_v24, %v1166_v25  ;;  %v1187_v34 = vsel %vm1175_vm5, %v1169_v14, %v1186_v28  ;;  %v1364_v47 = vshll.u32 %v18357_v16, %v1361_v15 }
 0x104   : > { %v1184_v39 = vsel %vm1174_vm6, %v1181_v30, %v1183_v31  ;;  %v1188_v46 = vsel %vm1174_vm6, %v1185_v33, %v1187_v34  ;;  %v1367_v48 = vshll.u32 %v18365_v7, %v1361_v15  ;;  %v1365_v50 = vshrl.u32 %v18365_v7, %v10478_v29 }
 0x105   : > { %v1368_v51 = vshrl.u32 %v18368_v9, %v10478_v29  ;;  %v1370_v52 = vshll.u32 %v18368_v9, %v1361_v15  ;;  %v1371_v53 = vshrl.u32 %v18377_v4, %v10478_v29  ;;  %v1375_v60 = vor.u32 %v1374_v38, %v1373_v37 }
 0x106   : > { %v10513_v55 = vmul.u32.u64.low %v1189_v36, %v1184_v39  ;;  %v10514_v56 = vmul.u32.u64.high %v1189_v36, %v1184_v39, %v10513_v55  ;;  %v10519_v63 = vmul.u32.u64.low %v1189_v36, %v1188_v46  ;;  %v10520_v1 = vmul.u32.u64.high %v1189_v36, %v1188_v46, %v10519_v63 }
 0x107   : > { %v1378_v2 = vor.u32 %v1377_v45, %v1376_v42  ;;  %vm1382_vm8 = vcmp.lt.s32.totalorder %v10497_v40, 4  ;;  %v1256_v5 = vsel %vm1255_vm7, %v1254_v32, 0  ;;  %v1157_v8 = vshrl.u32 %v18357_v16, %v10450_v59 }
 0x108   : > { %v1366_v10 = vor.u32 %v1365_v50, %v1364_v47  ;;  %v1369_v11 = vor.u32 %v1368_v51, %v1367_v48  ;;  %v1372_v12 = vor.u32 %v1371_v53, %v1370_v52  ;;  %v1178_v13 = vsel %vm1176_vm3, %v1166_v25, 2102212464 }
 0x109   : > { %vm1379_vm9 = vcmp.lt.s32.totalorder %v10497_v40, 1  ;;  %vm1381_vm10 = vcmp.lt.s32.totalorder %v10497_v40, 3  ;;  %v1388_v14 = vsel %vm1382_vm8, %v1375_v60, 920167782  ;;  %v1355_v15 = vor.u32 8388608, %v1354_v57 }
 0x10a   : > { %v1392_v43 = vsel %vm1382_vm8, %v1378_v2, 1326507024  ;;  %v1258_v17 = vand.u32 31, %v1256_v5  ;;  %v1177_v59 = vsel %vm1173_vm4, %v1157_v8, %v1160_v23  ;;  %v1453_v19 = vand.u32 2139095040, %v10524_v6 }
 0x10b   : > { %v1179_v20 = vsel %vm1175_vm5, %v1163_v24, %v1178_v13  ;;  %vm1380_vm11 = vcmp.lt.s32.totalorder %v10497_v40, 2  ;;  %v1387_v21 = vsel %vm1379_vm9, %v1366_v10, %v1369_v11  ;;  %v1389_v22 = vsel %vm1381_vm10, %v1372_v12, %v1388_v14 }
 0x10c   : > { %v1199_v25 = vadd.s32 1, %v10514_v56  ;;  %v1391_v26 = vsel %vm1379_vm9, %v1369_v11, %v1372_v12  ;;  %v1393_v23 = vsel %vm1381_vm10, %v1375_v60, %v1392_v43  ;;  %vm1198_vm12 = vc.u32 %v10520_v1, %v10513_v55 }
 0x10d   : > { %v1395_v24 = vshll.u32 %v1355_v15, 8  ;;  %v10553_v27 = vsub.s32 32, %v1258_v17  ;;  %v1180_v28 = vsel %vm1174_vm6, %v1177_v59, %v1179_v20  ;;  %v1390_v30 = vsel %vm1380_vm11, %v1387_v21, %v1389_v22 }
 0x10e   : > { %v1394_v31 = vsel %vm1380_vm11, %v1391_v26, %v1393_v23  ;;  %v1454_v32 = vshrl.u32 %v1453_v19, 23  ;;  %v1200_v33 = vsel %vm1198_vm12, %v1199_v25, %v10514_v56  ;;  %v18356_v34 = vand.u32 2147483647, %v10448_v58 }
 0x10f   : > { %v1196_v37 = vmul.u32 %v1189_v36, %v1180_v28  ;;  %v10563_v38 = vmul.u32.u64.low %v1395_v24, %v1390_v30  ;;  %v10564_v39 = vmul.u32.u64.high %v1395_v24, %v1390_v30, %v10563_v38  ;;  %v1271_v3 = vshrl.u32 %v18363_v62, %v10553_v27 }
 0x110   : > { %v10569_v42 = vmul.u32.u64.low %v1395_v24, %v1394_v31  ;;  %v10570_v45 = vmul.u32.u64.high %v1395_v24, %v1394_v31, %v10569_v42  ;;  %v1274_v46 = vshrl.u32 %v18360_v0, %v10553_v27  ;;  %v10574_v48 = vshrl.u32 %v1256_v5, 5 }
 0x111   : > { %v1201_v47 = vadd.s32 %v1200_v33, %v1196_v37  ;;  %v1270_v50 = vshll.u32 %v18377_v4, %v1258_v17  ;;  %v8958_v51 = vadd.s32 4294967169, %v1454_v32  ;;  %v1262_v36 = vshrl.u32 %v18365_v7, %v10553_v27 }
 0x112   : > { %v1265_v52 = vshrl.u32 %v18368_v9, %v10553_v27  ;;  %v1268_v53 = vshrl.u32 %v18377_v4, %v10553_v27  ;;  %v1273_v54 = vshll.u32 %v18363_v62, %v1258_v17  ;;  %v1363_v56 = vshrl.u32 %v18357_v16, %v10478_v29 }
 0x113   : > { %v1384_v57 = vsel %vm1382_vm8, %v1372_v12, 2102212464  ;;  %v1251_v60 = vand.u32 8388607, %v18356_v34  ;;  %v1272_v63 = vor.u32 %v1271_v3, %v1270_v50  ;;  %v1261_v2 = vshll.u32 %v18357_v16, %v1258_v17 }
 0x114   : > { %v1264_v5 = vshll.u32 %v18365_v7, %v1258_v17  ;;  %v1267_v8 = vshll.u32 %v18368_v9, %v1258_v17  ;;  %v1275_v13 = vor.u32 %v1274_v46, %v1273_v54  ;;  %v1202_v14 = vadd.s32 536870912, %v1201_v47  ;;  %v795_v54 = vpop.f32.mrf.mxu0 }
 0x115   : > { %v1460_v15 = vadd.s32 1, %v8958_v51  ;;  %v1263_v43 = vor.u32 %v1262_v36, %v1261_v2  ;;  %vm1279_vm13 = vcmp.lt.s32.totalorder %v10574_v48, 4  ;;  %v1383_v29 = vsel %vm1379_vm9, %v1363_v56, %v1366_v10 }
 0x116   : > { %v1266_v59 = vor.u32 %v1265_v52, %v1264_v5  ;;  %v1269_v19 = vor.u32 %v1268_v53, %v1267_v8  ;;  %v1385_v12 = vsel %vm1381_vm10, %v1369_v11, %v1384_v57  ;;  %v1285_v20 = vsel %vm1279_vm13, %v1272_v63, 920167782 }
 0x117   : > { %v1405_v21 = vadd.s32 1, %v10564_v39  ;;  %v1252_v17 = vor.u32 8388608, %v1251_v60  ;;  %v1289_v22 = vsel %vm1279_vm13, %v1275_v13, 1326507024  ;;  %vm1404_vm14 = vc.u32 %v10570_v45, %v10563_v38 }
 0x118   : > { %vm1276_vm15 = vcmp.lt.s32.totalorder %v10574_v48, 1  ;;  %vm1278_vm1 = vcmp.lt.s32.totalorder %v10574_v48, 3  ;;  %vm1461_vm2 = vcmp.gt.s32.totalorder %v1460_v15, 0  ;;  %v10607_v10 = vshrl.u32 %v1202_v14, 30 }
 0x119   : > { %v1386_v11 = vsel %vm1380_vm11, %v1383_v29, %v1385_v12  ;;  %v1284_v25 = vsel %vm1276_vm15, %v1263_v43, %v1266_v59  ;;  %v1286_v26 = vsel %vm1278_vm1, %v1269_v19, %v1285_v20  ;;  %v1288_v23 = vsel %vm1276_vm15, %v1266_v59, %v1269_v19 }
 0x11a   : > { %v1290_v28 = vsel %vm1278_vm1, %v1272_v63, %v1289_v22  ;;  %v1406_v30 = vsel %vm1404_vm14, %v1405_v21, %v10564_v39  ;;  %vm1277_vm3 = vcmp.lt.s32.totalorder %v10574_v48, 2  ;;  %v1462_v31 = vsel %vm1461_vm2, %v1460_v15, 0 }
 0x11b   : > { %v1402_v32 = vmul.u32 %v1395_v24, %v1386_v11  ;;  %v1287_v40 = vsel %vm1277_vm3, %v1284_v25, %v1286_v26  ;;  %v1204_v33 = vshll.u32 %v10607_v10, 30  ;;  %v1291_v37 = vsel %vm1277_vm3, %v1288_v23, %v1290_v28 }
 0x11c   : > { %v1292_v3 = vshll.u32 %v1252_v17, 8  ;;  %v1464_v46 = vand.u32 31, %v1462_v31  ;;  %v1281_v39 = vsel %vm1279_vm13, %v1269_v19, 2102212464  ;;  %v1260_v53 = vshrl.u32 %v18357_v16, %v10553_v27 }
 0x11d   : > { %v1407_v42 = vadd.s32 %v1406_v30, %v1402_v32  ;;  %v10635_v52 = vsub.s32 %v1201_v47, %v1204_v33  ;;  %v1282_v63 = vsel %vm1278_vm1, %v1266_v59, %v1281_v39  ;;  %v10646_v2 = vadd.f32 %v795_v54, %v10435_v41 }
 0x11e   : > { %v10626_v50 = vmul.u32.u64.low %v1292_v3, %v1287_v40  ;;  %v10627_v51 = vmul.u32.u64.high %v1292_v3, %v1287_v40, %v10626_v50  ;;  %v10632_v36 = vmul.u32.u64.low %v1292_v3, %v1291_v37  ;;  %v10633_v24 = vmul.u32.u64.high %v1292_v3, %v1291_v37, %v10632_v36 }
 0x11f   : > { %v1408_v56 = vadd.s32 536870912, %v1407_v42  ;;  %v10639_v57 = vsub.s32 32, %v1464_v46  ;;  %v1280_v60 = vsel %vm1276_vm15, %v1260_v53, %v1263_v43  ;;  %18810 = vst [vmem:[#allocation7_spill] sm:$0xff] %v10646_v2  ;;  %v1207_v5 = vsub.s32 0, %v10635_v52 }
 0x120   : > { %v18354_v47 = vand.u32 2147483647, %v10524_v6  ;;  %v1283_v27 = vsel %vm1277_vm3, %v1280_v60, %v1282_v63  ;;  %v1476_v13 = vshll.u32 %v18377_v4, %v1464_v46  ;;  %v1302_v15 = vadd.s32 1, %v10627_v51 }
 0x121   : > { %v10650_v8 = vshrl.u32 %v1408_v56, 30  ;;  %v1477_v14 = vshrl.u32 %v18363_v62, %v10639_v57  ;;  %v10658_v43 = vshrl.u32 %v1462_v31, 5  ;;  %v1479_v59 = vshll.u32 %v18363_v62, %v1464_v46 }
 0x122   : > { %v1480_v19 = vshrl.u32 %v18360_v0, %v10639_v57  ;;  %vm1301_vm4 = vc.u32 %v10633_v24, %v10626_v50  ;;  %v1467_v48 = vshll.u32 %v18357_v16, %v1464_v46  ;;  %v1470_v29 = vshll.u32 %v18365_v7, %v1464_v46 }
 0x123   : > { %v1556_v12 = vand.u32 2139095040, %v10646_v2  ;;  %v1468_v20 = vshrl.u32 %v18365_v7, %v10639_v57  ;;  %v1471_v21 = vshrl.u32 %v18368_v9, %v10639_v57  ;;  %v1473_v17 = vshll.u32 %v18368_v9, %v1464_v46 }
 0x124   : > { %v1474_v22 = vshrl.u32 %v18377_v4, %v10639_v57  ;;  %v1457_v11 = vand.u32 8388607, %v18354_v47  ;;  %v1478_v25 = vor.u32 %v1477_v14, %v1476_v13  ;;  %v8947_v26 = vmin.u32 %v1207_v5, %v10635_v52 }
 0x125   : > { %v1303_v23 = vsel %vm1301_vm4, %v1302_v15, %v10627_v51  ;;  %v1481_v28 = vor.u32 %v1480_v19, %v1479_v59  ;;  %vm1485_vm5 = vcmp.lt.s32.totalorder %v10658_v43, 4  ;;  %v1299_v30 = vmul.u32 %v1292_v3, %v1283_v27 }
 0x126   : > { %v1557_v31 = vshrl.u32 %v1556_v12, 23  ;;  %v1410_v32 = vshll.u32 %v10650_v8, 30  ;;  %v1469_v40 = vor.u32 %v1468_v20, %v1467_v48  ;;  %v1472_v33 = vor.u32 %v1471_v21, %v1470_v29 }
 0x127   : > { %v1475_v37 = vor.u32 %v1474_v22, %v1473_v17  ;;  %v1304_v46 = vadd.s32 %v1303_v23, %v1299_v30  ;;  %vm1482_vm6 = vcmp.lt.s32.totalorder %v10658_v43, 1  ;;  %vm1484_vm7 = vcmp.lt.s32.totalorder %v10658_v43, 3  ;;  %v1004_v22 = vpop.f32.mrf.mxu1 }
 0x128   : > { %v1491_v39 = vsel %vm1485_vm5, %v1478_v25, 920167782  ;;  %v1209_v36 = vclz %v8947_v26  ;;  %v1458_v51 = vor.u32 8388608, %v1457_v11  ;;  %v1495_v53 = vsel %vm1485_vm5, %v1481_v28, 1326507024 }
 0x129   : > { %v8962_v3 = vadd.s32 4294967169, %v1557_v31  ;;  %v10687_v54 = vsub.s32 %v1407_v42, %v1410_v32  ;;  %vm1483_vm8 = vcmp.lt.s32.totalorder %v10658_v43, 2  ;;  %v1490_v56 = vsel %vm1482_vm6, %v1469_v40, %v1472_v33 }
 0x12a   : > { %v1492_v60 = vsel %vm1484_vm7, %v1475_v37, %v1491_v39  ;;  %v1305_v63 = vadd.s32 536870912, %v1304_v46  ;;  %v1494_v5 = vsel %vm1482_vm6, %v1472_v33, %v1475_v37  ;;  %v1496_v27 = vsel %vm1484_vm7, %v1478_v25, %v1495_v53 }
 0x12b   : > { %v8948_v13 = vadd.s32 4294967294, %v1209_v36  ;;  %v1498_v14 = vshll.u32 %v1458_v51, 8  ;;  %v1493_v42 = vsel %vm1483_vm8, %v1490_v56, %v1492_v60  ;;  %v1563_v15 = vadd.s32 1, %v8962_v3 }
 0x12c   : > { %v1413_v59 = vsub.s32 0, %v10687_v54  ;;  %v1497_v19 = vsel %vm1483_vm8, %v1494_v5, %v1496_v27  ;;  %v10703_v48 = vshrl.u32 %v1305_v63, 30  ;;  %v1466_v26 = vshrl.u32 %v18357_v16, %v10639_v57 }
 0x12d   : > { %vm8949_vm9 = vcmp.lt.s32.totalorder %v8948_v13, 0  ;;  %v10705_v29 = vmul.u32.u64.low %v1498_v14, %v1493_v42  ;;  %v10706_v12 = vmul.u32.u64.high %v1498_v14, %v1493_v42, %v10705_v29  ;;  %vm1564_vm10 = vcmp.gt.s32.totalorder %v1563_v15, 0 }
 0x12e   : > { %v10709_v20 = vmul.u32.u64.low %v1498_v14, %v1497_v19  ;;  %v10710_v21 = vmul.u32.u64.high %v1498_v14, %v1497_v19, %v10709_v20  ;;  %v8955_v17 = vmin.u32 %v1413_v59, %v10687_v54  ;;  %v1212_v11 = vsel %vm8949_vm9, 0, %v8948_v13 }
 0x12f   : > { %v1307_v25 = vshll.u32 %v10703_v48, 30  ;;  %v1487_v23 = vsel %vm1485_vm5, %v1475_v37, 2102212464  ;;  %v1565_v28 = vsel %vm1564_vm10, %v1563_v15, 0  ;;  %v10719_v30 = vadd.f32 %v1004_v22, %v10435_v41 }
 0x130   : > { %v1217_v31 = vsub.s32 4294967266, %v1212_v11  ;;  %v1415_v32 = vclz %v8955_v17  ;;  %v1486_v36 = vsel %vm1482_vm6, %v1466_v26, %v1469_v40  ;;  %v1488_v51 = vsel %vm1484_vm7, %v1472_v33, %v1487_v23 }
 0x131   : > { %18811 = vst [vmem:[#allocation8_spill] sm:$0xff] %v10719_v30  ;;  %v10721_v39 = vsub.s32 %v1304_v46, %v1307_v25  ;;  %v1567_v53 = vand.u32 31, %v1565_v28  ;;  %v1213_v3 = vsub.s32 32, %v1212_v11  ;;  %v1508_v57 = vadd.s32 1, %v10706_v12 }
 0x132   : > { %vm1507_vm11 = vc.u32 %v10710_v21, %v10705_v29  ;;  %v1762_v37 = vand.u32 2139095040, %v10719_v30  ;;  %v1197_v56 = vadd.s32 %v10513_v55, %v10520_v1  ;;  %v8956_v46 = vadd.s32 4294967294, %v1415_v32  ;;  %v797_v32 = vpop.f32.mrf.mxu0 }
 0x133   : > { %v1489_v60 = vsel %vm1483_vm8, %v1486_v36, %v1488_v51  ;;  %v1218_v40 = vadd.s32 127, %v1217_v31  ;;  %v1310_v63 = vsub.s32 0, %v10721_v39  ;;  %v10736_v33 = vsub.s32 32, %v1567_v53 }
 0x134   : > { %v1215_v5 = vshrl.u32 %v1197_v56, %v1213_v3  ;;  %v1509_v27 = vsel %vm1507_vm11, %v1508_v57, %v10706_v12  ;;  %v1505_v13 = vmul.u32 %v1498_v14, %v1489_v60  ;;  %v1763_v42 = vshrl.u32 %v1762_v37, 23 }
 0x135   : > { %v1214_v15 = vshll.u32 %v10635_v52, %v1212_v11  ;;  %vm8957_vm12 = vcmp.lt.s32.totalorder %v8956_v46, 0  ;;  %v1219_v59 = vshll.u32 %v1218_v40, 23  ;;  %v8951_v55 = vmin.u32 %v1310_v63, %v10721_v39 }
 0x136   : > { %v10741_v1 = vadd.s32 %v1509_v27, %v1505_v13  ;;  %v1580_v43 = vshrl.u32 %v18363_v62, %v10736_v33  ;;  %v1227_v20 = vsub.s32 4, %v10607_v10  ;;  %v18355_v17 = vand.u32 2147483647, %v10646_v2 }
 0x137   : > { %v1216_v19 = vor.u32 %v1215_v5, %v1214_v15  ;;  %v1583_v14 = vshrl.u32 %v18360_v0, %v10736_v33  ;;  %v10749_v12 = vsel %vm8957_vm12, 0, %v8956_v46  ;;  %v10751_v52 = vshrl.u32 %v1565_v28, 5 }
 0x138   : > { %v1579_v22 = vshll.u32 %v18377_v4, %v1567_v53  ;;  %v8970_v11 = vadd.s32 4294967169, %v1763_v42  ;;  %v1571_v25 = vshrl.u32 %v18365_v7, %v10736_v33  ;;  %v1574_v26 = vshrl.u32 %v18368_v9, %v10736_v33 }
 0x139   : > { %v1577_v23 = vshrl.u32 %v18377_v4, %v10736_v33  ;;  %v1582_v31 = vshll.u32 %v18363_v62, %v1567_v53  ;;  %v1220_v36 = vor.u32 4788187, %v1219_v59  ;;  %v1312_v51 = vclz %v8951_v55 }
 0x13a   : > { %v1511_v28 = vadd.s32 536870912, %v10741_v1  ;;  %v1581_v3 = vor.u32 %v1580_v43, %v1579_v22  ;;  %v1570_v57 = vshll.u32 %v18357_v16, %v1567_v53  ;;  %v1573_v37 = vshll.u32 %v18365_v7, %v1567_v53 }
 0x13b   : > { %v1576_v56 = vshll.u32 %v18368_v9, %v1567_v53  ;;  %v1584_v46 = vor.u32 %v1583_v14, %v1582_v31  ;;  %vm1143_vm13 = vcmp.lt.s32.totalorder %v10440_v44, 0  ;;  %v1423_v60 = vsub.s32 4294967266, %v10749_v12 }
 0x13c   : > { %v1560_v40 = vand.u32 8388607, %v18355_v17  ;;  %v1769_v63 = vadd.s32 1, %v8970_v11  ;;  %v10770_v5 = vadd.f32 %v797_v32, %v10435_v41  ;;  %v10772_v27 = vor.u32 %v1571_v25, %v1570_v57 }
 0x13d   : > { %v10774_v13 = vor.u32 %v1574_v26, %v1573_v37  ;;  %v1578_v42 = vor.u32 %v1577_v23, %v1576_v56  ;;  %vm1588_vm14 = vcmp.lt.s32.totalorder %v10751_v52, 4  ;;  %v1223_v53 = vcvt.s32.f32 %v1216_v19 }
 0x13e   : > { %18812 = vst [vmem:[#allocation9_spill] sm:$0xff] %v10770_v5  ;;  %v1403_v15 = vadd.s32 %v10563_v38, %v10570_v45  ;;  %v10779_v59 = vshrl.u32 %v1511_v28, 30  ;;  %v1594_v55 = vsel %vm1588_vm14, %v1581_v3, 920167782  ;;  %v1221_v43 = vand.u32 2147483647, %v1220_v36 }
 0x13f   : > { %v1419_v14 = vsub.s32 32, %v10749_v12  ;;  %v8952_v22 = vadd.s32 4294967294, %v1312_v51  ;;  %v1598_v11 = vsel %vm1588_vm14, %v1584_v46, 1326507024  ;;  %v1424_v25 = vadd.s32 127, %v1423_v60 }
 0x140   : > { %vm1585_vm15 = vcmp.lt.s32.totalorder %v10751_v52, 1  ;;  %vm1587_vm1 = vcmp.lt.s32.totalorder %v10751_v52, 3  ;;  %vm1770_vm2 = vcmp.gt.s32.totalorder %v1769_v63, 0  ;;  %v1561_v19 = vor.u32 8388608, %v1560_v40 }
 0x141   : > { %v1593_v38 = vsel %vm1585_vm15, %v10772_v27, %v10774_v13  ;;  %v1595_v45 = vsel %vm1587_vm1, %v1578_v42, %v1594_v55  ;;  %v1659_v26 = vand.u32 2139095040, %v10770_v5  ;;  %v1433_v23 = vsub.s32 4, %v10650_v8 }
 0x142   : > { %v1513_v31 = vshll.u32 %v10779_v59, 30  ;;  %v1597_v32 = vsel %vm1585_vm15, %v10774_v13, %v1578_v42  ;;  %v1599_v36 = vsel %vm1587_vm1, %v1581_v3, %v1598_v11  ;;  %v1224_v51 = vmul.f32 %v1223_v53, %v1221_v43 }
 0x143   : > { %vm8953_vm3 = vcmp.lt.s32.totalorder %v8952_v22, 0  ;;  %vm1586_vm4 = vcmp.lt.s32.totalorder %v10751_v52, 2  ;;  %v1771_v28 = vsel %vm1770_vm2, %v1769_v63, 0  ;;  %vm1349_vm5 = vcmp.lt.s32.totalorder %v10444_v49, 0 }
 0x144   : > { %v1421_v57 = vshrl.u32 %v1403_v15, %v1419_v14  ;;  %v1425_v37 = vshll.u32 %v1424_v25, 23  ;;  %v1596_v56 = vsel %vm1586_vm4, %v1593_v38, %v1595_v45  ;;  %v10809_v46 = vsel %vm1143_vm13, %v1227_v20, %v10607_v10  ;;  %v1006_v38 = vpop.f32.mrf.mxu1 }
 0x145   : > { %v1600_v3 = vsel %vm1586_vm4, %v1597_v32, %v1599_v36  ;;  %v10813_v60 = vshll.u32 %v1561_v19, 8  ;;  %v1660_v40 = vshrl.u32 %v1659_v26, 23  ;;  %v1420_v63 = vshll.u32 %v10687_v54, %v10749_v12 }
 0x146   : > { %v10817_v53 = vsel %vm8953_vm3, 0, %v8952_v22  ;;  %v10820_v15 = vsub.s32 %v10741_v1, %v1513_v31  ;;  %v1773_v55 = vand.u32 31, %v1771_v28  ;;  %v1225_v43 = vxor.u32 2147483648, %v1224_v51 }
 0x147   : > { %v10825_v10 = vsel %vm1349_vm5, %v1433_v23, %v10650_v8  ;;  %v10828_v20 = vmul.u32.u64.low %v10813_v60, %v1596_v56  ;;  %v10829_v14 = vmul.u32.u64.high %v10813_v60, %v1596_v56, %v10828_v20  ;;  %v1422_v11 = vor.u32 %v1421_v57, %v1420_v63 }
 0x148   : > { %v1426_v25 = vor.u32 4788187, %v1425_v37  ;;  %v10833_v54 = vmul.u32.u64.low %v10813_v60, %v1600_v3  ;;  %v10834_v12 = vmul.u32.u64.high %v10813_v60, %v1600_v3, %v10833_v54  ;;  %vm10838_vm6 = vcmp.le.f32.partialorder %v1141_v61, 0.7853982 }
 0x149   : > { %vm10844_vm7 = vcmp.le.f32.partialorder %v1347_v35, 0.7853982  ;;  %v1320_v22 = vsub.s32 4294967266, %v10817_v53  ;;  %v8966_v19 = vadd.s32 4294967169, %v1660_v40  ;;  %v1230_v45 = vsel %vm10838_vm6, 0, %v10809_v46 }
 0x14a   : > { %v1436_v61 = vsel %vm10844_vm7, 0, %v10825_v10  ;;  %v1516_v26 = vsub.s32 0, %v10820_v15  ;;  %v10856_v23 = vsub.s32 32, %v1773_v55  ;;  %v1226_v35 = vsel %vm1143_vm13, %v1225_v43, %v1224_v51 }
 0x14b   : > { %v1300_v31 = vadd.s32 %v10626_v50, %v10633_v24  ;;  %v1569_v32 = vshrl.u32 %v18357_v16, %v10736_v33  ;;  %v1590_v36 = vsel %vm1588_vm14, %v1578_v42, 2102212464  ;;  %v1427_v57 = vand.u32 2147483647, %v1426_v25 }
 0x14c   : > { %v1429_v37 = vcvt.s32.f32 %v1422_v11  ;;  %v1316_v56 = vsub.s32 32, %v10817_v53  ;;  %v10868_v3 = vadd.f32 %v1006_v38, %v10435_v41  ;;  %v1321_v40 = vadd.s32 127, %v1320_v22 }
 0x14d   : > { %v1589_v51 = vsel %vm1585_vm15, %v1569_v32, %v10772_v27  ;;  %v18359_v50 = vand.u32 2147483647, %v10719_v30  ;;  %v1666_v24 = vadd.s32 1, %v8966_v19  ;;  %v8959_v33 = vmin.u32 %v1516_v26, %v10820_v15 }
 0x14e   : > { %18817 = vst [vmem:[#allocation10_spill] sm:$0xff] %v10868_v3  ;;  %v1591_v42 = vsel %vm1587_vm1, %v10774_v13, %v1590_v36  ;;  %v1785_v63 = vshll.u32 %v18377_v4, %v1773_v55  ;;  %v1786_v41 = vshrl.u32 %v18363_v62, %v10856_v23  ;;  %v1611_v43 = vadd.s32 1, %v10829_v14 }
 0x14f   : > { %v10882_v11 = vshrl.u32 %v1771_v28, 5  ;;  %v1788_v27 = vshll.u32 %v18363_v62, %v1773_v55  ;;  %v1789_v25 = vshrl.u32 %v18360_v0, %v10856_v23  ;;  %vm1610_vm8 = vc.u32 %v10834_v12, %v10828_v20 }
 0x150   : > { %v1776_v54 = vshll.u32 %v18357_v16, %v1773_v55  ;;  %v1779_v13 = vshll.u32 %v18365_v7, %v1773_v55  ;;  %v1782_v22 = vshll.u32 %v18368_v9, %v1773_v55  ;;  %v1777_v19 = vshrl.u32 %v18365_v7, %v10856_v23 }
 0x151   : > { %v1780_v28 = vshrl.u32 %v18368_v9, %v10856_v23  ;;  %v1783_v38 = vshrl.u32 %v18377_v4, %v10856_v23  ;;  %vm1667_vm9 = vcmp.gt.s32.totalorder %v1666_v24, 0  ;;  %v1430_v26 = vmul.f32 %v1429_v37, %v1427_v57 }
 0x152   : > { %v1317_v32 = vshll.u32 %v10721_v39, %v10817_v53  ;;  %v1766_v36 = vand.u32 8388607, %v18359_v50  ;;  %v1787_v18 = vor.u32 %v1786_v41, %v1785_v63  ;;  %v1322_v47 = vshll.u32 %v1321_v40, 23 }
 0x153   : > { %v1592_v55 = vsel %vm1586_vm4, %v1589_v51, %v1591_v42  ;;  %v1790_v17 = vor.u32 %v1789_v25, %v1788_v27  ;;  %vm1794_vm10 = vcmp.lt.s32.totalorder %v10882_v11, 4  ;;  %v1318_v34 = vshrl.u32 %v1300_v31, %v1316_v56  ;;  %v10919_v56 = vpop.permute.xlu0 %547 }
 0x154   : > { %v1518_v16 = vclz %v8959_v33  ;;  %v1612_v57 = vsel %vm1610_vm8, %v1611_v43, %v10829_v14  ;;  %v1668_v37 = vsel %vm1667_vm9, %v1666_v24, 0  ;;  %v10909_v39 = vor.u32 %v1777_v19, %v1776_v54 }
 0x155   : > { %v10911_v53 = vor.u32 %v1780_v28, %v1779_v13  ;;  %v1784_v63 = vor.u32 %v1783_v38, %v1782_v22  ;;  %v1865_v40 = vand.u32 2139095040, %v10868_v3  ;;  %v1608_v52 = vmul.u32 %v10813_v60, %v1592_v55 }
 0x156   : > { %vm1791_vm11 = vcmp.lt.s32.totalorder %v10882_v11, 1  ;;  %vm1793_vm12 = vcmp.lt.s32.totalorder %v10882_v11, 3  ;;  %v1800_v31 = vsel %vm1794_vm10, %v1787_v18, 920167782  ;;  %v1323_v14 = vor.u32 4788187, %v1322_v47 }
 0x157   : > { %v1767_v51 = vor.u32 8388608, %v1766_v36  ;;  %v1804_v24 = vsel %vm1794_vm10, %v1790_v17, 1326507024  ;;  %v1670_v33 = vand.u32 31, %v1668_v37  ;;  %v1229_v42 = vsel %vm10838_vm6, %v10440_v44, %v1226_v35 }
 0x158   : > { %v1319_v60 = vor.u32 %v1318_v34, %v1317_v32  ;;  %v8960_v41 = vadd.s32 4294967294, %v1518_v16  ;;  %v10926_v43 = vadd.s32 %v1612_v57, %v1608_v52  ;;  %vm1792_vm13 = vcmp.lt.s32.totalorder %v10882_v11, 2 }
 0x159   : > { %v1799_v47 = vsel %vm1791_vm11, %v10909_v39, %v10911_v53  ;;  %v1801_v27 = vsel %vm1793_vm12, %v1784_v63, %v1800_v31  ;;  %v1866_v17 = vshrl.u32 %v1865_v40, 23  ;;  %v10939_v35 = vand.u32 3, %v1230_v45  ;;  %v801_v45 = vpop.f32.mrf.mxu0 }
 0x15a   : > { %v1431_v16 = vxor.u32 2147483648, %v1430_v26  ;;  %v1803_v34 = vsel %vm1791_vm11, %v10911_v53, %v1784_v63  ;;  %v1805_v25 = vsel %vm1793_vm12, %v1787_v18, %v1804_v24  ;;  %v10950_v54 = vand.u32 3, %v1436_v61  ;;  %v10959_v18 = vpop.permute.xlu0 %542 }
 0x15b   : > { %18818 = vst [vmem:[#allocation11_spill] sm:$0xff] %v10939_v35  ;;  %v1324_v13 = vand.u32 2147483647, %v1323_v14  ;;  %v10952_v1 = vshll.u32 %v1767_v51, 8  ;;  %v10954_v46 = vsub.s32 32, %v1670_v33  ;;  %9493 = vcosq.f32 %v1229_v42 }
 0x15c   : > { %18819 = vst [vmem:[#allocation12_spill] sm:$0xff] %v10950_v54  ;;  %v1326_v22 = vcvt.s32.f32 %v1319_v60  ;;  %v1330_v19 = vsub.s32 4, %v10703_v48  ;;  %v1802_v28 = vsel %vm1792_vm13, %v1799_v47, %v1801_v27  ;;  %vm8961_vm14 = vcmp.lt.s32.totalorder %v8960_v41, 0 }
 0x15d   : > { %v1614_v10 = vadd.s32 536870912, %v10926_v43  ;;  %v1806_v61 = vsel %vm1792_vm13, %v1803_v34, %v1805_v25  ;;  %v8974_v38 = vadd.s32 4294967169, %v1866_v17  ;;  %9495 = vsinq.f32 %v1229_v42 }
 0x15e   : > { %v1432_v32 = vsel %vm1349_vm5, %v1431_v16, %v1430_v26  ;;  %v18362_v36 = vand.u32 2147483647, %v10770_v5  ;;  %v10968_v55 = vadd.f32 %v801_v45, %v10959_v18  ;;  %v10970_v57 = vmul.f32 %v1326_v22, %v1324_v13 }
 0x15f   : > { %v10973_v40 = vmul.u32.u64.low %v10952_v1, %v1802_v28  ;;  %v10974_v52 = vmul.u32.u64.high %v10952_v1, %v1802_v28, %v10973_v40  ;;  %v1683_v31 = vshrl.u32 %v18363_v62, %v10954_v46  ;;  %v10979_v14 = vsel %vm8961_vm14, 0, %v8960_v41 }
 0x160   : > { %18820 = vst [vmem:[#allocation13_spill] sm:$0xff] %v10968_v55  ;;  %v10982_v51 = vmul.u32.u64.low %v10952_v1, %v1806_v61  ;;  %v10983_v26 = vmul.u32.u64.high %v10952_v1, %v1806_v61, %v10982_v51  ;;  %v1686_v24 = vshrl.u32 %v18360_v0, %v10954_v46  ;;  %v10987_v42 = vshrl.u32 %v1614_v10, 30 }
 0x161   : > { %v10989_v60 = vshrl.u32 %v1668_v37, 5  ;;  %v1682_v47 = vshll.u32 %v18377_v4, %v1670_v33  ;;  %v1872_v27 = vadd.s32 1, %v8974_v38  ;;  %v1674_v17 = vshrl.u32 %v18365_v7, %v10954_v46 }
 0x162   : > { %v1677_v41 = vshrl.u32 %v18368_v9, %v10954_v46  ;;  %v1680_v16 = vshrl.u32 %v18377_v4, %v10954_v46  ;;  %v1685_v34 = vshll.u32 %v18363_v62, %v1670_v33  ;;  %v1526_v25 = vsub.s32 4294967266, %v10979_v14 }
 0x163   : > { %v18821_v13 = vmov 683565275   ;;  %v1796_v45 = vsel %vm1794_vm10, %v1784_v63, 2102212464  ;;  %v1684_v22 = vor.u32 %v1683_v31, %v1682_v47  ;;  %v1676_v10 = vshll.u32 %v18365_v7, %v1670_v33 }
 0x164   : > { %v1775_v37 = vshrl.u32 %v18821_v13, %v10856_v23  ;;  %v1673_v28 = vshll.u32 %v18821_v13, %v1670_v33  ;;  %v1679_v61 = vshll.u32 %v18368_v9, %v1670_v33  ;;  %v1687_v38 = vor.u32 %v1686_v24, %v1685_v34 }
 0x165   : > { %v1522_v51 = vsub.s32 32, %v10979_v14  ;;  %v1616_v50 = vshll.u32 %v10987_v42, 30  ;;  %v1663_v0 = vand.u32 8388607, %v18362_v36  ;;  %vm1873_vm15 = vcmp.gt.s32.totalorder %v1872_v27, 0 }
 0x166   : > { %vm1246_vm1 = vcmp.lt.s32.totalorder %v10448_v58, 0  ;;  %v11012_v23 = vor.u32 %v1674_v17, %v1673_v28  ;;  %v11014_v63 = vor.u32 %v1677_v41, %v1676_v10  ;;  %v1681_v31 = vor.u32 %v1680_v16, %v1679_v61 }
 0x167   : > { %vm1691_vm2 = vcmp.lt.s32.totalorder %v10989_v60, 4  ;;  %v1527_v47 = vadd.s32 127, %v1526_v25  ;;  %v1795_v33 = vsel %vm1791_vm11, %v1775_v37, %v10909_v39  ;;  %v1797_v24 = vsel %vm1793_vm12, %v10911_v53, %v1796_v45 }
 0x168   : > { %v1697_v34 = vsel %vm1691_vm2, %v1684_v22, 920167782  ;;  %v1817_v17 = vadd.s32 1, %v10974_v52  ;;  %v1701_v41 = vsel %vm1691_vm2, %v1687_v38, 1326507024  ;;  %v1874_v16 = vsel %vm1873_vm15, %v1872_v27, 0  ;;  %v11029_v25 = vpop.eup %9493 }
 0x169   : > { %v1968_v28 = vand.u32 2139095040, %v10968_v55  ;;  %18822 = vst [vmem:[#allocation14_spill] sm:$0xff] %v11029_v25  ;;  %v11032_v10 = vsub.s32 %v10926_v43, %v1616_v50  ;;  %vm1816_vm3 = vc.u32 %v10983_v26, %v10973_v40  ;;  %vm1688_vm4 = vcmp.lt.s32.totalorder %v10989_v60, 1 }
 0x16a   : > { %vm1690_vm5 = vcmp.lt.s32.totalorder %v10989_v60, 3  ;;  %v1798_v39 = vsel %vm1792_vm13, %v1795_v33, %v1797_v24  ;;  %v1664_v53 = vor.u32 8388608, %v1663_v0  ;;  %v1696_v27 = vsel %vm1688_vm4, %v11012_v23, %v11014_v63  ;;  %v11046_v43 = vpop.eup %9495 }
 0x16b   : > { %v1698_v50 = vsel %vm1690_vm5, %v1681_v31, %v1697_v34  ;;  %18823 = vst [vmem:[#allocation15_spill] sm:$0xff] %v11046_v43  ;;  %v1506_v37 = vadd.s32 %v10705_v29, %v10710_v21  ;;  %v1700_v45 = vsel %vm1688_vm4, %v11014_v63, %v1681_v31  ;;  %v1702_v0 = vsel %vm1690_vm5, %v1684_v22, %v1701_v41 }
 0x16c   : > { %v1876_v11 = vand.u32 31, %v1874_v16  ;;  %v11058_v61 = vsel %vm10844_vm7, %v10444_v49, %v1432_v32  ;;  %v1818_v38 = vsel %vm1816_vm3, %v1817_v17, %v10974_v52  ;;  %vm1689_vm6 = vcmp.lt.s32.totalorder %v10989_v60, 2 }
 0x16d   : > { %v1969_v33 = vshrl.u32 %v1968_v28, 23  ;;  %v1328_v29 = vxor.u32 2147483648, %v10970_v57  ;;  %v1524_v21 = vshrl.u32 %v1506_v37, %v1522_v51  ;;  %v1814_v24 = vmul.u32 %v10952_v1, %v1798_v39 }
 0x16e   : > { %v1699_v34 = vsel %vm1689_vm6, %v1696_v27, %v1698_v50  ;;  %v1528_v22 = vshll.u32 %v1527_v47, 23  ;;  %v1619_v41 = vsub.s32 0, %v11032_v10  ;;  %v1703_v8 = vsel %vm1689_vm6, %v1700_v45, %v1702_v0  ;;  %v1010_v50 = vpop.f32.mrf.mxu1 }
 0x16f   : > { %v11069_v32 = vshll.u32 %v1664_v53, 8  ;;  %9497 = vcosq.f32 %v11058_v61  ;;  %v11077_v52 = vsel %vm1246_vm1, %v1330_v19, %v10703_v48  ;;  %v11079_v1 = vadd.s32 %v1818_v38, %v1814_v24 }
 0x170   : > { %18824 = vst [vmem:[#allocation16_spill] sm:$0xff] %v11077_v52  ;;  %v11081_v51 = vsub.s32 32, %v1876_v11  ;;  %v1523_v47 = vshll.u32 %v10820_v15, %v10979_v14  ;;  %v8978_v39 = vadd.s32 4294967169, %v1969_v33  ;;  %v11093_v53 = vsel %vm1246_vm1, %v1328_v29, %v10970_v57 }
 0x171   : > { %v11086_v17 = vmul.u32.u64.low %v11069_v32, %v1699_v34  ;;  %v11087_v28 = vmul.u32.u64.high %v11069_v32, %v1699_v34, %v11086_v17  ;;  %v11097_v19 = vmul.u32.u64.low %v11069_v32, %v1703_v8  ;;  %v11098_v27 = vmul.u32.u64.high %v11069_v32, %v1703_v8, %v11097_v19 }
 0x172   : > { %v11100_v37 = vor.u32 %v1524_v21, %v1523_v47  ;;  %v11102_v15 = vor.u32 4788187, %v1528_v22  ;;  %v8963_v14 = vmin.u32 %v1619_v41, %v11032_v10  ;;  %v1820_v0 = vadd.s32 536870912, %v11079_v1 }
 0x173   : > { %18825 = vst [vmem:[#allocation17_spill] sm:$0xff] %v11086_v17  ;;  %18826 = vst [vmem:[#allocation18_spill] sm:$0xff] %v11098_v27  ;;  %v1672_v57 = vshrl.u32 %v18821_v13, %v10954_v46  ;;  %v1888_v38 = vshll.u32 %v18377_v4, %v1876_v11  ;;  %v1889_v33 = vshrl.u32 %v18363_v62, %v11081_v51  ;;  %v1693_v29 = vsel %vm1691_vm2, %v1681_v31, 2102212464 }
 0x174   : > { %v11114_v21 = vshrl.u32 %v1874_v16, 5  ;;  %v1975_v24 = vadd.s32 1, %v8978_v39  ;;  %v11117_v34 = vadd.f32 %v1010_v50, %v10959_v18  ;;  %v1879_v22 = vshll.u32 %v18821_v13, %v1876_v11 }
 0x175   : > { %v1882_v41 = vshll.u32 %v18365_v7, %v1876_v11  ;;  %v1891_v46 = vshll.u32 %v18363_v62, %v1876_v11  ;;  %v18828_v8 = vmov 1326507024   ;;  %v18829_v19 = vand.u32 2147483647, %v10448_v58 }
 0x176   : > { %18827 = vst [vmem:[#allocation19_spill] sm:$0xff] %v11117_v34  ;;  %v1892_v47 = vshrl.u32 %v18828_v8, %v11081_v51  ;;  %v18830_v36 = vmov 0  ;;  %v1880_v31 = vshrl.u32 %v18365_v7, %v11081_v51  ;;  %v1883_v16 = vshrl.u32 %v18368_v9, %v11081_v51 }
 0x177   : > { %vm11126_vm7 = vcmp.le.f32.partialorder %v18829_v19, 0.7853982  ;;  %v1885_v39 = vshll.u32 %v18368_v9, %v1876_v11  ;;  %v1886_v50 = vshrl.u32 %v18377_v4, %v11081_v51  ;;  %vm1452_vm8 = vcmp.lt.s32.totalorder %v10524_v6, 0 }
 0x178   : > { %v18831_v36 = vsel %vm11126_vm7, 4294967295, %v18830_v36  ;;  %v1621_v62 = vclz %v8963_v14  ;;  %v1692_v19 = vsel %vm1688_vm4, %v1672_v57, %v11012_v23  ;;  %v1694_v48 = vsel %vm1690_vm5, %v11014_v63, %v1693_v29 }
 0x179   : > { %18832 = vst [vmem:[#allocation20_spill] sm:$0xff] %v18831_v36  ;;  %v1890_v7 = vor.u32 %v1889_v33, %v1888_v38  ;;  %v1714_v45 = vadd.s32 1, %v11087_v28  ;;  %v18833_v49 = vand.u32 2147483647, %v10868_v3  ;;  %vm1897_vm9 = vcmp.lt.s32.totalorder %v11114_v21, 4 }
 0x17a   : > { %vm1976_vm10 = vcmp.gt.s32.totalorder %v1975_v24, 0  ;;  %v11148_v9 = vshrl.u32 %v1820_v0, 30  ;;  %vm1713_vm11 = vc.u32 %v11098_v27, %v11086_v17  ;;  %v1893_v14 = vor.u32 %v1892_v47, %v1891_v46 }
 0x17b   : > { %v1869_v11 = vand.u32 8388607, %v18833_v49  ;;  %v2174_v23 = vand.u32 2139095040, %v11117_v34  ;;  %v1695_v63 = vsel %vm1689_vm6, %v1692_v19, %v1694_v48  ;;  %v11155_v57 = vor.u32 %v1880_v31, %v1879_v22  ;;  %v803_v49 = vpop.f32.mrf.mxu0 }
 0x17c   : > { %v11157_v38 = vor.u32 %v1883_v16, %v1882_v41  ;;  %v1887_v33 = vor.u32 %v1886_v50, %v1885_v39  ;;  %vm1894_vm12 = vcmp.lt.s32.totalorder %v11114_v21, 1  ;;  %vm1896_vm13 = vcmp.lt.s32.totalorder %v11114_v21, 3  ;;  %v11163_v46 = vpop.eup %9497 }
 0x17d   : > { %v1903_v0 = vsel %vm1897_vm9, %v1890_v7, 920167782  ;;  %v1977_v29 = vsel %vm1976_vm10, %v1975_v24, 0  ;;  %18834 = vst [vmem:[#allocation21_spill] sm:$0xff] %v11163_v46  ;;  %v1530_v47 = vand.u32 2147483647, %v11102_v15  ;;  %v1715_v48 = vsel %vm1713_vm11, %v1714_v45, %v11087_v28 }
 0x17e   : > { %v8964_v60 = vadd.s32 4294967294, %v1621_v62  ;;  %v1870_v22 = vor.u32 8388608, %v1869_v11  ;;  %v1711_v41 = vmul.u32 %v11069_v32, %v1695_v63  ;;  %v1907_v31 = vsel %vm1897_vm9, %v1893_v14, 1326507024 }
 0x17f   : > { %v2175_v16 = vshrl.u32 %v2174_v23, 23  ;;  %v11171_v39 = vadd.f32 %v803_v49, %v10959_v18  ;;  %vm1555_vm14 = vcmp.lt.s32.totalorder %v10646_v2, 0  ;;  %vm1895_vm15 = vcmp.lt.s32.totalorder %v11114_v21, 2 }
 0x180   : > { %v1902_v62 = vsel %vm1894_vm12, %v11155_v57, %v11157_v38  ;;  %v1904_v28 = vsel %vm1896_vm13, %v1887_v33, %v1903_v0  ;;  %v1979_v32 = vand.u32 31, %v1977_v29  ;;  %v1332_v15 = vsel %vm11126_vm7, %v10448_v58, %v11093_v53 }
 0x181   : > { %18835 = vst [vmem:[#allocation22_spill] sm:$0xff] %v11171_v39  ;;  %v1532_v45 = vcvt.s32.f32 %v11100_v37  ;;  %v1822_v24 = vshll.u32 %v11148_v9, 30  ;;  %v11187_v50 = vadd.s32 %v1715_v48, %v1711_v41  ;;  %9499 = vsinq.f32 %v11058_v61 }
 0x182   : > { %v18836_v19 = vsub.s32 4, %v10779_v59  ;;  %v1906_v14 = vsel %vm1894_vm12, %v11157_v38, %v1887_v33  ;;  %v1908_v53 = vsel %vm1896_vm13, %v1890_v7, %v1907_v31  ;;  %vm8965_vm1 = vcmp.lt.s32.totalorder %v8964_v60, 0 }
 0x183   : > { %v11202_v37 = vmul.f32 %v1532_v45, %v1530_v47  ;;  %v1905_v61 = vsel %vm1895_vm15, %v1902_v62, %v1904_v28  ;;  %v8986_v23 = vadd.s32 4294967169, %v2175_v16  ;;  %9501 = vcosq.f32 %v1332_v15 }
 0x184   : > { %v11195_v11 = vsel %vm1452_vm8, %v18836_v19, %v10779_v59  ;;  %v11206_v63 = vshll.u32 %v1870_v22, 8  ;;  %v11208_v49 = vsub.s32 32, %v1979_v32  ;;  %v2071_v59 = vand.u32 2139095040, %v11171_v39 }
 0x185   : > { %18837 = vst [vmem:[#allocation23_spill] sm:$0xff] %v11195_v11  ;;  %v1639_v0 = vsub.s32 4, %v10987_v42  ;;  %v11213_v48 = vsub.s32 %v11079_v1, %v1822_v24  ;;  %v1717_v7 = vadd.s32 536870912, %v11187_v50  ;;  %v1909_v47 = vsel %vm1895_vm15, %v1906_v14, %v1908_v53 }
 0x186   : > { %v11218_v41 = vsel %vm8965_vm1, 0, %v8964_v60  ;;  %v11221_v31 = vmul.u32.u64.low %v11206_v63, %v1905_v61  ;;  %v11222_v22 = vmul.u32.u64.high %v11206_v63, %v1905_v61, %v11221_v31  ;;  %v18372_v16 = vand.u32 2147483647, %v10968_v55 }
 0x187   : > { %9503 = vsinq.f32 %v1332_v15  ;;  %v1878_v1 = vshrl.u32 %v18821_v13, %v11081_v51  ;;  %v2181_v28 = vadd.s32 1, %v8986_v23  ;;  %v18840_v60 = vmov 920167782  }
 0x188   : > { %18838 = vst [vmem:[#allocation24_spill] sm:$0xff] %v11221_v31  ;;  %v11230_v45 = vmul.u32.u64.low %v11206_v63, %v1909_v47  ;;  %v11231_v24 = vmul.u32.u64.high %v11206_v63, %v1909_v47, %v11230_v45  ;;  %v1992_v19 = vshrl.u32 %v18840_v60, %v11208_v49  ;;  %v2072_v14 = vshrl.u32 %v2071_v59, 23 }
 0x189   : > { %v1629_v53 = vsub.s32 4294967266, %v11218_v41  ;;  %v11239_v15 = vsel %vm1555_vm14, %v1639_v0, %v10987_v42  ;;  %v1825_v61 = vsub.s32 0, %v11213_v48  ;;  %v11242_v62 = vshrl.u32 %v1717_v7, 30 }
 0x18a   : > { %18839 = vst [vmem:[#allocation25_spill] sm:$0xff] %v11231_v24  ;;  %v1899_v51 = vsel %vm1897_vm9, %v1887_v33, 2102212464  ;;  %v1972_v23 = vand.u32 8388607, %v18372_v16  ;;  %v1991_v45 = vshll.u32 %v18377_v4, %v1979_v32  ;;  %v11251_v54 = vshrl.u32 %v1977_v29, 5 }
 0x18b   : > { %18841 = vst [vmem:[#allocation26_spill] sm:$0xff] %v11242_v62  ;;  %v18842_v47 = vmov 2475754826   ;;  %v18843_v42 = vmov 2131351028   ;;  %v1989_v7 = vshrl.u32 %v18377_v4, %v11208_v49  ;;  %vm2182_vm2 = vcmp.gt.s32.totalorder %v2181_v28, 0 }
 0x18c   : > { %v1983_v59 = vshrl.u32 %v18842_v47, %v11208_v49  ;;  %v1986_v0 = vshrl.u32 %v18843_v42, %v11208_v49  ;;  %v18844_v46 = vand.u32 2147483647, %v10646_v2  ;;  %v1898_v16 = vsel %vm1894_vm12, %v1878_v1, %v11155_v57 }
 0x18d   : > { %v1982_v29 = vshll.u32 %v18821_v13, %v1979_v32  ;;  %v1993_v44 = vor.u32 %v1992_v19, %v1991_v45  ;;  %v8982_v35 = vadd.s32 4294967169, %v2072_v14  ;;  %v1719_v25 = vshll.u32 %v11242_v62, 30 }
 0x18e   : > { %vm11259_vm3 = vcmp.le.f32.partialorder %v18844_v46, 0.7853982  ;;  %v1985_v43 = vshll.u32 %v18842_v47, %v1979_v32  ;;  %v1988_v4 = vshll.u32 %v18843_v42, %v1979_v32  ;;  %v1995_v46 = vshrl.u32 %v18828_v8, %v11208_v49  ;;  %v11278_v19 = vpop.eup %9499 }
 0x18f   : > { %v1900_v58 = vsel %vm1896_vm13, %v11157_v38, %v1899_v51  ;;  %v1920_v11 = vadd.s32 1, %v11222_v22  ;;  %v11276_v57 = vor.u32 %v1983_v59, %v1982_v29  ;;  %v2183_v1 = vsel %vm2182_vm2, %v2181_v28, 0  ;;  %18847 = vst [vmem:[#allocation27_spill] sm:$0xff] %v11278_v19 }
 0x190   : > { %v11280_v14 = vor.u32 %v1986_v0, %v1985_v43  ;;  %v1990_v45 = vor.u32 %v1989_v7, %v1988_v4  ;;  %v1994_v36 = vshll.u32 %v18840_v60, %v1979_v32  ;;  %vm2000_vm4 = vcmp.lt.s32.totalorder %v11251_v54, 4  ;;  %v11289_v59 = vpop.eup %9501 }
 0x191   : > { %v8971_v52 = vmin.u32 %v1825_v61, %v11213_v48  ;;  %vm1919_vm5 = vc.u32 %v11231_v24, %v11221_v31  ;;  %v2006_v38 = vsel %vm2000_vm4, %v1993_v44, 920167782  ;;  %v2078_v51 = vadd.s32 1, %v8982_v35  ;;  %18848 = vst [vmem:[#allocation28_spill] sm:$0xff] %v11289_v59 }
 0x192   : > { %v1625_v28 = vsub.s32 32, %v11218_v41  ;;  %v1901_v4 = vsel %vm1895_vm15, %v1898_v16, %v1900_v58  ;;  %v1996_v43 = vor.u32 %v1995_v46, %v1994_v36  ;;  %v2185_v32 = vand.u32 31, %v2183_v1 }
 0x193   : > { %v11294_v0 = vadd.s32 127, %v1629_v53  ;;  %v11297_v61 = vsub.s32 %v11187_v50, %v1719_v25  ;;  %vm1997_vm6 = vcmp.lt.s32.totalorder %v11251_v54, 1  ;;  %vm1999_vm9 = vcmp.lt.s32.totalorder %v11251_v54, 3 }
 0x194   : > { %v1921_v35 = vsel %vm1919_vm5, %v1920_v11, %v11222_v22  ;;  %v1973_v7 = vor.u32 8388608, %v1972_v23  ;;  %v2005_v21 = vsel %vm1997_vm6, %v11276_v57, %v11280_v14  ;;  %v2007_v58 = vsel %vm1999_vm9, %v1990_v45, %v2006_v38  ;;  %v11308_v36 = vpop.eup %9503 }
 0x195   : > { %18849 = vst [vmem:[#allocation29_spill] sm:$0xff] %v11297_v61  ;;  %18850 = vst [vmem:[#allocation30_spill] sm:$0xff] %v11308_v36  ;;  %v1609_v25 = vadd.s32 %v10828_v20, %v10834_v12  ;;  %v1827_v50 = vclz %v8971_v52  ;;  %v1917_v16 = vmul.u32 %v11206_v63, %v1901_v4  ;;  %vm2079_vm10 = vcmp.gt.s32.totalorder %v2078_v51, 0 }
 0x196   : > { %vm1998_vm11 = vcmp.lt.s32.totalorder %v11251_v54, 2  ;;  %v2010_v22 = vsel %vm2000_vm4, %v1996_v43, 1326507024  ;;  %v11319_v53 = vsub.s32 32, %v2185_v32  ;;  %v18851_v23 = vxor.u32 2147483648, %v11202_v37 }
 0x197   : > { %v1722_v12 = vsub.s32 0, %v11297_v61  ;;  %v11329_v52 = vadd.s32 %v1921_v35, %v1917_v16  ;;  %v2008_v63 = vsel %vm1998_vm11, %v2005_v21, %v2007_v58  ;;  %v11333_v29 = vshrl.u32 %v1609_v25, %v1625_v28  ;;  %v1012_v16 = vpop.f32.mrf.mxu1 }
 0x198   : > { %v11326_v20 = vsel %vm1452_vm8, %v18851_v23, %v11202_v37  ;;  %v11336_v38 = vshll.u32 %v1973_v7, 8  ;;  %v2080_v4 = vsel %vm2079_vm10, %v2078_v51, 0  ;;  %v11338_v43 = vadd.s32 4294967294, %v1827_v50 }
 0x199   : > { %v2009_v37 = vsel %vm1997_vm6, %v11280_v14, %v1990_v45  ;;  %v2011_v35 = vsel %vm1999_vm9, %v1993_v44, %v2010_v22  ;;  %v2200_v7 = vshll.u32 %v18840_v60, %v2185_v32  ;;  %v2201_v51 = vshrl.u32 %v18828_v8, %v11319_v53 }
 0x19a   : > { %v11347_v21 = vmul.u32.u64.low %v11336_v38, %v2008_v63  ;;  %v11348_v28 = vmul.u32.u64.high %v11336_v38, %v2008_v63, %v11347_v21  ;;  %v11355_v58 = vmin.u32 %v1722_v12, %v11297_v61  ;;  %v1923_v25 = vadd.s32 536870912, %v11329_v52 }
 0x19b   : > { %v1981_v44 = vshrl.u32 %v18821_v13, %v11208_v49  ;;  %v2082_v50 = vand.u32 31, %v2080_v4  ;;  %v2012_v22 = vsel %vm1998_vm11, %v2009_v37, %v2011_v35  ;;  %v11362_v23 = vshrl.u32 %v2183_v1, 5 }
 0x19c   : > { %v18852_v63 = vmov 2102212464   ;;  %v2198_v46 = vshrl.u32 %v18840_v60, %v11319_v53  ;;  %v2191_v12 = vshll.u32 %v18842_v47, %v2185_v32  ;;  %v2192_v19 = vshrl.u32 %v18843_v42, %v11319_v53 }
 0x19d   : > { %v2197_v11 = vshll.u32 %v18852_v63, %v2185_v32  ;;  %v2194_v59 = vshll.u32 %v18843_v42, %v2185_v32  ;;  %v2195_v49 = vshrl.u32 %v18852_v63, %v11319_v53  ;;  %v2002_v1 = vsel %vm2000_vm4, %v1990_v45, 2102212464 }
 0x19e   : > { %v18853_v37 = vand.u32 2147483647, %v11117_v34  ;;  %v2202_v36 = vor.u32 %v2201_v51, %v2200_v7  ;;  %v2188_v55 = vshll.u32 %v18821_v13, %v2185_v32  ;;  %v2189_v5 = vshrl.u32 %v18842_v47, %v11319_v53 }
 0x19f   : > { %v11381_v62 = vsub.s32 32, %v2082_v50  ;;  %v11384_v31 = vadd.f32 %v1012_v16, %v10959_v18  ;;  %v2001_v45 = vsel %vm1997_vm6, %v1981_v44, %v11276_v57  ;;  %v2199_v7 = vor.u32 %v2198_v46, %v2197_v11 }
 0x1a0   : > { %v2178_v35 = vand.u32 8388607, %v18853_v37  ;;  %v11390_v34 = vmul.u32.u64.low %v11336_v38, %v2012_v22  ;;  %v11391_v37 = vmul.u32.u64.high %v11336_v38, %v2012_v22, %v11390_v34  ;;  %v2003_v32 = vsel %vm1999_vm9, %v11280_v14, %v2002_v1 }
 0x1a1   : > { %18854 = vst [vmem:[#allocation31_spill] sm:$0xff] %v11384_v31  ;;  %v11396_v51 = vor.u32 %v2192_v19, %v2191_v12  ;;  %v11398_v3 = vor.u32 %v2195_v49, %v2194_v59  ;;  %vm2206_vm8 = vcmp.lt.s32.totalorder %v11362_v23, 4  ;;  %v2023_v18 = vadd.s32 1, %v11348_v28 }
 0x1a2   : > { %v2179_v16 = vor.u32 8388608, %v2178_v35  ;;  %v2216_v57 = vsel %vm2206_vm8, %v2202_v36, 1326507024  ;;  %v18855_v44 = vand.u32 2147483647, %v11171_v39  ;;  %v11408_v11 = vor.u32 %v2189_v5, %v2188_v55 }
 0x1a3   : > { %vm2203_vm12 = vcmp.lt.s32.totalorder %v11362_v23, 1  ;;  %v2095_v19 = vshrl.u32 %v18840_v60, %v11381_v62  ;;  %v2277_v14 = vand.u32 2139095040, %v11384_v31  ;;  %vm2204_vm13 = vcmp.lt.s32.totalorder %v11362_v23, 2 }
 0x1a4   : > { %v11406_v34 = vand.u32 8388607, %v18855_v44  ;;  %vm2205_vm15 = vcmp.lt.s32.totalorder %v11362_v23, 3  ;;  %v2212_v59 = vsel %vm2206_vm8, %v2199_v7, 920167782  ;;  %v2098_v36 = vshrl.u32 %v18828_v8, %v11381_v62 }
 0x1a5   : > { %vm8973_vm1 = vcmp.lt.s32.totalorder %v11338_v43, 0  ;;  %v2215_v5 = vsel %vm2203_vm12, %v11396_v51, %v11398_v3  ;;  %v2217_v55 = vsel %vm2205_vm15, %v2199_v7, %v2216_v57  ;;  %v11427_v46 = vshrl.u32 %v2080_v4, 5 }
 0x1a6   : > { %v2094_v22 = vshll.u32 %v18852_v63, %v2082_v50  ;;  %v2086_v12 = vshrl.u32 %v18842_v47, %v11381_v62  ;;  %v2089_v49 = vshrl.u32 %v18843_v42, %v11381_v62  ;;  %v2092_v1 = vshrl.u32 %v18852_v63, %v11381_v62 }
 0x1a7   : > { %v2097_v35 = vshll.u32 %v18840_v60, %v2082_v50  ;;  %v2211_v7 = vsel %vm2203_vm12, %v11408_v11, %v11396_v51  ;;  %v2213_v4 = vsel %vm2205_vm15, %v11398_v3, %v2212_v59  ;;  %v2278_v44 = vshrl.u32 %v2277_v14, 23 }
 0x1a8   : > { %v2096_v57 = vor.u32 %v2095_v19, %v2094_v22  ;;  %v18856_v39 = vand.u32 2147483647, %v10524_v6  ;;  %v18857_v24 = vmov 0  ;;  %v2085_v61 = vshll.u32 %v18821_v13, %v2082_v50 }
 0x1a9   : > { %v2088_v2 = vshll.u32 %v18842_v47, %v2082_v50  ;;  %v2091_v17 = vshll.u32 %v18843_v42, %v2082_v50  ;;  %v2099_v27 = vor.u32 %v2098_v36, %v2097_v35  ;;  %v11453_v8 = vshrl.u32 %v1923_v25, 30 }
 0x1aa   : > { %vm11446_vm2 = vcmp.le.f32.partialorder %v18856_v39, 0.7853982  ;;  %v2004_v59 = vsel %vm1998_vm11, %v2001_v45, %v2003_v32  ;;  %vm2022_vm4 = vc.u32 %v11391_v37, %v11347_v21  ;;  %v2218_v39 = vsel %vm2204_vm13, %v2215_v5, %v2217_v55 }
 0x1ab   : > { %v18858_v24 = vsel %vm11446_vm2, 4294967295, %v18857_v24  ;;  %v11461_v19 = vor.u32 %v2086_v12, %v2085_v61  ;;  %v11463_v14 = vor.u32 %v2089_v49, %v2088_v2  ;;  %v2093_v22 = vor.u32 %v2092_v1, %v2091_v17 }
 0x1ac   : > { %18859 = vst [vmem:[#allocation32_spill] sm:$0xff] %v18858_v24  ;;  %vm2103_vm5 = vcmp.lt.s32.totalorder %v11427_v46, 4  ;;  %v2214_v25 = vsel %vm2204_vm13, %v2211_v7, %v2213_v4  ;;  %v11468_v50 = vshll.u32 %v2179_v16, 8  ;;  %v8990_v45 = vadd.s32 4294967169, %v2278_v44 }
 0x1ad   : > { %v2109_v54 = vsel %vm2103_vm5, %v2096_v57, 920167782  ;;  %v2020_v32 = vmul.u32 %v11336_v38, %v2004_v59  ;;  %v2024_v36 = vsel %vm2022_vm4, %v2023_v18, %v11348_v28  ;;  %v2076_v61 = vor.u32 8388608, %v11406_v34 }
 0x1ae   : > { %v2113_v2 = vsel %vm2103_vm5, %v2099_v27, 1326507024  ;;  %v11478_v17 = vmul.u32.u64.low %v11468_v50, %v2218_v39  ;;  %v11479_v5 = vmul.u32.u64.high %v11468_v50, %v2218_v39, %v11478_v17  ;;  %vm2100_vm6 = vcmp.lt.s32.totalorder %v11427_v46, 1 }
 0x1af   : > { %vm2102_vm9 = vcmp.lt.s32.totalorder %v11427_v46, 3  ;;  %v11484_v16 = vmul.u32.u64.low %v11468_v50, %v2214_v25  ;;  %v11485_v55 = vmul.u32.u64.high %v11468_v50, %v2214_v25, %v11484_v16  ;;  %v2108_v38 = vsel %vm2100_vm6, %v11461_v19, %v11463_v14 }
 0x1b0   : > { %v2110_v27 = vsel %vm2102_vm9, %v2093_v22, %v2109_v54  ;;  %v18860_v28 = vshll.u32 %v11294_v0, 23  ;;  %v2112_v34 = vsel %vm2100_vm6, %v11463_v14, %v2093_v22  ;;  %v2114_v12 = vsel %vm2102_vm9, %v2096_v57, %v2113_v2 }
 0x1b1   : > { %v2284_v49 = vadd.s32 1, %v8990_v45  ;;  %v11504_v1 = vsel %vm8973_vm1, 0, %v11338_v43  ;;  %v1925_v35 = vshll.u32 %v11453_v8, 30  ;;  %v11507_v7 = vadd.s32 %v2024_v36, %v2020_v32 }
 0x1b2   : > { %v1632_v18 = vor.u32 4788187, %v18860_v28  ;;  %vm2101_vm10 = vcmp.lt.s32.totalorder %v11427_v46, 2  ;;  %v11514_v0 = vsel %vm11446_vm2, %v10524_v6, %v11326_v20  ;;  %v1626_v4 = vshll.u32 %v11032_v10, %v11218_v41 }
 0x1b3   : > { %v2187_v57 = vshrl.u32 %v18821_v13, %v11319_v53  ;;  %v2111_v43 = vsel %vm2101_vm10, %v2108_v38, %v2110_v27  ;;  %v1724_v44 = vclz %v11355_v58  ;;  %v2208_v59 = vsel %vm2206_vm8, %v11398_v3, 2102212464 }
 0x1b4   : > { %v2115_v39 = vsel %vm2101_vm10, %v2112_v34, %v2114_v12  ;;  %v11528_v20 = vshll.u32 %v2076_v61, 8  ;;  %v1628_v25 = vor.u32 %v11333_v29, %v1626_v4  ;;  %v1633_v10 = vand.u32 2147483647, %v1632_v18 }
 0x1b5   : > { %v1835_v41 = vsub.s32 4294967266, %v11504_v1  ;;  %vm2285_vm11 = vcmp.gt.s32.totalorder %v2284_v49, 0  ;;  %v11533_v53 = vsub.s32 %v11329_v52, %v1925_v35  ;;  %v2026_v58 = vadd.s32 536870912, %v11507_v7 }
 0x1b6   : > { %v11537_v54 = vmul.u32.u64.low %v11528_v20, %v2111_v43  ;;  %v11538_v45 = vmul.u32.u64.high %v11528_v20, %v2111_v43, %v11537_v54  ;;  %v2207_v3 = vsel %vm2203_vm12, %v2187_v57, %v11408_v11  ;;  %v2209_v29 = vsel %vm2205_vm15, %v11396_v51, %v2208_v59  ;;  %v807_v51 = vpop.f32.mrf.mxu0 }
 0x1b7   : > { %v11548_v32 = vmul.u32.u64.low %v11528_v20, %v2115_v39  ;;  %v11549_v36 = vmul.u32.u64.high %v11528_v20, %v2115_v39, %v11548_v32  ;;  %vm1761_vm8 = vcmp.lt.s32.totalorder %v10719_v30, 0  ;;  %v1831_v52 = vsub.s32 32, %v11504_v1 }
 0x1b8   : > { %v8968_v61 = vadd.s32 4294967294, %v1724_v44  ;;  %v2229_v2 = vadd.s32 1, %v11485_v55  ;;  %v2286_v17 = vsel %vm2285_vm11, %v2284_v49, 0  ;;  %v1635_v38 = vcvt.s32.f32 %v1628_v25 }
 0x1b9   : > { %v1815_v11 = vadd.s32 %v10973_v40, %v10983_v26  ;;  %v1836_v27 = vadd.s32 127, %v1835_v41  ;;  %vm2228_vm12 = vc.u32 %v11479_v5, %v11484_v16  ;;  %v1928_v28 = vsub.s32 0, %v11533_v53 }
 0x1ba   : > { %v11559_v18 = vshrl.u32 %v2026_v58, 30  ;;  %v2210_v34 = vsel %vm2204_vm13, %v2207_v3, %v2209_v29  ;;  %v2105_v12 = vsel %vm2103_vm5, %v2093_v22, 2102212464  ;;  %v11565_v49 = vmul.f32 %v1635_v38, %v1633_v10 }
 0x1bb   : > { %v1845_v35 = vsub.s32 4, %v11148_v9  ;;  %v2084_v40 = vshrl.u32 %v18821_v13, %v11381_v62  ;;  %v2288_v26 = vand.u32 31, %v2286_v17  ;;  %v1833_v4 = vshrl.u32 %v1815_v11, %v1831_v52 }
 0x1bc   : > { %vm8969_vm15 = vcmp.lt.s32.totalorder %v8968_v61, 0  ;;  %v2230_v57 = vsel %vm2228_vm12, %v2229_v2, %v11485_v55  ;;  %v11572_v43 = vadd.f32 %v807_v51, %v10919_v56  ;;  %v1837_v23 = vshll.u32 %v1836_v27, 23 }
 0x1bd   : > { %v2226_v44 = vmul.u32 %v11468_v50, %v2210_v34  ;;  %v2104_v22 = vsel %vm2100_vm6, %v2084_v40, %v11461_v19  ;;  %v2106_v59 = vsel %vm2102_vm9, %v11463_v14, %v2105_v12  ;;  %v1832_v62 = vshll.u32 %v11213_v48, %v11504_v1 }
 0x1be   : > { %18861 = vst [vmem:[#allocation33_spill] sm:$0xff] %v11572_v43  ;;  %v8975_v39 = vmin.u32 %v1928_v28, %v11533_v53  ;;  %v2028_v55 = vshll.u32 %v11559_v18, 30  ;;  %v2126_v25 = vadd.s32 1, %v11538_v45  ;;  %v11586_v10 = vsel %vm8969_vm15, 0, %v8968_v61 }
 0x1bf   : > { %v11588_v50 = vadd.s32 %v2230_v57, %v2226_v44  ;;  %vm2125_vm13 = vc.u32 %v11549_v36, %v11537_v54  ;;  %v11592_v19 = vsub.s32 32, %v2288_v26  ;;  %9505 = vcosq.f32 %v11514_v0 }
 0x1c0   : > { %v18862_v48 = vsel %vm11259_vm3, 0, %v11239_v15  ;;  %v2107_v1 = vsel %vm2101_vm10, %v2104_v22, %v2106_v59  ;;  %v2380_v41 = vand.u32 2139095040, %v11572_v43  ;;  %v1637_v58 = vxor.u32 2147483648, %v11565_v49 }
 0x1c1   : > { %v11599_v14 = vand.u32 3, %v18862_v48  ;;  %v1834_v3 = vor.u32 %v1833_v4, %v1832_v62  ;;  %v1838_v29 = vor.u32 4788187, %v1837_v23  ;;  %v11608_v32 = vsel %vm1761_vm8, %v1845_v35, %v11148_v9 }
 0x1c2   : > { %v1732_v52 = vsub.s32 4294967266, %v11586_v10  ;;  %v1930_v61 = vclz %v8975_v39  ;;  %v11612_v15 = vsub.s32 %v11507_v7, %v2028_v55  ;;  %v2127_v46 = vsel %vm2125_vm13, %v2126_v25, %v11538_v45 }
 0x1c3   : > { %18863 = vst [vmem:[#allocation34_spill] sm:$0xff] %v11599_v14  ;;  %v2232_v2 = vadd.s32 536870912, %v11588_v50  ;;  %v2123_v38 = vmul.u32 %v11528_v20, %v2107_v1  ;;  %v2300_v11 = vshll.u32 %v18852_v63, %v2288_v26  ;;  %v2301_v27 = vshrl.u32 %v18840_v60, %v11592_v19 }
 0x1c4   : > { %v18404_v9 = vand.u32 2147483647, %v11384_v31  ;;  %v2303_v51 = vshll.u32 %v18840_v60, %v2288_v26  ;;  %v18864_v28 = vmov 1326507024   ;;  %v2381_v7 = vshrl.u32 %v2380_v41, 23 }
 0x1c5   : > { %v2304_v34 = vshrl.u32 %v18864_v28, %v11592_v19  ;;  %v11624_v12 = vadd.s32 %v2127_v46, %v2123_v38  ;;  %v11626_v45 = vshrl.u32 %v2286_v17, 5  ;;  %v2291_v35 = vshll.u32 %v18821_v13, %v2288_v26 }
 0x1c6   : > { %v2294_v20 = vshll.u32 %v18842_v47, %v2288_v26  ;;  %v2292_v40 = vshrl.u32 %v18842_v47, %v11592_v19  ;;  %v2295_v4 = vshrl.u32 %v18843_v42, %v11592_v19  ;;  %v2297_v57 = vshll.u32 %v18843_v42, %v2288_v26 }
 0x1c7   : > { %v2298_v23 = vshrl.u32 %v18852_v63, %v11592_v19  ;;  %v18865_v44 = vand.u32 2147483647, %v10719_v30  ;;  %v1839_v22 = vand.u32 2147483647, %v1838_v29  ;;  %v1841_v59 = vcvt.s32.f32 %v1834_v3 }
 0x1c8   : > { %v11643_v62 = vshrl.u32 %v2232_v2, 30  ;;  %v2302_v39 = vor.u32 %v2301_v27, %v2300_v11  ;;  %v8976_v55 = vadd.s32 4294967294, %v1930_v61  ;;  %v2031_v25 = vsub.s32 0, %v11612_v15  ;;  %v18868_v2 = vld [vmem:[#allocation18_spill] sm:$0xff]  ;;  %v18869_v11 = vld [vmem:[#allocation17_spill] sm:$0xff] }
 0x1c9   : > { %vm11639_vm1 = vcmp.le.f32.partialorder %v18865_v44, 0.7853982  ;;  %v2305_v48 = vor.u32 %v2304_v34, %v2303_v51  ;;  %v8994_v1 = vadd.s32 4294967169, %v2381_v7  ;;  %v1728_v26 = vsub.s32 32, %v11586_v10 }
 0x1ca   : > { %v1733_v41 = vadd.s32 127, %v1732_v52  ;;  %v2129_v46 = vadd.s32 536870912, %v11624_v12  ;;  %v2281_v38 = vand.u32 8388607, %v18404_v9  ;;  %v11650_v44 = vor.u32 %v2292_v40, %v2291_v35 }
 0x1cb   : > { %v11652_v29 = vor.u32 %v2295_v4, %v2294_v20  ;;  %v2299_v3 = vor.u32 %v2298_v23, %v2297_v57  ;;  %vm2309_vm4 = vcmp.lt.s32.totalorder %v11626_v45, 4  ;;  %v1842_v61 = vmul.f32 %v1841_v59, %v1839_v22 }
 0x1cc   : > { %v1712_v27 = vadd.s32 %v18869_v11, %v18868_v2  ;;  %v2234_v51 = vshll.u32 %v11643_v62, 30  ;;  %v2315_v52 = vsel %vm2309_vm4, %v2302_v39, 920167782  ;;  %vm8977_vm5 = vcmp.lt.s32.totalorder %v8976_v55, 0  ;;  %v11663_v20 = vpop.eup %9505 }
 0x1cd   : > { %v8979_v34 = vmin.u32 %v2031_v25, %v11612_v15  ;;  %v2319_v7 = vsel %vm2309_vm4, %v2305_v48, 1326507024  ;;  %v2387_v35 = vadd.s32 1, %v8994_v1  ;;  %18870 = vst [vmem:[#allocation18_spill] sm:$0xff] %v11663_v20  ;;  %v1734_v4 = vshll.u32 %v1733_v41, 23 }
 0x1ce   : > { %v1730_v40 = vshrl.u32 %v1712_v27, %v1728_v26  ;;  %vm2306_vm6 = vcmp.lt.s32.totalorder %v11626_v45, 1  ;;  %vm2308_vm9 = vcmp.lt.s32.totalorder %v11626_v45, 3  ;;  %v11667_v57 = vshrl.u32 %v2129_v46, 30 }
 0x1cf   : > { %v2282_v23 = vor.u32 8388608, %v2281_v38  ;;  %v2314_v22 = vsel %vm2306_vm6, %v11650_v44, %v11652_v29  ;;  %v2316_v59 = vsel %vm2308_vm9, %v2299_v3, %v2315_v52  ;;  %v1933_v25 = vsel %vm8977_vm5, 0, %v8976_v55  ;;  %v18872_v38 = vld [vmem:[#allocation29_spill] sm:$0xff] }
 0x1d0   : > { %v11676_v48 = vsub.s32 %v11588_v50, %v2234_v51  ;;  %v2318_v1 = vsel %vm2306_vm6, %v11652_v29, %v2299_v3  ;;  %v2320_v26 = vsel %vm2308_vm9, %v2302_v39, %v2319_v7  ;;  %v1848_v41 = vsel %vm11639_vm1, 0, %v11608_v32  ;;  %v18871_v50 = vld [vmem:[#allocation7_spill] sm:$0xff] }
 0x1d1   : > { %v2033_v46 = vclz %v8979_v34  ;;  %vm2307_vm10 = vcmp.lt.s32.totalorder %v11626_v45, 2  ;;  %vm2388_vm11 = vcmp.gt.s32.totalorder %v2387_v35, 0  ;;  %v1638_v55 = vsel %vm1555_vm14, %v1637_v58, %v11565_v49 }
 0x1d2   : > { %v1729_v2 = vshll.u32 %v18872_v38, %v11586_v10  ;;  %v1735_v11 = vor.u32 4788187, %v1734_v4  ;;  %v2317_v39 = vsel %vm2307_vm10, %v2314_v22, %v2316_v59  ;;  %v1938_v27 = vsub.s32 4294967266, %v1933_v25 }
 0x1d3   : > { %v2131_v32 = vshll.u32 %v11667_v57, 30  ;;  %v2321_v51 = vsel %vm2307_vm10, %v2318_v1, %v2320_v26  ;;  %v11699_v52 = vshll.u32 %v2282_v23, 8  ;;  %v1843_v34 = vxor.u32 2147483648, %v1842_v61 }
 0x1d4   : > { %v1731_v7 = vor.u32 %v1730_v40, %v1729_v2  ;;  %v2237_v9 = vsub.s32 0, %v11676_v48  ;;  %v2389_v49 = vsel %vm2388_vm11, %v2387_v35, 0  ;;  %v1641_v10 = vsel %vm11259_vm3, %v18871_v50, %v1638_v55  ;;  %v18873_v55 = vld [vmem:[#allocation25_spill] sm:$0xff]  ;;  %v18874_v2 = vld [vmem:[#allocation24_spill] sm:$0xff] }
 0x1d5   : > { %v8980_v58 = vadd.s32 4294967294, %v2033_v46  ;;  %v11706_v4 = vmul.u32.u64.low %v11699_v52, %v2317_v39  ;;  %v11707_v22 = vmul.u32.u64.high %v11699_v52, %v2317_v39, %v11706_v4  ;;  %v1736_v59 = vand.u32 2147483647, %v1735_v11 }
 0x1d6   : > { %v1934_v38 = vsub.s32 32, %v1933_v25  ;;  %v11711_v23 = vmul.u32.u64.low %v11699_v52, %v2321_v51  ;;  %v11712_v1 = vmul.u32.u64.high %v11699_v52, %v2321_v51, %v11711_v23  ;;  %9507 = vsinq.f32 %v11514_v0 }
 0x1d7   : > { %v1939_v40 = vadd.s32 127, %v1938_v27  ;;  %v11716_v35 = vsub.s32 %v11624_v12, %v2131_v32  ;;  %v2391_v33 = vand.u32 31, %v2389_v49  ;;  %v1844_v26 = vsel %vm1761_vm8, %v1843_v34, %v1842_v61  ;;  %v1016_v32 = vpop.f32.mrf.mxu1 }
 0x1d8   : > { %v1738_v46 = vcvt.s32.f32 %v1731_v7  ;;  %v1918_v39 = vadd.s32 %v18874_v2, %v18873_v55  ;;  %v8987_v11 = vmin.u32 %v2237_v9, %v11676_v48  ;;  %9509 = vcosq.f32 %v1641_v10  ;;  %v18876_v7 = vld [vmem:[#allocation26_spill] sm:$0xff] }
 0x1d9   : > { %v11723_v6 = vand.u32 3, %v1848_v41  ;;  %vm8981_vm14 = vcmp.lt.s32.totalorder %v8980_v58, 0  ;;  %v2290_v0 = vshrl.u32 %v18821_v13, %v11592_v19  ;;  %9511 = vsinq.f32 %v1641_v10 }
 0x1da   : > { %v11727_v12 = vmul.f32 %v1738_v46, %v1736_v59  ;;  %v1936_v27 = vshrl.u32 %v1918_v39, %v1934_v38  ;;  %v2311_v61 = vsel %vm2309_vm4, %v2299_v3, 2102212464  ;;  %v11734_v51 = vsel %vm11639_vm1, %v10719_v30, %v1844_v26 }
 0x1db   : > { %18875 = vst [vmem:[#allocation17_spill] sm:$0xff] %v11723_v6  ;;  %v1940_v9 = vshll.u32 %v1939_v40, 23  ;;  %v2134_v41 = vsub.s32 0, %v11716_v35  ;;  %v11737_v34 = vsub.s32 32, %v2391_v33  ;;  %v1935_v10 = vshll.u32 %v11533_v53, %v1933_v25 }
 0x1dc   : > { %v11741_v59 = vsel %vm8981_vm14, 0, %v8980_v58  ;;  %v2239_v38 = vclz %v8987_v11  ;;  %v2310_v3 = vsel %vm2306_vm6, %v2290_v0, %v11650_v44  ;;  %v2312_v17 = vsel %vm2308_vm9, %v11652_v29, %v2311_v61 }
 0x1dd   : > { %v2332_v23 = vadd.s32 1, %v11707_v22  ;;  %v11751_v40 = vadd.f32 %v1016_v32, %v10919_v56  ;;  %9513 = vcosq.f32 %v11734_v51  ;;  %v11755_v25 = vor.u32 %v1936_v27, %v1935_v10  ;;  %v18878_v10 = vld [vmem:[#allocation9_spill] sm:$0xff] }
 0x1de   : > { %vm2331_vm3 = vc.u32 %v11712_v1, %v11706_v4  ;;  %v1941_v58 = vor.u32 4788187, %v1940_v9  ;;  %v2041_v44 = vsub.s32 4294967266, %v11741_v59  ;;  %v8983_v26 = vmin.u32 %v2134_v41, %v11716_v35 }
 0x1df   : > { %18877 = vst [vmem:[#allocation29_spill] sm:$0xff] %v11751_v40  ;;  %v2404_v29 = vshrl.u32 %v18840_v60, %v11737_v34  ;;  %v8988_v46 = vadd.s32 4294967294, %v2239_v38  ;;  %v2313_v55 = vsel %vm2307_vm10, %v2310_v3, %v2312_v17  ;;  %v2407_v39 = vshrl.u32 %v18864_v28, %v11737_v34 }
 0x1e0   : > { %v2333_v11 = vsel %vm2331_vm3, %v2332_v23, %v11707_v22  ;;  %v11769_v0 = vshrl.u32 %v2389_v49, 5  ;;  %v2403_v27 = vshll.u32 %v18852_v63, %v2391_v33  ;;  %v2586_v61 = vand.u32 2139095040, %v11751_v40 }
 0x1e1   : > { %v2395_v32 = vshrl.u32 %v18842_v47, %v11737_v34  ;;  %v2398_v45 = vshrl.u32 %v18843_v42, %v11737_v34  ;;  %v2401_v9 = vshrl.u32 %v18852_v63, %v11737_v34  ;;  %v2406_v41 = vshll.u32 %v18840_v60, %v2391_v33 }
 0x1e2   : > { %vm1658_vm8 = vcmp.lt.s32.totalorder %v18878_v10, 0  ;;  %v2042_v22 = vadd.s32 127, %v2041_v44  ;;  %v2136_v49 = vclz %v8983_v26  ;;  %v2329_v38 = vmul.u32 %v11699_v52, %v2313_v55 }
 0x1e3   : > { %v2405_v3 = vor.u32 %v2404_v29, %v2403_v27  ;;  %v11782_v17 = vpop.eup %9507  ;;  %v2394_v23 = vshll.u32 %v18821_v13, %v2391_v33  ;;  %v2397_v53 = vshll.u32 %v18842_v47, %v2391_v33  ;;  %v2400_v19 = vshll.u32 %v18843_v42, %v2391_v33 }
 0x1e4   : > { %18879 = vst [vmem:[#allocation25_spill] sm:$0xff] %v11782_v17  ;;  %v2408_v2 = vor.u32 %v2407_v39, %v2406_v41  ;;  %vm8989_vm12 = vcmp.lt.s32.totalorder %v8988_v46, 0  ;;  %v11787_v20 = vadd.s32 %v2333_v11, %v2329_v38  ;;  %v18880_v24 = vand.u32 2147483647, %v11572_v43  ;;  %v18890_v17 = vld [vmem:[#allocation13_spill] sm:$0xff] }
 0x1e5   : > { %v2587_v44 = vshrl.u32 %v2586_v61, 23  ;;  %v11791_v26 = vpop.eup %9509  ;;  %v11793_v52 = vor.u32 %v2395_v32, %v2394_v23  ;;  %v11795_v29 = vor.u32 %v2398_v45, %v2397_v53  ;;  %v2402_v55 = vor.u32 %v2401_v9, %v2400_v19 }
 0x1e6   : > { %v2384_v6 = vand.u32 8388607, %v18880_v24  ;;  %18881 = vst [vmem:[#allocation24_spill] sm:$0xff] %v11791_v26  ;;  %vm2412_vm15 = vcmp.lt.s32.totalorder %v11769_v0, 4  ;;  %v11798_v27 = vpop.eup %9511  ;;  %v1944_v33 = vcvt.s32.f32 %v11755_v25  ;;  %v2021_v39 = vadd.s32 %v11347_v21, %v11391_v37 }
 0x1e7   : > { %18882 = vst [vmem:[#allocation26_spill] sm:$0xff] %v11798_v27  ;;  %v2037_v11 = vsub.s32 32, %v11741_v59  ;;  %v2418_v24 = vsel %vm2412_vm15, %v2405_v3, 920167782  ;;  %v1942_v61 = vand.u32 2147483647, %v1941_v58  ;;  %9515 = vsinq.f32 %v11734_v51 }
 0x1e8   : > { %v11806_v32 = vsel %vm8989_vm12, 0, %v8988_v46  ;;  %v8984_v53 = vadd.s32 4294967294, %v2136_v49  ;;  %v2422_v19 = vsel %vm2412_vm15, %v2408_v2, 1326507024  ;;  %v2335_v45 = vadd.s32 536870912, %v11787_v20 }
 0x1e9   : > { %vm2409_vm13 = vcmp.lt.s32.totalorder %v11769_v0, 1  ;;  %vm2411_vm1 = vcmp.lt.s32.totalorder %v11769_v0, 3  ;;  %v9002_v25 = vadd.s32 4294967169, %v2587_v44  ;;  %v18883_v21 = vand.u32 2147483647, %v18878_v10 }
 0x1ea   : > { %v18884_v37 = vmov 0  ;;  %v2043_v58 = vshll.u32 %v2042_v22, 23  ;;  %v2385_v46 = vor.u32 8388608, %v2384_v6  ;;  %v2417_v2 = vsel %vm2409_vm13, %v11793_v52, %v11795_v29  ;;  %v11825_v41 = vpop.eup %9513  ;;  %v809_v22 = vpop.f32.mrf.mxu0 }
 0x1eb   : > { %vm11815_vm4 = vcmp.le.f32.partialorder %v18883_v21, 0.7853982  ;;  %v2419_v9 = vsel %vm2411_vm1, %v2402_v55, %v2418_v24  ;;  %18887 = vst [vmem:[#allocation36_spill] sm:$0xff] %v11825_v41  ;;  %v2039_v49 = vshrl.u32 %v2021_v39, %v2037_v11  ;;  %v2247_v38 = vsub.s32 4294967266, %v11806_v32  ;;  %v18891_v11 = vld [vmem:[#allocation10_spill] sm:$0xff] }
 0x1ec   : > { %v18885_v37 = vsel %vm11815_vm4, 4294967295, %v18884_v37  ;;  %v2421_v23 = vsel %vm2409_vm13, %v11795_v29, %v2402_v55  ;;  %v2423_v6 = vsel %vm2411_vm1, %v2405_v3, %v2422_v19  ;;  %v18888_v44 = vsub.s32 4, %v18876_v7 }
 0x1ed   : > { %18886 = vst [vmem:[#allocation35_spill] sm:$0xff] %v18885_v37  ;;  %v1945_v24 = vmul.f32 %v1944_v33, %v1942_v61  ;;  %vm1967_vm5 = vcmp.lt.s32.totalorder %v18890_v17, 0  ;;  %v2038_v39 = vshll.u32 %v11612_v15, %v11741_v59  ;;  %vm2410_vm6 = vcmp.lt.s32.totalorder %v11769_v0, 2 }
 0x1ee   : > { %v11838_v21 = vsel %vm1658_vm8, %v18888_v44, %v18876_v7  ;;  %vm1864_vm9 = vcmp.lt.s32.totalorder %v18891_v11, 0  ;;  %vm8985_vm10 = vcmp.lt.s32.totalorder %v8984_v53, 0  ;;  %v11845_v3 = vshrl.u32 %v2335_v45, 30 }
 0x1ef   : > { %18889 = vst [vmem:[#allocation37_spill] sm:$0xff] %v11838_v21  ;;  %v2420_v19 = vsel %vm2410_vm6, %v2417_v2, %v2419_v9  ;;  %v2593_v41 = vadd.s32 1, %v9002_v25  ;;  %v2044_v30 = vor.u32 4788187, %v2043_v58  ;;  %v2424_v7 = vsel %vm2410_vm6, %v2421_v23, %v2423_v6 }
 0x1f0   : > { %v11851_v33 = vshll.u32 %v2385_v46, 8  ;;  %v11854_v61 = vadd.f32 %v809_v22, %v10919_v56  ;;  %v18893_v15 = vxor.u32 2147483648, %v11727_v12  ;;  %v18894_v45 = vand.u32 2147483647, %v18890_v17 }
 0x1f1   : > { %v2040_v25 = vor.u32 %v2039_v49, %v2038_v39  ;;  %v2051_v58 = vsub.s32 4, %v11559_v18  ;;  %v2248_v46 = vadd.s32 127, %v2247_v38  ;;  %v18897_v9 = vand.u32 2147483647, %v18891_v11 }
 0x1f2   : > { %18892 = vst [vmem:[#allocation38_spill] sm:$0xff] %v11854_v61  ;;  %v1741_v59 = vsel %vm1658_vm8, %v18893_v15, %v11727_v12  ;;  %vm11863_vm11 = vcmp.le.f32.partialorder %v18894_v45, 0.7853982  ;;  %v18898_v23 = vmov 0  ;;  %v2243_v6 = vsub.s32 32, %v11806_v32 }
 0x1f3   : > { %vm11870_vm14 = vcmp.le.f32.partialorder %v18897_v9, 0.7853982  ;;  %v11875_v22 = vsel %vm8985_vm10, 0, %v8984_v53  ;;  %v11878_v12 = vmul.u32.u64.low %v11851_v33, %v2420_v19  ;;  %v11879_v44 = vmul.u32.u64.high %v11851_v33, %v2420_v19, %v11878_v12 }
 0x1f4   : > { %v18899_v23 = vsel %vm11870_vm14, 4294967295, %v18898_v23  ;;  %v2337_v49 = vshll.u32 %v11845_v3, 30  ;;  %v11884_v39 = vmul.u32.u64.low %v11851_v33, %v2424_v7  ;;  %v11885_v38 = vmul.u32.u64.high %v11851_v33, %v2424_v7, %v11884_v39 }
 0x1f5   : > { %18900 = vst [vmem:[#allocation39_spill] sm:$0xff] %v18899_v23  ;;  %vm2594_vm3 = vcmp.gt.s32.totalorder %v2593_v41, 0  ;;  %v1946_v15 = vxor.u32 2147483648, %v1945_v24  ;;  %v2045_v45 = vand.u32 2147483647, %v2044_v30  ;;  %v2483_v9 = vand.u32 2139095040, %v11854_v61 }
 0x1f6   : > { %v1744_v53 = vsel %vm11815_vm4, %v18878_v10, %v1741_v59  ;;  %v1948_v19 = vsub.s32 4, %v11453_v8  ;;  %v2227_v26 = vadd.s32 %v11484_v16, %v11479_v5  ;;  %v2249_v27 = vshll.u32 %v2248_v46, 23 }
 0x1f7   : > { %v2047_v14 = vcvt.s32.f32 %v2040_v25  ;;  %v2144_v7 = vsub.s32 4294967266, %v11875_v22  ;;  %v2414_v51 = vsel %vm2412_vm15, %v2402_v55, 2102212464  ;;  %v2595_v39 = vsel %vm2594_vm3, %v2593_v41, 0 }
 0x1f8   : > { %v2052_v30 = vsel %vm1967_vm5, %v2051_v58, %v11559_v18  ;;  %v2245_v50 = vshrl.u32 %v2227_v26, %v2243_v6  ;;  %v11902_v59 = vsub.s32 %v11787_v20, %v2337_v49  ;;  %v2393_v10 = vshrl.u32 %v18821_v13, %v11737_v34 }
 0x1f9   : > { %v1947_v5 = vsel %vm1864_vm9, %v1946_v15, %v1945_v24  ;;  %v2048_v16 = vmul.f32 %v2047_v14, %v2045_v45  ;;  %v2244_v25 = vshll.u32 %v11676_v48, %v11806_v32  ;;  %v2484_v55 = vshrl.u32 %v2483_v9, 23 }
 0x1fa   : > { %v2250_v41 = vor.u32 4788187, %v2249_v27  ;;  %v2413_v18 = vsel %vm2409_vm13, %v2393_v10, %v11793_v52  ;;  %v2415_v20 = vsel %vm2411_vm1, %v11795_v29, %v2414_v51  ;;  %v2597_v26 = vand.u32 31, %v2595_v39 }
 0x1fb   : > { %v11919_v34 = vsel %vm1864_vm9, %v1948_v19, %v11453_v8  ;;  %v2054_v14 = vsel %vm11863_vm11, 0, %v2052_v30  ;;  %v2145_v48 = vadd.s32 127, %v2144_v7  ;;  %v2435_v27 = vadd.s32 1, %v11879_v44  ;;  %v1018_v19 = vpop.f32.mrf.mxu1  ;;  %v11945_v7 = vpop.permute.xlu1 %602  ;;  %v18904_v30 = vld [vmem:[#allocation19_spill] sm:$0xff] }
 0x1fc   : > { %18901 = vst [vmem:[#allocation40_spill] sm:$0xff] %v11919_v34  ;;  %v11927_v10 = vsel %vm11870_vm14, %v18891_v11, %v1947_v5  ;;  %v2246_v52 = vor.u32 %v2245_v50, %v2244_v25  ;;  %v2340_v29 = vsub.s32 0, %v11902_v59  ;;  %vm2434_vm8 = vc.u32 %v11885_v38, %v11878_v12  ;;  %18903 = vst [vmem:[#allocation42_spill] sm:$0xff] %v11945_v7 }
 0x1fd   : > { %9517 = vcosq.f32 %v1744_v53  ;;  %v2049_v8 = vxor.u32 2147483648, %v2048_v16  ;;  %v2416_v32 = vsel %vm2410_vm6, %v2413_v18, %v2415_v20  ;;  %v8998_v24 = vadd.s32 4294967169, %v2484_v55  ;;  %v11952_v55 = vpop.eup %9515 }
 0x1fe   : > { %9519 = vsinq.f32 %v1744_v53  ;;  %v2251_v58 = vand.u32 2147483647, %v2250_v41  ;;  %v2140_v46 = vsub.s32 32, %v11875_v22  ;;  %v11935_v6 = vsub.s32 32, %v2597_v26  ;;  %18905 = vst [vmem:[#allocation43_spill] sm:$0xff] %v11952_v55 }
 0x1ff   : > { %9521 = vcosq.f32 %v11927_v10  ;;  %v11938_v50 = vand.u32 3, %v2054_v14  ;;  %v2146_v49 = vshll.u32 %v2145_v48, 23  ;;  %v2436_v15 = vsel %vm2434_vm8, %v2435_v27, %v11879_v44 }
 0x200   : > { %v2253_v45 = vcvt.s32.f32 %v2246_v52  ;;  %v2124_v9 = vadd.s32 %v11537_v54, %v11549_v36  ;;  %v8991_v0 = vmin.u32 %v2340_v29, %v11902_v59  ;;  %v2432_v53 = vmul.u32 %v11851_v33, %v2416_v32 }
 0x201   : > { %18902 = vst [vmem:[#allocation41_spill] sm:$0xff] %v11938_v50  ;;  %v2050_v51 = vsel %vm1967_vm5, %v2049_v8, %v2048_v16  ;;  %vm2173_vm12 = vcmp.lt.s32.totalorder %v18904_v30, 0  ;;  %v2257_v5 = vsub.s32 4, %v11643_v62  ;;  %v18418_v44 = vand.u32 2147483647, %v11751_v40 }
 0x202   : > { %v2490_v25 = vadd.s32 1, %v8998_v24  ;;  %v11954_v54 = vmul.f32 %v2253_v45, %v2251_v58  ;;  %v2142_v36 = vshrl.u32 %v2124_v9, %v2140_v46  ;;  %v11956_v41 = vadd.s32 %v2436_v15, %v2432_v53  ;;  %v11980_v58 = vpop.permute.xlu1 %592 }
 0x203   : > { %v2610_v33 = vshrl.u32 %v18840_v60, %v11935_v6  ;;  %v2141_v16 = vshll.u32 %v11716_v35, %v11875_v22  ;;  %v2147_v18 = vor.u32 4788187, %v2146_v49  ;;  %v2613_v20 = vshrl.u32 %v18864_v28, %v11935_v6  ;;  %18907 = vst [vmem:[#allocation45_spill] sm:$0xff] %v11980_v58 }
 0x204   : > { %v11965_v14 = vadd.f32 %v1018_v19, %v10919_v56  ;;  %v2342_v48 = vclz %v8991_v0  ;;  %v11967_v27 = vshrl.u32 %v2595_v39, 5  ;;  %v2601_v52 = vshrl.u32 %v18842_v47, %v11935_v6 }
 0x205   : > { %v2609_v29 = vshll.u32 %v18852_v63, %v2597_v26  ;;  %v2604_v8 = vshrl.u32 %v18843_v42, %v11935_v6  ;;  %v2607_v35 = vshrl.u32 %v18852_v63, %v11935_v6  ;;  %v2612_v22 = vshll.u32 %v18840_v60, %v2597_v26 }
 0x206   : > { %18906 = vst [vmem:[#allocation44_spill] sm:$0xff] %v11965_v14  ;;  %vm2491_vm15 = vcmp.gt.s32.totalorder %v2490_v25, 0  ;;  %v2143_v32 = vor.u32 %v2142_v36, %v2141_v16  ;;  %v2438_v56 = vadd.s32 536870912, %v11956_v41  ;;  %v2590_v39 = vand.u32 8388607, %v18418_v44 }
 0x207   : > { %v2611_v24 = vor.u32 %v2610_v33, %v2609_v29  ;;  %v18908_v46 = vand.u32 2147483647, %v18904_v30  ;;  %v2600_v15 = vshll.u32 %v18821_v13, %v2597_v26  ;;  %v2603_v45 = vshll.u32 %v18842_v47, %v2597_v26 }
 0x208   : > { %v2606_v9 = vshll.u32 %v18843_v42, %v2597_v26  ;;  %v2614_v0 = vor.u32 %v2613_v20, %v2612_v22  ;;  %v2148_v53 = vand.u32 2147483647, %v2147_v18  ;;  %v8992_v19 = vadd.s32 4294967294, %v2342_v48 }
 0x209   : > { %vm11984_vm13 = vcmp.le.f32.partialorder %v18908_v46, 0.7853982  ;;  %v2492_v36 = vsel %vm2491_vm15, %v2490_v25, 0  ;;  %v2689_v33 = vand.u32 2139095040, %v11965_v14  ;;  %v11992_v16 = vor.u32 %v2601_v52, %v2600_v15 }
 0x20a   : > { %v11994_v29 = vor.u32 %v2604_v8, %v2603_v45  ;;  %v2608_v46 = vor.u32 %v2607_v35, %v2606_v9  ;;  %vm2618_vm1 = vcmp.lt.s32.totalorder %v11967_v27, 4  ;;  %v11997_v44 = vpop.eup %9517  ;;  %v12002_v55 = vsel %vm11863_vm11, %v18890_v17, %v2050_v51 }
 0x20b   : > { %18911 = vst [vmem:[#allocation46_spill] sm:$0xff] %v11997_v44  ;;  %v12007_v26 = vsel %vm2173_vm12, %v2257_v5, %v11643_v62  ;;  %v12009_v25 = vshrl.u32 %v2438_v56, 30  ;;  %v2624_v18 = vsel %vm2618_vm1, %v2611_v24, 920167782  ;;  %v12013_v20 = vpop.eup %9519  ;;  %v2255_v48 = vxor.u32 2147483648, %v11954_v54  ;;  %v12022_v5 = vpop.permute.xlu1 %562 }
 0x20c   : > { %18912 = vst [vmem:[#allocation47_spill] sm:$0xff] %v12013_v20  ;;  %v2150_v52 = vcvt.s32.f32 %v2143_v32  ;;  %v2628_v2 = vsel %vm2618_vm1, %v2614_v0, 1326507024  ;;  %v2494_v51 = vand.u32 31, %v2492_v36  ;;  %v12018_v8 = vpop.eup %9521  ;;  %vm8993_vm5 = vcmp.lt.s32.totalorder %v8992_v19, 0  ;;  %18914 = vst [vmem:[#allocation49_spill] sm:$0xff] %v12022_v5  ;;  %v813_v0 = vpop.f32.mrf.mxu0 }
 0x20d   : > { %18913 = vst [vmem:[#allocation48_spill] sm:$0xff] %v12018_v8  ;;  %vm2615_vm6 = vcmp.lt.s32.totalorder %v11967_v27, 1  ;;  %vm2617_vm9 = vcmp.lt.s32.totalorder %v11967_v27, 3  ;;  %v2690_v62 = vshrl.u32 %v2689_v33, 23  ;;  %v2591_v22 = vor.u32 8388608, %v2590_v39 }
 0x20e   : > { %v12024_v35 = vmul.f32 %v2150_v52, %v2148_v53  ;;  %v2623_v32 = vsel %vm2615_vm6, %v11992_v16, %v11994_v29  ;;  %v2625_v56 = vsel %vm2617_vm9, %v2608_v46, %v2624_v18  ;;  %v2440_v15 = vshll.u32 %v12009_v25, 30 }
 0x20f   : > { %v2627_v45 = vsel %vm2615_vm6, %v11994_v29, %v2608_v46  ;;  %v2629_v9 = vsel %vm2617_vm9, %v2611_v24, %v2628_v2  ;;  %9523 = vsinq.f32 %v11927_v10  ;;  %v12040_v39 = vsel %vm8993_vm5, 0, %v8992_v19 }
 0x210   : > { %vm2616_vm10 = vcmp.lt.s32.totalorder %v11967_v27, 2  ;;  %v12043_v53 = vsub.s32 32, %v2494_v51  ;;  %9525 = vcosq.f32 %v12002_v55  ;;  %v9006_v24 = vadd.s32 4294967169, %v2690_v62 }
 0x211   : > { %v2626_v18 = vsel %vm2616_vm10, %v2623_v32, %v2625_v56  ;;  %v12054_v10 = vsel %vm2173_vm12, %v2255_v48, %v11954_v54  ;;  %v12058_v19 = vadd.s32 %v11706_v4, %v11712_v1  ;;  %v2630_v52 = vsel %vm2616_vm10, %v2627_v45, %v2629_v9  ;;  %v12073_v56 = vpop.permute.xlu1 %552 }
 0x212   : > { %v12062_v2 = vshll.u32 %v2591_v22, 8  ;;  %v2152_v33 = vxor.u32 2147483648, %v12024_v35  ;;  %v2350_v32 = vsub.s32 4294967266, %v12040_v39  ;;  %v12067_v62 = vsub.s32 %v11956_v41, %v2440_v15 }
 0x213   : > { %v18915_v54 = vand.u32 2147483647, %v11854_v61  ;;  %v2507_v22 = vshrl.u32 %v18840_v60, %v12043_v53  ;;  %v2510_v45 = vshrl.u32 %v18864_v28, %v12043_v53  ;;  %v2696_v9 = vadd.s32 1, %v9006_v24 }
 0x214   : > { %v12076_v4 = vmul.u32.u64.low %v12062_v2, %v2626_v18  ;;  %v12077_v1 = vmul.u32.u64.high %v12062_v2, %v2626_v18, %v12076_v4  ;;  %v12085_v41 = vmul.u32.u64.low %v12062_v2, %v2630_v52  ;;  %v12086_v15 = vmul.u32.u64.high %v12062_v2, %v2630_v52, %v12085_v41 }
 0x215   : > { %v12071_v48 = vand.u32 8388607, %v18915_v54  ;;  %v12089_v54 = vadd.f32 %v813_v0, %v12073_v56  ;;  %v2498_v11 = vshrl.u32 %v18842_v47, %v12043_v53  ;;  %v2501_v18 = vshrl.u32 %v18843_v42, %v12043_v53  ;;  %v18917_v41 = vld [vmem:[#allocation22_spill] sm:$0xff] }
 0x216   : > { %v2506_v8 = vshll.u32 %v18852_v63, %v2494_v51  ;;  %v2509_v23 = vshll.u32 %v18840_v60, %v2494_v51  ;;  %v2599_v34 = vshrl.u32 %v18821_v13, %v11935_v6  ;;  %v2620_v52 = vsel %vm2618_vm1, %v2608_v46, 2102212464 }
 0x217   : > { %18916 = vst [vmem:[#allocation50_spill] sm:$0xff] %v12089_v54  ;;  %v12101_v24 = vshrl.u32 %v2492_v36, 5  ;;  %v2504_v0 = vshrl.u32 %v18852_v63, %v12043_v53  ;;  %vm2070_vm11 = vcmp.lt.s32.totalorder %v18917_v41, 0  ;;  %v2497_v44 = vshll.u32 %v18821_v13, %v2494_v51 }
 0x218   : > { %v2500_v20 = vshll.u32 %v18842_v47, %v2494_v51  ;;  %v2508_v37 = vor.u32 %v2507_v22, %v2506_v8  ;;  %v2511_v21 = vor.u32 %v2510_v45, %v2509_v23  ;;  %v2443_v50 = vsub.s32 0, %v12067_v62 }
 0x219   : > { %v2619_v6 = vsel %vm2615_vm6, %v2599_v34, %v11992_v16  ;;  %v2503_v36 = vshll.u32 %v18843_v42, %v2494_v51  ;;  %vm2697_vm3 = vcmp.gt.s32.totalorder %v2696_v9, 0  ;;  %v2621_v46 = vsel %vm2617_vm9, %v11994_v29, %v2620_v52 }
 0x21a   : > { %v12116_v17 = vor.u32 %v2498_v11, %v2497_v44  ;;  %v12118_v7 = vor.u32 %v2501_v18, %v2500_v20  ;;  %v2888_v8 = vand.u32 2139095040, %v12089_v54  ;;  %v2346_v23 = vsub.s32 32, %v12040_v39 }
 0x21b   : > { %v2351_v22 = vadd.s32 127, %v2350_v32  ;;  %v2505_v45 = vor.u32 %v2504_v0, %v2503_v36  ;;  %vm2515_vm8 = vcmp.lt.s32.totalorder %v12101_v24, 4  ;;  %v2641_v34 = vadd.s32 1, %v12077_v1 }
 0x21c   : > { %v2521_v16 = vsel %vm2515_vm8, %v2508_v37, 920167782  ;;  %v2525_v29 = vsel %vm2515_vm8, %v2511_v21, 1326507024  ;;  %v2698_v11 = vsel %vm2697_vm3, %v2696_v9, 0  ;;  %v12128_v44 = vpop.eup %9523  ;;  %v18920_v51 = vmov 0 }
 0x21d   : > { %18918 = vst [vmem:[#allocation51_spill] sm:$0xff] %v12128_v44  ;;  %v18919_v20 = vand.u32 2147483647, %v18917_v41  ;;  %v8995_v32 = vmin.u32 %v2443_v50, %v12067_v62  ;;  %v2622_v18 = vsel %vm2616_vm10, %v2619_v6, %v2621_v46  ;;  %vm2640_vm15 = vc.u32 %v12086_v15, %v12076_v4  ;;  %v12142_v21 = vpop.eup %9525 }
 0x21e   : > { %vm2512_vm1 = vcmp.lt.s32.totalorder %v12101_v24, 1  ;;  %18923 = vst [vmem:[#allocation53_spill] sm:$0xff] %v12142_v21  ;;  %v2488_v9 = vor.u32 8388608, %v12071_v48  ;;  %vm2514_vm5 = vcmp.lt.s32.totalorder %v12101_v24, 3  ;;  %v2889_v50 = vshrl.u32 %v2888_v8, 23 }
 0x21f   : > { %vm12132_vm12 = vcmp.le.f32.partialorder %v18919_v20, 0.7853982  ;;  %v2520_v52 = vsel %vm2512_vm1, %v12116_v17, %v12118_v7  ;;  %v2522_v27 = vsel %vm2514_vm5, %v2505_v45, %v2521_v16  ;;  %v2524_v0 = vsel %vm2512_vm1, %v12118_v7, %v2505_v45 }
 0x220   : > { %v18921_v51 = vsel %vm12132_vm12, 4294967295, %v18920_v51  ;;  %v2526_v6 = vsel %vm2514_vm5, %v2508_v37, %v2525_v29  ;;  %v2700_v36 = vand.u32 31, %v2698_v11  ;;  %9527 = vsinq.f32 %v12002_v55 }
 0x221   : > { %18922 = vst [vmem:[#allocation52_spill] sm:$0xff] %v18921_v51  ;;  %v12162_v48 = vsel %vm11984_vm13, %v18904_v30, %v12054_v10  ;;  %v18924_v46 = vsel %vm11984_vm13, 0, %v12007_v26  ;;  %v2642_v16 = vsel %vm2640_vm15, %v2641_v34, %v12077_v1  ;;  %v2153_v37 = vsel %vm2070_vm11, %v2152_v33, %v12024_v35 }
 0x222   : > { %v12168_v8 = vand.u32 3, %v18924_v46  ;;  %v2348_v55 = vshrl.u32 %v12058_v19, %v2346_v23  ;;  %v2638_v29 = vmul.u32 %v12062_v2, %v2622_v18  ;;  %vm2513_vm6 = vcmp.lt.s32.totalorder %v12101_v24, 2 }
 0x223   : > { %v2352_v10 = vshll.u32 %v2351_v22, 23  ;;  %v2523_v49 = vsel %vm2513_vm6, %v2520_v52, %v2522_v27  ;;  %v2527_v26 = vsel %vm2513_vm6, %v2524_v0, %v2526_v6  ;;  %v9010_v20 = vadd.s32 4294967169, %v2889_v50 }
 0x224   : > { %18925 = vst [vmem:[#allocation54_spill] sm:$0xff] %v12168_v8  ;;  %v2445_v46 = vclz %v8995_v32  ;;  %v12181_v1 = vadd.s32 %v2642_v16, %v2638_v29  ;;  %v12183_v34 = vshll.u32 %v2488_v9, 8  ;;  %v12185_v35 = vsub.s32 32, %v2700_v36 }
 0x225   : > { %9529 = vcosq.f32 %v12162_v48  ;;  %v2347_v19 = vshll.u32 %v11902_v59, %v12040_v39  ;;  %v18429_v2 = vand.u32 2147483647, %v11965_v14  ;;  %v12204_v9 = vsel %vm12132_vm12, %v18917_v41, %v2153_v37  ;;  %v1022_v39 = vpop.f32.mrf.mxu1 }
 0x226   : > { %v12193_v23 = vmul.u32.u64.low %v12183_v34, %v2527_v26  ;;  %v12194_v22 = vmul.u32.u64.high %v12183_v34, %v2527_v26, %v12193_v23  ;;  %v12197_v32 = vmul.u32.u64.low %v12183_v34, %v2523_v49  ;;  %v12198_v18 = vmul.u32.u64.high %v12183_v34, %v2523_v49, %v12197_v32 }
 0x227   : > { %v2349_v52 = vor.u32 %v2348_v55, %v2347_v19  ;;  %v2895_v59 = vadd.s32 1, %v9010_v20  ;;  %v2353_v27 = vor.u32 4788187, %v2352_v10  ;;  %v8996_v0 = vadd.s32 4294967294, %v2445_v46 }
 0x228   : > { %v2644_v6 = vadd.s32 536870912, %v12181_v1  ;;  %v2713_v16 = vshrl.u32 %v18840_v60, %v12185_v35  ;;  %v2496_v29 = vshrl.u32 %v18821_v13, %v12043_v53  ;;  %v2517_v49 = vsel %vm2515_vm8, %v2505_v45, 2102212464 }
 0x229   : > { %v2693_v37 = vand.u32 8388607, %v18429_v2  ;;  %v2716_v55 = vshrl.u32 %v18864_v28, %v12185_v35  ;;  %v12218_v26 = vshrl.u32 %v2698_v11, 5  ;;  %v2704_v10 = vshrl.u32 %v18842_v47, %v12185_v35 }
 0x22a   : > { %v2712_v20 = vshll.u32 %v18852_v63, %v2700_v36  ;;  %v12224_v46 = vadd.f32 %v1022_v39, %v12073_v56  ;;  %v2707_v53 = vshrl.u32 %v18843_v42, %v12185_v35  ;;  %v2710_v45 = vshrl.u32 %v18852_v63, %v12185_v35 }
 0x22b   : > { %v2715_v19 = vshll.u32 %v18840_v60, %v2700_v36  ;;  %vm2896_vm13 = vcmp.gt.s32.totalorder %v2895_v59, 0  ;;  %v12231_v23 = vshrl.u32 %v2644_v6, 30  ;;  %v2516_v11 = vsel %vm2512_vm1, %v2496_v29, %v12116_v17 }
 0x22c   : > { %18926 = vst [vmem:[#allocation55_spill] sm:$0xff] %v12224_v46  ;;  %v2703_v2 = vshll.u32 %v18821_v13, %v2700_v36  ;;  %v2714_v50 = vor.u32 %v2713_v16, %v2712_v20  ;;  %vm2276_vm9 = vcmp.lt.s32.totalorder %v11384_v31, 0  ;;  %v2518_v39 = vsel %vm2514_vm5, %v12118_v7, %v2517_v49 }
 0x22d   : > { %v2706_v33 = vshll.u32 %v18842_v47, %v2700_v36  ;;  %v2709_v44 = vshll.u32 %v18843_v42, %v2700_v36  ;;  %v2717_v8 = vor.u32 %v2716_v55, %v2715_v19  ;;  %v12243_v6 = vpop.eup %9527  ;;  %vm2537_vm10 = vc.u32 %v12194_v22, %v12197_v32 }
 0x22e   : > { %18927 = vst [vmem:[#allocation56_spill] sm:$0xff] %v12243_v6  ;;  %v2538_v17 = vadd.s32 1, %v12198_v18  ;;  %v12248_v29 = vor.u32 %v2704_v10, %v2703_v2  ;;  %v2897_v16 = vsel %vm2896_vm13, %v2895_v59, 0  ;;  %vm2721_vm3 = vcmp.lt.s32.totalorder %v12218_v26, 4 }
 0x22f   : > { %v12250_v20 = vor.u32 %v2707_v53, %v2706_v33  ;;  %v2711_v30 = vor.u32 %v2710_v45, %v2709_v44  ;;  %v3094_v7 = vand.u32 2139095040, %v12224_v46  ;;  %v2354_v49 = vand.u32 2147483647, %v2353_v27 }
 0x230   : > { %v2646_v36 = vshll.u32 %v12231_v23, 30  ;;  %v2519_v55 = vsel %vm2513_vm6, %v2516_v11, %v2518_v39  ;;  %v2727_v19 = vsel %vm2721_vm3, %v2714_v50, 920167782  ;;  %v2356_v21 = vcvt.s32.f32 %v2349_v52 }
 0x231   : > { %vm8997_vm8 = vcmp.lt.s32.totalorder %v8996_v0, 0  ;;  %v2731_v33 = vsel %vm2721_vm3, %v2717_v8, 1326507024  ;;  %v2899_v2 = vand.u32 31, %v2897_v16  ;;  %v2539_v59 = vsel %vm2537_vm10, %v2538_v17, %v12198_v18 }
 0x232   : > { %v12261_v44 = vpop.eup %9529  ;;  %v2694_v27 = vor.u32 8388608, %v2693_v37  ;;  %vm2718_vm15 = vcmp.lt.s32.totalorder %v12218_v26, 1  ;;  %vm2720_vm1 = vcmp.lt.s32.totalorder %v12218_v26, 3  ;;  %v2535_v24 = vmul.u32 %v12183_v34, %v2519_v55 }
 0x233   : > { %18928 = vst [vmem:[#allocation57_spill] sm:$0xff] %v12261_v44  ;;  %v2726_v8 = vsel %vm2718_vm15, %v12248_v29, %v12250_v20  ;;  %v2728_v52 = vsel %vm2720_vm1, %v2711_v30, %v2727_v19  ;;  %v3095_v10 = vshrl.u32 %v3094_v7, 23  ;;  %v12276_v53 = vmul.f32 %v2356_v21, %v2354_v49 }
 0x234   : > { %v12279_v18 = vsub.s32 %v12181_v1, %v2646_v36  ;;  %v2730_v37 = vsel %vm2718_vm15, %v12250_v20, %v2711_v30  ;;  %v2732_v34 = vsel %vm2720_vm1, %v2714_v50, %v2731_v33  ;;  %v12287_v45 = vsel %vm8997_vm8, 0, %v8996_v0 }
 0x235   : > { %v12289_v11 = vadd.s32 %v2539_v59, %v2535_v24  ;;  %vm2719_vm5 = vcmp.lt.s32.totalorder %v12218_v26, 2  ;;  %v12292_v39 = vsub.s32 32, %v2899_v2  ;;  %9531 = vsinq.f32 %v12162_v48 }
 0x236   : > { %v18929_v21 = vsub.s32 4, %v11667_v57  ;;  %v18931_v50 = vsub.s32 4, %v11845_v3  ;;  %v2729_v17 = vsel %vm2719_vm5, %v2726_v8, %v2728_v52  ;;  %9533 = vcosq.f32 %v12204_v9 }
 0x237   : > { %v2733_v48 = vsel %vm2719_vm5, %v2730_v37, %v2732_v34  ;;  %v12314_v7 = vshll.u32 %v2694_v27, 8  ;;  %v9018_v49 = vadd.s32 4294967169, %v3095_v10  ;;  %9535 = vsinq.f32 %v12204_v9 }
 0x238   : > { %v12300_v1 = vsel %vm2070_vm11, %v18929_v21, %v11667_v57  ;;  %v12307_v0 = vsel %vm2276_vm9, %v18931_v50, %v11845_v3  ;;  %v2649_v3 = vsub.s32 0, %v12279_v18  ;;  %v2541_v55 = vadd.s32 536870912, %v12289_v11 }
 0x239   : > { %18930 = vst [vmem:[#allocation58_spill] sm:$0xff] %v12300_v1  ;;  %18932 = vst [vmem:[#allocation59_spill] sm:$0xff] %v12307_v0  ;;  %v12322_v19 = vmul.u32.u64.low %v12314_v7, %v2729_v17  ;;  %v12323_v33 = vmul.u32.u64.high %v12314_v7, %v2729_v17, %v12322_v19  ;;  %v2912_v59 = vshrl.u32 %v18840_v60, %v12292_v39  ;;  %v2453_v27 = vsub.s32 4294967266, %v12287_v45 }
 0x23a   : > { %v12330_v9 = vmul.u32.u64.low %v12314_v7, %v2733_v48  ;;  %v12331_v24 = vmul.u32.u64.high %v12314_v7, %v2733_v48, %v12330_v9  ;;  %v2915_v8 = vshrl.u32 %v18864_v28, %v12292_v39  ;;  %v12336_v10 = vshrl.u32 %v2897_v16, 5 }
 0x23b   : > { %v2911_v37 = vshll.u32 %v18852_v63, %v2899_v2  ;;  %v3101_v34 = vadd.s32 1, %v9018_v49  ;;  %v2903_v21 = vshrl.u32 %v18842_v47, %v12292_v39  ;;  %v2906_v50 = vshrl.u32 %v18843_v42, %v12292_v39  ;;  %v815_v9 = vpop.f32.mrf.mxu0 }
 0x23c   : > { %v2909_v17 = vshrl.u32 %v18852_v63, %v12292_v39  ;;  %v2914_v48 = vshll.u32 %v18840_v60, %v2899_v2  ;;  %v9003_v36 = vmin.u32 %v2649_v3, %v12279_v18  ;;  %v12347_v57 = vshrl.u32 %v2541_v55, 30 }
 0x23d   : > { %v2723_v16 = vsel %vm2721_vm3, %v2711_v30, 2102212464  ;;  %v2913_v49 = vor.u32 %v2912_v59, %v2911_v37  ;;  %v2902_v52 = vshll.u32 %v18821_v13, %v2899_v2  ;;  %v2905_v44 = vshll.u32 %v18842_v47, %v2899_v2 }
 0x23e   : > { %v2908_v6 = vshll.u32 %v18843_v42, %v2899_v2  ;;  %v2916_v41 = vor.u32 %v2915_v8, %v2914_v48  ;;  %v2702_v0 = vshrl.u32 %v18821_v13, %v12185_v35  ;;  %v18933_v51 = vand.u32 2147483647, %v12089_v54 }
 0x23f   : > { %vm3102_vm11 = vcmp.gt.s32.totalorder %v3101_v34, 0  ;;  %v12359_v3 = vadd.f32 %v815_v9, %v12073_v56  ;;  %v2904_v55 = vor.u32 %v2903_v21, %v2902_v52  ;;  %v2907_v30 = vor.u32 %v2906_v50, %v2905_v44 }
 0x240   : > { %v2892_v1 = vand.u32 8388607, %v18933_v51  ;;  %v2910_v59 = vor.u32 %v2909_v17, %v2908_v6  ;;  %vm2920_vm6 = vcmp.lt.s32.totalorder %v12336_v10, 4  ;;  %v2651_v37 = vclz %v9003_v36 }
 0x241   : > { %18934 = vst [vmem:[#allocation60_spill] sm:$0xff] %v12359_v3  ;;  %v2722_v2 = vsel %vm2718_vm15, %v2702_v0, %v12248_v29  ;;  %v2724_v35 = vsel %vm2720_vm1, %v12250_v20, %v2723_v16  ;;  %v2926_v51 = vsel %vm2920_vm6, %v2913_v49, 920167782  ;;  %v2543_v8 = vshll.u32 %v12347_v57, 30 }
 0x242   : > { %v2744_v52 = vadd.s32 1, %v12323_v33  ;;  %v2930_v6 = vsel %vm2920_vm6, %v2916_v41, 1326507024  ;;  %v3103_v44 = vsel %vm3102_vm11, %v3101_v34, 0  ;;  %v12374_v36 = vpop.eup %9531  ;;  %vm2743_vm13 = vc.u32 %v12331_v24, %v12322_v19 }
 0x243   : > { %18935 = vst [vmem:[#allocation61_spill] sm:$0xff] %v12374_v36  ;;  %v2893_v29 = vor.u32 8388608, %v2892_v1  ;;  %vm2917_vm10 = vcmp.lt.s32.totalorder %v12336_v10, 1  ;;  %vm2919_vm3 = vcmp.lt.s32.totalorder %v12336_v10, 3  ;;  %v12380_v20 = vpop.eup %9533  ;;  %v2725_v0 = vsel %vm2719_vm5, %v2722_v2, %v2724_v35 }
 0x244   : > { %18936 = vst [vmem:[#allocation62_spill] sm:$0xff] %v12380_v20  ;;  %v2925_v21 = vsel %vm2917_vm10, %v2904_v55, %v2907_v30  ;;  %v2927_v41 = vsel %vm2919_vm3, %v2910_v59, %v2926_v51  ;;  %v2991_v34 = vand.u32 2139095040, %v12359_v3  ;;  %v12389_v50 = vpop.eup %9535  ;;  %v2454_v1 = vadd.s32 127, %v2453_v27 }
 0x245   : > { %18937 = vst [vmem:[#allocation63_spill] sm:$0xff] %v12389_v50  ;;  %v2929_v17 = vsel %vm2917_vm10, %v2907_v30, %v2910_v59  ;;  %v2931_v48 = vsel %vm2919_vm3, %v2913_v49, %v2930_v6  ;;  %v3105_v9 = vand.u32 31, %v3103_v44  ;;  %v2433_v26 = vadd.s32 %v11878_v12, %v11885_v38 }
 0x246   : > { %v12398_v16 = vsub.s32 %v12289_v11, %v2543_v8  ;;  %v2745_v2 = vsel %vm2743_vm13, %v2744_v52, %v12323_v33  ;;  %vm2918_vm8 = vcmp.lt.s32.totalorder %v12336_v10, 2  ;;  %v9004_v35 = vadd.s32 4294967294, %v2651_v37 }
 0x247   : > { %v2741_v51 = vmul.u32 %v12314_v7, %v2725_v0  ;;  %v2928_v49 = vsel %vm2918_vm8, %v2925_v21, %v2927_v41  ;;  %v18938_v12 = vxor.u32 2147483648, %v12276_v53  ;;  %v2932_v11 = vsel %vm2918_vm8, %v2929_v17, %v2931_v48 }
 0x248   : > { %v12418_v33 = vshll.u32 %v2893_v29, 8  ;;  %v2992_v8 = vshrl.u32 %v2991_v34, 23  ;;  %v18939_v37 = vsub.s32 32, %v12287_v45  ;;  %v2455_v7 = vshll.u32 %v2454_v1, 23 }
 0x249   : > { %v12414_v38 = vsel %vm2276_vm9, %v18938_v12, %v12276_v53  ;;  %v12422_v6 = vadd.s32 %v2745_v2, %v2741_v51  ;;  %v12424_v0 = vsub.s32 32, %v3105_v9  ;;  %v2546_v21 = vsub.s32 0, %v12398_v16 }
 0x24a   : > { %v2451_v52 = vshrl.u32 %v2433_v26, %v18939_v37  ;;  %v12428_v41 = vmul.u32.u64.low %v12418_v33, %v2928_v49  ;;  %v12429_v53 = vmul.u32.u64.high %v12418_v33, %v2928_v49, %v12428_v41  ;;  %v18438_v17 = vand.u32 2147483647, %v12224_v46 }
 0x24b   : > { %v2450_v29 = vshll.u32 %v12067_v62, %v12287_v45  ;;  %vm9005_vm9 = vcmp.lt.s32.totalorder %v9004_v35, 0  ;;  %v12436_v34 = vmul.u32.u64.low %v12418_v33, %v2932_v11  ;;  %v12437_v1 = vmul.u32.u64.high %v12418_v33, %v2932_v11, %v12436_v34 }
 0x24c   : > { %v12441_v48 = vadd.s32 %v12076_v4, %v12086_v15  ;;  %v2901_v26 = vshrl.u32 %v18821_v13, %v12292_v39  ;;  %v2922_v2 = vsel %vm2920_vm6, %v2910_v59, 2102212464  ;;  %v9014_v51 = vadd.s32 4294967169, %v2992_v8 }
 0x24d   : > { %v12447_v49 = vor.u32 %v2451_v52, %v2450_v29  ;;  %v12449_v12 = vor.u32 4788187, %v2455_v7  ;;  %v2747_v62 = vadd.s32 536870912, %v12422_v6  ;;  %v3118_v45 = vshrl.u32 %v18840_v60, %v12424_v0  ;;  %v1024_v29 = vpop.f32.mrf.mxu1 }
 0x24e   : > { %v12454_v11 = vsel %vm9005_vm9, 0, %v9004_v35  ;;  %v8999_v4 = vmin.u32 %v2546_v21, %v12398_v16  ;;  %v2921_v15 = vsel %vm2917_vm10, %v2901_v26, %v2904_v55  ;;  %v3098_v39 = vand.u32 8388607, %v18438_v17 }
 0x24f   : > { %v2923_v59 = vsel %vm2919_vm3, %v2907_v30, %v2922_v2  ;;  %v3109_v8 = vshrl.u32 %v18842_v47, %v12424_v0  ;;  %v3117_v37 = vshll.u32 %v18852_v63, %v3105_v9  ;;  %v3121_v35 = vshrl.u32 %v18864_v28, %v12424_v0 }
 0x250   : > { %v12468_v52 = vshrl.u32 %v3103_v44, 5  ;;  %v3112_v7 = vshrl.u32 %v18843_v42, %v12424_v0  ;;  %v3115_v55 = vshrl.u32 %v18852_v63, %v12424_v0  ;;  %v2998_v21 = vadd.s32 1, %v9014_v51 }
 0x251   : > { %v12474_v34 = vshrl.u32 %v2747_v62, 30  ;;  %v3108_v30 = vshll.u32 %v18821_v13, %v3105_v9  ;;  %v3119_v26 = vor.u32 %v3118_v45, %v3117_v37  ;;  %v3120_v2 = vshll.u32 %v18840_v60, %v3105_v9 }
 0x252   : > { %v18941_v17 = vand.u32 2147483647, %v11384_v31  ;;  %v18942_v44 = vmov 0  ;;  %vm2379_vm1 = vcmp.lt.s32.totalorder %v11572_v43, 0  ;;  %v2924_v27 = vsel %vm2918_vm8, %v2921_v15, %v2923_v59 }
 0x253   : > { %18940 = vst [vmem:[#allocation64_spill] sm:$0xff] %v12474_v34  ;;  %v2943_v51 = vadd.s32 1, %v12429_v53  ;;  %v3111_v62 = vshll.u32 %v18842_v47, %v3105_v9  ;;  %v3114_v36 = vshll.u32 %v18843_v42, %v3105_v9  ;;  %vm2942_vm5 = vc.u32 %v12437_v1, %v12428_v41 }
 0x254   : > { %vm12480_vm15 = vcmp.le.f32.partialorder %v18941_v17, 0.7853982  ;;  %v12492_v45 = vor.u32 %v3109_v8, %v3108_v30  ;;  %v3122_v17 = vor.u32 %v3121_v35, %v3120_v2  ;;  %v12495_v37 = vadd.f32 %v1024_v29, %v12073_v56 }
 0x255   : > { %v18943_v44 = vsel %vm12480_vm15, 4294967295, %v18942_v44  ;;  %v12497_v20 = vor.u32 %v3112_v7, %v3111_v62  ;;  %v3116_v50 = vor.u32 %v3115_v55, %v3114_v36  ;;  %vm3126_vm11 = vcmp.lt.s32.totalorder %v12468_v52, 4 }
 0x256   : > { %18944 = vst [vmem:[#allocation65_spill] sm:$0xff] %v18943_v44  ;;  %18945 = vst [vmem:[#allocation66_spill] sm:$0xff] %v12495_v37  ;;  %vm2999_vm6 = vcmp.gt.s32.totalorder %v2998_v21, 0  ;;  %v2459_v10 = vcvt.s32.f32 %v12447_v49  ;;  %v2548_v15 = vclz %v8999_v4  ;;  %v2749_v9 = vshll.u32 %v12474_v34, 30 }
 0x257   : > { %v3132_v59 = vsel %vm3126_vm11, %v3119_v26, 920167782  ;;  %v18946_v8 = vand.u32 2147483647, %v11572_v43  ;;  %v2457_v56 = vand.u32 2147483647, %v12449_v12  ;;  %v2940_v49 = vmul.u32 %v12418_v33, %v2924_v27 }
 0x258   : > { %vm2585_vm10 = vcmp.lt.s32.totalorder %v11751_v40, 0  ;;  %v2655_v36 = vsub.s32 32, %v12454_v11  ;;  %v2944_v4 = vsel %vm2942_vm5, %v2943_v51, %v12429_v53  ;;  %vm3123_vm3 = vcmp.lt.s32.totalorder %v12468_v52, 1  ;;  %v12529_v53 = vpop.permute.xlu0 %607 }
 0x259   : > { %vm12506_vm13 = vcmp.le.f32.partialorder %v18946_v8, 0.7853982  ;;  %vm3125_vm8 = vcmp.lt.s32.totalorder %v12468_v52, 3  ;;  %v3136_v7 = vsel %vm3126_vm11, %v3122_v17, 1326507024  ;;  %v3000_v55 = vsel %vm2999_vm6, %v2998_v21, 0 }
 0x25a   : > { %v3099_v12 = vor.u32 8388608, %v3098_v39  ;;  %v3131_v29 = vsel %vm3123_vm3, %v12492_v45, %v12497_v20  ;;  %v3133_v27 = vsel %vm3125_vm8, %v3116_v50, %v3132_v59  ;;  %v3197_v33 = vand.u32 2139095040, %v12495_v37  ;;  %18949 = vst [vmem:[#allocation67_spill] sm:$0xff] %v12529_v53 }
 0x25b   : > { %v2659_v30 = vsub.s32 4294967266, %v12454_v11  ;;  %v9000_v2 = vadd.s32 4294967294, %v2548_v15  ;;  %v12533_v51 = vsub.s32 %v12422_v6, %v2749_v9  ;;  %v12535_v21 = vadd.s32 %v2944_v4, %v2940_v49 }
 0x25c   : > { %vm3124_vm9 = vcmp.lt.s32.totalorder %v12468_v52, 2  ;;  %v3135_v39 = vsel %vm3123_vm3, %v12497_v20, %v3116_v50  ;;  %v3137_v62 = vsel %vm3125_vm8, %v3119_v26, %v3136_v7  ;;  %v3002_v17 = vand.u32 31, %v3000_v55 }
 0x25d   : > { %v12547_v15 = vsel %vm12480_vm15, %v11384_v31, %v12414_v38  ;;  %v18950_v6 = vsub.s32 4, %v12009_v25  ;;  %v2669_v59 = vsub.s32 4, %v12231_v23  ;;  %v3134_v8 = vsel %vm3124_vm9, %v3131_v29, %v3133_v27 }
 0x25e   : > { %v12559_v26 = vmul.f32 %v2459_v10, %v2457_v56  ;;  %v2657_v49 = vshrl.u32 %v12441_v48, %v2655_v36  ;;  %v12562_v4 = vshll.u32 %v3099_v12, 8  ;;  %v3198_v38 = vshrl.u32 %v3197_v33, 23  ;;  %v12575_v48 = vpop.permute.xlu0 %597 }
 0x25f   : > { %v12554_v9 = vsel %vm2379_vm1, %v18950_v6, %v12009_v25  ;;  %v2660_v7 = vadd.s32 127, %v2659_v30  ;;  %vm9001_vm5 = vcmp.lt.s32.totalorder %v9000_v2, 0  ;;  %v2752_v31 = vsub.s32 0, %v12533_v51  ;;  %18951 = vst [vmem:[#allocation68_spill] sm:$0xff] %v12575_v48 }
 0x260   : > { %v3138_v25 = vsel %vm3124_vm9, %v3135_v39, %v3137_v62  ;;  %v2946_v6 = vadd.s32 536870912, %v12535_v21  ;;  %v12569_v44 = vmul.u32.u64.low %v12562_v4, %v3134_v8  ;;  %v12570_v53 = vmul.u32.u64.high %v12562_v4, %v3134_v8, %v12569_v44 }
 0x261   : > { %v12573_v10 = vsub.s32 32, %v3002_v17  ;;  %9537 = vcosq.f32 %v12547_v15  ;;  %v2656_v36 = vshll.u32 %v12279_v18, %v12454_v11  ;;  %v12586_v12 = vsel %vm2585_vm10, %v2669_v59, %v12231_v23 }
 0x262   : > { %v12588_v29 = vsel %vm9001_vm5, 0, %v9000_v2  ;;  %v12591_v27 = vmul.u32.u64.low %v12562_v4, %v3138_v25  ;;  %v12592_v33 = vmul.u32.u64.high %v12562_v4, %v3138_v25, %v12591_v27  ;;  %v9022_v30 = vadd.s32 4294967169, %v3198_v38 }
 0x263   : > { %v12595_v62 = vor.u32 %v2657_v49, %v2656_v36  ;;  %v3107_v8 = vshrl.u32 %v18821_v13, %v12424_v0  ;;  %v3128_v18 = vsel %vm3126_vm11, %v3116_v50, 2102212464  ;;  %v2661_v11 = vshll.u32 %v2660_v7, 23  ;;  %v12619_v36 = vpop.permute.xlu0 %567 }
 0x264   : > { %v9007_v23 = vmin.u32 %v2752_v31, %v12533_v51  ;;  %v12602_v2 = vshrl.u32 %v2946_v6, 30  ;;  %v3015_v59 = vshrl.u32 %v18840_v60, %v12573_v10  ;;  %v2556_v38 = vsub.s32 4294967266, %v12588_v29  ;;  %18953 = vst [vmem:[#allocation70_spill] sm:$0xff] %v12619_v36 }
 0x265   : > { %v3127_v49 = vsel %vm3123_vm3, %v3107_v8, %v12492_v45  ;;  %v3018_v0 = vshrl.u32 %v18864_v28, %v12573_v10  ;;  %v3129_v31 = vsel %vm3125_vm8, %v12497_v20, %v3128_v18  ;;  %v12616_v50 = vshrl.u32 %v3000_v55, 5 }
 0x266   : > { %18952 = vst [vmem:[#allocation69_spill] sm:$0xff] %v12602_v2  ;;  %v3014_v7 = vshll.u32 %v18852_v63, %v3002_v17  ;;  %v3204_v6 = vadd.s32 1, %v9022_v30  ;;  %v3006_v27 = vshrl.u32 %v18842_v47, %v12573_v10  ;;  %v3009_v45 = vshrl.u32 %v18843_v42, %v12573_v10 }
 0x267   : > { %v3012_v8 = vshrl.u32 %v18852_v63, %v12573_v10  ;;  %v3017_v56 = vshll.u32 %v18840_v60, %v3002_v17  ;;  %v2754_v39 = vclz %v9007_v23  ;;  %v2948_v20 = vshll.u32 %v12602_v2, 30 }
 0x268   : > { %v3149_v55 = vadd.s32 1, %v12570_v53  ;;  %v3016_v18 = vor.u32 %v3015_v59, %v3014_v7  ;;  %v3005_v30 = vshll.u32 %v18821_v13, %v3002_v17  ;;  %v3008_v25 = vshll.u32 %v18842_v47, %v3002_v17  ;;  %v819_v7 = vpop.f32.mrf.mxu0 }
 0x269   : > { %v3011_v48 = vshll.u32 %v18843_v42, %v3002_v17  ;;  %v3019_v58 = vor.u32 %v3018_v0, %v3017_v56  ;;  %v3130_v36 = vsel %vm3124_vm9, %v3127_v49, %v3129_v31  ;;  %vm3148_vm11 = vc.u32 %v12592_v33, %v12569_v44  ;;  %v12643_v49 = vpop.permute.xlu0 %557 }
 0x26a   : > { %v18954_v23 = vand.u32 2147483647, %v12359_v3  ;;  %vm3205_vm6 = vcmp.gt.s32.totalorder %v3204_v6, 0  ;;  %v3007_v2 = vor.u32 %v3006_v27, %v3005_v30  ;;  %v3010_v46 = vor.u32 %v3009_v45, %v3008_v25 }
 0x26b   : > { %v3013_v59 = vor.u32 %v3012_v8, %v3011_v48  ;;  %vm3023_vm3 = vcmp.lt.s32.totalorder %v12616_v50, 4  ;;  %v2662_v5 = vor.u32 4788187, %v2661_v11  ;;  %v2552_v17 = vsub.s32 32, %v12588_v29 }
 0x26c   : > { %v2995_v34 = vand.u32 8388607, %v18954_v23  ;;  %v2557_v56 = vadd.s32 127, %v2556_v38  ;;  %v3029_v52 = vsel %vm3023_vm3, %v3016_v18, 920167782  ;;  %v12646_v0 = vsub.s32 %v12535_v21, %v2948_v20 }
 0x26d   : > { %v3150_v31 = vsel %vm3148_vm11, %v3149_v55, %v12570_v53  ;;  %v3033_v48 = vsel %vm3023_vm3, %v3019_v58, 1326507024  ;;  %v3206_v25 = vsel %vm3205_vm6, %v3204_v6, 0  ;;  %v3146_v11 = vmul.u32 %v12562_v4, %v3130_v36 }
 0x26e   : > { %v12651_v27 = vpop.eup %9537  ;;  %vm3020_vm8 = vcmp.lt.s32.totalorder %v12616_v50, 1  ;;  %vm3022_vm9 = vcmp.lt.s32.totalorder %v12616_v50, 3  ;;  %v12657_v38 = vadd.f32 %v819_v7, %v12643_v49  ;;  %v9008_v45 = vadd.s32 4294967294, %v2754_v39 }
 0x26f   : > { %18955 = vst [vmem:[#allocation71_spill] sm:$0xff] %v12651_v27  ;;  %v2996_v21 = vor.u32 8388608, %v2995_v34  ;;  %v3028_v53 = vsel %vm3020_vm8, %v3007_v2, %v3010_v46  ;;  %v3030_v58 = vsel %vm3022_vm9, %v3013_v59, %v3029_v52  ;;  %v12663_v6 = vadd.s32 %v3150_v31, %v3146_v11 }
 0x270   : > { %18956 = vst [vmem:[#allocation72_spill] sm:$0xff] %v12657_v38  ;;  %v3032_v4 = vsel %vm3020_vm8, %v3010_v46, %v3013_v59  ;;  %v3034_v36 = vsel %vm3022_vm9, %v3016_v18, %v3033_v48  ;;  %v3208_v8 = vand.u32 31, %v3206_v25  ;;  %v2536_v20 = vadd.s32 %v12197_v32, %v12194_v22 }
 0x271   : > { %v2558_v39 = vshll.u32 %v2557_v56, 23  ;;  %v2951_v34 = vsub.s32 0, %v12646_v0  ;;  %vm3021_vm5 = vcmp.lt.s32.totalorder %v12616_v50, 2  ;;  %v18957_v55 = vxor.u32 2147483648, %v12559_v26 }
 0x272   : > { %v2663_v23 = vand.u32 2147483647, %v2662_v5  ;;  %v3031_v18 = vsel %vm3021_vm5, %v3028_v53, %v3030_v58  ;;  %v3300_v7 = vand.u32 2139095040, %v12657_v38  ;;  %v2554_v52 = vshrl.u32 %v2536_v20, %v2552_v17 }
 0x273   : > { %v12678_v30 = vsel %vm2379_vm1, %v18957_v55, %v12559_v26  ;;  %vm9009_vm11 = vcmp.lt.s32.totalorder %v9008_v45, 0  ;;  %v3035_v22 = vsel %vm3021_vm5, %v3032_v4, %v3034_v36  ;;  %v12685_v32 = vshll.u32 %v2996_v21, 8 }
 0x274   : > { %v2665_v56 = vcvt.s32.f32 %v12595_v62  ;;  %v2553_v31 = vshll.u32 %v12398_v16, %v12588_v29  ;;  %v3152_v26 = vadd.s32 536870912, %v12663_v6  ;;  %v12691_v5 = vsub.s32 32, %v3208_v8 }
 0x275   : > { %v12693_v48 = vor.u32 4788187, %v2558_v39  ;;  %v9011_v11 = vmin.u32 %v2951_v34, %v12646_v0  ;;  %v12697_v17 = vmul.u32.u64.low %v12685_v32, %v3031_v18  ;;  %v12698_v53 = vmul.u32.u64.high %v12685_v32, %v3031_v18, %v12697_v17 }
 0x276   : > { %v12701_v21 = vsel %vm9009_vm11, 0, %v9008_v45  ;;  %v12704_v62 = vmul.u32.u64.low %v12685_v32, %v3035_v22  ;;  %v12705_v58 = vmul.u32.u64.high %v12685_v32, %v3035_v22, %v12704_v62  ;;  %v3301_v16 = vshrl.u32 %v3300_v7, 23 }
 0x277   : > { %v12707_v29 = vmul.f32 %v2665_v56, %v2663_v23  ;;  %v12709_v4 = vor.u32 %v2554_v52, %v2553_v31  ;;  %v3004_v36 = vshrl.u32 %v18821_v13, %v12573_v10  ;;  %v3025_v20 = vsel %vm3023_vm3, %v3013_v59, 2102212464 }
 0x278   : > { %v12715_v39 = vshrl.u32 %v3152_v26, 30  ;;  %v18463_v45 = vand.u32 2147483647, %v12495_v37  ;;  %v3221_v34 = vshrl.u32 %v18840_v60, %v12691_v5  ;;  %v3224_v55 = vshrl.u32 %v18864_v28, %v12691_v5 }
 0x279   : > { %v2560_v23 = vand.u32 2147483647, %v12693_v48  ;;  %v2762_v18 = vsub.s32 4294967266, %v12701_v21  ;;  %v2953_v7 = vclz %v9011_v11  ;;  %v3024_v10 = vsel %vm3020_vm8, %v3004_v36, %v3007_v2 }
 0x27a   : > { %18958 = vst [vmem:[#allocation73_spill] sm:$0xff] %v12715_v39  ;;  %v3026_v59 = vsel %vm3022_vm9, %v3010_v46, %v3025_v20  ;;  %v3220_v52 = vshll.u32 %v18852_v63, %v3208_v8  ;;  %v3223_v22 = vshll.u32 %v18840_v60, %v3208_v8  ;;  %v9026_v56 = vadd.s32 4294967169, %v3301_v16 }
 0x27b   : > { %v12730_v31 = vshrl.u32 %v3206_v25, 5  ;;  %v3212_v26 = vshrl.u32 %v18842_v47, %v12691_v5  ;;  %v3215_v48 = vshrl.u32 %v18843_v42, %v12691_v5  ;;  %v3218_v11 = vshrl.u32 %v18852_v63, %v12691_v5 }
 0x27c   : > { %v3154_v2 = vshll.u32 %v12715_v39, 30  ;;  %v3201_v46 = vand.u32 8388607, %v18463_v45  ;;  %v3222_v62 = vor.u32 %v3221_v34, %v3220_v52  ;;  %v3225_v36 = vor.u32 %v3224_v55, %v3223_v22  ;;  %v1028_v52 = vpop.f32.mrf.mxu1 }
 0x27d   : > { %v3046_v16 = vadd.s32 1, %v12698_v53  ;;  %v3211_v25 = vshll.u32 %v18821_v13, %v3208_v8  ;;  %v3214_v20 = vshll.u32 %v18842_v47, %v3208_v8  ;;  %v3217_v27 = vshll.u32 %v18843_v42, %v3208_v8 }
 0x27e   : > { %v2758_v3 = vsub.s32 32, %v12701_v21  ;;  %v3027_v54 = vsel %vm3021_vm5, %v3024_v10, %v3026_v59  ;;  %vm3045_vm1 = vc.u32 %v12705_v58, %v12697_v17  ;;  %v3307_v39 = vadd.s32 1, %v9026_v56 }
 0x27f   : > { %v12750_v45 = vor.u32 %v3212_v26, %v3211_v25  ;;  %v12752_v34 = vor.u32 %v3215_v48, %v3214_v20  ;;  %v3219_v55 = vor.u32 %v3218_v11, %v3217_v27  ;;  %vm3229_vm6 = vcmp.lt.s32.totalorder %v12730_v31, 4 }
 0x280   : > { %v2763_v22 = vadd.s32 127, %v2762_v18  ;;  %v9012_v37 = vadd.s32 4294967294, %v2953_v7  ;;  %v3235_v8 = vsel %vm3229_vm6, %v3222_v62, 920167782  ;;  %v3239_v50 = vsel %vm3229_vm6, %v3225_v36, 1326507024 }
 0x281   : > { %v12760_v10 = vsub.s32 %v12663_v6, %v3154_v2  ;;  %v3043_v59 = vmul.u32 %v12685_v32, %v3027_v54  ;;  %v3047_v56 = vsel %vm3045_vm1, %v3046_v16, %v12698_v53  ;;  %v3202_v26 = vor.u32 8388608, %v3201_v46 }
 0x282   : > { %vm3226_vm3 = vcmp.lt.s32.totalorder %v12730_v31, 1  ;;  %vm3228_vm8 = vcmp.lt.s32.totalorder %v12730_v31, 3  ;;  %vm3308_vm9 = vcmp.gt.s32.totalorder %v3307_v39, 0  ;;  %v12767_v27 = vadd.f32 %v1028_v52, %v12643_v49 }
 0x283   : > { %v18960_v18 = vand.u32 2147483647, %v11751_v40  ;;  %v3234_v54 = vsel %vm3226_vm3, %v12750_v45, %v12752_v34  ;;  %v3236_v6 = vsel %vm3228_vm8, %v3219_v55, %v3235_v8  ;;  %v3238_v32 = vsel %vm3226_vm3, %v12752_v34, %v3219_v55 }
 0x284   : > { %18959 = vst [vmem:[#allocation74_spill] sm:$0xff] %v12767_v27  ;;  %v3240_v53 = vsel %vm3228_vm8, %v3222_v62, %v3239_v50  ;;  %v2465_v48 = vsel %vm12506_vm13, %v11572_v43, %v12678_v30  ;;  %v2667_v11 = vxor.u32 2147483648, %v12707_v29  ;;  %v2742_v2 = vadd.s32 %v12322_v19, %v12331_v24 }
 0x285   : > { %vm12771_vm5 = vcmp.le.f32.partialorder %v18960_v18, 0.7853982  ;;  %v12793_v46 = vadd.s32 %v3047_v56, %v3043_v59  ;;  %v2562_v36 = vcvt.s32.f32 %v12709_v4  ;;  %vm9013_vm11 = vcmp.lt.s32.totalorder %v9012_v37, 0 }
 0x286   : > { %vm3227_vm1 = vcmp.lt.s32.totalorder %v12730_v31, 2  ;;  %v3309_v16 = vsel %vm3308_vm9, %v3307_v39, 0  ;;  %v2760_v25 = vshrl.u32 %v2742_v2, %v2758_v3  ;;  %v2764_v62 = vshll.u32 %v2763_v22, 23 }
 0x287   : > { %v3237_v20 = vsel %vm3227_vm1, %v3234_v54, %v3236_v6  ;;  %v3241_v30 = vsel %vm3227_vm1, %v3238_v32, %v3240_v53  ;;  %v12801_v52 = vmul.f32 %v2562_v36, %v2560_v23  ;;  %v3157_v19 = vsub.s32 0, %v12760_v10 }
 0x288   : > { %v12804_v24 = vshll.u32 %v3202_v26, 8  ;;  %v3506_v4 = vand.u32 2139095040, %v12767_v27  ;;  %v2759_v8 = vshll.u32 %v12533_v51, %v12701_v21  ;;  %v12809_v39 = vsel %vm9013_vm11, 0, %v9012_v37 }
 0x289   : > { %v3049_v3 = vadd.s32 536870912, %v12793_v46  ;;  %v3311_v22 = vand.u32 31, %v3309_v16  ;;  %9539 = vsinq.f32 %v12547_v15  ;;  %v2668_v51 = vsel %vm2585_vm10, %v2667_v11, %v12707_v29 }
 0x28a   : > { %v12813_v50 = vmul.u32.u64.low %v12804_v24, %v3241_v30  ;;  %v12814_v59 = vmul.u32.u64.high %v12804_v24, %v3241_v30, %v12813_v50  ;;  %v12817_v23 = vmul.u32.u64.low %v12804_v24, %v3237_v20  ;;  %v12818_v56 = vmul.u32.u64.high %v12804_v24, %v3237_v20, %v12817_v23 }
 0x28b   : > { %v12825_v37 = vor.u32 %v2760_v25, %v2759_v8  ;;  %v12827_v21 = vor.u32 4788187, %v2764_v62  ;;  %9541 = vcosq.f32 %v2465_v48  ;;  %v2961_v26 = vsub.s32 4294967266, %v12809_v39  ;;  %v821_v62 = vpop.f32.mrf.mxu0 }
 0x28c   : > { %v9019_v18 = vmin.u32 %v3157_v19, %v12760_v10  ;;  %v3507_v54 = vshrl.u32 %v3506_v4, 23  ;;  %9543 = vsinq.f32 %v2465_v48  ;;  %v18963_v6 = vsel %vm12506_vm13, 0, %v12554_v9 }
 0x28d   : > { %v12835_v15 = vand.u32 3, %v18963_v6  ;;  %v12840_v32 = vsub.s32 32, %v3311_v22  ;;  %v12845_v53 = vsel %vm12771_vm5, %v11751_v40, %v2668_v51  ;;  %v2564_v11 = vxor.u32 2147483648, %v12801_v52 }
 0x28e   : > { %v12848_v48 = vshrl.u32 %v3049_v3, 30  ;;  %v3231_v35 = vsel %vm3229_vm6, %v3219_v55, 2102212464  ;;  %v2766_v9 = vand.u32 2147483647, %v12827_v21  ;;  %v2768_v2 = vcvt.s32.f32 %v12825_v37 }
 0x28f   : > { %18964 = vst [vmem:[#allocation75_spill] sm:$0xff] %v12835_v15  ;;  %v2941_v36 = vadd.s32 %v12428_v41, %v12437_v1  ;;  %v3210_v25 = vshrl.u32 %v18821_v13, %v12691_v5  ;;  %v2957_v20 = vsub.s32 32, %v12809_v39  ;;  %v2962_v30 = vadd.s32 127, %v2961_v26 }
 0x290   : > { %18965 = vst [vmem:[#allocation76_spill] sm:$0xff] %v12848_v48  ;;  %v3159_v19 = vclz %v9019_v18  ;;  %v9034_v4 = vadd.s32 4294967169, %v3507_v54  ;;  %vm2482_vm13 = vcmp.lt.s32.totalorder %v11854_v61, 0  ;;  %v3232_v8 = vsel %vm3228_vm8, %v12752_v34, %v3231_v35 }
 0x291   : > { %v3230_v55 = vsel %vm3226_vm3, %v3210_v25, %v12750_v45  ;;  %v18468_v41 = vand.u32 2147483647, %v12657_v38  ;;  %v3324_v1 = vshrl.u32 %v18840_v60, %v12840_v32  ;;  %v3051_v5 = vshll.u32 %v12848_v48, 30 }
 0x292   : > { %vm3251_vm10 = vc.u32 %v12814_v59, %v12817_v23  ;;  %v3252_v3 = vadd.s32 1, %v12818_v56  ;;  %v12874_v50 = vadd.f32 %v821_v62, %v12643_v49  ;;  %v3315_v45 = vshrl.u32 %v18842_v47, %v12840_v32 }
 0x293   : > { %v3318_v34 = vshrl.u32 %v18843_v42, %v12840_v32  ;;  %v3323_v51 = vshll.u32 %v18852_v63, %v3311_v22  ;;  %v3327_v37 = vshrl.u32 %v18864_v28, %v12840_v32  ;;  %v3233_v21 = vsel %vm3227_vm1, %v3230_v55, %v3232_v8 }
 0x294   : > { %18966 = vst [vmem:[#allocation77_spill] sm:$0xff] %v12874_v50  ;;  %v12885_v26 = vshrl.u32 %v3309_v16, 5  ;;  %v3321_v18 = vshrl.u32 %v18852_v63, %v12840_v32  ;;  %v3513_v54 = vadd.s32 1, %v9034_v4  ;;  %v3314_v6 = vshll.u32 %v18821_v13, %v3311_v22 }
 0x295   : > { %v3317_v35 = vshll.u32 %v18842_v47, %v3311_v22  ;;  %v3325_v25 = vor.u32 %v3324_v1, %v3323_v51  ;;  %v3326_v62 = vshll.u32 %v18840_v60, %v3311_v22  ;;  %v12893_v29 = vsub.s32 %v12793_v46, %v3051_v5 }
 0x296   : > { %v3253_v31 = vsel %vm3251_vm10, %v3252_v3, %v12818_v56  ;;  %v3304_v16 = vand.u32 8388607, %v18468_v41  ;;  %v3320_v4 = vshll.u32 %v18843_v42, %v3311_v22  ;;  %v3249_v55 = vmul.u32 %v12804_v24, %v3233_v21  ;;  %v12907_v48 = vpop.eup %9539 }
 0x297   : > { %v12903_v8 = vor.u32 %v3315_v45, %v3314_v6  ;;  %v12905_v1 = vor.u32 %v3318_v34, %v3317_v35  ;;  %v3328_v51 = vor.u32 %v3327_v37, %v3326_v62  ;;  %18967 = vst [vmem:[#allocation78_spill] sm:$0xff] %v12907_v48  ;;  %v18968_v46 = vand.u32 2147483647, %v11854_v61 }
 0x298   : > { %v3322_v56 = vor.u32 %v3321_v18, %v3320_v4  ;;  %vm3332_vm3 = vcmp.lt.s32.totalorder %v12885_v26, 4  ;;  %vm3514_vm8 = vcmp.gt.s32.totalorder %v3513_v54, 0  ;;  %v3403_v22 = vand.u32 2139095040, %v12874_v50  ;;  %v12917_v24 = vpop.eup %9541 }
 0x299   : > { %vm12911_vm6 = vcmp.le.f32.partialorder %v18968_v46, 0.7853982  ;;  %18971 = vst [vmem:[#allocation79_spill] sm:$0xff] %v12917_v24  ;;  %v2963_v3 = vshll.u32 %v2962_v30, 23  ;;  %v9020_v45 = vadd.s32 4294967294, %v3159_v19  ;;  %v12919_v34 = vadd.s32 %v3253_v31, %v3249_v55  ;;  %v12923_v21 = vpop.eup %9543 }
 0x29a   : > { %v3338_v37 = vsel %vm3332_vm3, %v3325_v25, 920167782  ;;  %18972 = vst [vmem:[#allocation80_spill] sm:$0xff] %v12923_v21  ;;  %v2565_v18 = vsel %vm2482_vm13, %v2564_v11, %v12801_v52  ;;  %v2769_v6 = vmul.f32 %v2768_v2, %v2766_v9  ;;  %v2959_v35 = vshrl.u32 %v2941_v36, %v2957_v20 }
 0x29b   : > { %v3054_v62 = vsub.s32 0, %v12893_v29  ;;  %vm3329_vm9 = vcmp.lt.s32.totalorder %v12885_v26, 1  ;;  %vm3331_vm11 = vcmp.lt.s32.totalorder %v12885_v26, 3  ;;  %v3342_v30 = vsel %vm3332_vm3, %v3328_v51, 1326507024 }
 0x29c   : > { %v3515_v19 = vsel %vm3514_vm8, %v3513_v54, 0  ;;  %v3305_v31 = vor.u32 8388608, %v3304_v16  ;;  %v3337_v4 = vsel %vm3329_vm9, %v12903_v8, %v12905_v1  ;;  %v3339_v52 = vsel %vm3331_vm11, %v3322_v56, %v3338_v37 }
 0x29d   : > { %v3404_v11 = vshrl.u32 %v3403_v22, 23  ;;  %vm18490_vm1 = vcmp.lt.s32.totalorder %v11965_v14, 0  ;;  %v2958_v9 = vshll.u32 %v12646_v0, %v12809_v39  ;;  %v2964_v2 = vor.u32 4788187, %v2963_v3 }
 0x29e   : > { %vm9021_vm10 = vcmp.lt.s32.totalorder %v9020_v45, 0  ;;  %v3255_v36 = vadd.s32 536870912, %v12919_v34  ;;  %vm3330_vm8 = vcmp.lt.s32.totalorder %v12885_v26, 2  ;;  %v3341_v20 = vsel %vm3329_vm9, %v12905_v1, %v3322_v56 }
 0x29f   : > { %v3343_v54 = vsel %vm3331_vm11, %v3325_v25, %v3342_v30  ;;  %v3517_v16 = vand.u32 31, %v3515_v19  ;;  %9545 = vcosq.f32 %v12845_v53  ;;  %v2566_v55 = vsub.s32 4, %v12347_v57 }
 0x2a0   : > { %v9015_v0 = vmin.u32 %v3054_v62, %v12893_v29  ;;  %v3340_v39 = vsel %vm3330_vm8, %v3337_v4, %v3339_v52  ;;  %v2960_v51 = vor.u32 %v2959_v35, %v2958_v9  ;;  %v12954_v46 = vsel %vm9021_vm10, 0, %v9020_v45 }
 0x2a1   : > { %v12956_v22 = vshll.u32 %v3305_v31, 8  ;;  %v9030_v3 = vadd.s32 4294967169, %v3404_v11  ;;  %v12961_v25 = vsel %vm12911_vm6, %v11854_v61, %v2565_v18  ;;  %v2770_v37 = vxor.u32 2147483648, %v2769_v6 }
 0x2a2   : > { %v2965_v30 = vand.u32 2147483647, %v2964_v2  ;;  %v3344_v41 = vsel %vm3330_vm8, %v3341_v20, %v3343_v54  ;;  %v12965_v62 = vshrl.u32 %v3255_v36, 30  ;;  %v12972_v45 = vsub.s32 32, %v3517_v16 }
 0x2a3   : > { %v12968_v4 = vmul.u32.u64.low %v12956_v22, %v3340_v39  ;;  %v12969_v35 = vmul.u32.u64.high %v12956_v22, %v3340_v39, %v12968_v4  ;;  %9547 = vsinq.f32 %v12845_v53  ;;  %v18974_v18 = vsel %vm12771_vm5, 0, %v12586_v12 }
 0x2a4   : > { %18973 = vst [vmem:[#allocation81_spill] sm:$0xff] %v12965_v62  ;;  %v12979_v31 = vand.u32 3, %v18974_v18  ;;  %v3167_v52 = vsub.s32 4294967266, %v12954_v46  ;;  %v3056_v11 = vclz %v9015_v0  ;;  %v2967_v9 = vcvt.s32.f32 %v2960_v51 }
 0x2a5   : > { %v12983_v2 = vmul.u32.u64.low %v12956_v22, %v3344_v41  ;;  %v12984_v36 = vmul.u32.u64.high %v12956_v22, %v3344_v41, %v12983_v2  ;;  %v3410_v20 = vadd.s32 1, %v9030_v3  ;;  %v12989_v54 = vsel %vm2482_vm13, %v2566_v55, %v12347_v57 }
 0x2a6   : > { %18975 = vst [vmem:[#allocation82_spill] sm:$0xff] %v12979_v31  ;;  %9549 = vcosq.f32 %v12961_v25  ;;  %v3313_v12 = vshrl.u32 %v18821_v13, %v12840_v32  ;;  %v3334_v7 = vsel %vm3332_vm3, %v3322_v56, 2102212464  ;;  %v12998_v53 = vsel %vm18490_vm1, %v2770_v37, %v2769_v6 }
 0x2a7   : > { %v13000_v41 = vmul.f32 %v2967_v9, %v2965_v30  ;;  %v3257_v0 = vshll.u32 %v12965_v62, 30  ;;  %v3530_v57 = vshrl.u32 %v18840_v60, %v12972_v45  ;;  %v3168_v55 = vadd.s32 127, %v3167_v52 }
 0x2a8   : > { %v9016_v39 = vadd.s32 4294967294, %v3056_v11  ;;  %v3333_v32 = vsel %vm3329_vm9, %v3313_v12, %v12903_v8  ;;  %v3335_v56 = vsel %vm3331_vm11, %v12905_v1, %v3334_v7  ;;  %v3521_v6 = vshrl.u32 %v18842_v47, %v12972_v45 }
 0x2a9   : > { %v3529_v3 = vshll.u32 %v18852_v63, %v3517_v16  ;;  %vm3411_vm5 = vcmp.gt.s32.totalorder %v3410_v20, 0  ;;  %v13015_v37 = vshrl.u32 %v3515_v19, 5  ;;  %v3524_v30 = vshrl.u32 %v18843_v42, %v12972_v45 }
 0x2aa   : > { %v3527_v8 = vshrl.u32 %v18852_v63, %v12972_v45  ;;  %v3533_v18 = vshrl.u32 %v18864_v28, %v12972_v45  ;;  %v13024_v52 = vsub.s32 %v12919_v34, %v3257_v0  ;;  %v3355_v1 = vadd.s32 1, %v12969_v35 }
 0x2ab   : > { %v3520_v11 = vshll.u32 %v18821_v13, %v3517_v16  ;;  %v3531_v9 = vor.u32 %v3530_v57, %v3529_v3  ;;  %v3523_v19 = vshll.u32 %v18842_v47, %v3517_v16  ;;  %v3526_v2 = vshll.u32 %v18843_v42, %v3517_v16 }
 0x2ac   : > { %v3532_v12 = vshll.u32 %v18840_v60, %v3517_v16  ;;  %v3412_v7 = vsel %vm3411_vm5, %v3410_v20, 0  ;;  %v13031_v51 = vpop.eup %9545  ;;  %v3336_v62 = vsel %vm3330_vm8, %v3333_v32, %v3335_v56  ;;  %vm3354_vm13 = vc.u32 %v12984_v36, %v12968_v4 }
 0x2ad   : > { %18976 = vst [vmem:[#allocation83_spill] sm:$0xff] %v13031_v51  ;;  %v18977_v34 = vand.u32 2147483647, %v12767_v27  ;;  %v13039_v38 = vor.u32 %v3521_v6, %v3520_v11  ;;  %v13041_v57 = vor.u32 %v3524_v30, %v3523_v19  ;;  %v3528_v3 = vor.u32 %v3527_v8, %v3526_v2 }
 0x2ae   : > { %v3534_v48 = vor.u32 %v3533_v18, %v3532_v12  ;;  %vm3538_vm3 = vcmp.lt.s32.totalorder %v13015_v37, 4  ;;  %v3147_v16 = vadd.s32 %v12569_v44, %v12592_v33  ;;  %v3260_v26 = vsub.s32 0, %v13024_v52  ;;  %v1030_v44 = vpop.f32.mrf.mxu1 }
 0x2af   : > { %v3510_v0 = vand.u32 8388607, %v18977_v34  ;;  %v3544_v20 = vsel %vm3538_vm3, %v3531_v9, 920167782  ;;  %v3414_v32 = vand.u32 31, %v3412_v7  ;;  %v3163_v6 = vsub.s32 32, %v12954_v46 }
 0x2b0   : > { %vm9017_vm9 = vcmp.lt.s32.totalorder %v9016_v39, 0  ;;  %v3356_v30 = vsel %vm3354_vm13, %v3355_v1, %v12969_v35  ;;  %v13052_v8 = vpop.eup %9547  ;;  %v3169_v18 = vshll.u32 %v3168_v55, 23  ;;  %v3352_v11 = vmul.u32 %v12956_v22, %v3336_v62 }
 0x2b1   : > { %18978 = vst [vmem:[#allocation84_spill] sm:$0xff] %v13052_v8  ;;  %vm3535_vm11 = vcmp.lt.s32.totalorder %v13015_v37, 1  ;;  %vm3537_vm10 = vcmp.lt.s32.totalorder %v13015_v37, 3  ;;  %v3511_v33 = vor.u32 8388608, %v3510_v0  ;;  %v3548_v35 = vsel %vm3538_vm3, %v3534_v48, 1326507024 }
 0x2b2   : > { %v3543_v19 = vsel %vm3535_vm11, %v13039_v38, %v13041_v57  ;;  %v3545_v2 = vsel %vm3537_vm10, %v3528_v3, %v3544_v20  ;;  %v13067_v22 = vsel %vm9017_vm9, 0, %v9016_v39  ;;  %v9023_v62 = vmin.u32 %v3260_v26, %v13024_v52 }
 0x2b3   : > { %v13065_v55 = vpop.eup %9549  ;;  %v13070_v1 = vadd.s32 %v3356_v30, %v3352_v11  ;;  %v13072_v12 = vsub.s32 32, %v3414_v32  ;;  %v3164_v34 = vshll.u32 %v12760_v10, %v12954_v46  ;;  %v3044_v0 = vadd.s32 %v12697_v17, %v12705_v58 }
 0x2b4   : > { %18979 = vst [vmem:[#allocation85_spill] sm:$0xff] %v13065_v55  ;;  %vm3536_vm8 = vcmp.lt.s32.totalorder %v13015_v37, 2  ;;  %v13080_v48 = vadd.f32 %v1030_v44, %v12643_v49  ;;  %v3547_v26 = vsel %vm3535_vm11, %v13041_v57, %v3528_v3  ;;  %v3549_v20 = vsel %vm3537_vm10, %v3531_v9, %v3548_v35  ;;  %v18993_v37 = vld [vmem:[#allocation55_spill] sm:$0xff] }
 0x2b5   : > { %v3546_v39 = vsel %vm3536_vm8, %v3543_v19, %v3545_v2  ;;  %v18476_v10 = vand.u32 2147483647, %v12874_v50  ;;  %v3165_v46 = vshrl.u32 %v3147_v16, %v3163_v6  ;;  %v13090_v30 = vor.u32 4788187, %v3169_v18 }
 0x2b6   : > { %18980 = vst [vmem:[#allocation86_spill] sm:$0xff] %v13080_v48  ;;  %v3060_v17 = vsub.s32 32, %v13067_v22  ;;  %v13093_v58 = vshll.u32 %v3511_v33, 8  ;;  %v3064_v49 = vsub.s32 4294967266, %v13067_v22  ;;  %v3262_v11 = vclz %v9023_v62 }
 0x2b7   : > { %v3358_v44 = vadd.s32 536870912, %v13070_v1  ;;  %v3427_v19 = vshrl.u32 %v18840_v60, %v13072_v12  ;;  %v3550_v9 = vsel %vm3536_vm8, %v3547_v26, %v3549_v20  ;;  %v3430_v6 = vshrl.u32 %v18864_v28, %v13072_v12 }
 0x2b8   : > { %v13102_v2 = vmul.u32.u64.low %v13093_v58, %v3546_v39  ;;  %v13103_v16 = vmul.u32.u64.high %v13093_v58, %v3546_v39, %v13102_v2  ;;  %v3407_v18 = vand.u32 8388607, %v18476_v10  ;;  %v13110_v33 = vshrl.u32 %v3412_v7, 5 }
 0x2b9   : > { %v3418_v35 = vshrl.u32 %v18842_v47, %v13072_v12  ;;  %v3426_v62 = vshll.u32 %v18852_v63, %v3414_v32  ;;  %v3421_v26 = vshrl.u32 %v18843_v42, %v13072_v12  ;;  %v3424_v39 = vshrl.u32 %v18852_v63, %v13072_v12 }
 0x2ba   : > { %v3429_v20 = vshll.u32 %v18840_v60, %v3414_v32  ;;  %v3609_v56 = vand.u32 2139095040, %v13080_v48  ;;  %v13122_v50 = vmul.u32.u64.low %v13093_v58, %v3550_v9  ;;  %v13123_v10 = vmul.u32.u64.high %v13093_v58, %v3550_v9, %v13122_v50 }
 0x2bb   : > { %v3417_v7 = vshll.u32 %v18821_v13, %v3414_v32  ;;  %v3428_v27 = vor.u32 %v3427_v19, %v3426_v62  ;;  %v13126_v51 = vshrl.u32 %v3358_v44, 30  ;;  %v3420_v8 = vshll.u32 %v18842_v47, %v3414_v32 }
 0x2bc   : > { %v3423_v31 = vshll.u32 %v18843_v42, %v3414_v32  ;;  %v3431_v40 = vor.u32 %v3430_v6, %v3429_v20  ;;  %v3166_v24 = vor.u32 %v3165_v46, %v3164_v34  ;;  %v3171_v21 = vand.u32 2147483647, %v13090_v30 }
 0x2bd   : > { %18981 = vst [vmem:[#allocation87_spill] sm:$0xff] %v13126_v51  ;;  %v3540_v15 = vsel %vm3538_vm3, %v3528_v3, 2102212464  ;;  %v13133_v43 = vor.u32 %v3418_v35, %v3417_v7  ;;  %v13135_v9 = vor.u32 %v3421_v26, %v3420_v8  ;;  %vm3435_vm5 = vcmp.lt.s32.totalorder %v13110_v33, 4 }
 0x2be   : > { %v13137_v50 = vor.u32 %v3424_v39, %v3423_v31  ;;  %v3610_v44 = vshrl.u32 %v3609_v56, 23  ;;  %v3062_v19 = vshrl.u32 %v3044_v0, %v3060_v17  ;;  %v3065_v62 = vadd.s32 127, %v3064_v49  ;;  %v18986_v0 = vld [vmem:[#allocation50_spill] sm:$0xff] }
 0x2bf   : > { %v3519_v32 = vshrl.u32 %v18821_v13, %v12972_v45  ;;  %v3441_v34 = vsel %vm3435_vm5, %v3428_v27, 920167782  ;;  %v9024_v46 = vadd.s32 4294967294, %v3262_v11  ;;  %v3360_v3 = vshll.u32 %v13126_v51, 30  ;;  %v825_v11 = vpop.f32.mrf.mxu0 }
 0x2c0   : > { %v3408_v30 = vor.u32 8388608, %v3407_v18  ;;  %v3445_v8 = vsel %vm3435_vm5, %v3431_v40, 1326507024  ;;  %v18982_v31 = vand.u32 2147483647, %v11965_v14  ;;  %v18983_v6 = vmov 0 }
 0x2c1   : > { %v3539_v45 = vsel %vm3535_vm11, %v3519_v32, %v13039_v38  ;;  %v3541_v56 = vsel %vm3537_vm10, %v13041_v57, %v3540_v15  ;;  %vm18491_vm3 = vcmp.lt.s32.totalorder %v13110_v33, 1  ;;  %vm3434_vm9 = vcmp.lt.s32.totalorder %v13110_v33, 3 }
 0x2c2   : > { %vm13149_vm13 = vcmp.le.f32.partialorder %v18982_v31, 0.7853982  ;;  %vm18524_vm0 = vcmp.lt.s32.totalorder %v18986_v0, 0  ;;  %v3561_v40 = vadd.s32 1, %v13103_v16  ;;  %v3440_v17 = vsel %vm18491_vm3, %v13133_v43, %v13135_v9 }
 0x2c3   : > { %v18984_v6 = vsel %vm13149_vm13, 4294967295, %v18983_v6  ;;  %v3442_v38 = vsel %vm3434_vm9, %v13137_v50, %v3441_v34  ;;  %v9038_v49 = vadd.s32 4294967169, %v3610_v44  ;;  %v3066_v15 = vshll.u32 %v3065_v62, 23 }
 0x2c4   : > { %18985 = vst [vmem:[#allocation88_spill] sm:$0xff] %v18984_v6  ;;  %vm3560_vm11 = vc.u32 %v13123_v10, %v13102_v2  ;;  %v3444_v57 = vsel %vm18491_vm3, %v13135_v9, %v13137_v50  ;;  %v3446_v18 = vsel %vm3434_vm9, %v3428_v27, %v3445_v8  ;;  %v3173_v35 = vcvt.s32.f32 %v3166_v24  ;;  %v18991_v24 = vld [vmem:[#allocation49_spill] sm:$0xff] }
 0x2c5   : > { %v13179_v26 = vsub.s32 %v13070_v1, %v3360_v3  ;;  %v3542_v39 = vsel %vm3536_vm8, %v3539_v45, %v3541_v56  ;;  %vm3433_vm10 = vcmp.lt.s32.totalorder %v13110_v33, 2  ;;  %v18987_v20 = vand.u32 2147483647, %v18986_v0 }
 0x2c6   : > { %v18988_v7 = vmov 0  ;;  %v3061_v44 = vshll.u32 %v12893_v29, %v13067_v22  ;;  %vm9025_vm3 = vcmp.lt.s32.totalorder %v9024_v46, 0  ;;  %v3443_v27 = vsel %vm3433_vm10, %v3440_v17, %v3442_v38 }
 0x2c7   : > { %vm13186_vm1 = vcmp.le.f32.partialorder %v18987_v20, 0.7853982  ;;  %v13195_v1 = vadd.f32 %v825_v11, %v18991_v24  ;;  %vm18504_vm8 = vcmp.lt.s32.totalorder %v18993_v37, 0  ;;  %v3562_v62 = vsel %vm3560_vm11, %v3561_v40, %v13103_v16 }
 0x2c8   : > { %v18989_v7 = vsel %vm13186_vm1, 4294967295, %v18988_v7  ;;  %v3447_v32 = vsel %vm3433_vm10, %v3444_v57, %v3446_v18  ;;  %v13201_v34 = vshll.u32 %v3408_v30, 8  ;;  %v3616_v3 = vadd.s32 1, %v9038_v49  ;;  %v1034_v18 = vpop.f32.mrf.mxu1 }
 0x2c9   : > { %18990 = vst [vmem:[#allocation89_spill] sm:$0xff] %v18989_v7  ;;  %18992 = vst [vmem:[#allocation49_spill] sm:$0xff] %v13195_v1  ;;  %v3174_v8 = vmul.f32 %v3173_v35, %v3171_v21  ;;  %v3063_v31 = vor.u32 %v3062_v19, %v3061_v44  ;;  %v3067_v29 = vor.u32 4788187, %v3066_v15  ;;  %v3558_v22 = vmul.u32 %v13093_v58, %v3542_v39 }
 0x2ca   : > { %v3265_v45 = vsel %vm9025_vm3, 0, %v9024_v46  ;;  %v3363_v56 = vsub.s32 0, %v13179_v26  ;;  %v13206_v17 = vmul.u32.u64.low %v13201_v34, %v3443_v27  ;;  %v13207_v38 = vmul.u32.u64.high %v13201_v34, %v3443_v27, %v13206_v17 }
 0x2cb   : > { %v13210_v16 = vadd.s32 %v3562_v62, %v3558_v22  ;;  %v13213_v40 = vmul.u32.u64.low %v13201_v34, %v3447_v32  ;;  %v13214_v30 = vmul.u32.u64.high %v13201_v34, %v3447_v32, %v13213_v40  ;;  %v3712_v21 = vand.u32 2139095040, %v13195_v1 }
 0x2cc   : > { %18994 = vst [vmem:[#allocation90_spill] sm:$0xff] %v13206_v17  ;;  %9551 = vsinq.f32 %v12961_v25  ;;  %v2774_v58 = vsel %vm13149_vm13, %v11965_v14, %v12998_v53  ;;  %v18996_v19 = vand.u32 2147483647, %v18993_v37  ;;  %v18997_v46 = vmov 0 }
 0x2cd   : > { %18995 = vst [vmem:[#allocation91_spill] sm:$0xff] %v13214_v30  ;;  %vm3617_vm11 = vcmp.gt.s32.totalorder %v3616_v3, 0  ;;  %v19000_v49 = vxor.u32 2147483648, %v13000_v41  ;;  %v3175_v15 = vxor.u32 2147483648, %v3174_v8  ;;  %v3068_v25 = vand.u32 2147483647, %v3067_v29 }
 0x2ce   : > { %vm13224_vm3 = vcmp.le.f32.partialorder %v18996_v19, 0.7853982  ;;  %v3070_v57 = vcvt.s32.f32 %v3063_v31  ;;  %v3266_v35 = vsub.s32 32, %v3265_v45  ;;  %v3270_v39 = vsub.s32 4294967266, %v3265_v45 }
 0x2cf   : > { %v18998_v46 = vsel %vm13224_vm3, 4294967295, %v18997_v46  ;;  %v2970_v11 = vsel %vm18524_vm0, %v19000_v49, %v13000_v41  ;;  %v9027_v53 = vmin.u32 %v3363_v56, %v13179_v26  ;;  %v3437_v20 = vsel %vm3435_vm5, %v13137_v50, 2102212464 }
 0x2d0   : > { %18999 = vst [vmem:[#allocation92_spill] sm:$0xff] %v18998_v46  ;;  %v3564_v44 = vadd.s32 536870912, %v13210_v16  ;;  %v3416_v27 = vshrl.u32 %v18821_v13, %v13072_v12  ;;  %v3618_v62 = vsel %vm3617_vm11, %v3616_v3, 0  ;;  %v3713_v32 = vshrl.u32 %v3712_v21, 23 }
 0x2d1   : > { %9553 = vcosq.f32 %v2774_v58  ;;  %v2973_v41 = vsel %vm13186_vm1, %v18986_v0, %v2970_v11  ;;  %v3250_v31 = vadd.s32 %v12817_v23, %v12814_v59  ;;  %v13246_v29 = vadd.f32 %v1034_v18, %v18991_v24  ;;  %v19004_v11 = vld [vmem:[#allocation64_spill] sm:$0xff] }
 0x2d2   : > { %v3176_v50 = vsel %vm18504_vm8, %v3175_v15, %v3174_v8  ;;  %v3071_v22 = vmul.f32 %v3070_v57, %v3068_v25  ;;  %vm19002_vm5 = vcmp.lt.s32.totalorder %v13110_v33, 1  ;;  %v3438_v3 = vsel %vm3434_vm9, %v13135_v9, %v3437_v20  ;;  %v827_v33 = vpop.f32.mrf.mxu0 }
 0x2d3   : > { %19001 = vst [vmem:[#allocation93_spill] sm:$0xff] %v13246_v29  ;;  %v3436_v12 = vsel %vm19002_vm5, %v3416_v27, %v13133_v43  ;;  %v3268_v56 = vshrl.u32 %v3250_v31, %v3266_v35  ;;  %v3271_v40 = vadd.s32 127, %v3270_v39  ;;  %v3458_v21 = vadd.s32 1, %v13207_v38 }
 0x2d4   : > { %v3620_v59 = vand.u32 31, %v3618_v62  ;;  %v3365_v23 = vclz %v9027_v53  ;;  %v13257_v19 = vshrl.u32 %v3564_v44, 30  ;;  %vm3457_vm11 = vc.u32 %v13214_v30, %v13206_v17  ;;  %v19006_v44 = vld [vmem:[#allocation60_spill] sm:$0xff] }
 0x2d5   : > { %v9042_v8 = vadd.s32 4294967169, %v3713_v32  ;;  %9555 = vsinq.f32 %v2774_v58  ;;  %v3267_v49 = vshll.u32 %v13024_v52, %v3265_v45  ;;  %v3439_v43 = vsel %vm3433_vm10, %v3436_v12, %v3438_v3 }
 0x2d6   : > { %19003 = vst [vmem:[#allocation94_spill] sm:$0xff] %v13257_v19  ;;  %v3918_v9 = vand.u32 2139095040, %v13246_v29  ;;  %v2772_v15 = vsub.s32 4, %v19004_v11  ;;  %9557 = vcosq.f32 %v2973_v41  ;;  %v13269_v25 = vsel %vm13224_vm3, %v18993_v37, %v3176_v50 }
 0x2d7   : > { %19005 = vst [vmem:[#allocation64_spill] sm:$0xff] %v13269_v25  ;;  %v3072_v57 = vxor.u32 2147483648, %v3071_v22  ;;  %v13271_v18 = vor.u32 %v3268_v56, %v3267_v49  ;;  %v3272_v35 = vshll.u32 %v3271_v40, 23  ;;  %v3459_v58 = vsel %vm3457_vm11, %v3458_v21, %v13207_v38  ;;  %v13305_v21 = vpop.f32.mrf.mxu0 }
 0x2d8   : > { %v13274_v52 = vsub.s32 32, %v3620_v59  ;;  %v9028_v45 = vadd.s32 4294967294, %v3365_v23  ;;  %v3566_v39 = vshll.u32 %v13257_v19, 30  ;;  %v3455_v53 = vmul.u32 %v13201_v34, %v3439_v43 }
 0x2d9   : > { %v3719_v20 = vadd.s32 1, %v9042_v8  ;;  %9559 = vsinq.f32 %v2973_v41  ;;  %vm18503_vm9 = vcmp.lt.s32.totalorder %v19006_v44, 0  ;;  %v18492_v27 = vand.u32 2147483647, %v13080_v48  ;;  %v13280_v31 = vpop.eup %9551  ;;  %v13294_v41 = vpop.f32.mrf.mxu1 }
 0x2da   : > { %v3919_v32 = vshrl.u32 %v3918_v9, 23  ;;  %vm19007_vm10 = vcmp.lt.s32.totalorder %v11965_v14, 0  ;;  %9561 = vcosq.f32 %v13269_v25  ;;  %v13290_v50 = vsel %vm18503_vm9, %v3072_v57, %v3071_v22 }
 0x2db   : > { %v13285_v38 = vsel %vm19007_vm10, %v2772_v15, %v19004_v11  ;;  %19009 = vst [vmem:[#allocation96_spill] sm:$0xff] %v13290_v50  ;;  %v13292_v34 = vadd.s32 %v3459_v58, %v3455_v53  ;;  %v3273_v12 = vor.u32 4788187, %v3272_v35  ;;  %v13298_v3 = vadd.s32 %v12968_v4, %v12984_v36  ;;  %v13327_v57 = vpop.f32.mrf.mxu1 }
 0x2dc   : > { %19008 = vst [vmem:[#allocation95_spill] sm:$0xff] %v13285_v38  ;;  %v3636_v56 = vshrl.u32 %v18864_v28, %v13274_v52  ;;  %v13303_v40 = vadd.f32 %v827_v33, %v18991_v24  ;;  %v3276_v22 = vcvt.s32.f32 %v13271_v18  ;;  %vm9029_vm5 = vcmp.lt.s32.totalorder %v9028_v45, 0 }
 0x2dd   : > { %v13309_v23 = vsub.s32 %v13210_v16, %v3566_v39  ;;  %vm3720_vm11 = vcmp.gt.s32.totalorder %v3719_v20, 0  ;;  %v13313_v8 = vand.u32 8388607, %v18492_v27  ;;  %v3633_v4 = vshrl.u32 %v18840_v60, %v13274_v52  ;;  %v13333_v39 = vpop.f32.mrf.mxu0  ;;  %v13350_v0 = vpop.f32.mrf.mxu1 }
 0x2de   : > { %19010 = vst [vmem:[#allocation97_spill] sm:$0xff] %v13303_v40  ;;  %v3635_v36 = vshll.u32 %v18840_v60, %v3620_v59  ;;  %v9050_v49 = vadd.s32 4294967169, %v3919_v32  ;;  %v13318_v43 = vpop.eup %9553  ;;  %v3461_v9 = vadd.s32 536870912, %v13292_v34  ;;  %v13321_v11 = vshrl.u32 %v3618_v62, 5  ;;  %19014 = vst [vmem:[#allocation101_spill] sm:$0xff] %v13350_v0 }
 0x2df   : > { %19011 = vst [vmem:[#allocation98_spill] sm:$0xff] %v13309_v23  ;;  %19012 = vst [vmem:[#allocation99_spill] sm:$0xff] %v13318_v43  ;;  %v3627_v16 = vshrl.u32 %v18843_v42, %v13274_v52  ;;  %v3630_v15 = vshrl.u32 %v18852_v63, %v13274_v52  ;;  %v3632_v18 = vshll.u32 %v18852_v63, %v3620_v59  ;;  %v13330_v58 = vsel %vm3720_vm11, %v3719_v20, 0 }
 0x2e0   : > { %v3637_v35 = vor.u32 %v3636_v56, %v3635_v36  ;;  %v3815_v33 = vand.u32 2139095040, %v13303_v40  ;;  %v3569_v62 = vsub.s32 0, %v13309_v23  ;;  %v3624_v53 = vshrl.u32 %v18842_v47, %v13274_v52 }
 0x2e1   : > { %v3626_v32 = vshll.u32 %v18842_v47, %v3620_v59  ;;  %v3629_v27 = vshll.u32 %v18843_v42, %v3620_v59  ;;  %v3623_v19 = vshll.u32 %v18821_v13, %v3620_v59  ;;  %v3634_v51 = vor.u32 %v3633_v4, %v3632_v18  ;;  %v13358_v18 = vpop.f32.mrf.mxu0 }
 0x2e2   : > { %v18508_v56 = vand.u32 2147483647, %v13195_v1  ;;  %v3925_v20 = vadd.s32 1, %v9050_v49  ;;  %v13342_v36 = vpop.eup %9555  ;;  %vm3641_vm10 = vcmp.lt.s32.totalorder %v13321_v11, 4  ;;  %v13348_v7 = vand.u32 31, %v13330_v58  ;;  %19017 = vst [vmem:[#allocation104_spill] sm:$0xff] %v13358_v18 }
 0x2e3   : > { %19013 = vst [vmem:[#allocation100_spill] sm:$0xff] %v13342_v36  ;;  %v13344_v46 = vor.u32 %v3627_v16, %v3626_v32  ;;  %v3631_v37 = vor.u32 %v3630_v15, %v3629_v27  ;;  %v13352_v48 = vpop.eup %9557  ;;  %v3274_v50 = vand.u32 2147483647, %v3273_v12  ;;  %v13354_v59 = vshrl.u32 %v3461_v9, 30  ;;  %v13389_v25 = vpop.f32.mrf.mxu0 }
 0x2e4   : > { %19015 = vst [vmem:[#allocation102_spill] sm:$0xff] %v13352_v48  ;;  %v3651_v4 = vsel %vm3641_vm10, %v3637_v35, 1326507024  ;;  %v3816_v49 = vshrl.u32 %v3815_v33, 23  ;;  %v13361_v27 = vsel %vm9029_vm5, 0, %v9028_v45  ;;  %v9035_v16 = vmin.u32 %v3569_v62, %v13309_v23  ;;  %v13381_v33 = vpop.f32.mrf.mxu1  ;;  %19022 = vst [vmem:[#allocation109_spill] sm:$0xff] %v13389_v25 }
 0x2e5   : > { %19016 = vst [vmem:[#allocation103_spill] sm:$0xff] %v13354_v59  ;;  %v3614_v15 = vor.u32 8388608, %v13313_v8  ;;  %v3625_v32 = vor.u32 %v3624_v53, %v3623_v19  ;;  %vm3638_vm11 = vcmp.lt.s32.totalorder %v13321_v11, 1  ;;  %vm3640_vm9 = vcmp.lt.s32.totalorder %v13321_v11, 3  ;;  %19019 = vst [vmem:[#allocation106_spill] sm:$0xff] %v13381_v33 }
 0x2e6   : > { %v3647_v12 = vsel %vm3641_vm10, %v3634_v51, 920167782  ;;  %vm3926_vm8 = vcmp.gt.s32.totalorder %v3925_v20, 0  ;;  %v13369_v9 = vpop.eup %9559  ;;  %v3650_v45 = vsel %vm3638_vm11, %v13344_v46, %v3631_v37  ;;  %v3652_v35 = vsel %vm3640_vm9, %v3634_v51, %v3651_v4 }
 0x2e7   : > { %19018 = vst [vmem:[#allocation105_spill] sm:$0xff] %v13369_v9  ;;  %v3716_v19 = vand.u32 8388607, %v18508_v56  ;;  %v13379_v8 = vsub.s32 32, %v13348_v7  ;;  %v13383_v62 = vpop.eup %9561  ;;  %v13385_v53 = vmul.f32 %v3276_v22, %v3274_v50  ;;  %v3463_v48 = vshll.u32 %v13354_v59, 30 }
 0x2e8   : > { %19020 = vst [vmem:[#allocation107_spill] sm:$0xff] %v13383_v62  ;;  %v9046_v9 = vadd.s32 4294967169, %v3816_v49  ;;  %vm3639_vm5 = vcmp.lt.s32.totalorder %v13321_v11, 2  ;;  %v3646_v51 = vsel %vm3638_vm11, %v3625_v32, %v13344_v46  ;;  %v3648_v4 = vsel %vm3640_vm9, %v3631_v37, %v3647_v12  ;;  %v13408_v12 = vpop.f32.mrf.mxu1 }
 0x2e9   : > { %19021 = vst [vmem:[#allocation108_spill] sm:$0xff] %v13385_v53  ;;  %v3927_v56 = vsel %vm3926_vm8, %v3925_v20, 0  ;;  %v3571_v22 = vclz %v9035_v16  ;;  %v3653_v18 = vsel %vm3639_vm5, %v3650_v45, %v3652_v35  ;;  %v13401_v49 = vshll.u32 %v3614_v15, 8  ;;  %19023 = vst [vmem:[#allocation110_spill] sm:$0xff] %v13408_v12  ;;  %v13417_v35 = vpop.f32.mrf.mxu0 }
 0x2ea   : > { %v3622_v25 = vshrl.u32 %v18821_v13, %v13274_v52  ;;  %v3717_v33 = vor.u32 8388608, %v3716_v19  ;;  %v3739_v59 = vshrl.u32 %v18864_v28, %v13379_v8  ;;  %v13411_v20 = vsub.s32 %v13292_v34, %v3463_v48  ;;  %19025 = vst [vmem:[#allocation112_spill] sm:$0xff] %v13417_v35 }
 0x2eb   : > { %v3649_v16 = vsel %vm3639_vm5, %v3646_v51, %v3648_v4  ;;  %v13415_v45 = vand.u32 31, %v3927_v56  ;;  %v3822_v15 = vadd.s32 1, %v9046_v9  ;;  %v3643_v52 = vsel %vm3641_vm10, %v3631_v37, 2102212464  ;;  %v13452_v53 = vpop.f32.mrf.mxu0 }
 0x2ec   : > { %19024 = vst [vmem:[#allocation111_spill] sm:$0xff] %v13411_v20  ;;  %v13422_v19 = vmul.u32.u64.low %v13401_v49, %v3653_v18  ;;  %v13423_v50 = vmul.u32.u64.high %v13401_v49, %v3653_v18, %v13422_v19  ;;  %v3738_v62 = vshll.u32 %v18840_v60, %v13348_v7  ;;  %v13428_v48 = vshrl.u32 %v13330_v58, 5  ;;  %v13443_v58 = vpop.f32.mrf.mxu1  ;;  %19029 = vst [vmem:[#allocation116_spill] sm:$0xff] %v13452_v53 }
 0x2ed   : > { %v3730_v34 = vshrl.u32 %v18843_v42, %v13379_v8  ;;  %v3733_v9 = vshrl.u32 %v18852_v63, %v13379_v8  ;;  %v3736_v51 = vshrl.u32 %v18840_v60, %v13379_v8  ;;  %v3729_v18 = vshll.u32 %v18842_v47, %v13348_v7  ;;  %19028 = vst [vmem:[#allocation115_spill] sm:$0xff] %v13443_v58 }
 0x2ee   : > { %19026 = vst [vmem:[#allocation113_spill] sm:$0xff] %v13423_v50  ;;  %v13437_v37 = vmul.u32.u64.low %v13401_v49, %v3649_v16  ;;  %v13438_v4 = vmul.u32.u64.high %v13401_v49, %v3649_v16, %v13437_v37  ;;  %v3740_v19 = vor.u32 %v3739_v59, %v3738_v62  ;;  %v3732_v35 = vshll.u32 %v18843_v42, %v13348_v7 }
 0x2ef   : > { %v3735_v12 = vshll.u32 %v18852_v63, %v13348_v7  ;;  %v13450_v1 = vsub.s32 32, %v13415_v45  ;;  %vm3823_vm8 = vcmp.gt.s32.totalorder %v3822_v15, 0  ;;  %v13454_v16 = vadd.s32 4294967294, %v3571_v22 }
 0x2f0   : > { %19027 = vst [vmem:[#allocation114_spill] sm:$0xff] %v13437_v37  ;;  %v3642_v17 = vsel %vm3638_vm11, %v3622_v25, %v3625_v32  ;;  %v3644_v59 = vsel %vm3640_vm9, %v13344_v46, %v3643_v52  ;;  %v3727_v62 = vshrl.u32 %v18842_v47, %v13379_v8  ;;  %v13463_v58 = vor.u32 %v3730_v34, %v3729_v18  ;;  %v13473_v46 = vpop.f32.mrf.mxu1 }
 0x2f1   : > { %v13465_v30 = vor.u32 %v3733_v9, %v3732_v35  ;;  %v3737_v44 = vor.u32 %v3736_v51, %v3735_v12  ;;  %vm3744_vm10 = vcmp.lt.s32.totalorder %v13428_v48, 4  ;;  %v3726_v53 = vshll.u32 %v18821_v13, %v13348_v7  ;;  %19030 = vst [vmem:[#allocation117_spill] sm:$0xff] %v13473_v46  ;;  %v13485_v51 = vpop.f32.mrf.mxu0 }
 0x2f2   : > { %v3754_v25 = vsel %vm3744_vm10, %v3740_v19, 1326507024  ;;  %v3824_v32 = vsel %vm3823_vm8, %v3822_v15, 0  ;;  %v13477_v52 = vsel %vm3639_vm5, %v3642_v17, %v3644_v59  ;;  %v13479_v35 = vshll.u32 %v3717_v33, 8  ;;  %19032 = vst [vmem:[#allocation118_spill] sm:$0xff] %v13485_v51 }
 0x2f3   : > { %v19031_v12 = vand.u32 2147483647, %v13246_v29  ;;  %v3942_v9 = vshrl.u32 %v18840_v60, %v13450_v1  ;;  %vm3663_vm9 = vc.u32 %v13423_v50, %v13437_v37  ;;  %v13489_v7 = vor.u32 %v3727_v62, %v3726_v53  ;;  %v13509_v62 = vpop.f32.mrf.mxu1  ;;  %v13515_v22 = vpop.f32.mrf.mxu0 }
 0x2f4   : > { %vm18527_vm11 = vcmp.lt.s32.totalorder %v13428_v48, 1  ;;  %vm18526_vm5 = vcmp.lt.s32.totalorder %v13428_v48, 3  ;;  %v3941_v33 = vshll.u32 %v18852_v63, %v13415_v45  ;;  %v3826_v15 = vand.u32 31, %v3824_v32  ;;  %19033 = vst [vmem:[#allocation119_spill] sm:$0xff] %v13509_v62  ;;  %19034 = vst [vmem:[#allocation120_spill] sm:$0xff] %v13515_v22 }
 0x2f5   : > { %v3922_v34 = vand.u32 8388607, %v19031_v12  ;;  %v3753_v17 = vsel %vm18527_vm11, %v13463_v58, %v13465_v30  ;;  %v3755_v11 = vsel %vm18526_vm5, %v3737_v44, %v3754_v25  ;;  %v13501_v18 = vshrl.u32 %v3927_v56, 5  ;;  %v13544_v61 = vpop.f32.mrf.mxu1 }
 0x2f6   : > { %v3933_v53 = vshrl.u32 %v18842_v47, %v13450_v1  ;;  %v3936_v19 = vshrl.u32 %v18843_v42, %v13450_v1  ;;  %v3939_v59 = vshrl.u32 %v18852_v63, %v13450_v1  ;;  %v3664_v12 = vadd.s32 1, %v13438_v4  ;;  %19035 = vst [vmem:[#allocation121_spill] sm:$0xff] %v13544_v61 }
 0x2f7   : > { %vm18534_vm8 = vcmp.lt.s32.totalorder %v13428_v48, 2  ;;  %v3943_v25 = vor.u32 %v3942_v9, %v3941_v33  ;;  %v3945_v56 = vshrl.u32 %v18864_v28, %v13450_v1  ;;  %v3750_v51 = vsel %vm3744_vm10, %v3737_v44, 920167782 }
 0x2f8   : > { %v3932_v46 = vshll.u32 %v18821_v13, %v13415_v45  ;;  %v3935_v29 = vshll.u32 %v18842_v47, %v13415_v45  ;;  %v3938_v62 = vshll.u32 %v18843_v42, %v13415_v45  ;;  %v3749_v9 = vsel %vm18527_vm11, %v13489_v7, %v13463_v58 }
 0x2f9   : > { %v13531_v33 = vsel %vm18534_vm8, %v3753_v17, %v3755_v11  ;;  %v3944_v44 = vshll.u32 %v18840_v60, %v13415_v45  ;;  %v13535_v22 = vsub.s32 32, %v3826_v15  ;;  %vm3950_vm0 = vcmp.lt.s32.totalorder %v13501_v18, 4 }
 0x2fa   : > { %v13537_v43 = vor.u32 %v3933_v53, %v3932_v46  ;;  %v13539_v14 = vor.u32 %v3936_v19, %v3935_v29  ;;  %v13541_v36 = vor.u32 %v3939_v59, %v3938_v62  ;;  %v3751_v17 = vsel %vm18526_vm5, %v13465_v30, %v3750_v51  ;;  %v13555_v29 = vpop.f32.mrf.mxu0 }
 0x2fb   : > { %v3946_v11 = vor.u32 %v3945_v56, %v3944_v44  ;;  %v3956_v45 = vsel %vm3950_vm0, %v3943_v25, 920167782  ;;  %v13553_v46 = vadd.f32 %v13294_v41, %v18991_v24  ;;  %19037 = vst [vmem:[#allocation123_spill] sm:$0xff] %v13555_v29  ;;  %v3665_v53 = vsel %vm3663_vm9, %v3664_v12, %v13438_v4  ;;  %v13582_v56 = vpop.f32.mrf.mxu1 }
 0x2fc   : > { %v13563_v19 = vmul.u32.u64.low %v13479_v35, %v13531_v33  ;;  %v13564_v59 = vmul.u32.u64.high %v13479_v35, %v13531_v33, %v13563_v19  ;;  %v3923_v51 = vor.u32 8388608, %v3922_v34  ;;  %vm18536_vm5 = vcmp.lt.s32.totalorder %v13501_v18, 1  ;;  %19039 = vst [vmem:[#allocation125_spill] sm:$0xff] %v13582_v56 }
 0x2fd   : > { %19036 = vst [vmem:[#allocation122_spill] sm:$0xff] %v13553_v46  ;;  %vm18535_vm11 = vcmp.lt.s32.totalorder %v13501_v18, 3  ;;  %v3839_v41 = vshrl.u32 %v18840_v60, %v13535_v22  ;;  %v3752_v62 = vsel %vm18534_vm8, %v3749_v9, %v3751_v17  ;;  %v3955_v4 = vsel %vm18536_vm5, %v13537_v43, %v13539_v14  ;;  %v13590_v19 = vpop.f32.mrf.mxu0  ;;  %v13607_v38 = vpop.f32.mrf.mxu1 }
 0x2fe   : > { %19038 = vst [vmem:[#allocation124_spill] sm:$0xff] %v13564_v59  ;;  %v3957_v34 = vsel %vm18535_vm11, %v13541_v36, %v3956_v45  ;;  %v3842_v12 = vshrl.u32 %v18864_v28, %v13535_v22  ;;  %v3960_v33 = vsel %vm3950_vm0, %v3946_v11, 1326507024  ;;  %v13586_v44 = vshrl.u32 %v3824_v32, 5  ;;  %19040 = vst [vmem:[#allocation126_spill] sm:$0xff] %v13590_v19 }
 0x2ff   : > { %v3838_v9 = vshll.u32 %v18852_v63, %v3826_v15  ;;  %v4021_v17 = vand.u32 2139095040, %v13553_v46  ;;  %v3830_v24 = vshrl.u32 %v18842_v47, %v13535_v22  ;;  %v3833_v45 = vshrl.u32 %v18843_v42, %v13535_v22  ;;  %19042 = vst [vmem:[#allocation127_spill] sm:$0xff] %v13607_v38 }
 0x300   : > { %v3836_v56 = vshrl.u32 %v18852_v63, %v13535_v22  ;;  %v3841_v29 = vshll.u32 %v18840_v60, %v3826_v15  ;;  %vm18539_vm9 = vcmp.lt.s32.totalorder %v13501_v18, 2  ;;  %v13600_v32 = vshll.u32 %v3923_v51, 8 }
 0x301   : > { %v19041_v11 = vand.u32 2147483647, %v13303_v40  ;;  %v3840_v37 = vor.u32 %v3839_v41, %v3838_v9  ;;  %v3829_v19 = vshll.u32 %v18821_v13, %v3826_v15  ;;  %v3832_v50 = vshll.u32 %v18842_v47, %v3826_v15 }
 0x302   : > { %v3835_v0 = vshll.u32 %v18843_v42, %v3826_v15  ;;  %v3843_v6 = vor.u32 %v3842_v12, %v3841_v29  ;;  %v3958_v55 = vsel %vm18539_vm9, %v3955_v4, %v3957_v34  ;;  %v3959_v51 = vsel %vm18536_vm5, %v13539_v14, %v13541_v36 }
 0x303   : > { %v3819_v61 = vand.u32 8388607, %v19041_v11  ;;  %v3961_v41 = vsel %vm18535_vm11, %v3943_v25, %v3960_v33  ;;  %v4022_v9 = vshrl.u32 %v4021_v17, 23  ;;  %v13617_v11 = vpop.f32.mrf.mxu0  ;;  %v13619_v40 = vor.u32 %v3830_v24, %v3829_v19 }
 0x304   : > { %v13621_v15 = vor.u32 %v3833_v45, %v3832_v50  ;;  %v3837_v29 = vor.u32 %v3836_v56, %v3835_v0  ;;  %vm3847_vm8 = vcmp.lt.s32.totalorder %v13586_v44, 4  ;;  %v3661_v4 = vmul.u32 %v13401_v49, %v13477_v52  ;;  %v13642_v49 = vpop.f32.mrf.mxu1 }
 0x305   : > { %v13627_v34 = vmul.u32.u64.low %v13479_v35, %v3752_v62  ;;  %v13628_v12 = vmul.u32.u64.high %v13479_v35, %v3752_v62, %v13627_v34  ;;  %v3853_v25 = vsel %vm3847_vm8, %v3840_v37, 920167782  ;;  %v3962_v24 = vsel %vm18539_vm9, %v3959_v51, %v3961_v41  ;;  %v13648_v56 = vpop.f32.mrf.mxu0 }
 0x306   : > { %v13636_v50 = vmul.u32.u64.low %v13600_v32, %v3958_v55  ;;  %v13637_v33 = vmul.u32.u64.high %v13600_v32, %v3958_v55, %v13636_v50  ;;  %v3857_v0 = vsel %vm3847_vm8, %v3843_v6, 1326507024  ;;  %v13644_v52 = vadd.s32 %v3665_v53, %v3661_v4 }
 0x307   : > { %19043 = vst [vmem:[#allocation128_spill] sm:$0xff] %v13627_v34  ;;  %vm18538_vm11 = vcmp.lt.s32.totalorder %v13586_v44, 1  ;;  %vm18537_vm5 = vcmp.lt.s32.totalorder %v13586_v44, 3  ;;  %v9054_v62 = vadd.s32 4294967169, %v4022_v9  ;;  %v3746_v55 = vsel %vm3744_vm10, %v13465_v30, 2102212464 }
 0x308   : > { %19044 = vst [vmem:[#allocation129_spill] sm:$0xff] %v13636_v50  ;;  %v3820_v17 = vor.u32 8388608, %v3819_v61  ;;  %v3852_v6 = vsel %vm18538_vm11, %v13619_v40, %v13621_v15  ;;  %v3854_v53 = vsel %vm18537_vm5, %v3837_v29, %v3853_v25  ;;  %v3856_v51 = vsel %vm18538_vm11, %v13621_v15, %v3837_v29  ;;  %v13676_v25 = vpop.f32.mrf.mxu1 }
 0x309   : > { %v13660_v19 = vmul.u32.u64.low %v13600_v32, %v3962_v24  ;;  %v13661_v45 = vmul.u32.u64.high %v13600_v32, %v3962_v24, %v13660_v19  ;;  %v3858_v30 = vsel %vm18537_vm5, %v3840_v37, %v3857_v0  ;;  %v3370_v61 = vshll.u32 %v13179_v26, %v13361_v27 }
 0x30a   : > { %v19046_v41 = vsub.s32 32, %v13361_v27  ;;  %v3725_v4 = vshrl.u32 %v18821_v13, %v13379_v8  ;;  %vm18540_vm10 = vcmp.lt.s32.totalorder %v13586_v44, 2  ;;  %v19047_v24 = vsub.s32 4294967266, %v13361_v27 }
 0x30b   : > { %19045 = vst [vmem:[#allocation130_spill] sm:$0xff] %v13661_v45  ;;  %v19048_v37 = vsub.s32 0, %v13411_v20  ;;  %v3855_v26 = vsel %vm18540_vm10, %v3852_v6, %v3854_v53  ;;  %v4028_v38 = vadd.s32 1, %v9054_v62  ;;  %vm19049_vm5 = vcmp.lt.s32.totalorder %v13428_v48, 1 }
 0x30c   : > { %v3371_v9 = vshrl.u32 %v13298_v3, %v19046_v41  ;;  %v13680_v19 = vadd.s32 127, %v19047_v24  ;;  %v13687_v3 = vpop.f32.mrf.mxu0  ;;  %v3745_v8 = vsel %vm19049_vm5, %v3725_v4, %v13489_v7  ;;  %vm19050_vm11 = vcmp.lt.s32.totalorder %v13428_v48, 3 }
 0x30d   : > { %v9031_v0 = vmin.u32 %v19048_v37, %v13411_v20  ;;  %v3747_v27 = vsel %vm19050_vm11, %v13463_v58, %v3746_v55  ;;  %v3859_v41 = vsel %vm18540_vm10, %v3856_v51, %v3858_v30  ;;  %v13697_v24 = vshll.u32 %v3820_v17, 8  ;;  %v13714_v17 = vpop.f32.mrf.mxu1 }
 0x30e   : > { %v3667_v6 = vadd.s32 536870912, %v13644_v52  ;;  %v3767_v62 = vadd.s32 1, %v13628_v12  ;;  %v3952_v53 = vsel %vm3950_vm0, %v13541_v36, 2102212464  ;;  %vm3766_vm5 = vc.u32 %v13564_v59, %v13627_v34  ;;  %v13722_v36 = vpop.f32.mrf.mxu0 }
 0x30f   : > { %v3931_v58 = vshrl.u32 %v18821_v13, %v13450_v1  ;;  %v13710_v7 = vmul.u32.u64.low %v13697_v24, %v3855_v26  ;;  %v13711_v55 = vmul.u32.u64.high %v13697_v24, %v3855_v26, %v13710_v7  ;;  %vm19052_vm11 = vcmp.lt.s32.totalorder %v13428_v48, 2 }
 0x310   : > { %v3748_v51 = vsel %vm19052_vm11, %v3745_v8, %v3747_v27  ;;  %v13719_v30 = vmul.u32.u64.low %v13697_v24, %v3859_v41  ;;  %v13720_v4 = vmul.u32.u64.high %v13697_v24, %v3859_v41, %v13719_v30  ;;  %vm4029_vm0 = vcmp.gt.s32.totalorder %v4028_v38, 0 }
 0x311   : > { %19051 = vst [vmem:[#allocation131_spill] sm:$0xff] %v13710_v7  ;;  %v3468_v37 = vclz %v9031_v0  ;;  %vm19054_vm10 = vcmp.lt.s32.totalorder %v13501_v18, 1  ;;  %vm19055_vm9 = vcmp.lt.s32.totalorder %v13501_v18, 3  ;;  %v3973_v34 = vadd.s32 1, %v13637_v33 }
 0x312   : > { %19053 = vst [vmem:[#allocation132_spill] sm:$0xff] %v13720_v4  ;;  %v3951_v1 = vsel %vm19054_vm10, %v3931_v58, %v13537_v43  ;;  %v3953_v26 = vsel %vm19055_vm9, %v13539_v14, %v3952_v53  ;;  %v13731_v48 = vor.u32 %v3371_v9, %v3370_v61  ;;  %v3768_v8 = vsel %vm3766_vm5, %v3767_v62, %v13628_v12  ;;  %v19057_v58 = vld [vmem:[#allocation70_spill] sm:$0xff]  ;;  %v13744_v53 = vpop.f32.mrf.mxu1 }
 0x313   : > { %vm3972_vm11 = vc.u32 %v13661_v45, %v13636_v50  ;;  %v18542_v27 = vand.u32 2147483647, %v13553_v46  ;;  %v3764_v0 = vmul.u32 %v13479_v35, %v3748_v51  ;;  %v3849_v43 = vsel %vm3847_vm8, %v3837_v29, 2102212464  ;;  %v19074_v45 = vld [vmem:[#allocation68_spill] sm:$0xff] }
 0x314   : > { %19056 = vst [vmem:[#allocation133_spill] sm:$0xff] %v13731_v48  ;;  %v4030_v41 = vsel %vm4029_vm0, %v4028_v38, 0  ;;  %v13742_v14 = vadd.f32 %v13305_v21, %v19057_v58  ;;  %vm19059_vm9 = vcmp.lt.s32.totalorder %v13454_v16, 0  ;;  %v13751_v61 = vshrl.u32 %v3667_v6, 30  ;;  %v13757_v38 = vpop.f32.mrf.mxu0 }
 0x315   : > { %v13749_v12 = vsel %vm19059_vm9, 0, %v13454_v16  ;;  %vm19062_vm10 = vcmp.lt.s32.totalorder %v13501_v18, 2  ;;  %v3828_v29 = vshrl.u32 %v18821_v13, %v13535_v22  ;;  %v3375_v21 = vshll.u32 %v13680_v19, 23 }
 0x316   : > { %19058 = vst [vmem:[#allocation70_spill] sm:$0xff] %v13742_v14  ;;  %19060 = vst [vmem:[#allocation134_spill] sm:$0xff] %v13749_v12  ;;  %v3954_v35 = vsel %vm19062_vm10, %v3951_v1, %v3953_v26  ;;  %v9032_v9 = vadd.s32 4294967294, %v3468_v37  ;;  %v13760_v62 = vadd.s32 %v3768_v8, %v3764_v0  ;;  %v3974_v16 = vsel %vm3972_vm11, %v3973_v34, %v13637_v33  ;;  %v13778_v33 = vpop.f32.mrf.mxu1  ;;  %v13786_v26 = vpop.f32.mrf.mxu0 }
 0x317   : > { %19061 = vst [vmem:[#allocation135_spill] sm:$0xff] %v13751_v61  ;;  %vm19064_vm8 = vcmp.lt.s32.totalorder %v13586_v44, 1  ;;  %vm19065_vm5 = vcmp.lt.s32.totalorder %v13586_v44, 3  ;;  %v4025_v6 = vand.u32 8388607, %v18542_v27  ;;  %v4032_v19 = vand.u32 31, %v4030_v41 }
 0x318   : > { %19063 = vst [vmem:[#allocation136_spill] sm:$0xff] %v13760_v62  ;;  %v3848_v18 = vsel %vm19064_vm8, %v3828_v29, %v13619_v40  ;;  %v3850_v22 = vsel %vm19065_vm5, %v13621_v15, %v3849_v43  ;;  %v3575_v51 = vsub.s32 32, %v13749_v12  ;;  %v3970_v30 = vmul.u32 %v13600_v32, %v3954_v35 }
 0x319   : > { %v3870_v37 = vadd.s32 1, %v13711_v55  ;;  %v4124_v34 = vand.u32 2139095040, %v13742_v14  ;;  %v3559_v40 = vadd.s32 %v13102_v2, %v13123_v10  ;;  %v3579_v1 = vsub.s32 4294967266, %v13749_v12 }
 0x31a   : > { %v3669_v15 = vshll.u32 %v13751_v61, 30  ;;  %vm3869_vm0 = vc.u32 %v13720_v4, %v13710_v7  ;;  %vm9033_vm11 = vcmp.lt.s32.totalorder %v9032_v9, 0  ;;  %v3770_v32 = vadd.s32 536870912, %v13760_v62  ;;  %v13801_v7 = vpop.f32.mrf.mxu1 }
 0x31b   : > { %v13789_v8 = vadd.s32 %v3974_v16, %v3970_v30  ;;  %vm19067_vm9 = vcmp.lt.s32.totalorder %v13586_v44, 2  ;;  %v13793_v43 = vor.u32 4788187, %v3375_v21  ;;  %v4026_v2 = vor.u32 8388608, %v4025_v6 }
 0x31c   : > { %v3851_v0 = vsel %vm19067_vm9, %v3848_v18, %v3850_v22  ;;  %v4033_v35 = vsub.s32 32, %v4032_v19  ;;  %v13798_v27 = vshrl.u32 %v3559_v40, %v3575_v51  ;;  %v3871_v61 = vsel %vm3869_vm0, %v3870_v37, %v13711_v55  ;;  %v879_v22 = vpop.f32.mrf.mxu0 }
 0x31d   : > { %19066 = vst [vmem:[#allocation137_spill] sm:$0xff] %v13789_v8  ;;  %19068 = vst [vmem:[#allocation138_spill] sm:$0xff] %v13793_v43  ;;  %v4125_v46 = vshrl.u32 %v4124_v34, 23  ;;  %v13803_v16 = vadd.s32 127, %v3579_v1  ;;  %v13805_v44 = vsel %vm9033_vm11, 0, %v9032_v9  ;;  %v13808_v21 = vsub.s32 %v13644_v52, %v3669_v15  ;;  %v19073_v15 = vld [vmem:[#allocation45_spill] sm:$0xff] }
 0x31e   : > { %19069 = vst [vmem:[#allocation139_spill] sm:$0xff] %v13798_v27  ;;  %v3867_v18 = vmul.u32 %v13697_v24, %v3851_v0  ;;  %v13811_v6 = vshrl.u32 %v3770_v32, 30  ;;  %v13814_v51 = vadd.s32 536870912, %v13789_v8  ;;  %v13819_v30 = vadd.f32 %v13327_v57, %v19057_v58  ;;  %v1088_v0 = vpop.f32.mrf.mxu1  ;;  %v19075_v8 = vld [vmem:[#allocation67_spill] sm:$0xff] }
 0x31f   : > { %19070 = vst [vmem:[#allocation140_spill] sm:$0xff] %v13803_v16  ;;  %v4036_v9 = vshrl.u32 %v18842_v47, %v4033_v35  ;;  %v4039_v52 = vshrl.u32 %v18843_v42, %v4033_v35  ;;  %v13825_v34 = vshll.u32 %v4026_v2, 8  ;;  %v13827_v24 = vshrl.u32 %v4030_v41, 5  ;;  %v881_v2 = vpop.f32.mrf.mxu0  ;;  %v19106_v16 = vld [vmem:[#allocation13_spill] sm:$0xff] }
 0x320   : > { %19071 = vst [vmem:[#allocation141_spill] sm:$0xff] %v13811_v6  ;;  %19072 = vst [vmem:[#allocation142_spill] sm:$0xff] %v13819_v30  ;;  %v13821_v37 = vadd.s32 %v3871_v61, %v3867_v18  ;;  %v4035_v40 = vshll.u32 %v18821_v13, %v4032_v19  ;;  %v9058_v1 = vadd.s32 4294967169, %v4125_v46  ;;  %v862_v32 = vadd.f32 %v13617_v11, %v19073_v15  ;;  %v1090_v12 = vpop.f32.mrf.mxu1 }
 0x321   : > { %v4038_v57 = vshll.u32 %v18842_v47, %v4032_v19  ;;  %v4042_v61 = vshrl.u32 %v18852_v63, %v4033_v35  ;;  %v4045_v18 = vshrl.u32 %v18840_v60, %v4033_v35  ;;  %v864_v10 = vadd.f32 %v13648_v56, %v19073_v15 }
 0x322   : > { %v4041_v41 = vshll.u32 %v18843_v42, %v4032_v19  ;;  %v4044_v29 = vshll.u32 %v18852_v63, %v4032_v19  ;;  %v13840_v46 = vshrl.u32 %v18864_v28, %v4033_v35  ;;  %v1073_v11 = vadd.f32 %v13676_v25, %v19073_v15 }
 0x323   : > { %v4034_v55 = vshrl.u32 %v18821_v13, %v4033_v35  ;;  %v13845_v4 = vor.u32 %v4036_v9, %v4035_v40  ;;  %v13847_v50 = vor.u32 %v4039_v52, %v4038_v57  ;;  %v868_v56 = vadd.f32 %v13687_v3, %v19074_v45 }
 0x324   : > { %v13852_v59 = vshll.u32 %v18840_v60, %v4032_v19  ;;  %v4131_v20 = vadd.s32 1, %v9058_v1  ;;  %v2789_v48 = vmul.f32 %v862_v32, %v862_v32  ;;  %v882_v27 = vadd.f32 %v881_v2, %v19075_v8 }
 0x325   : > { %v13855_v23 = vor.u32 %v4042_v61, %v4041_v41  ;;  %v13857_v25 = vor.u32 %v4045_v18, %v4044_v29  ;;  %v2790_v35 = vmul.f32 %v864_v10, %v864_v10  ;;  %v1077_v9 = vadd.f32 %v13714_v17, %v19074_v45  ;;  %v19076_v18 = vld [vmem:[#allocation42_spill] sm:$0xff] }
 0x326   : > { %vm18558_vm10 = vcmp.lt.s32.totalorder %v13827_v24, 1  ;;  %v2792_v3 = vmul.f32 %v1073_v11, %v1073_v11  ;;  %v870_v19 = vadd.f32 %v13722_v36, %v19074_v45  ;;  %vm4053_vm8 = vcmp.lt.s32.totalorder %v13827_v24, 4 }
 0x327   : > { %v13870_v29 = vsel %vm18558_vm10, %v4034_v55, %v13845_v4  ;;  %v2793_v10 = vmul.f32 %v868_v56, %v868_v56  ;;  %v1091_v40 = vadd.f32 %v1090_v12, %v19075_v8  ;;  %vm4132_vm5 = vcmp.gt.s32.totalorder %v4131_v20, 0 }
 0x328   : > { %v2805_v17 = vsub.f32 0.0, %v2789_v48  ;;  %v1079_v1 = vadd.f32 %v13744_v53, %v19074_v45  ;;  %v2802_v32 = vmul.f32 %v882_v27, %v882_v27  ;;  %v13878_v36 = vsel %vm4053_vm8, %v13855_v23, 2102212464 }
 0x329   : > { %v2806_v57 = vsub.f32 0.0, %v2790_v35  ;;  %v2795_v61 = vmul.f32 %v1077_v9, %v1077_v9  ;;  %v874_v55 = vadd.f32 %v13757_v38, %v19076_v18  ;;  %v4330_v2 = vand.u32 2139095040, %v13819_v30 }
 0x32a   : > { %v2808_v41 = vsub.f32 0.0, %v2792_v3  ;;  %v2794_v12 = vmul.f32 %v870_v19, %v870_v19  ;;  %v880_v48 = vadd.f32 %v879_v22, %v19075_v8  ;;  %v13884_v11 = vsel %vm4132_vm5, %v4131_v20, 0 }
 0x32b   : > { %v2809_v45 = vsub.f32 0.0, %v2793_v10  ;;  %v1083_v27 = vadd.f32 %v13778_v33, %v19076_v18  ;;  %v2804_v53 = vmul.f32 %v1091_v40, %v1091_v40  ;;  %v2821_v56 = vmul.f32 1.442695, %v2805_v17 }
 0x32c   : > { %v2796_v52 = vmul.f32 %v1079_v1, %v1079_v1  ;;  %v876_v35 = vadd.f32 %v13786_v26, %v19076_v18  ;;  %v2818_v9 = vsub.f32 0.0, %v2802_v32  ;;  %v2823_v38 = vmul.f32 1.442695, %v2806_v57 }
 0x32d   : > { %v2811_v43 = vsub.f32 0.0, %v2795_v61  ;;  %v2797_v62 = vmul.f32 %v874_v55, %v874_v55  ;;  %v1089_v3 = vadd.f32 %v1088_v0, %v19075_v8  ;;  %v2827_v19 = vmul.f32 1.442695, %v2808_v41 }
 0x32e   : > { %v2810_v22 = vsub.f32 0.0, %v2794_v12  ;;  %v1085_v20 = vadd.f32 %v13801_v7, %v19076_v18  ;;  %v2801_v10 = vmul.f32 %v880_v48, %v880_v48  ;;  %vm18559_vm0 = vcmp.lt.s32.totalorder %v13827_v24, 3 }
 0x32f   : > { %v1071_v33 = vadd.f32 %v13642_v49, %v19073_v15  ;;  %v2829_v40 = vmul.f32 1.442695, %v2809_v45  ;;  %v2799_v17 = vmul.f32 %v1083_v27, %v1083_v27  ;;  %v2820_v26 = vsub.f32 0.0, %v2804_v53 }
 0x330   : > { %9563 = vpow2.f32 %v2821_v56  ;;  %v2812_v1 = vsub.f32 0.0, %v2796_v52  ;;  %v2798_v32 = vmul.f32 %v876_v35, %v876_v35  ;;  %v2847_v57 = vmul.f32 1.442695, %v2818_v9 }
 0x331   : > { %9565 = vpow2.f32 %v2823_v38  ;;  %v2833_v8 = vmul.f32 1.442695, %v2811_v43  ;;  %v2813_v0 = vsub.f32 0.0, %v2797_v62  ;;  %v2803_v61 = vmul.f32 %v1089_v3, %v1089_v3 }
 0x332   : > { %9567 = vpow2.f32 %v2827_v19  ;;  %v2831_v55 = vmul.f32 1.442695, %v2810_v22  ;;  %v2800_v7 = vmul.f32 %v1085_v20, %v1085_v20  ;;  %v2817_v18 = vsub.f32 0.0, %v2801_v10 }
 0x333   : > { %v4331_v41 = vshrl.u32 %v4330_v2, 23  ;;  %9569 = vpow2.f32 %v2829_v40  ;;  %v2815_v12 = vsub.f32 0.0, %v2799_v17  ;;  %v2851_v48 = vmul.f32 1.442695, %v2820_v26 }
 0x334   : > { %v4059_v49 = vsel %vm4053_vm8, %v13857_v25, 920167782  ;;  %v2835_v15 = vmul.f32 1.442695, %v2812_v1  ;;  %v2814_v52 = vsub.f32 0.0, %v2798_v32  ;;  %9571 = vpow2.f32 %v2847_v57  ;;  %v9909_v32 = vld [vmem:[%s10114_s27 + $0x68] sm:$0xff] }
 0x335   : > { %v2791_v45 = vmul.f32 %v1071_v33, %v1071_v33  ;;  %9573 = vpow2.f32 %v2833_v8  ;;  %v2837_v43 = vmul.f32 1.442695, %v2813_v0  ;;  %v2819_v62 = vsub.f32 0.0, %v2803_v61  ;;  %v19082_v0 = vld [vmem:[#allocation101_spill] sm:$0xff] }
 0x336   : > { %v13900_v27 = vand.u32 31, %v13884_v11  ;;  %9575 = vpow2.f32 %v2831_v55  ;;  %v2816_v53 = vsub.f32 0.0, %v2800_v7  ;;  %v2845_v2 = vmul.f32 1.442695, %v2817_v18  ;;  %v19084_v18 = vld [vmem:[#allocation38_spill] sm:$0xff] }
 0x337   : > { %v13906_v56 = vsel %vm18558_vm10, %v13845_v4, %v13847_v50  ;;  %v9066_v35 = vadd.s32 4294967169, %v4331_v41  ;;  %v2841_v9 = vmul.f32 1.442695, %v2815_v12  ;;  %9577 = vpow2.f32 %v2851_v48 }
 0x338   : > { %v13911_v38 = vsel %vm18559_vm0, %v13855_v23, %v4059_v49  ;;  %v13915_v3 = vadd.f32 %v13333_v39, %v19057_v58  ;;  %9579 = vpow2.f32 %v2835_v15  ;;  %v2839_v19 = vmul.f32 1.442695, %v2814_v52 }
 0x339   : > { %v2807_v22 = vsub.f32 0.0, %v2791_v45  ;;  %9581 = vpow2.f32 %v2837_v43  ;;  %v2849_v20 = vmul.f32 1.442695, %v2819_v62  ;;  %v2569_v4 = vsel %vm12911_vm6, 0, %v12989_v54  ;;  %v19079_v54 = vld [vmem:[#allocation85_spill] sm:$0xff]  ;;  %v19086_v43 = vld [vmem:[#allocation44_spill] sm:$0xff] }
 0x33a   : > { %19077 = vst [vmem:[#allocation45_spill] sm:$0xff] %v13915_v3  ;;  %v19078_v10 = vor.u32 %v13840_v46, %v13852_v59  ;;  %v13928_v40 = vsub.s32 32, %v13900_v27  ;;  %v2843_v39 = vmul.f32 1.442695, %v2816_v53  ;;  %9583 = vpow2.f32 %v2845_v2  ;;  %v19080_v46 = vld [vmem:[#allocation95_spill] sm:$0xff]  ;;  %v19088_v2 = vld [vmem:[#allocation33_spill] sm:$0xff] }
 0x33b   : > { %v13930_v17 = vadd.s32 1, %v9066_v35  ;;  %9585 = vpow2.f32 %v2841_v9  ;;  %v2573_v26 = vand.u32 3, %v2569_v4  ;;  %v2576_v1 = vxor.u32 2147483648, %v13280_v31  ;;  %v19087_v62 = vld [vmem:[#allocation99_spill] sm:$0xff] }
 0x33c   : > { %v13925_v33 = vsel %vm4053_vm8, %v19078_v10, 1326507024  ;;  %9587 = vpow2.f32 %v2839_v19  ;;  %v2579_v59 = vxor.u32 2147483648, %v19079_v54  ;;  %v2775_v57 = vsel %vm13149_vm13, 0, %v19080_v46  ;;  %v19089_v19 = vld [vmem:[#allocation75_spill] sm:$0xff] }
 0x33d   : > { %v13938_v8 = vpop.eup %9563  ;;  %v13942_v61 = vadd.f32 %v19082_v0, %v19057_v58  ;;  %v13944_v55 = vmul.f32 1.442695, %v2807_v22  ;;  %9589 = vpow2.f32 %v2849_v20  ;;  %vm2575_vm6 = vcmp.eq.s32.totalorder %v2573_v26, 0  ;;  %v19085_v58 = vld [vmem:[#allocation100_spill] sm:$0xff] }
 0x33e   : > { %v13946_v7 = vpop.eup %9565  ;;  %9591 = vpow2.f32 %v2843_v39  ;;  %vm2572_vm11 = vweird.f32 %v19084_v18  ;;  %v2577_v41 = vsel %vm2575_vm6, %v19079_v54, %v2576_v1  ;;  %vm2578_vm9 = vcmp.eq.s32.totalorder %v2573_v26, 2  ;;  %v19091_v54 = vld [vmem:[#allocation79_spill] sm:$0xff]  ;;  %v19092_v18 = vld [vmem:[#allocation29_spill] sm:$0xff] }
 0x33f   : > { %19083 = vst [vmem:[#allocation68_spill] sm:$0xff] %v13942_v61  ;;  %v13950_v12 = vpop.eup %9567  ;;  %vm2574_vm13 = vcmp.lt.s32.totalorder %v2573_v26, 2  ;;  %v2580_v48 = vsel %vm2578_vm9, %v2579_v59, %v13280_v31  ;;  %v2779_v49 = vand.u32 3, %v2775_v57  ;;  %v2782_v15 = vxor.u32 2147483648, %v19085_v58  ;;  %v19090_v26 = vld [vmem:[#allocation80_spill] sm:$0xff] }
 0x340   : > { %v13954_v52 = vpop.eup %9569  ;;  %v2581_v45 = vsel %vm2574_vm13, %v2577_v41, %v2580_v48  ;;  %vm2778_vm8 = vweird.f32 %v19086_v43  ;;  %v2785_v53 = vxor.u32 2147483648, %v19087_v62  ;;  %vm2469_vm5 = vweird.f32 %v19088_v2 }
 0x341   : > { %v9572_v35 = vpop.eup %9571  ;;  %v2582_v9 = vsel %vm2572_vm11, nan, %v2581_v45  ;;  %vm2781_vm6 = vcmp.eq.s32.totalorder %v2779_v49, 0  ;;  %vm2784_vm10 = vcmp.eq.s32.totalorder %v2779_v49, 2  ;;  %vm2471_vm0 = vcmp.lt.s32.totalorder %v19089_v19, 2 }
 0x342   : > { %v13960_v31 = vpop.eup %9573  ;;  %v2866_v22 = vmul.f32 %v9572_v35, %v2582_v9  ;;  %vm2780_vm9 = vcmp.lt.s32.totalorder %v2779_v49, 2  ;;  %v2783_v20 = vsel %vm2781_vm6, %v19087_v62, %v2782_v15  ;;  %v2786_v4 = vsel %vm2784_vm10, %v2785_v53, %v19085_v58  ;;  %v19093_v15 = vld [vmem:[#allocation82_spill] sm:$0xff]  ;;  %v19094_v62 = vld [vmem:[#allocation84_spill] sm:$0xff]  ;;  %v19095_v35 = vld [vmem:[#allocation83_spill] sm:$0xff] }
 0x343   : > { %v13964_v10 = vpop.eup %9575  ;;  %v2787_v39 = vsel %vm2780_vm9, %v2783_v20, %v2786_v4  ;;  %vm2472_vm13 = vcmp.eq.s32.totalorder %v19089_v19, 0  ;;  %v2473_v1 = vxor.u32 2147483648, %v19090_v26  ;;  %v2476_v59 = vxor.u32 2147483648, %v19091_v54  ;;  %v9910_v20 = vld [vmem:[%s10114_s27 + $0x78] sm:$0xff] }
 0x344   : > { %v9578_v46 = vpop.eup %9577  ;;  %v2882_v57 = vadd.f32 %v9909_v32, %v2866_v22  ;;  %v2788_v0 = vsel %vm2778_vm8, nan, %v2787_v39  ;;  %vm2475_vm11 = vcmp.eq.s32.totalorder %v19089_v19, 2  ;;  %vm2675_vm10 = vweird.f32 %v19092_v18 }
 0x345   : > { %v13974_v41 = vpop.eup %9579  ;;  %v2868_v48 = vmul.f32 %v9578_v46, %v2788_v0  ;;  %v2474_v49 = vsel %vm2472_vm13, %v19091_v54, %v2473_v1  ;;  %v2477_v58 = vsel %vm2475_vm11, %v2476_v59, %v19090_v26  ;;  %vm2677_vm6 = vcmp.lt.s32.totalorder %v19093_v15, 2  ;;  %v19096_v26 = vld [vmem:[#allocation58_spill] sm:$0xff]  ;;  %v9912_v1 = vld [vmem:[%s10114_s27 + $0x70] sm:$0xff] }
 0x346   : > { %v13979_v45 = vpop.eup %9581  ;;  %4677 = vmatprep.subr.mxu0 %v2882_v57  ;;  %v2478_v43 = vsel %vm2471_vm0, %v2474_v49, %v2477_v58  ;;  %vm2678_vm8 = vcmp.eq.s32.totalorder %v19093_v15, 0  ;;  %v2679_v53 = vxor.u32 2147483648, %v19094_v62  ;;  %v2682_v9 = vxor.u32 2147483648, %v19095_v35  ;;  %v19099_v58 = vld [vmem:[#allocation62_spill] sm:$0xff] }
 0x347   : > { %v9584_v22 = vpop.eup %9583  ;;  %v2884_v4 = vadd.f32 %v9910_v20, %v2868_v48  ;;  %v2479_v39 = vsel %vm2469_vm5, nan, %v2478_v43  ;;  %vm2681_vm9 = vcmp.eq.s32.totalorder %v19093_v15, 2  ;;  %v2157_v19 = vsel %vm12132_vm12, 0, %v19096_v26  ;;  %v19098_v48 = vld [vmem:[#allocation63_spill] sm:$0xff] }
 0x348   : > { %v13993_v54 = vpop.eup %9585  ;;  %v2865_v59 = vmul.f32 %v9584_v22, %v2479_v39  ;;  %v2680_v46 = vsel %vm2678_vm8, %v19095_v35, %v2679_v53  ;;  %v2683_v32 = vsel %vm2681_vm9, %v2682_v9, %v19094_v62  ;;  %v2161_v57 = vand.u32 3, %v2157_v19  ;;  %v19100_v20 = vld [vmem:[#allocation59_spill] sm:$0xff]  ;;  %v19102_v35 = vld [vmem:[#allocation22_spill] sm:$0xff] }
 0x349   : > { %v9588_v0 = vpop.eup %9587  ;;  %4766 = vmatprep.subr.mxu1 %v2884_v4  ;;  %v2684_v2 = vsel %vm2677_vm6, %v2680_v46, %v2683_v32  ;;  %v2164_v49 = vxor.u32 2147483648, %v19098_v48  ;;  %v2167_v43 = vxor.u32 2147483648, %v19099_v58  ;;  %v2363_v26 = vsel %vm12480_vm15, 0, %v19100_v20  ;;  %v9911_v22 = vld [vmem:[%s10114_s27 + $0x60] sm:$0xff]  ;;  %v19103_v46 = vld [vmem:[#allocation78_spill] sm:$0xff] }
 0x34a   : > { %v9590_v5 = vpop.eup %9589  ;;  %v2881_v53 = vadd.f32 %v9911_v22, %v2865_v59  ;;  %v2685_v62 = vsel %vm2675_vm10, nan, %v2684_v2  ;;  %vm2160_vm12 = vweird.f32 %v19102_v35  ;;  %vm2163_vm0 = vcmp.eq.s32.totalorder %v2161_v57, 0  ;;  %v19104_v20 = vld [vmem:[#allocation71_spill] sm:$0xff] }
 0x34b   : > { %v9592_v15 = vpop.eup %9591  ;;  %v2867_v9 = vmul.f32 %v9590_v5, %v2685_v62  ;;  %vm2162_vm5 = vcmp.lt.s32.totalorder %v2161_v57, 2  ;;  %v2165_v4 = vsel %vm2163_vm0, %v19099_v58, %v2164_v49  ;;  %vm2166_vm13 = vcmp.eq.s32.totalorder %v2161_v57, 2  ;;  %v19105_v22 = vld [vmem:[#allocation31_spill] sm:$0xff]  ;;  %v19107_v57 = vld [vmem:[#allocation41_spill] sm:$0xff] }
 0x34c   : > { %4678 = vmatpush1.msra.mxu0 %v2881_v53  ;;  %v2168_v39 = vsel %vm2166_vm13, %v2167_v43, %v19098_v48  ;;  %v2367_v19 = vand.u32 3, %v2363_v26  ;;  %v2370_v32 = vxor.u32 2147483648, %v19103_v46  ;;  %v2373_v59 = vxor.u32 2147483648, %v19104_v20  ;;  %v19108_v26 = vld [vmem:[#allocation56_spill] sm:$0xff]  ;;  %v19109_v62 = vld [vmem:[#allocation53_spill] sm:$0xff] }
 0x34d   : > { %v2883_v18 = vadd.f32 %v9912_v1, %v2867_v9  ;;  %v2169_v2 = vsel %vm2162_vm5, %v2165_v4, %v2168_v39  ;;  %vm2366_vm15 = vweird.f32 %v19105_v22  ;;  %vm2057_vm11 = vweird.f32 %v19106_v16  ;;  %v9913_v9 = vld [vmem:[%s10114_s27 + $0x48] sm:$0xff]  ;;  %v19112_v1 = vld [vmem:[#allocation61_spill] sm:$0xff] }
 0x34e   : > { %v2170_v5 = vsel %vm2160_vm12, nan, %v2169_v2  ;;  %vm2369_vm10 = vcmp.eq.s32.totalorder %v2367_v19, 0  ;;  %vm2372_vm6 = vcmp.eq.s32.totalorder %v2367_v19, 2  ;;  %vm2059_vm8 = vcmp.lt.s32.totalorder %v19107_v57, 2  ;;  %v19113_v2 = vld [vmem:[#allocation57_spill] sm:$0xff] }
 0x34f   : > { %4767 = vmatpush1.msra.mxu1 %v2883_v18  ;;  %v2862_v48 = vmul.f32 %v9588_v0, %v2170_v5  ;;  %vm2368_vm9 = vcmp.lt.s32.totalorder %v2367_v19, 2  ;;  %v2371_v49 = vsel %vm2369_vm10, %v19104_v20, %v2370_v32  ;;  %v2374_v58 = vsel %vm2372_vm6, %v2373_v59, %v19103_v46  ;;  %v19110_v0 = vld [vmem:[#allocation19_spill] sm:$0xff]  ;;  %v19111_v20 = vld [vmem:[#allocation54_spill] sm:$0xff] }
 0x350   : > { %v2375_v43 = vsel %vm2368_vm9, %v2371_v49, %v2374_v58  ;;  %vm2060_vm0 = vcmp.eq.s32.totalorder %v19107_v57, 0  ;;  %v2061_v53 = vxor.u32 2147483648, %v19108_v26  ;;  %v2064_v35 = vxor.u32 2147483648, %v19109_v62  ;;  %v9914_v5 = vld [vmem:[%s10114_s27 + $0x58] sm:$0xff]  ;;  %v19114_v49 = vld [vmem:[#allocation37_spill] sm:$0xff] }
 0x351   : > { %v2878_v4 = vadd.f32 %v9913_v9, %v2862_v48  ;;  %v2376_v39 = vsel %vm2366_vm15, nan, %v2375_v43  ;;  %vm2063_vm12 = vcmp.eq.s32.totalorder %v19107_v57, 2  ;;  %vm2263_vm5 = vweird.f32 %v19110_v0  ;;  %v19116_v9 = vld [vmem:[#allocation47_spill] sm:$0xff] }
 0x352   : > { %v2864_v19 = vmul.f32 %v9592_v15, %v2376_v39  ;;  %v2062_v46 = vsel %vm2060_vm0, %v19109_v62, %v2061_v53  ;;  %v2065_v32 = vsel %vm2063_vm12, %v2064_v35, %v19108_v26  ;;  %vm2265_vm13 = vcmp.lt.s32.totalorder %v19111_v20, 2 }
 0x353   : > { %4679 = vmatprep.subr.mxu0 %v2878_v4  ;;  %v2066_v59 = vsel %vm2059_vm8, %v2062_v46, %v2065_v32  ;;  %vm2266_vm10 = vcmp.eq.s32.totalorder %v19111_v20, 0  ;;  %v2267_v18 = vxor.u32 2147483648, %v19112_v1  ;;  %v2270_v22 = vxor.u32 2147483648, %v19113_v2  ;;  %v19117_v4 = vld [vmem:[#allocation46_spill] sm:$0xff]  ;;  %v19127_v46 = vld [vmem:[#allocation24_spill] sm:$0xff] }
 0x354   : > { %v2880_v48 = vadd.f32 %v9914_v5, %v2864_v19  ;;  %v2067_v15 = vsel %vm2057_vm11, nan, %v2066_v59  ;;  %vm2269_vm15 = vcmp.eq.s32.totalorder %v19111_v20, 2  ;;  %v1745_v43 = vsel %vm11815_vm4, 0, %v19114_v49  ;;  %v19118_v19 = vld [vmem:[#allocation40_spill] sm:$0xff]  ;;  %v9915_v59 = vld [vmem:[%s10114_s27 + $0x40] sm:$0xff] }
 0x355   : > { %v2861_v57 = vmul.f32 %v13979_v45, %v2067_v15  ;;  %v2268_v26 = vsel %vm2266_vm10, %v19113_v2, %v2267_v18  ;;  %v2271_v53 = vsel %vm2269_vm15, %v2270_v22, %v19112_v1  ;;  %v1749_v62 = vand.u32 3, %v1745_v43  ;;  %v19120_v1 = vld [vmem:[#allocation9_spill] sm:$0xff]  ;;  %v19122_v49 = vld [vmem:[#allocation48_spill] sm:$0xff] }
 0x356   : > { %4768 = vmatprep.subr.mxu1 %v2880_v48  ;;  %v2272_v35 = vsel %vm2265_vm13, %v2268_v26, %v2271_v53  ;;  %v1752_v16 = vxor.u32 2147483648, %v19116_v9  ;;  %v1755_v39 = vxor.u32 2147483648, %v19117_v4  ;;  %v1951_v32 = vsel %vm11870_vm14, 0, %v19118_v19  ;;  %v19121_v48 = vld [vmem:[#allocation51_spill] sm:$0xff]  ;;  %v9916_v43 = vld [vmem:[%s10114_s27 + $0x50] sm:$0xff]  ;;  %v19123_v26 = vld [vmem:[#allocation10_spill] sm:$0xff] }
 0x357   : > { %v2877_v45 = vadd.f32 %v9915_v59, %v2861_v57  ;;  %v2273_v18 = vsel %vm2263_vm5, nan, %v2272_v35  ;;  %vm1748_vm4 = vweird.f32 %v19120_v1  ;;  %vm1751_vm11 = vcmp.eq.s32.totalorder %v1749_v62, 0  ;;  %v19124_v53 = vld [vmem:[#allocation7_spill] sm:$0xff]  ;;  %v9917_v59 = vld [vmem:[%s10114_s27 + $0x28] sm:$0xff] }
 0x358   : > { %v2863_v20 = vmul.f32 %v13993_v54, %v2273_v18  ;;  %vm1750_vm6 = vcmp.lt.s32.totalorder %v1749_v62, 2  ;;  %v1753_v2 = vsel %vm1751_vm11, %v19117_v4, %v1752_v16  ;;  %vm1754_vm8 = vcmp.eq.s32.totalorder %v1749_v62, 2  ;;  %v19125_v62 = vld [vmem:[#allocation34_spill] sm:$0xff] }
 0x359   : > { %4680 = vmatpush1.msra.mxu0 %v2877_v45  ;;  %v1756_v22 = vsel %vm1754_vm8, %v1755_v39, %v19116_v9  ;;  %v1955_v5 = vand.u32 3, %v1951_v32  ;;  %v1958_v15 = vxor.u32 2147483648, %v19121_v48  ;;  %v1961_v58 = vxor.u32 2147483648, %v19122_v49  ;;  %v19126_v39 = vld [vmem:[#allocation26_spill] sm:$0xff] }
 0x35a   : > { %v2879_v0 = vadd.f32 %v9916_v43, %v2863_v20  ;;  %v1757_v57 = vsel %vm1750_vm6, %v1753_v2, %v1756_v22  ;;  %vm1954_vm14 = vweird.f32 %v19123_v26  ;;  %vm1645_vm9 = vweird.f32 %v19124_v53  ;;  %v19129_v22 = vld [vmem:[#allocation17_spill] sm:$0xff]  ;;  %v9918_v43 = vld [vmem:[%s10114_s27 + $0x38] sm:$0xff] }
 0x35b   : > { %v1758_v54 = vsel %vm1748_vm4, nan, %v1757_v57  ;;  %vm1957_vm0 = vcmp.eq.s32.totalorder %v1955_v5, 0  ;;  %vm1960_vm12 = vcmp.eq.s32.totalorder %v1955_v5, 2  ;;  %vm1647_vm5 = vcmp.lt.s32.totalorder %v19125_v62, 2  ;;  %v19132_v57 = vld [vmem:[#allocation16_spill] sm:$0xff] }
 0x35c   : > { %4769 = vmatpush1.msra.mxu1 %v2879_v0  ;;  %v2858_v35 = vmul.f32 %v13964_v10, %v1758_v54  ;;  %vm1956_vm13 = vcmp.lt.s32.totalorder %v1955_v5, 2  ;;  %v1959_v9 = vsel %vm1957_vm0, %v19122_v49, %v1958_v15  ;;  %v1962_v16 = vsel %vm1960_vm12, %v1961_v58, %v19121_v48  ;;  %v19128_v10 = vld [vmem:[#allocation8_spill] sm:$0xff]  ;;  %v19130_v48 = vld [vmem:[#allocation43_spill] sm:$0xff] }
 0x35d   : > { %v1963_v4 = vsel %vm1956_vm13, %v1959_v9, %v1962_v16  ;;  %vm1648_vm10 = vcmp.eq.s32.totalorder %v19125_v62, 0  ;;  %v1649_v19 = vxor.u32 2147483648, %v19126_v39  ;;  %v1652_v32 = vxor.u32 2147483648, %v19127_v46  ;;  %v19131_v49 = vld [vmem:[#allocation36_spill] sm:$0xff] }
 0x35e   : > { %v2874_v45 = vadd.f32 %v9917_v59, %v2858_v35  ;;  %v1964_v18 = vsel %vm1954_vm14, nan, %v1963_v4  ;;  %vm1651_vm15 = vcmp.eq.s32.totalorder %v19125_v62, 2  ;;  %vm1851_vm4 = vweird.f32 %v19128_v10  ;;  %v9920_v10 = vld [vmem:[%s10114_s27 + $0x30] sm:$0xff]  ;;  %v19145_v59 = vld [vmem:[#allocation11_spill] sm:$0xff] }
 0x35f   : > { %v2860_v1 = vmul.f32 %v13974_v41, %v1964_v18  ;;  %v1650_v20 = vsel %vm1648_vm10, %v19127_v46, %v1649_v19  ;;  %v1653_v2 = vsel %vm1651_vm15, %v1652_v32, %v19126_v39  ;;  %vm1853_vm11 = vcmp.lt.s32.totalorder %v19129_v22, 2  ;;  %v19134_v39 = vld [vmem:[#allocation30_spill] sm:$0xff]  ;;  %v19135_v19 = vld [vmem:[#allocation28_spill] sm:$0xff]  ;;  %v19136_v32 = vld [vmem:[#allocation23_spill] sm:$0xff] }
 0x360   : > { %4681 = vmatprep.subr.mxu0 %v2874_v45  ;;  %v1654_v5 = vsel %vm1647_vm5, %v1650_v20, %v1653_v2  ;;  %vm1854_vm6 = vcmp.eq.s32.totalorder %v19129_v22, 0  ;;  %v1855_v15 = vxor.u32 2147483648, %v19130_v48  ;;  %v1858_v58 = vxor.u32 2147483648, %v19131_v49 }
 0x361   : > { %v2876_v0 = vadd.f32 %v9918_v43, %v2860_v1  ;;  %v1655_v41 = vsel %vm1645_vm9, nan, %v1654_v5  ;;  %vm1857_vm8 = vcmp.eq.s32.totalorder %v19129_v22, 2  ;;  %v1333_v54 = vsel %vm11126_vm7, 0, %v19132_v57  ;;  %v19140_v43 = vld [vmem:[#allocation5_spill] sm:$0xff] }
 0x362   : > { %v2857_v62 = vmul.f32 %v13954_v52, %v1655_v41  ;;  %v1856_v35 = vsel %vm1854_vm6, %v19131_v49, %v1855_v15  ;;  %v1859_v9 = vsel %vm1857_vm8, %v1858_v58, %v19130_v48  ;;  %v1337_v16 = vand.u32 3, %v1333_v54  ;;  %v9919_v52 = vld [vmem:[%s10114_s27 + $0x20] sm:$0xff]  ;;  %v19138_v48 = vld [vmem:[#allocation25_spill] sm:$0xff] }
 0x363   : > { %4770 = vmatprep.subr.mxu1 %v2876_v0  ;;  %v1860_v4 = vsel %vm1853_vm11, %v1856_v35, %v1859_v9  ;;  %v1340_v53 = vxor.u32 2147483648, %v19134_v39  ;;  %v1343_v46 = vxor.u32 2147483648, %v19135_v19  ;;  %v1539_v45 = vsel %vm11446_vm2, 0, %v19136_v32  ;;  %v19142_v35 = vld [vmem:[#allocation6_spill] sm:$0xff] }
 0x364   : > { %9593 = vpow2.f32 %v13944_v55  ;;  %v2873_v18 = vadd.f32 %v9919_v52, %v2857_v62  ;;  %v1861_v1 = vsel %vm1851_vm4, nan, %v1860_v4  ;;  %vm1339_vm7 = vcmp.eq.s32.totalorder %v1337_v16, 0  ;;  %v19139_v55 = vld [vmem:[#allocation18_spill] sm:$0xff] }
 0x365   : > { %v2859_v20 = vmul.f32 %v13960_v31, %v1861_v1  ;;  %vm1338_vm14 = vcmp.lt.s32.totalorder %v1337_v16, 2  ;;  %v1341_v2 = vsel %vm1339_vm7, %v19135_v19, %v1340_v53  ;;  %vm1342_vm9 = vcmp.eq.s32.totalorder %v1337_v16, 2  ;;  %v19143_v16 = vld [vmem:[#allocation15_spill] sm:$0xff]  ;;  %v9921_v19 = vld [vmem:[%s10114_s27 + $0x8] sm:$0xff] }
 0x366   : > { %4682 = vmatpush1.msra.mxu0 %v2873_v18  ;;  %v1344_v22 = vsel %vm1342_vm9, %v1343_v46, %v19134_v39  ;;  %v1543_v5 = vand.u32 3, %v1539_v45  ;;  %v1546_v15 = vxor.u32 2147483648, %v19138_v48  ;;  %v1549_v49 = vxor.u32 2147483648, %v19139_v55  ;;  %v19144_v39 = vld [vmem:[#allocation14_spill] sm:$0xff]  ;;  %v19146_v18 = vld [vmem:[#allocation3_spill] sm:$0xff] }
 0x367   : > { %vm4051_vm2 = vcmp.lt.s32.totalorder %v13827_v24, 2  ;;  %vm4338_vm0 = vcmp.gt.s32.totalorder %v13930_v17, 0  ;;  %v2875_v58 = vadd.f32 %v9920_v10, %v2859_v20  ;;  %vm1336_vm12 = vweird.f32 %v19140_v43  ;;  %v19147_v20 = vld [vmem:[#allocation27_spill] sm:$0xff] }
 0x368   : > { %v1345_v31 = vsel %vm1338_vm14, %v1341_v2, %v1344_v22  ;;  %v19141_v0 = vand.u32 2139095040, %v13915_v3  ;;  %vm1545_vm5 = vcmp.eq.s32.totalorder %v1543_v5, 0  ;;  %vm1548_vm13 = vcmp.eq.s32.totalorder %v1543_v5, 2  ;;  %v19148_v22 = vld [vmem:[#allocation21_spill] sm:$0xff] }
 0x369   : > { %v1346_v57 = vsel %vm1336_vm12, nan, %v1345_v31  ;;  %4771 = vmatpush1.msra.mxu1 %v2875_v58  ;;  %vm1544_vm10 = vcmp.lt.s32.totalorder %v1543_v5, 2  ;;  %v1547_v54 = vsel %vm1545_vm5, %v19139_v55, %v1546_v15  ;;  %v1550_v62 = vsel %vm1548_vm13, %v1549_v49, %v19138_v48  ;;  %v9922_v48 = vld [vmem:[%s10114_s27 + $0x18] sm:$0xff]  ;;  %v19149_v49 = vld [vmem:[#allocation12_spill] sm:$0xff] }
 0x36a   : > { %v4228_v41 = vshrl.u32 %v19141_v0, 23  ;;  %v2854_v26 = vmul.f32 %v13946_v7, %v1346_v57  ;;  %vm1542_vm15 = vweird.f32 %v19142_v35  ;;  %v1551_v9 = vsel %vm1544_vm10, %v1547_v54, %v1550_v62  ;;  %v19150_v0 = vld [vmem:[#allocation4_spill] sm:$0xff]  ;;  %v9923_v62 = vld [vmem:[%s10114_s27] sm:$0xff] }
 0x36b   : > { %v1237_v4 = vxor.u32 2147483648, %v19143_v16  ;;  %v1240_v53 = vxor.u32 2147483648, %v19144_v39  ;;  %v1552_v32 = vsel %vm1542_vm15, nan, %v1551_v9  ;;  %vm1236_vm4 = vcmp.eq.s32.totalorder %v19145_v59, 0  ;;  %v4613_v35 = vld [vmem:[%s18342_s3] sm:$0xff] }
 0x36c   : > { %v2870_v46 = vadd.f32 %v9921_v19, %v2854_v26  ;;  %vm1239_vm11 = vcmp.eq.s32.totalorder %v19145_v59, 2  ;;  %v2856_v7 = vmul.f32 %v13950_v12, %v1552_v32  ;;  %vm1235_vm6 = vcmp.lt.s32.totalorder %v19145_v59, 2 }
 0x36d   : > { %v1238_v45 = vsel %vm1236_vm4, %v19144_v39, %v1237_v4  ;;  %v1241_v52 = vsel %vm1239_vm11, %v1240_v53, %v19143_v16  ;;  %vm1233_vm8 = vweird.f32 %v19146_v18  ;;  %v1443_v2 = vxor.u32 2147483648, %v19147_v20  ;;  %v4614_v18 = vld [vmem:[%s18342_s3 + $0x8] sm:$0xff] }
 0x36e   : > { %4683 = vmatprep.subr.mxu0 %v2870_v46  ;;  %v1242_v1 = vsel %vm1235_vm6, %v1238_v45, %v1241_v52  ;;  %v1446_v5 = vxor.u32 2147483648, %v19148_v22  ;;  %v2872_v15 = vadd.f32 %v9922_v48, %v2856_v7  ;;  %vm1442_vm7 = vcmp.eq.s32.totalorder %v19149_v49, 0 }
 0x36f   : > { %v1243_v55 = vsel %vm1233_vm8, nan, %v1242_v1  ;;  %vm1445_vm14 = vcmp.eq.s32.totalorder %v19149_v49, 2  ;;  %vm1441_vm9 = vcmp.lt.s32.totalorder %v19149_v49, 2  ;;  %v1444_v10 = vsel %vm1442_vm7, %v19148_v22, %v1443_v2 }
 0x370   : > { %v2853_v12 = vmul.f32 %v13938_v8, %v1243_v55  ;;  %v1447_v58 = vsel %vm1445_vm14, %v1446_v5, %v19147_v20  ;;  %v4061_v43 = vsel %vm4051_vm2, %v13906_v56, %v13911_v38  ;;  %v4433_v31 = vand.u32 2139095040, %v13942_v61  ;;  %4772 = vmatprep.subr.mxu1 %v2872_v15 }
 0x371   : > { %vm1439_vm12 = vweird.f32 %v19150_v0  ;;  %v1448_v57 = vsel %vm1441_vm9, %v1444_v10, %v1447_v58  ;;  %v9594_v26 = vpop.eup %9593  ;;  %vm19151_vm5 = vcmp.lt.s32.totalorder %v13827_v24, 3  ;;  %v14156_v54 = vsel %vm4338_vm0, %v13930_v17, 0 }
 0x372   : > { %v4056_v8 = vsel %vm19151_vm5, %v13847_v50, %v13878_v36  ;;  %v2869_v56 = vadd.f32 %v9923_v62, %v2853_v12  ;;  %v1449_v38 = vsel %vm1439_vm12, nan, %v1448_v57  ;;  %vm19152_vm13 = vcmp.lt.s32.totalorder %v13827_v24, 1  ;;  %vm19153_vm10 = vmmov %vm19151_vm5 }
 0x373   : > { %v4062_v9 = vsel %vm19152_vm13, %v13847_v50, %v13855_v23  ;;  %v4064_v36 = vsel %vm19153_vm10, %v13857_v25, %v13925_v33  ;;  %v9062_v17 = vadd.s32 4294967169, %v4228_v41  ;;  %v2855_v16 = vmul.f32 %v9594_v26, %v1449_v38  ;;  %v9924_v33 = vld [vmem:[%s10114_s27 + $0x10] sm:$0xff] }
 0x374   : > { %v14171_v4 = vmul.u32.u64.low %v13825_v34, %v4061_v43  ;;  %v14172_v39 = vmul.u32.u64.high %v13825_v34, %v4061_v43, %v14171_v4  ;;  %v19154_v53 = vand.u32 2147483647, %v13742_v14  ;;  %v4148_v46 = vshrl.u32 %v18840_v60, %v13928_v40  ;;  %4684 = vmatpush1.msra.mxu0 %v2869_v56 }
 0x375   : > { %v14182_v23 = vadd.s32 536870912, %v13821_v37  ;;  %v14185_v50 = vand.u32 31, %v14156_v54  ;;  %v4434_v25 = vshrl.u32 %v4433_v31, 23  ;;  %v2871_v41 = vadd.f32 %v9924_v33, %v2855_v16  ;;  %v4615_v31 = vld [vmem:[%s18342_s3 + $0x10] sm:$0xff] }
 0x376   : > { %v14177_v19 = vand.u32 8388607, %v19154_v53  ;;  %vm19155_vm0 = vcmask 261120   ;;  %v14192_v32 = vsel %vm4051_vm2, %v13870_v29, %v4056_v8  ;;  %v14196_v59 = vsel %vm4051_vm2, %v4062_v9, %v4064_v36 }
 0x377   : > { %9074 = vmatmul.mubr.msk.f32.vlgmr.msra.gmra.mxu0 %vm19155_vm0, %v4613_v35  ;;  %v4139_v7 = vshrl.u32 %v18842_v47, %v13928_v40  ;;  %v4147_v45 = vshll.u32 %v18852_v63, %v13900_v27  ;;  %v19156_v52 = vmov 0.0   ;;  %v14207_v1 = vshrl.u32 %v13884_v11, 5  ;;  %4773 = vmatpush1.msra.mxu1 %v2871_v41  ;;  %vm19157_vm2 = vmmov %vm19155_vm0 }
 0x378   : > { %4723 = vmatprep.mubr.f32.mxu0 %v19156_v52  ;;  %v4142_v24 = vshrl.u32 %v18843_v42, %v13928_v40  ;;  %v4145_v29 = vshrl.u32 %v18852_v63, %v13928_v40  ;;  %v4234_v20 = vadd.s32 1, %v9062_v17  ;;  %v4138_v2 = vshll.u32 %v18821_v13, %v13900_v27  ;;  %9078 = vmatmul.mubr.msk.f32.vlgmr.msra.gmra.mxu1 %vm19157_vm2, %v4613_v35  ;;  %vm19158_vm15 = vmmov %vm19155_vm0  ;;  %v4616_v17 = vld [vmem:[%s18342_s3 + $0x18] sm:$0xff] }
 0x379   : > { %v4149_v22 = vor.u32 %v4148_v46, %v4147_v45  ;;  %v4151_v5 = vshrl.u32 %v18864_v28, %v13928_v40  ;;  %v18561_v48 = vand.u32 2147483647, %v13819_v30  ;;  %v4141_v11 = vshll.u32 %v18842_v47, %v13900_v27  ;;  %4812 = vmatprep.mubr.f32.mxu1 %v19156_v52  ;;  %vm19159_vm6 = vmmov %vm19155_vm0 }
 0x37a   : > { %v4144_v15 = vshll.u32 %v18843_v42, %v13900_v27  ;;  %v14224_v55 = vsub.s32 32, %v14185_v50  ;;  %v9070_v49 = vadd.s32 4294967169, %v4434_v25  ;;  %v14234_v58 = vor.u32 %v4139_v7, %v4138_v2  ;;  %vm19160_vm8 = vmmov %vm19155_vm0 }
 0x37b   : > { %9075 = vmatmul.mubr.msk.f32.gmra.mxu0 %vm19158_vm15, %v4614_v18  ;;  %v14230_v12 = vmul.u32.u64.low %v13825_v34, %v14196_v59  ;;  %v14231_v10 = vmul.u32.u64.high %v13825_v34, %v14196_v59, %v14230_v12  ;;  %v4150_v43 = vshll.u32 %v18840_v60, %v13900_v27  ;;  %v14242_v0 = vor.u32 %v4142_v24, %v4141_v11  ;;  %vm19161_vm12 = vmmov %vm19155_vm0 }
 0x37c   : > { %4729 = vmatprep.mubr.f32.mxu0 %v19156_v52  ;;  %v14244_v57 = vor.u32 %v4145_v29, %v4144_v15  ;;  %vm4156_vm4 = vcmp.lt.s32.totalorder %v14207_v1, 4  ;;  %vm4235_vm11 = vcmp.gt.s32.totalorder %v4234_v20, 0  ;;  %v4129_v8 = vor.u32 8388608, %v14177_v19  ;;  %9079 = vmatmul.mubr.msk.f32.gmra.mxu1 %vm19159_vm6, %v4614_v18  ;;  %vm19162_vm13 = vmmov %vm19155_vm0 }
 0x37d   : > { %v4152_v62 = vor.u32 %v4151_v5, %v4150_v43  ;;  %v4162_v27 = vsel %vm4156_vm4, %v4149_v22, 920167782  ;;  %v14254_v56 = vadd.s32 1, %v14172_v39  ;;  %v4334_v38 = vand.u32 8388607, %v18561_v48  ;;  %4818 = vmatprep.mubr.f32.mxu1 %v19156_v52 }
 0x37e   : > { %v4354_v35 = vshrl.u32 %v18840_v60, %v14224_v55  ;;  %v4440_v9 = vadd.s32 1, %v9070_v49  ;;  %vm4153_vm7 = vcmp.lt.s32.totalorder %v14207_v1, 1  ;;  %vm4154_vm14 = vcmp.lt.s32.totalorder %v14207_v1, 2 }
 0x37f   : > { %9076 = vmatmul.mubr.msk.f32.gmra.mxu0 %vm19160_vm8, %v4615_v31  ;;  %vm4155_vm9 = vcmp.lt.s32.totalorder %v14207_v1, 3  ;;  %v4236_v36 = vsel %vm4235_vm11, %v4234_v20, 0  ;;  %v4161_v16 = vsel %vm4153_vm7, %v14234_v58, %v14242_v0  ;;  %v4345_v19 = vshrl.u32 %v18842_v47, %v14224_v55 }
 0x380   : > { %4735 = vmatprep.mubr.f32.mxu0 %v19156_v52  ;;  %v4163_v53 = vsel %vm4155_vm9, %v14244_v57, %v4162_v27  ;;  %v4353_v46 = vshll.u32 %v18852_v63, %v14185_v50  ;;  %v4166_v25 = vsel %vm4156_vm4, %v4152_v62, 1326507024  ;;  %v14283_v33 = vshrl.u32 %v14156_v54, 5  ;;  %9080 = vmatmul.mubr.msk.f32.gmra.mxu1 %vm19161_vm12, %v4615_v31 }
 0x381   : > { %v4348_v41 = vshrl.u32 %v18843_v42, %v14224_v55  ;;  %v4351_v59 = vshrl.u32 %v18852_v63, %v14224_v55  ;;  %v4344_v7 = vshll.u32 %v18821_v13, %v14185_v50  ;;  %v4238_v18 = vand.u32 31, %v4236_v36  ;;  %4824 = vmatprep.mubr.f32.mxu1 %v19156_v52 }
 0x382   : > { %v4355_v45 = vor.u32 %v4354_v35, %v4353_v46  ;;  %vm4441_vm5 = vcmp.gt.s32.totalorder %v4440_v9, 0  ;;  %v4347_v54 = vshll.u32 %v18842_v47, %v14185_v50  ;;  %v4350_v24 = vshll.u32 %v18843_v42, %v14185_v50 }
 0x383   : > { %9077 = vmatmul.mubr.msk.f32.gmra.mxu0 %vm19162_vm13, %v4616_v17  ;;  %v4357_v29 = vshrl.u32 %v18864_v28, %v14224_v55  ;;  %v18560_v20 = vand.u32 2147483647, %v13915_v3  ;;  %v4165_v2 = vsel %vm4153_vm7, %v14242_v0, %v14244_v57  ;;  %v4167_v5 = vsel %vm4155_vm9, %v4149_v22, %v4166_v25 }
 0x384   : > { %4921 = vmatprep.mubr.f32.mxu0 %v19156_v52  ;;  %v14308_v11 = vor.u32 %v4345_v19, %v4344_v7  ;;  %v4356_v15 = vshll.u32 %v18840_v60, %v14185_v50  ;;  %v14312_v49 = vor.u32 %v4348_v41, %v4347_v54  ;;  %v14314_v12 = vor.u32 %v4351_v59, %v4350_v24 }
 0x385   : > { %vm4362_vm10 = vcmp.lt.s32.totalorder %v14283_v33, 4  ;;  %v4442_v43 = vsel %vm4441_vm5, %v4440_v9, 0  ;;  %9081 = vmatmul.mubr.msk.f32.gmra.mxu1 %vm19155_vm0, %v4616_v17  ;;  %v14320_v31 = vsel %vm4154_vm14, %v4161_v16, %v4163_v53  ;;  %v4335_v62 = vor.u32 8388608, %v4334_v38 }
 0x386   : > { %v4368_v22 = vsel %vm4362_vm10, %v4355_v45, 920167782  ;;  %v14324_v27 = vsub.s32 32, %v4238_v18  ;;  %4992 = vmatprep.mubr.f32.mxu1 %v19156_v52  ;;  %v14329_v50 = vsel %vm4154_vm14, %v4165_v2, %v4167_v5  ;;  %v14331_v35 = vshll.u32 %v4129_v8, 8 }
 0x387   : > { %v4358_v9 = vor.u32 %v4357_v29, %v4356_v15  ;;  %v14335_v17 = vand.u32 8388607, %v18560_v20  ;;  %v4137_v38 = vshrl.u32 %v18821_v13, %v13928_v40  ;;  %vm4359_vm2 = vcmp.lt.s32.totalorder %v14283_v33, 1 }
 0x388   : > { %vm4361_vm15 = vcmp.lt.s32.totalorder %v14283_v33, 3  ;;  %v4444_v16 = vand.u32 31, %v4442_v43  ;;  %v14343_v53 = vmul.u32.u64.low %v14331_v35, %v14320_v31  ;;  %v14344_v19 = vmul.u32.u64.high %v14331_v35, %v14320_v31, %v14343_v53 }
 0x389   : > { %v4367_v8 = vsel %vm4359_vm2, %v14308_v11, %v14312_v49  ;;  %v4369_v40 = vsel %vm4361_vm15, %v14314_v12, %v4368_v22  ;;  %v14356_v46 = vmul.u32.u64.low %v14331_v35, %v14329_v50  ;;  %v14357_v25 = vmul.u32.u64.high %v14331_v35, %v14329_v50, %v14356_v46 }
 0x38a   : > { %v14360_v41 = vshll.u32 %v4335_v62, 8  ;;  %v4251_v59 = vshrl.u32 %v18840_v60, %v14324_v27  ;;  %v14367_v7 = vsel %vm4153_vm7, %v4137_v38, %v14234_v58  ;;  %vm4360_vm11 = vcmp.lt.s32.totalorder %v14283_v33, 2 }
 0x38b   : > { %v4372_v54 = vsel %vm4362_vm10, %v4358_v9, 1326507024  ;;  %v4232_v24 = vor.u32 8388608, %v14335_v17  ;;  %v14375_v29 = vsel %vm4360_vm11, %v4367_v8, %v4369_v40  ;;  %v4250_v2 = vshll.u32 %v18852_v63, %v4238_v18 }
 0x38c   : > { %v4254_v5 = vshrl.u32 %v18864_v28, %v14324_v27  ;;  %v14380_v15 = vsub.s32 32, %v4444_v16  ;;  %v4371_v58 = vsel %vm4359_vm2, %v14312_v49, %v14314_v12  ;;  %v14386_v31 = vshrl.u32 %v4236_v36, 5 }
 0x38d   : > { %v4242_v62 = vshrl.u32 %v18842_v47, %v14324_v27  ;;  %v4245_v22 = vshrl.u32 %v18843_v42, %v14324_v27  ;;  %v4373_v50 = vsel %vm4361_vm15, %v4355_v45, %v4372_v54  ;;  %v4248_v9 = vshrl.u32 %v18852_v63, %v14324_v27 }
 0x38e   : > { %v4252_v17 = vor.u32 %v4251_v59, %v4250_v2  ;;  %v4253_v38 = vshll.u32 %v18840_v60, %v4238_v18  ;;  %v14399_v8 = vmul.u32.u64.low %v14360_v41, %v14375_v29  ;;  %v14400_v36 = vmul.u32.u64.high %v14360_v41, %v14375_v29, %v14399_v8 }
 0x38f   : > { %v4241_v40 = vshll.u32 %v18821_v13, %v4238_v18  ;;  %v4244_v46 = vshll.u32 %v18842_v47, %v4238_v18  ;;  %v4247_v20 = vshll.u32 %v18843_v42, %v4238_v18  ;;  %v4457_v59 = vshrl.u32 %v18840_v60, %v14380_v15 }
 0x390   : > { %v4255_v48 = vor.u32 %v4254_v5, %v4253_v38  ;;  %vm4259_vm6 = vcmp.lt.s32.totalorder %v14386_v31, 4  ;;  %v4460_v29 = vshrl.u32 %v18864_v28, %v14380_v15  ;;  %v14420_v5 = vshrl.u32 %v4442_v43, 5 }
 0x391   : > { %v14409_v54 = vor.u32 %v4242_v62, %v4241_v40  ;;  %v14411_v2 = vor.u32 %v4245_v22, %v4244_v46  ;;  %v14416_v26 = vor.u32 %v4248_v9, %v4247_v20  ;;  %v4265_v18 = vsel %vm4259_vm6, %v4252_v17, 920167782 }
 0x392   : > { %v4456_v38 = vshll.u32 %v18852_v63, %v4444_v16  ;;  %vm4075_vm8 = vc.u32 %v14231_v10, %v14171_v4  ;;  %v4448_v62 = vshrl.u32 %v18842_v47, %v14380_v15  ;;  %v4451_v22 = vshrl.u32 %v18843_v42, %v14380_v15 }
 0x393   : > { %v4454_v20 = vshrl.u32 %v18852_v63, %v14380_v15  ;;  %v4459_v9 = vshll.u32 %v18840_v60, %v4444_v16  ;;  %vm4256_vm7 = vcmp.lt.s32.totalorder %v14386_v31, 1  ;;  %vm4258_vm12 = vcmp.lt.s32.totalorder %v14386_v31, 3 }
 0x394   : > { %v4269_v43 = vsel %vm4259_vm6, %v4255_v48, 1326507024  ;;  %v4458_v40 = vor.u32 %v4457_v59, %v4456_v38  ;;  %v4447_v46 = vshll.u32 %v18821_v13, %v4444_v16  ;;  %v4450_v45 = vshll.u32 %v18842_v47, %v4444_v16 }
 0x395   : > { %v4453_v28 = vshll.u32 %v18843_v42, %v4444_v16  ;;  %v4461_v52 = vor.u32 %v4460_v29, %v4459_v9  ;;  %v4374_v63 = vsel %vm4360_vm11, %v4371_v58, %v4373_v50  ;;  %v4264_v60 = vsel %vm4256_vm7, %v14409_v54, %v14411_v2 }
 0x396   : > { %v4266_v48 = vsel %vm4258_vm12, %v14416_v26, %v4265_v18  ;;  %v19163_v59 = vand.u32 2147483647, %v13942_v61  ;;  %v14450_v3 = vor.u32 %v4448_v62, %v4447_v46  ;;  %v14452_v47 = vor.u32 %v4451_v22, %v4450_v45 }
 0x397   : > { %v4455_v16 = vor.u32 %v4454_v20, %v4453_v28  ;;  %vm4465_vm5 = vcmp.lt.s32.totalorder %v14420_v5, 4  ;;  %v4158_v58 = vsel %vm4156_vm4, %v14244_v57, 2102212464  ;;  %v4268_v50 = vsel %vm4256_vm7, %v14411_v2, %v14416_v26 }
 0x398   : > { %v4437_v38 = vand.u32 8388607, %v19163_v59  ;;  %v4270_v29 = vsel %vm4258_vm12, %v4252_v17, %v4269_v43  ;;  %v4471_v18 = vsel %vm4465_vm5, %v4458_v40, 920167782  ;;  %vm4257_vm13 = vcmp.lt.s32.totalorder %v14386_v31, 2 }
 0x399   : > { %v14467_v45 = vmul.u32.u64.low %v14360_v41, %v4374_v63  ;;  %v14468_v28 = vmul.u32.u64.high %v14360_v41, %v4374_v63, %v14467_v45  ;;  %v4475_v57 = vsel %vm4465_vm5, %v4461_v52, 1326507024  ;;  %v4267_v62 = vsel %vm4257_vm13, %v4264_v60, %v4266_v48 }
 0x39a   : > { %v14475_v22 = vshll.u32 %v4232_v24, 8  ;;  %vm4462_vm4 = vcmp.lt.s32.totalorder %v14420_v5, 1  ;;  %vm4464_vm0 = vcmp.lt.s32.totalorder %v14420_v5, 3  ;;  %v4271_v17 = vsel %vm4257_vm13, %v4268_v50, %v4270_v29 }
 0x39b   : > { %v4438_v20 = vor.u32 8388608, %v4437_v38  ;;  %v4470_v63 = vsel %vm4462_vm4, %v14450_v3, %v14452_v47  ;;  %v4472_v52 = vsel %vm4464_vm0, %v4455_v16, %v4471_v18  ;;  %v4159_v60 = vsel %vm4155_vm9, %v14242_v0, %v4158_v58 }
 0x39c   : > { %v4364_v24 = vsel %vm4362_vm10, %v14314_v12, 2102212464  ;;  %v4474_v9 = vsel %vm4462_vm4, %v14452_v47, %v4455_v16  ;;  %v4476_v43 = vsel %vm4464_vm0, %v4458_v40, %v4475_v57  ;;  %v4343_v46 = vshrl.u32 %v18821_v13, %v14224_v55 }
 0x39d   : > { %v14501_v48 = vmul.u32.u64.low %v14475_v22, %v4267_v62  ;;  %v14502_v59 = vmul.u32.u64.high %v14475_v22, %v4267_v62, %v14501_v48  ;;  %vm4463_vm9 = vcmp.lt.s32.totalorder %v14420_v5, 2  ;;  %v4077_v0 = vsel %vm4075_vm8, %v14254_v56, %v14172_v39 }
 0x39e   : > { %v14512_v12 = vmul.u32.u64.low %v14475_v22, %v4271_v17  ;;  %v14513_v38 = vmul.u32.u64.high %v14475_v22, %v4271_v17, %v14512_v12  ;;  %v4473_v55 = vsel %vm4463_vm9, %v4470_v63, %v4472_v52  ;;  %v4363_v40 = vsel %vm4359_vm2, %v4343_v46, %v14308_v11 }
 0x39f   : > { %v4365_v58 = vsel %vm4361_vm15, %v14312_v49, %v4364_v24  ;;  %v4477_v50 = vsel %vm4463_vm9, %v4474_v9, %v4476_v43  ;;  %v14525_v29 = vshll.u32 %v4438_v20, 8  ;;  %v4160_v39 = vsel %vm4154_vm14, %v14367_v7, %v4159_v60 }
 0x3a0   : > { %vm4178_vm10 = vc.u32 %v14357_v25, %v14343_v53  ;;  %v4179_v56 = vadd.s32 1, %v14344_v19  ;;  %v4385_v11 = vadd.s32 1, %v14400_v36  ;;  %vm4384_vm2 = vc.u32 %v14468_v28, %v14399_v8 }
 0x3a1   : > { %v4261_v49 = vsel %vm4259_vm6, %v14416_v26, 2102212464  ;;  %v14540_v18 = vmul.u32.u64.low %v14525_v29, %v4473_v55  ;;  %v14541_v45 = vmul.u32.u64.high %v14525_v29, %v4473_v55, %v14540_v18  ;;  %v4366_v1 = vsel %vm4360_vm11, %v4363_v40, %v4365_v58 }
 0x3a2   : > { %v4240_v7 = vshrl.u32 %v18821_v13, %v14324_v27  ;;  %v14549_v57 = vmul.u32.u64.low %v14525_v29, %v4477_v50  ;;  %v14550_v62 = vmul.u32.u64.high %v14525_v29, %v4477_v50, %v14549_v57  ;;  %v3476_v17 = vsub.s32 4294967266, %v13805_v44 }
 0x3a3   : > { %v3672_v20 = vsub.s32 0, %v13808_v21  ;;  %v3772_v26 = vshll.u32 %v13811_v6, 30  ;;  %v19164_v63 = vmul.u32 %v13825_v34, %v14192_v32  ;;  %v4180_v33 = vsel %vm4178_vm10, %v4179_v56, %v14344_v19  ;;  %v19174_v57 = vld [vmem:[#allocation138_spill] sm:$0xff] }
 0x3a4   : > { %v4386_v60 = vsel %vm4384_vm2, %v4385_v11, %v14400_v36  ;;  %v4260_v27 = vsel %vm4256_vm7, %v4240_v7, %v14409_v54  ;;  %v4262_v24 = vsel %vm4258_vm12, %v14411_v2, %v4261_v49  ;;  %v4176_v9 = vmul.u32 %v14331_v35, %v4160_v39  ;;  %v19170_v49 = vld [vmem:[#allocation60_spill] sm:$0xff] }
 0x3a5   : > { %v14558_v52 = vadd.s32 %v4077_v0, %v19164_v63  ;;  %v4382_v43 = vmul.u32 %v14360_v41, %v4366_v1  ;;  %v4282_v34 = vadd.s32 1, %v14502_v59  ;;  %v4467_v32 = vsel %vm4465_vm5, %v4455_v16, 2102212464  ;;  %v19168_v0 = vld [vmem:[#allocation136_spill] sm:$0xff]  ;;  %v19175_v63 = vld [vmem:[#allocation66_spill] sm:$0xff] }
 0x3a6   : > { %v14574_v19 = vshrl.u32 %v13814_v51, 30  ;;  %v14577_v36 = vshrl.u32 %v14182_v23, 30  ;;  %vm4281_vm14 = vc.u32 %v14513_v38, %v14501_v48  ;;  %v4446_v54 = vshrl.u32 %v18821_v13, %v14380_v15  ;;  %v19167_v51 = vld [vmem:[#allocation140_spill] sm:$0xff] }
 0x3a7   : > { %v4079_v35 = vadd.s32 536870912, %v14558_v52  ;;  %v14584_v41 = vadd.s32 %v4180_v33, %v4176_v9  ;;  %v14586_v2 = vadd.s32 %v4386_v60, %v4382_v43  ;;  %v4263_v16 = vsel %vm4257_vm13, %v4260_v27, %v4262_v24  ;;  %v19176_v33 = vld [vmem:[#allocation98_spill] sm:$0xff]  ;;  %v19179_v27 = vld [vmem:[#allocation139_spill] sm:$0xff] }
 0x3a8   : > { %19165 = vst [vmem:[#allocation67_spill] sm:$0xff] %v14574_v19  ;;  %19166 = vst [vmem:[#allocation42_spill] sm:$0xff] %v14577_v36  ;;  %v3581_v46 = vshll.u32 %v19167_v51, 23  ;;  %v14592_v23 = vsub.s32 %v19168_v0, %v3772_v26  ;;  %v4466_v12 = vsel %vm4462_vm4, %v4446_v54, %v14450_v3  ;;  %v4468_v15 = vsel %vm4464_vm0, %v14452_v47, %v4467_v32  ;;  %v19177_v60 = vld [vmem:[#allocation134_spill] sm:$0xff]  ;;  %v19180_v43 = vld [vmem:[#allocation91_spill] sm:$0xff] }
 0x3a9   : > { %v3477_v55 = vadd.s32 127, %v3476_v17  ;;  %v9039_v40 = vmin.u32 %v3672_v20, %v13808_v21  ;;  %v4283_v58 = vsel %vm4281_vm14, %v4282_v34, %v14502_v59  ;;  %v4488_v31 = vadd.s32 1, %v14541_v45  ;;  %v19181_v34 = vld [vmem:[#allocation90_spill] sm:$0xff] }
 0x3aa   : > { %v3978_v50 = vshll.u32 %v14574_v19, 30  ;;  %v3875_v39 = vshll.u32 %v14577_v36, 30  ;;  %v4279_v56 = vmul.u32 %v14475_v22, %v4263_v16  ;;  %vm4487_vm15 = vc.u32 %v14550_v62, %v14540_v18  ;;  %v19182_v16 = vld [vmem:[#allocation137_spill] sm:$0xff] }
 0x3ab   : > { %v14608_v3 = vshrl.u32 %v4079_v35, 30  ;;  %v4182_v47 = vadd.s32 536870912, %v14584_v41  ;;  %v4388_v11 = vadd.s32 536870912, %v14586_v2  ;;  %v4469_v59 = vsel %vm4463_vm9, %v4466_v12, %v4468_v15 }
 0x3ac   : > { %v19171_v1 = vand.u32 2147483647, %v19170_v49  ;;  %v3377_v22 = vand.u32 2147483647, %v19174_v57  ;;  %v3472_v17 = vsub.s32 32, %v13805_v44  ;;  %v3775_v20 = vsub.s32 0, %v14592_v23 }
 0x3ad   : > { %19169 = vst [vmem:[#allocation85_spill] sm:$0xff] %v14608_v3  ;;  %v14623_v26 = vadd.s32 %v4283_v58, %v4279_v56  ;;  %vm18600_vm6 = vcmp.lt.s32.totalorder %v19175_v63, 0  ;;  %v19178_v5 = vshll.u32 %v19176_v33, %v19177_v60  ;;  %v3582_v9 = vor.u32 4788187, %v3581_v46  ;;  %v19192_v60 = vld [vmem:[#allocation111_spill] sm:$0xff] }
 0x3ae   : > { %vm14616_vm11 = vcmp.le.f32.partialorder %v19171_v1, 0.7853982  ;;  %v3456_v32 = vadd.s32 %v19181_v34, %v19180_v43  ;;  %v4489_v54 = vsel %vm4487_vm15, %v4488_v31, %v14541_v45  ;;  %v3478_v35 = vshll.u32 %v3477_v55, 23  ;;  %v19188_v55 = vld [vmem:[#allocation72_spill] sm:$0xff]  ;;  %v19289_v45 = vld [vmem:[#allocation135_spill] sm:$0xff] }
 0x3af   : > { %v3578_v24 = vor.u32 %v19179_v27, %v19178_v5  ;;  %v14634_v51 = vsub.s32 %v19182_v16, %v3978_v50  ;;  %v14637_v0 = vsub.s32 %v13821_v37, %v3875_v39  ;;  %v4485_v12 = vmul.u32 %v14525_v29, %v4469_v59  ;;  %v19189_v50 = vld [vmem:[#allocation108_spill] sm:$0xff] }
 0x3b0   : > { %v3674_v15 = vclz %v9039_v40  ;;  %v4081_v58 = vshll.u32 %v14608_v3, 30  ;;  %v14641_v56 = vshrl.u32 %v4182_v47, 30  ;;  %v14643_v46 = vshrl.u32 %v4388_v11, 30  ;;  %v19190_v47 = vld [vmem:[#allocation133_spill] sm:$0xff] }
 0x3b1   : > { %v19185_v1 = vand.u32 2147483647, %v19175_v63  ;;  %vm18603_vm7 = vcmp.lt.s32.totalorder %v19188_v55, 0  ;;  %v3474_v31 = vshrl.u32 %v3456_v32, %v3472_v17  ;;  %v9043_v37 = vmin.u32 %v3775_v20, %v14592_v23 }
 0x3b2   : > { %19183 = vst [vmem:[#allocation95_spill] sm:$0xff] %v14641_v56  ;;  %19184 = vst [vmem:[#allocation88_spill] sm:$0xff] %v14643_v46  ;;  %v4285_v29 = vadd.s32 536870912, %v14623_v26  ;;  %v14654_v40 = vadd.s32 %v4489_v54, %v4485_v12  ;;  %v3278_v39 = vxor.u32 2147483648, %v19189_v50  ;;  %v19191_v11 = vcvt.s32.f32 %v19190_v47  ;;  %v19197_v12 = vld [vmem:[#allocation64_spill] sm:$0xff] }
 0x3b3   : > { %vm14647_vm8 = vcmp.le.f32.partialorder %v19185_v1, 0.7853982  ;;  %v3583_v57 = vand.u32 2147483647, %v3582_v9  ;;  %v3585_v33 = vcvt.s32.f32 %v3578_v24  ;;  %v3473_v5 = vshll.u32 %v19192_v60, %v13805_v44 }
 0x3b4   : > { %v3380_v59 = vmul.f32 %v19191_v11, %v3377_v22  ;;  %v3479_v27 = vor.u32 4788187, %v3478_v35  ;;  %v3981_v43 = vsub.s32 0, %v14634_v51  ;;  %v3878_v17 = vsub.s32 0, %v14637_v0 }
 0x3b5   : > { %v9040_v20 = vadd.s32 4294967294, %v3674_v15  ;;  %v14664_v34 = vsub.s32 %v14558_v52, %v4081_v58  ;;  %v4184_v32 = vshll.u32 %v14641_v56, 30  ;;  %v4390_v54 = vshll.u32 %v14643_v46, 30  ;;  %v19198_v52 = vld [vmem:[#allocation96_spill] sm:$0xff] }
 0x3b6   : > { %v19193_v22 = vand.u32 2147483647, %v19188_v55  ;;  %v3475_v44 = vor.u32 %v3474_v31, %v3473_v5  ;;  %v3777_v9 = vclz %v9043_v37  ;;  %v14674_v35 = vshrl.u32 %v4285_v29, 30 }
 0x3b7   : > { %v4491_v16 = vadd.s32 536870912, %v14654_v40  ;;  %9595 = vsinq.f32 %v19197_v12  ;;  %v3076_v15 = vsel %vm14616_vm11, %v19170_v49, %v19198_v52  ;;  %v3381_v58 = vxor.u32 2147483648, %v3380_v59  ;;  %v19201_v52 = vld [vmem:[#allocation77_spill] sm:$0xff] }
 0x3b8   : > { %vm14670_vm12 = vcmp.le.f32.partialorder %v19193_v22, 0.7853982  ;;  %19196 = vst [vmem:[#allocation101_spill] sm:$0xff] %v14674_v35  ;;  %v3586_v1 = vmul.f32 %v3585_v33, %v3583_v57  ;;  %v3279_v47 = vsel %vm18600_vm6, %v3278_v39, %v19189_v50  ;;  %v3480_v11 = vand.u32 2147483647, %v3479_v27  ;;  %v19200_v27 = vld [vmem:[#allocation74_spill] sm:$0xff] }
 0x3b9   : > { %v9051_v31 = vmin.u32 %v3981_v43, %v14634_v51  ;;  %v9047_v37 = vmin.u32 %v3878_v17, %v14637_v0  ;;  %vm9041_vm5 = vcmp.lt.s32.totalorder %v9040_v20, 0  ;;  %v4084_v29 = vsub.s32 0, %v14664_v34 }
 0x3ba   : > { %v14689_v60 = vsub.s32 %v14584_v41, %v4184_v32  ;;  %v14692_v5 = vsub.s32 %v14586_v2, %v4390_v54  ;;  %v3482_v22 = vcvt.s32.f32 %v3475_v44  ;;  %v9044_v57 = vadd.s32 4294967294, %v3777_v9 }
 0x3bb   : > { %v4287_v33 = vshll.u32 %v14674_v35, 30  ;;  %v14695_v12 = vshrl.u32 %v4491_v16, 30  ;;  %v3282_v50 = vsel %vm14647_vm8, %v19175_v63, %v3279_v47  ;;  %v3382_v39 = vsel %vm18603_vm7, %v3381_v58, %v3380_v59 }
 0x3bc   : > { %vm18598_vm13 = vcmp.lt.s32.totalorder %v19200_v27, 0  ;;  %v3587_v41 = vxor.u32 2147483648, %v3586_v1  ;;  %v3483_v43 = vmul.f32 %v3482_v22, %v3480_v11  ;;  %v14703_v17 = vsel %vm9041_vm5, 0, %v9040_v20 }
 0x3bd   : > { %19199 = vst [vmem:[#allocation38_spill] sm:$0xff] %v14695_v12  ;;  %v3983_v2 = vclz %v9051_v31  ;;  %v3880_v32 = vclz %v9047_v37  ;;  %9597 = vcosq.f32 %v3076_v15  ;;  %v9055_v54 = vmin.u32 %v4084_v29, %v14664_v34 }
 0x3be   : > { %v4187_v44 = vsub.s32 0, %v14689_v60  ;;  %v4393_v9 = vsub.s32 0, %v14692_v5  ;;  %9599 = vsinq.f32 %v3076_v15  ;;  %vm9045_vm4 = vcmp.lt.s32.totalorder %v9044_v57, 0 }
 0x3bf   : > { %v14709_v16 = vsub.s32 %v14623_v26, %v4287_v33  ;;  %v4493_v59 = vshll.u32 %v14695_v12, 30  ;;  %9601 = vcosq.f32 %v3282_v50  ;;  %v3385_v20 = vsel %vm14670_vm12, %v19188_v55, %v3382_v39 }
 0x3c0   : > { %vm18597_vm0 = vcmp.lt.s32.totalorder %v19201_v52, 0  ;;  %v3682_v58 = vsub.s32 4294967266, %v14703_v17  ;;  %v3588_v47 = vsel %vm18598_vm13, %v3587_v41, %v3586_v1  ;;  %v3484_v11 = vxor.u32 2147483648, %v3483_v43 }
 0x3c1   : > { %v9052_v15 = vadd.s32 4294967294, %v3983_v2  ;;  %v9048_v31 = vadd.s32 4294967294, %v3880_v32  ;;  %v14719_v37 = vsel %vm9045_vm4, 0, %v9044_v57  ;;  %v4086_v26 = vclz %v9055_v54 }
 0x3c2   : > { %v9059_v29 = vmin.u32 %v4187_v44, %v14689_v60  ;;  %v9067_v22 = vmin.u32 %v4393_v9, %v14692_v5  ;;  %9603 = vsinq.f32 %v3282_v50  ;;  %v19202_v33 = vand.u32 2147483647, %v19200_v27 }
 0x3c3   : > { %v4290_v13 = vsub.s32 0, %v14709_v16  ;;  %v14731_v1 = vsub.s32 %v14654_v40, %v4493_v59  ;;  %9605 = vcosq.f32 %v3385_v20  ;;  %v19205_v41 = vand.u32 2147483647, %v19201_v52 }
 0x3c4   : > { %vm14725_vm9 = vcmp.le.f32.partialorder %v19202_v33, 0.7853982  ;;  %v19206_v50 = vmov 0  ;;  %v3683_v2 = vadd.s32 127, %v3682_v58  ;;  %v14742_v32 = vpop.eup %9595  ;;  %v3678_v54 = vsub.s32 32, %v14703_v17  ;;  %v19209_v33 = vld [vmem:[#allocation113_spill] sm:$0xff] }
 0x3c5   : > { %v3591_v57 = vsel %vm14725_vm9, %v19200_v27, %v3588_v47  ;;  %vm14738_vm10 = vcmp.le.f32.partialorder %v19205_v41, 0.7853982  ;;  %v3785_v44 = vsub.s32 4294967266, %v14719_v37  ;;  %vm9053_vm2 = vcmp.lt.s32.totalorder %v9052_v15, 0  ;;  %v19210_v41 = vld [vmem:[#allocation114_spill] sm:$0xff] }
 0x3c6   : > { %v19207_v50 = vsel %vm14738_vm10, 4294967295, %v19206_v50  ;;  %vm9049_vm14 = vcmp.lt.s32.totalorder %v9048_v31, 0  ;;  %v3485_v40 = vsel %vm18597_vm0, %v3484_v11, %v3483_v43  ;;  %v9056_v9 = vadd.s32 4294967294, %v4086_v26 }
 0x3c7   : > { %19208 = vst [vmem:[#allocation100_spill] sm:$0xff] %v19207_v50  ;;  %v4189_v59 = vclz %v9059_v29  ;;  %v4395_v47 = vclz %v9067_v22  ;;  %9607 = vsinq.f32 %v3385_v20  ;;  %v3662_v42 = vadd.s32 %v19210_v41, %v19209_v33 }
 0x3c8   : > { %v9063_v58 = vmin.u32 %v4290_v13, %v14709_v16  ;;  %v4496_v46 = vsub.s32 0, %v14731_v1  ;;  %9609 = vcosq.f32 %v3591_v57  ;;  %v3684_v12 = vshll.u32 %v3683_v2, 23 }
 0x3c9   : > { %v14752_v56 = vsel %vm9053_vm2, 0, %v9052_v15  ;;  %v14754_v35 = vsel %vm9049_vm14, 0, %v9048_v31  ;;  %v3488_v43 = vsel %vm14738_vm10, %v19201_v52, %v3485_v40  ;;  %v3679_v20 = vshll.u32 %v13808_v21, %v14703_v17  ;;  %v19212_v17 = vld [vmem:[#allocation128_spill] sm:$0xff] }
 0x3ca   : > { %v3680_v11 = vshrl.u32 %v3662_v42, %v3678_v54  ;;  %v3786_v26 = vadd.s32 127, %v3785_v44  ;;  %v3781_v29 = vsub.s32 32, %v14719_v37  ;;  %vm9057_vm15 = vcmp.lt.s32.totalorder %v9056_v9, 0  ;;  %v14762_v33 = vpop.eup %9597  ;;  %v19211_v42 = vld [vmem:[#allocation124_spill] sm:$0xff] }
 0x3cb   : > { %v9060_v13 = vadd.s32 4294967294, %v4189_v59  ;;  %v9068_v22 = vadd.s32 4294967294, %v4395_v47  ;;  %v3991_v15 = vsub.s32 4294967266, %v14752_v56  ;;  %v3888_v31 = vsub.s32 4294967266, %v14754_v35  ;;  %v14767_v40 = vpop.eup %9599 }
 0x3cc   : > { %v4292_v2 = vclz %v9063_v58  ;;  %v9071_v41 = vmin.u32 %v4496_v46, %v14731_v1  ;;  %9611 = vsinq.f32 %v3591_v57  ;;  %v3685_v21 = vor.u32 4788187, %v3684_v12  ;;  %v14771_v44 = vpop.eup %9601 }
 0x3cd   : > { %v3765_v54 = vadd.s32 %v19212_v17, %v19211_v42  ;;  %19213 = vst [vmem:[#allocation44_spill] sm:$0xff] %v14771_v44  ;;  %9613 = vcosq.f32 %v3488_v43  ;;  %v3681_v59 = vor.u32 %v3680_v11, %v3679_v20  ;;  %v3787_v47 = vshll.u32 %v3786_v26, 23  ;;  %v19215_v20 = vld [vmem:[#allocation130_spill] sm:$0xff]  ;;  %v19216_v11 = vld [vmem:[#allocation129_spill] sm:$0xff]  ;;  %v19218_v44 = vld [vmem:[#allocation132_spill] sm:$0xff] }
 0x3ce   : > { %v14774_v3 = vsel %vm9057_vm15, 0, %v9056_v9  ;;  %v3987_v58 = vsub.s32 32, %v14752_v56  ;;  %vm9061_vm5 = vcmp.lt.s32.totalorder %v9060_v13, 0  ;;  %vm9069_vm4 = vcmp.lt.s32.totalorder %v9068_v22, 0 }
 0x3cf   : > { %v3783_v19 = vshrl.u32 %v3765_v54, %v3781_v29  ;;  %v3992_v46 = vadd.s32 127, %v3991_v15  ;;  %v3889_v36 = vadd.s32 127, %v3888_v31  ;;  %v9064_v57 = vadd.s32 4294967294, %v4292_v2  ;;  %v14777_v50 = vpop.eup %9603 }
 0x3d0   : > { %v4498_v12 = vclz %v9071_v41  ;;  %19214 = vst [vmem:[#allocation99_spill] sm:$0xff] %v14777_v50  ;;  %v3686_v42 = vand.u32 2147483647, %v3685_v21  ;;  %v3782_v17 = vshll.u32 %v14592_v23, %v14719_v37  ;;  %v3971_v26 = vadd.s32 %v19216_v11, %v19215_v20  ;;  %v14784_v29 = vpop.eup %9605  ;;  %v19219_v50 = vld [vmem:[#allocation131_spill] sm:$0xff] }
 0x3d1   : > { %v4094_v9 = vsub.s32 4294967266, %v14774_v3  ;;  %19217 = vst [vmem:[#allocation33_spill] sm:$0xff] %v14784_v29  ;;  %v3788_v54 = vor.u32 4788187, %v3787_v47  ;;  %v3884_v52 = vsub.s32 32, %v14754_v35  ;;  %v14787_v15 = vsel %vm9061_vm5, 0, %v9060_v13 }
 0x3d2   : > { %v14789_v31 = vsel %vm9069_vm4, 0, %v9068_v22  ;;  %v3688_v2 = vcvt.s32.f32 %v3681_v59  ;;  %v3784_v41 = vor.u32 %v3783_v19, %v3782_v17  ;;  %v3989_v21 = vshrl.u32 %v3971_v26, %v3987_v58  ;;  %v19220_v19 = vld [vmem:[#allocation86_spill] sm:$0xff] }
 0x3d3   : > { %v3868_v23 = vadd.s32 %v19219_v50, %v19218_v44  ;;  %v3993_v37 = vshll.u32 %v3992_v46, 23  ;;  %v3890_v6 = vshll.u32 %v3889_v36, 23  ;;  %vm9065_vm2 = vcmp.lt.s32.totalorder %v9064_v57, 0 }
 0x3d4   : > { %v9072_v20 = vadd.s32 4294967294, %v4498_v12  ;;  %v14793_v11 = vpop.eup %9607  ;;  %v3988_v47 = vshll.u32 %v14634_v51, %v14752_v56  ;;  %v4095_v29 = vadd.s32 127, %v4094_v9  ;;  %v4197_v13 = vsub.s32 4294967266, %v14787_v15 }
 0x3d5   : > { %v4403_v22 = vsub.s32 4294967266, %v14789_v31  ;;  %v14799_v59 = vpop.eup %9609  ;;  %9615 = vsinq.f32 %v3488_v43  ;;  %vm18594_vm14 = vcmp.lt.s32.totalorder %v19220_v19, 0  ;;  %v3689_v50 = vmul.f32 %v3688_v2, %v3686_v42 }
 0x3d6   : > { %v3789_v44 = vand.u32 2147483647, %v3788_v54  ;;  %v3886_v36 = vshrl.u32 %v3868_v23, %v3884_v52  ;;  %v3791_v58 = vcvt.s32.f32 %v3784_v41  ;;  %v3990_v46 = vor.u32 %v3989_v21, %v3988_v47  ;;  %v19224_v21 = vld [vmem:[#allocation49_spill] sm:$0xff] }
 0x3d7   : > { %v4090_v12 = vsub.s32 32, %v14774_v3  ;;  %v14804_v17 = vsel %vm9065_vm2, 0, %v9064_v57  ;;  %v3994_v51 = vor.u32 4788187, %v3993_v37  ;;  %v3885_v56 = vshll.u32 %v14637_v0, %v14754_v35 }
 0x3d8   : > { %v3891_v26 = vor.u32 4788187, %v3890_v6  ;;  %vm9073_vm15 = vcmp.lt.s32.totalorder %v9072_v20, 0  ;;  %v4074_v43 = vadd.s32 %v14171_v4, %v14231_v10  ;;  %v4096_v9 = vshll.u32 %v4095_v29, 23 }
 0x3d9   : > { %v4198_v42 = vadd.s32 127, %v4197_v13  ;;  %v4404_v54 = vadd.s32 127, %v4403_v22  ;;  %v14810_v52 = vpop.eup %9611  ;;  %v19221_v2 = vand.u32 2147483647, %v19220_v19  ;;  %v3690_v57 = vxor.u32 2147483648, %v3689_v50 }
 0x3da   : > { %vm18593_vm4 = vcmp.lt.s32.totalorder %v19224_v21, 0  ;;  %v3792_v0 = vmul.f32 %v3791_v58, %v3789_v44  ;;  %v3887_v6 = vor.u32 %v3886_v36, %v3885_v56  ;;  %v4300_v35 = vsub.s32 4294967266, %v14804_v17  ;;  %v14820_v23 = vpop.eup %9613 }
 0x3db   : > { %vm14814_vm5 = vcmp.le.f32.partialorder %v19221_v2, 0.7853982  ;;  %19225 = vst [vmem:[#allocation75_spill] sm:$0xff] %v14820_v23  ;;  %v3997_v4 = vcvt.s32.f32 %v3990_v46  ;;  %v4092_v10 = vshrl.u32 %v4074_v43, %v4090_v12  ;;  %v4193_v29 = vsub.s32 32, %v14787_v15 }
 0x3dc   : > { %v14824_v37 = vsel %vm9073_vm15, 0, %v9072_v20  ;;  %v3995_v47 = vand.u32 2147483647, %v3994_v51  ;;  %v3892_v13 = vand.u32 2147483647, %v3891_v26  ;;  %v4091_v22 = vshll.u32 %v14664_v34, %v14774_v3 }
 0x3dd   : > { %v4399_v2 = vsub.s32 32, %v14789_v31  ;;  %v4097_v44 = vor.u32 4788187, %v4096_v9  ;;  %v4177_v36 = vadd.s32 %v14343_v53, %v14357_v25  ;;  %v4199_v58 = vshll.u32 %v4198_v42, 23 }
 0x3de   : > { %v4405_v56 = vshll.u32 %v4404_v54, 23  ;;  %v3894_v46 = vcvt.s32.f32 %v3887_v6  ;;  %v4383_v12 = vadd.s32 %v14399_v8, %v14468_v28  ;;  %v4301_v43 = vadd.s32 127, %v4300_v35 }
 0x3df   : > { %v4506_v20 = vsub.s32 4294967266, %v14824_v37  ;;  %v3691_v51 = vsel %vm18594_vm14, %v3690_v57, %v3689_v50  ;;  %v19226_v3 = vand.u32 2147483647, %v19224_v21  ;;  %v3793_v26 = vxor.u32 2147483648, %v3792_v0 }
 0x3e0   : > { %v4093_v53 = vor.u32 %v4092_v10, %v4091_v22  ;;  %v4195_v25 = vshrl.u32 %v4177_v36, %v4193_v29  ;;  %v3998_v9 = vmul.f32 %v3997_v4, %v3995_v47  ;;  %v3895_v42 = vmul.f32 %v3894_v46, %v3892_v13 }
 0x3e1   : > { %vm14838_vm2 = vcmp.le.f32.partialorder %v19226_v3, 0.7853982  ;;  %v4401_v54 = vshrl.u32 %v4383_v12, %v4399_v2  ;;  %v4296_v8 = vsub.s32 32, %v14804_v17  ;;  %v4098_v28 = vand.u32 2147483647, %v4097_v44  ;;  %v19229_v12 = vld [vmem:[#allocation93_spill] sm:$0xff] }
 0x3e2   : > { %v4194_v6 = vshll.u32 %v14689_v60, %v14787_v15  ;;  %v4200_v35 = vor.u32 4788187, %v4199_v58  ;;  %v4406_v50 = vor.u32 4788187, %v4405_v56  ;;  %v4400_v57 = vshll.u32 %v14692_v5, %v14789_v31  ;;  %v14849_v29 = vpop.eup %9615 }
 0x3e3   : > { %v4280_v3 = vadd.s32 %v14501_v48, %v14513_v38  ;;  %v4302_v23 = vshll.u32 %v4301_v43, 23  ;;  %v4507_v10 = vadd.s32 127, %v4506_v20  ;;  %v3694_v4 = vsel %vm14814_vm5, %v19220_v19, %v3691_v51  ;;  %v19230_v43 = vld [vmem:[#allocation97_spill] sm:$0xff] }
 0x3e4   : > { %v3794_v47 = vsel %vm18593_vm4, %v3793_v26, %v3792_v0  ;;  %v4100_v60 = vcvt.s32.f32 %v4093_v53  ;;  %v4196_v15 = vor.u32 %v4195_v25, %v4194_v6  ;;  %v3999_v13 = vxor.u32 2147483648, %v3998_v9  ;;  %v885_v0 = vpop.f32.mrf.mxu0 }
 0x3e5   : > { %v4402_v22 = vor.u32 %v4401_v54, %v4400_v57  ;;  %v4298_v2 = vshrl.u32 %v4280_v3, %v4296_v8  ;;  %v4502_v5 = vsub.s32 32, %v14824_v37  ;;  %v3896_v31 = vxor.u32 2147483648, %v3895_v42 }
 0x3e6   : > { %v4101_v48 = vmul.f32 %v4100_v60, %v4098_v28  ;;  %v4201_v38 = vand.u32 2147483647, %v4200_v35  ;;  %v4407_v44 = vand.u32 2147483647, %v4406_v50  ;;  %v4297_v36 = vshll.u32 %v14709_v16, %v14804_v17  ;;  %v887_v35 = vpop.f32.mrf.mxu0  ;;  %v14872_v50 = vpop.permute.xlu1 %622 }
 0x3e7   : > { %v4303_v58 = vor.u32 4788187, %v4302_v23  ;;  %v4486_v56 = vadd.s32 %v14540_v18, %v14550_v62  ;;  %v4508_v46 = vshll.u32 %v4507_v10, 23  ;;  %9617 = vcosq.f32 %v3694_v4  ;;  %v1094_v23 = vpop.f32.mrf.mxu1 }
 0x3e8   : > { %vm18595_vm15 = vcmp.lt.s32.totalorder %v19229_v12, 0  ;;  %vm18596_vm4 = vcmp.lt.s32.totalorder %v19230_v43, 0  ;;  %v4203_v20 = vcvt.s32.f32 %v4196_v15  ;;  %v3797_v51 = vsel %vm14838_vm2, %v19224_v21, %v3794_v47  ;;  %v19237_v47 = vld [vmem:[#allocation122_spill] sm:$0xff] }
 0x3e9   : > { %v4409_v26 = vcvt.s32.f32 %v4402_v22  ;;  %v4299_v53 = vor.u32 %v4298_v2, %v4297_v36  ;;  %v4504_v25 = vshrl.u32 %v4486_v56, %v4502_v5  ;;  %v4000_v16 = vsel %vm18595_vm15, %v3999_v13, %v3998_v9  ;;  %v1096_v15 = vpop.f32.mrf.mxu1 }
 0x3ea   : > { %v3897_v18 = vsel %vm18596_vm4, %v3896_v31, %v3895_v42  ;;  %v4102_v62 = vxor.u32 2147483648, %v4101_v48  ;;  %v4204_v17 = vmul.f32 %v4203_v20, %v4201_v38  ;;  %v4304_v8 = vand.u32 2147483647, %v4303_v58  ;;  %v891_v31 = vpop.f32.mrf.mxu0  ;;  %v613_v58 = vpop.permute.xlu1 %612 }
 0x3eb   : > { %v4410_v54 = vmul.f32 %v4409_v26, %v4407_v44  ;;  %v4503_v28 = vshll.u32 %v14731_v1, %v14824_v37  ;;  %v4509_v6 = vor.u32 4788187, %v4508_v46  ;;  %9619 = vsinq.f32 %v3694_v4  ;;  %v1100_v46 = vpop.f32.mrf.mxu1  ;;  %v14908_v20 = vpop.permute.xlu0 %627 }
 0x3ec   : > { %v19231_v57 = vand.u32 2147483647, %v19229_v12  ;;  %v19234_v42 = vand.u32 2147483647, %v19230_v43  ;;  %9621 = vcosq.f32 %v3797_v51  ;;  %v4306_v37 = vcvt.s32.f32 %v4299_v53 }
 0x3ed   : > { %v4505_v10 = vor.u32 %v4504_v25, %v4503_v28  ;;  %9623 = vsinq.f32 %v3797_v51  ;;  %vm18599_vm4 = vcmp.lt.s32.totalorder %v19237_v47, 0  ;;  %v4205_v60 = vxor.u32 2147483648, %v4204_v17 }
 0x3ee   : > { %vm14876_vm14 = vcmp.le.f32.partialorder %v19231_v57, 0.7853982  ;;  %vm14882_vm15 = vcmp.le.f32.partialorder %v19234_v42, 0.7853982  ;;  %v4103_v13 = vsel %vm18599_vm4, %v4102_v62, %v4101_v48  ;;  %v4411_v22 = vxor.u32 2147483648, %v4410_v54  ;;  %v19249_v57 = vld [vmem:[#allocation45_spill] sm:$0xff] }
 0x3ef   : > { %v4003_v1 = vsel %vm14876_vm14, %v19229_v12, %v4000_v16  ;;  %v3900_v4 = vsel %vm14882_vm15, %v19230_v43, %v3897_v18  ;;  %v4307_v2 = vmul.f32 %v4306_v37, %v4304_v8  ;;  %v4510_v5 = vand.u32 2147483647, %v4509_v6  ;;  %v893_v16 = vpop.f32.mrf.mxu0 }
 0x3f0   : > { %9625 = vcosq.f32 %v4003_v1  ;;  %v19238_v38 = vand.u32 2147483647, %v19237_v47  ;;  %v19239_v44 = vmov 0  ;;  %vm18602_vm13 = vcmp.lt.s32.totalorder %v13742_v14, 0 }
 0x3f1   : > { %9627 = vsinq.f32 %v4003_v1  ;;  %v4512_v36 = vcvt.s32.f32 %v4505_v10  ;;  %v4206_v56 = vsel %vm18602_vm13, %v4205_v60, %v4204_v17  ;;  %vm18601_vm4 = vcmp.lt.s32.totalorder %v13819_v30, 0  ;;  %v1102_v1 = vpop.f32.mrf.mxu1 }
 0x3f2   : > { %vm14897_vm0 = vcmp.le.f32.partialorder %v19238_v38, 0.7853982  ;;  %9629 = vcosq.f32 %v3900_v4  ;;  %v4412_v51 = vsel %vm18601_vm4, %v4411_v22, %v4410_v54  ;;  %v4308_v26 = vxor.u32 2147483648, %v4307_v2 }
 0x3f3   : > { %v19240_v44 = vsel %vm14897_vm0, 4294967295, %v19239_v44  ;;  %v4106_v48 = vsel %vm14897_vm0, %v19237_v47, %v4103_v13  ;;  %v4513_v53 = vmul.f32 %v4512_v36, %v4510_v5  ;;  %v886_v25 = vadd.f32 %v885_v0, %v613_v58  ;;  %v897_v13 = vpop.f32.mrf.mxu0 }
 0x3f4   : > { %9631 = vsinq.f32 %v3900_v4  ;;  %v19241_v18 = vand.u32 2147483647, %v13742_v14  ;;  %v19242_v62 = vmov 0  ;;  %v14918_v17 = vpop.eup %9617  ;;  %v19245_v54 = vand.u32 2147483647, %v13819_v30 }
 0x3f5   : > { %9633 = vcosq.f32 %v4106_v48  ;;  %v19246_v28 = vmov 0  ;;  %v1095_v0 = vadd.f32 %v1094_v23, %v613_v58  ;;  %vm18605_vm13 = vcmp.lt.s32.totalorder %v19249_v57, 0  ;;  %v618_v23 = vpop.permute.xlu0 %617 }
 0x3f6   : > { %vm14914_vm6 = vcmp.le.f32.partialorder %v19241_v18, 0.7853982  ;;  %vm14925_vm4 = vcmp.le.f32.partialorder %v19245_v54, 0.7853982  ;;  %9635 = vsinq.f32 %v4106_v48  ;;  %v888_v42 = vadd.f32 %v887_v35, %v613_v58  ;;  %v1106_v48 = vpop.f32.mrf.mxu1 }
 0x3f7   : > { %v19243_v62 = vsel %vm14914_vm6, 4294967295, %v19242_v62  ;;  %v4209_v8 = vsel %vm14914_vm6, %v13742_v14, %v4206_v56  ;;  %v19247_v28 = vsel %vm14925_vm4, 4294967295, %v19246_v28  ;;  %v4415_v6 = vsel %vm14925_vm4, %v13819_v30, %v4412_v51 }
 0x3f8   : > { %19244 = vst [vmem:[#allocation80_spill] sm:$0xff] %v19243_v62  ;;  %19248 = vst [vmem:[#allocation79_spill] sm:$0xff] %v19247_v28  ;;  %v4309_v37 = vsel %vm18605_vm13, %v4308_v26, %v4307_v2  ;;  %v4514_v10 = vxor.u32 2147483648, %v4513_v53  ;;  %v4533_v4 = vmul.f32 %v886_v25, %v886_v25  ;;  %v1097_v60 = vadd.f32 %v1096_v15, %v613_v58  ;;  %v14935_v22 = vpop.eup %9619 }
 0x3f9   : > { %9637 = vcosq.f32 %v4209_v8  ;;  %v19250_v5 = vand.u32 2147483647, %v19249_v57  ;;  %v19251_v38 = vmov 0  ;;  %vm18618_vm4 = vcmp.lt.s32.totalorder %v13942_v61, 0  ;;  %v14944_v36 = vpop.eup %9621 }
 0x3fa   : > { %9639 = vsinq.f32 %v4209_v8  ;;  %v4535_v35 = vmul.f32 %v1095_v0, %v1095_v0  ;;  %v4534_v2 = vmul.f32 %v888_v42, %v888_v42  ;;  %v892_v58 = vadd.f32 %v891_v31, %v618_v23  ;;  %v14949_v56 = vpop.eup %9623  ;;  %v899_v8 = vpop.f32.mrf.mxu0 }
 0x3fb   : > { %vm14939_vm7 = vcmp.le.f32.partialorder %v19250_v5, 0.7853982  ;;  %9641 = vcosq.f32 %v4415_v6  ;;  %v4515_v51 = vsel %vm18618_vm4, %v4514_v10, %v4513_v53  ;;  %v4549_v26 = vsub.f32 0.0, %v4533_v4 }
 0x3fc   : > { %v19252_v38 = vsel %vm14939_vm7, 4294967295, %v19251_v38  ;;  %v4312_v15 = vsel %vm14939_vm7, %v19249_v57, %v4309_v37  ;;  %v4536_v25 = vmul.f32 %v1097_v60, %v1097_v60  ;;  %v1101_v18 = vadd.f32 %v1100_v46, %v618_v23  ;;  %v903_v62 = vpop.f32.mrf.mxu0  ;;  %v19259_v57 = vld [vmem:[#allocation69_spill] sm:$0xff] }
 0x3fd   : > { %19253 = vst [vmem:[#allocation29_spill] sm:$0xff] %v19252_v38  ;;  %9643 = vsinq.f32 %v4415_v6  ;;  %v894_v54 = vadd.f32 %v893_v16, %v618_v23  ;;  %v14953_v0 = vpop.eup %9625  ;;  %v19255_v5 = vand.u32 2147483647, %v13942_v61  ;;  %v19256_v42 = vmov 0  ;;  %v1108_v16 = vpop.f32.mrf.mxu1 }
 0x3fe   : > { %19254 = vst [vmem:[#allocation82_spill] sm:$0xff] %v14953_v0  ;;  %9645 = vcosq.f32 %v4312_v15  ;;  %v4551_v31 = vsub.f32 0.0, %v4535_v35  ;;  %v14961_v37 = vpop.eup %9627  ;;  %v4550_v46 = vsub.f32 0.0, %v4534_v2  ;;  %v4537_v10 = vmul.f32 %v892_v58, %v892_v58 }
 0x3ff   : > { %vm14957_vm13 = vcmp.le.f32.partialorder %v19255_v5, 0.7853982  ;;  %v1103_v6 = vadd.f32 %v1102_v1, %v618_v23  ;;  %v14966_v4 = vpop.eup %9629  ;;  %v4565_v60 = vmul.f32 1.442695, %v4549_v26  ;;  %v4552_v28 = vsub.f32 0.0, %v4536_v25  ;;  %v1112_v25 = vpop.f32.mrf.mxu1 }
 0x400   : > { %v19257_v42 = vsel %vm14957_vm13, 4294967295, %v19256_v42  ;;  %v4518_v53 = vsel %vm14957_vm13, %v13942_v61, %v4515_v51  ;;  %v4539_v30 = vmul.f32 %v1101_v18, %v1101_v18  ;;  %v898_v5 = vadd.f32 %v897_v13, %v14872_v50 }
 0x401   : > { %19258 = vst [vmem:[#allocation84_spill] sm:$0xff] %v19257_v42  ;;  %9647 = vsinq.f32 %v4312_v15  ;;  %v4538_v35 = vmul.f32 %v894_v54, %v894_v54  ;;  %v1107_v38 = vadd.f32 %v1106_v48, %v14872_v50  ;;  %v14970_v14 = vpop.eup %9631  ;;  %v4569_v51 = vmul.f32 1.442695, %v4551_v31  ;;  %v905_v48 = vpop.f32.mrf.mxu0 }
 0x402   : > { %9649 = vcosq.f32 %v4518_v53  ;;  %v900_v2 = vadd.f32 %v899_v8, %v14872_v50  ;;  %v14973_v1 = vpop.eup %9633  ;;  %v4567_v23 = vmul.f32 1.442695, %v4550_v46  ;;  %v4553_v58 = vsub.f32 0.0, %v4537_v10 }
 0x403   : > { %9651 = vsinq.f32 %v4518_v53  ;;  %v4540_v26 = vmul.f32 %v1103_v6, %v1103_v6  ;;  %v14975_v18 = vpop.eup %9635  ;;  %v4571_v13 = vmul.f32 1.442695, %v4552_v28  ;;  %v4555_v15 = vsub.f32 0.0, %v4539_v30 }
 0x404   : > { %9653 = vpow2.f32 %v4565_v60  ;;  %v4541_v54 = vmul.f32 %v898_v5, %v898_v5  ;;  %v4554_v42 = vsub.f32 0.0, %v4538_v35  ;;  %v4543_v61 = vmul.f32 %v1107_v38, %v1107_v38  ;;  %v1114_v38 = vpop.f32.mrf.mxu1 }
 0x405   : > { %v1109_v31 = vadd.f32 %v1108_v16, %v14872_v50  ;;  %v2971_v8 = vsub.s32 4, %v19259_v57  ;;  %9655 = vpow2.f32 %v4569_v51  ;;  %v4542_v53 = vmul.f32 %v900_v2, %v900_v2 }
 0x406   : > { %v14979_v0 = vpop.eup %9637  ;;  %v904_v46 = vadd.f32 %v903_v62, %v14908_v20  ;;  %v1113_v10 = vadd.f32 %v1112_v25, %v14908_v20  ;;  %9657 = vpow2.f32 %v4567_v23  ;;  %v4573_v30 = vmul.f32 1.442695, %v4553_v58  ;;  %v19263_v62 = vld [vmem:[#allocation50_spill] sm:$0xff] }
 0x407   : > { %19260 = vst [vmem:[#allocation83_spill] sm:$0xff] %v14979_v0  ;;  %v14983_v6 = vpop.eup %9639  ;;  %v4556_v28 = vsub.f32 0.0, %v4540_v26  ;;  %v906_v60 = vadd.f32 %v905_v48, %v14908_v20  ;;  %9659 = vpow2.f32 %v4571_v13  ;;  %v4577_v50 = vmul.f32 1.442695, %v4555_v15 }
 0x408   : > { %19261 = vst [vmem:[#allocation58_spill] sm:$0xff] %v14983_v6  ;;  %v14986_v5 = vpop.eup %9641  ;;  %v4557_v16 = vsub.f32 0.0, %v4541_v54  ;;  %v4575_v35 = vmul.f32 1.442695, %v4554_v42  ;;  %v4559_v51 = vsub.f32 0.0, %v4543_v61  ;;  %v4544_v2 = vmul.f32 %v1109_v31, %v1109_v31  ;;  %v19268_v31 = vld [vmem:[#allocation73_spill] sm:$0xff] }
 0x409   : > { %19262 = vst [vmem:[#allocation52_spill] sm:$0xff] %v14986_v5  ;;  %vm19264_vm4 = vcmp.lt.s32.totalorder %v19263_v62, 0  ;;  %v4558_v23 = vsub.f32 0.0, %v4542_v53  ;;  %v4545_v58 = vmul.f32 %v904_v46, %v904_v46  ;;  %v4547_v26 = vmul.f32 %v1113_v10, %v1113_v10  ;;  %v19269_v53 = vld [vmem:[#allocation76_spill] sm:$0xff]  ;;  %v19273_v61 = vld [vmem:[#allocation55_spill] sm:$0xff] }
 0x40a   : > { %v2972_v25 = vsel %vm19264_vm4, %v2971_v8, %v19259_v57  ;;  %v14991_v0 = vpop.eup %9643  ;;  %v1115_v48 = vadd.f32 %v1114_v38, %v14908_v20  ;;  %9661 = vpow2.f32 %v4573_v30  ;;  %v4579_v13 = vmul.f32 1.442695, %v4556_v28 }
 0x40b   : > { %19265 = vst [vmem:[#allocation63_spill] sm:$0xff] %v14991_v0  ;;  %v14994_v6 = vpop.eup %9645  ;;  %v4546_v15 = vmul.f32 %v906_v60, %v906_v60  ;;  %9663 = vpow2.f32 %v4577_v50  ;;  %v4581_v42 = vmul.f32 1.442695, %v4557_v16  ;;  %v2974_v54 = vsel %vm13186_vm1, 0, %v2972_v25  ;;  %v19271_v25 = vld [vmem:[#allocation105_spill] sm:$0xff] }
 0x40c   : > { %19266 = vst [vmem:[#allocation62_spill] sm:$0xff] %v14994_v6  ;;  %v3177_v5 = vsub.s32 4, %v19268_v31  ;;  %9665 = vpow2.f32 %v4575_v35  ;;  %v4585_v57 = vmul.f32 1.442695, %v4559_v51  ;;  %v4560_v8 = vsub.f32 0.0, %v4544_v2  ;;  %v19272_v51 = vld [vmem:[#allocation102_spill] sm:$0xff] }
 0x40d   : > { %v3074_v46 = vsub.s32 4, %v19269_v53  ;;  %v4583_v20 = vmul.f32 1.442695, %v4558_v23  ;;  %v4561_v38 = vsub.f32 0.0, %v4545_v58  ;;  %v4563_v0 = vsub.f32 0.0, %v4547_v26 }
 0x40e   : > { %v15000_v10 = vpop.eup %9647  ;;  %v4548_v30 = vmul.f32 %v1115_v48, %v1115_v48  ;;  %9667 = vpow2.f32 %v4579_v13  ;;  %v4562_v60 = vsub.f32 0.0, %v4546_v15  ;;  %v2978_v50 = vand.u32 3, %v2974_v54 }
 0x40f   : > { %v15002_v28 = vpop.eup %9649  ;;  %9669 = vpow2.f32 %v4581_v42  ;;  %v2981_v35 = vxor.u32 2147483648, %v19271_v25  ;;  %v2984_v2 = vxor.u32 2147483648, %v19272_v51  ;;  %vm19274_vm1 = vcmp.lt.s32.totalorder %v19273_v61, 0 }
 0x410   : > { %19270 = vst [vmem:[#allocation59_spill] sm:$0xff] %v15002_v28  ;;  %v15004_v16 = vpop.eup %9651  ;;  %v3178_v6 = vsel %vm19274_vm1, %v3177_v5, %v19268_v31  ;;  %9671 = vpow2.f32 %v4585_v57  ;;  %v4587_v58 = vmul.f32 1.442695, %v4560_v8  ;;  %vm19275_vm4 = vcmp.lt.s32.totalorder %v19170_v49, 0 }
 0x411   : > { %v15011_v23 = vpop.eup %9653  ;;  %v3075_v26 = vsel %vm19275_vm4, %v3074_v46, %v19269_v53  ;;  %9673 = vpow2.f32 %v4583_v20  ;;  %v4589_v48 = vmul.f32 1.442695, %v4561_v38  ;;  %v4593_v13 = vmul.f32 1.442695, %v4563_v0  ;;  %v19278_v46 = vld [vmem:[#allocation87_spill] sm:$0xff]  ;;  %v19280_v38 = vld [vmem:[#allocation81_spill] sm:$0xff] }
 0x412   : > { %v4564_v15 = vsub.f32 0.0, %v4548_v30  ;;  %v15016_v42 = vpop.eup %9655  ;;  %v4591_v54 = vmul.f32 1.442695, %v4562_v60  ;;  %vm2980_vm13 = vcmp.eq.s32.totalorder %v2978_v50, 0  ;;  %vm2983_vm6 = vcmp.eq.s32.totalorder %v2978_v50, 2 }
 0x413   : > { %19276 = vst [vmem:[#allocation65_spill] sm:$0xff] %v15016_v42  ;;  %v3180_v5 = vsel %vm13224_vm3, 0, %v3178_v6  ;;  %v15020_v31 = vpop.eup %9657  ;;  %v2982_v57 = vsel %vm2980_vm13, %v19272_v51, %v2981_v35  ;;  %v2985_v8 = vsel %vm2983_vm6, %v2984_v2, %v19271_v25  ;;  %v3077_v53 = vsel %vm14616_vm11, 0, %v3075_v26  ;;  %v19281_v6 = vld [vmem:[#allocation94_spill] sm:$0xff] }
 0x414   : > { %v3383_v0 = vsub.s32 4, %v19278_v46  ;;  %v15027_v20 = vpop.eup %9659  ;;  %9675 = vpow2.f32 %v4587_v58  ;;  %v3280_v30 = vsub.s32 4, %v19280_v38  ;;  %v4595_v60 = vmul.f32 1.442695, %v4564_v15 }
 0x415   : > { %19279 = vst [vmem:[#allocation22_spill] sm:$0xff] %v15027_v20  ;;  %9677 = vpow2.f32 %v4589_v48  ;;  %vm2979_vm1 = vcmp.lt.s32.totalorder %v2978_v50, 2  ;;  %v3589_v28 = vsub.s32 4, %v19281_v6  ;;  %v3184_v35 = vand.u32 3, %v3180_v5  ;;  %v19283_v48 = vld [vmem:[#allocation107_spill] sm:$0xff] }
 0x416   : > { %9679 = vpow2.f32 %v4593_v13  ;;  %v2986_v42 = vsel %vm2979_vm1, %v2982_v57, %v2985_v8  ;;  %v3081_v51 = vand.u32 3, %v3077_v53  ;;  %v3084_v7 = vxor.u32 2147483648, %v14767_v40 }
 0x417   : > { %v15031_v25 = vpop.eup %9661  ;;  %9681 = vpow2.f32 %v4591_v54  ;;  %v3087_v2 = vxor.u32 2147483648, %v14762_v33  ;;  %vm19282_vm3 = vcmp.lt.s32.totalorder %v19188_v55, 0  ;;  %vm2977_vm11 = vweird.f32 %v19263_v62 }
 0x418   : > { %v3384_v58 = vsel %vm19282_vm3, %v3383_v0, %v19278_v46  ;;  %v15038_v26 = vpop.eup %9663  ;;  %v3187_v50 = vxor.u32 2147483648, %v14742_v32  ;;  %v3190_v13 = vxor.u32 2147483648, %v19283_v48  ;;  %vm19284_vm6 = vcmp.lt.s32.totalorder %v19175_v63, 0 }
 0x419   : > { %v3281_v15 = vsel %vm19284_vm6, %v3280_v30, %v19280_v38  ;;  %v15046_v54 = vpop.eup %9665  ;;  %9683 = vpow2.f32 %v4595_v60  ;;  %v2987_v5 = vsel %vm2977_vm11, nan, %v2986_v42  ;;  %vm3080_vm13 = vweird.f32 %v19170_v49 }
 0x41a   : > { %vm19285_vm4 = vcmp.lt.s32.totalorder %v19200_v27, 0  ;;  %vm3186_vm1 = vcmp.eq.s32.totalorder %v3184_v35, 0  ;;  %vm3083_vm3 = vcmp.eq.s32.totalorder %v3081_v51, 0  ;;  %vm3086_vm7 = vcmp.eq.s32.totalorder %v3081_v51, 2 }
 0x41b   : > { %v3590_v57 = vsel %vm19285_vm4, %v3589_v28, %v19281_v6  ;;  %v3386_v62 = vsel %vm14670_vm12, 0, %v3384_v58  ;;  %v15054_v8 = vpop.eup %9667  ;;  %vm3189_vm0 = vcmp.eq.s32.totalorder %v3184_v35, 2  ;;  %v3085_v53 = vsel %vm3083_vm3, %v14762_v33, %v3084_v7  ;;  %v15068_v6 = vpop.f32.mrf.mxu0 }
 0x41c   : > { %v3088_v46 = vsel %vm3086_vm7, %v3087_v2, %v14767_v40  ;;  %v3283_v42 = vsel %vm14647_vm8, 0, %v3281_v15  ;;  %v15060_v0 = vpop.eup %9669  ;;  %vm3185_vm11 = vcmp.lt.s32.totalorder %v3184_v35, 2  ;;  %v3188_v38 = vsel %vm3186_vm1, %v19283_v48, %v3187_v50  ;;  %19287 = vst [vmem:[#allocation71_spill] sm:$0xff] %v15068_v6  ;;  %v19288_v40 = vld [vmem:[#allocation103_spill] sm:$0xff]  ;;  %v19293_v48 = vld [vmem:[#allocation33_spill] sm:$0xff] }
 0x41d   : > { %v3191_v30 = vsel %vm3189_vm0, %v3190_v13, %v14742_v32  ;;  %v3592_v24 = vsel %vm14725_vm9, 0, %v3590_v57  ;;  %v15066_v60 = vpop.eup %9671  ;;  %vm3082_vm12 = vcmp.lt.s32.totalorder %v3081_v51, 2  ;;  %v3390_v33 = vand.u32 3, %v3386_v62  ;;  %v19294_v51 = vld [vmem:[#allocation141_spill] sm:$0xff]  ;;  %v15082_v62 = vpop.f32.mrf.mxu1  ;;  %v19296_v6 = vld [vmem:[#allocation99_spill] sm:$0xff] }
 0x41e   : > { %19286 = vst [vmem:[#allocation78_spill] sm:$0xff] %v15066_v60  ;;  %v3486_v28 = vsub.s32 4, %v19288_v40  ;;  %v3692_v7 = vsub.s32 4, %v19289_v45  ;;  %v15072_v2 = vpop.eup %9673  ;;  %v15075_v35 = vmul.f32 %v15011_v23, %v2987_v5  ;;  %v3089_v58 = vsel %vm3082_vm12, %v3085_v53, %v3088_v46  ;;  %19295 = vst [vmem:[#allocation56_spill] sm:$0xff] %v15082_v62  ;;  %v19297_v60 = vld [vmem:[#allocation44_spill] sm:$0xff]  ;;  %v15090_v46 = vpop.f32.mrf.mxu0 }
 0x41f   : > { %19290 = vst [vmem:[#allocation31_spill] sm:$0xff] %v15072_v2  ;;  %v3287_v32 = vand.u32 3, %v3283_v42  ;;  %v3393_v39 = vxor.u32 2147483648, %v14793_v11  ;;  %v15078_v50 = vsel %vm3185_vm11, %v3188_v38, %v3191_v30  ;;  %v3396_v13 = vxor.u32 2147483648, %v19293_v48  ;;  %19298 = vst [vmem:[#allocation53_spill] sm:$0xff] %v15090_v46  ;;  %v19299_v38 = vld [vmem:[#allocation77_spill] sm:$0xff] }
 0x420   : > { %19291 = vst [vmem:[#allocation13_spill] sm:$0xff] %v15075_v35  ;;  %19292 = vst [vmem:[#allocation41_spill] sm:$0xff] %v15078_v50  ;;  %v3596_v15 = vand.u32 3, %v3592_v24  ;;  %v3795_v57 = vsub.s32 4, %v19294_v51  ;;  %v3290_v20 = vxor.u32 2147483648, %v19296_v6  ;;  %v3293_v2 = vxor.u32 2147483648, %v19297_v60 }
 0x421   : > { %v3599_v23 = vxor.u32 2147483648, %v14810_v52  ;;  %v3602_v5 = vxor.u32 2147483648, %v14799_v59  ;;  %v15088_v53 = vpop.eup %9675  ;;  %v3090_v42 = vsel %vm3080_vm13, nan, %v3089_v58  ;;  %vm3392_vm8 = vcmp.eq.s32.totalorder %v3390_v33, 0 }
 0x422   : > { %vm19300_vm7 = vcmp.lt.s32.totalorder %v19299_v38, 0  ;;  %vm19301_vm0 = vcmp.lt.s32.totalorder %v19220_v19, 0  ;;  %v15100_v62 = vpop.eup %9677  ;;  %vm3289_vm9 = vcmp.eq.s32.totalorder %v3287_v32, 0  ;;  %vm3292_vm6 = vcmp.eq.s32.totalorder %v3287_v32, 2 }
 0x423   : > { %v3487_v30 = vsel %vm19300_vm7, %v3486_v28, %v19288_v40  ;;  %v3693_v24 = vsel %vm19301_vm0, %v3692_v7, %v19289_v45  ;;  %v3394_v35 = vsel %vm3392_vm8, %v19293_v48, %v3393_v39  ;;  %vm3395_vm4 = vcmp.eq.s32.totalorder %v3390_v33, 2  ;;  %v15103_v46 = vpop.eup %9679  ;;  %v15111_v45 = vpop.f32.mrf.mxu1 }
 0x424   : > { %v3397_v49 = vsel %vm3395_vm4, %v3396_v13, %v14793_v11  ;;  %vm3598_vm13 = vcmp.eq.s32.totalorder %v3596_v15, 0  ;;  %vm3601_vm1 = vcmp.eq.s32.totalorder %v3596_v15, 2  ;;  %vm19302_vm3 = vcmp.lt.s32.totalorder %v19224_v21, 0  ;;  %v15109_v28 = vpop.eup %9681  ;;  %19303 = vst [vmem:[#allocation19_spill] sm:$0xff] %v15111_v45  ;;  %v15119_v13 = vpop.f32.mrf.mxu0 }
 0x425   : > { %v3796_v40 = vsel %vm19302_vm3, %v3795_v57, %v19294_v51  ;;  %v3600_v7 = vsel %vm3598_vm13, %v14799_v59, %v3599_v23  ;;  %v3603_v58 = vsel %vm3601_vm1, %v3602_v5, %v14810_v52  ;;  %v3489_v48 = vsel %vm14738_vm10, 0, %v3487_v30  ;;  %19305 = vst [vmem:[#allocation54_spill] sm:$0xff] %v15119_v13 }
 0x426   : > { %v3695_v11 = vsel %vm14814_vm5, 0, %v3693_v24  ;;  %v15122_v50 = vmul.f32 %v15020_v31, %v3090_v42  ;;  %v3291_v51 = vsel %vm3289_vm9, %v19297_v60, %v3290_v20  ;;  %v3294_v57 = vsel %vm3292_vm6, %v3293_v2, %v19296_v6  ;;  %v15129_v59 = vpop.eup %9683  ;;  %v15134_v20 = vpop.f32.mrf.mxu1  ;;  %v19307_v2 = vld [vmem:[#allocation75_spill] sm:$0xff] }
 0x427   : > { %vm3389_vm11 = vweird.f32 %v19188_v55  ;;  %vm3286_vm10 = vweird.f32 %v19175_v63  ;;  %vm3288_vm12 = vcmp.lt.s32.totalorder %v3287_v32, 2  ;;  %vm3391_vm8 = vcmp.lt.s32.totalorder %v3390_v33, 2  ;;  %19306 = vst [vmem:[#allocation61_spill] sm:$0xff] %v15134_v20  ;;  %v15139_v24 = vpop.f32.mrf.mxu0 }
 0x428   : > { %vm3597_vm5 = vcmp.lt.s32.totalorder %v3596_v15, 2  ;;  %v3798_v52 = vsel %vm14838_vm2, 0, %v3796_v40  ;;  %v3398_v41 = vsel %vm3391_vm8, %v3394_v35, %v3397_v49  ;;  %v3493_v23 = vand.u32 3, %v3489_v48  ;;  %19308 = vst [vmem:[#allocation57_spill] sm:$0xff] %v15139_v24  ;;  %v19309_v35 = vld [vmem:[#allocation42_spill] sm:$0xff]  ;;  %v15149_v48 = vpop.f32.mrf.mxu1 }
 0x429   : > { %v3604_v31 = vsel %vm3597_vm5, %v3600_v7, %v3603_v58  ;;  %v3699_v5 = vand.u32 3, %v3695_v11  ;;  %v3295_v60 = vsel %vm3288_vm12, %v3291_v51, %v3294_v57  ;;  %v3496_v6 = vxor.u32 2147483648, %v14849_v29  ;;  %v19310_v58 = vld [vmem:[#allocation67_spill] sm:$0xff]  ;;  %19311 = vst [vmem:[#allocation37_spill] sm:$0xff] %v15149_v48  ;;  %v15154_v55 = vpop.f32.mrf.mxu0 }
 0x42a   : > { %v3499_v42 = vxor.u32 2147483648, %v19307_v2  ;;  %v3702_v30 = vxor.u32 2147483648, %v14935_v22  ;;  %vm3595_vm7 = vweird.f32 %v19200_v27  ;;  %v3705_v34 = vxor.u32 2147483648, %v14918_v17  ;;  %19312 = vst [vmem:[#allocation35_spill] sm:$0xff] %v15154_v55 }
 0x42b   : > { %v3802_v33 = vand.u32 3, %v3798_v52  ;;  %v3898_v32 = vsub.s32 4, %v19309_v35  ;;  %v3399_v15 = vsel %vm3389_vm11, nan, %v3398_v41  ;;  %v3605_v49 = vsel %vm3595_vm7, nan, %v3604_v31 }
 0x42c   : > { %v3805_v40 = vxor.u32 2147483648, %v14949_v56  ;;  %v3808_v7 = vxor.u32 2147483648, %v14944_v36  ;;  %vm3495_vm2 = vcmp.eq.s32.totalorder %v3493_v23, 0  ;;  %vm3498_vm0 = vcmp.eq.s32.totalorder %v3493_v23, 2 }
 0x42d   : > { %vm3701_vm9 = vcmp.eq.s32.totalorder %v3699_v5, 0  ;;  %v4001_v39 = vsub.s32 4, %v19310_v58  ;;  %v3497_v27 = vsel %vm3495_vm2, %v19307_v2, %v3496_v6  ;;  %v3500_v11 = vsel %vm3498_vm0, %v3499_v42, %v14849_v29  ;;  %v19314_v6 = vld [vmem:[#allocation85_spill] sm:$0xff]  ;;  %v15170_v42 = vpop.f32.mrf.mxu1 }
 0x42e   : > { %v3703_v51 = vsel %vm3701_vm9, %v14918_v17, %v3702_v30  ;;  %vm3704_vm6 = vcmp.eq.s32.totalorder %v3699_v5, 2  ;;  %vm3804_vm4 = vcmp.eq.s32.totalorder %v3802_v33, 0  ;;  %vm3807_vm13 = vcmp.eq.s32.totalorder %v3802_v33, 2  ;;  %19316 = vst [vmem:[#allocation47_spill] sm:$0xff] %v15170_v42 }
 0x42f   : > { %v3706_v57 = vsel %vm3704_vm6, %v3705_v34, %v14935_v22  ;;  %vm19313_vm1 = vcmp.lt.s32.totalorder %v19230_v43, 0  ;;  %vm3494_vm3 = vcmp.lt.s32.totalorder %v3493_v23, 2  ;;  %v3806_v41 = vsel %vm3804_vm4, %v14944_v36, %v3805_v40  ;;  %v19319_v34 = vld [vmem:[#allocation101_spill] sm:$0xff]  ;;  %v19322_v40 = vld [vmem:[#allocation38_spill] sm:$0xff] }
 0x430   : > { %v3899_v52 = vsel %vm19313_vm1, %v3898_v32, %v19309_v35  ;;  %v3809_v31 = vsel %vm3807_vm13, %v3808_v7, %v14949_v56  ;;  %v4104_v29 = vsub.s32 4, %v19314_v6  ;;  %v15165_v17 = vsel %vm3286_vm10, nan, %v3295_v60  ;;  %v15175_v56 = vpop.f32.mrf.mxu0  ;;  %v19320_v32 = vld [vmem:[#allocation95_spill] sm:$0xff] }
 0x431   : > { %v3501_v2 = vsel %vm3494_vm3, %v3497_v27, %v3500_v11  ;;  %vm3700_vm11 = vcmp.lt.s32.totalorder %v3699_v5, 2  ;;  %vm19315_vm12 = vcmp.lt.s32.totalorder %v19229_v12, 0  ;;  %vm3492_vm8 = vweird.f32 %v19299_v38  ;;  %19317 = vst [vmem:[#allocation46_spill] sm:$0xff] %v15175_v56 }
 0x432   : > { %v4002_v22 = vsel %vm19315_vm12, %v4001_v39, %v19310_v58  ;;  %v3707_v23 = vsel %vm3700_vm11, %v3703_v51, %v3706_v57  ;;  %vm3803_vm5 = vcmp.lt.s32.totalorder %v3802_v33, 2  ;;  %v3901_v36 = vsel %vm14882_vm15, 0, %v3899_v52  ;;  %v15197_v58 = vpop.f32.mrf.mxu0  ;;  %v19325_v57 = vld [vmem:[#allocation82_spill] sm:$0xff] }
 0x433   : > { %v15178_v63 = vmul.f32 %v15031_v25, %v3399_v15  ;;  %v15181_v5 = vmul.f32 %v15038_v26, %v3605_v49  ;;  %vm3698_vm10 = vweird.f32 %v19220_v19  ;;  %v3810_v60 = vsel %vm3803_vm5, %v3806_v41, %v3809_v31  ;;  %v15192_v15 = vpop.f32.mrf.mxu1  ;;  %19323 = vst [vmem:[#allocation39_spill] sm:$0xff] %v15197_v58  ;;  %v19326_v41 = vld [vmem:[#allocation88_spill] sm:$0xff] }
 0x434   : > { %v3502_v30 = vsel %vm3492_vm8, nan, %v3501_v2  ;;  %v4004_v38 = vsel %vm14876_vm14, 0, %v4002_v22  ;;  %vm19318_vm7 = vcmp.lt.s32.totalorder %v19237_v47, 0  ;;  %v4310_v33 = vsub.s32 4, %v19319_v34  ;;  %19321 = vst [vmem:[#allocation40_spill] sm:$0xff] %v15192_v15  ;;  %v19329_v2 = vld [vmem:[#allocation70_spill] sm:$0xff] }
 0x435   : > { %v4105_v3 = vsel %vm19318_vm7, %v4104_v29, %v19314_v6  ;;  %v3708_v35 = vsel %vm3698_vm10, nan, %v3707_v23  ;;  %vm3801_vm15 = vweird.f32 %v19224_v21  ;;  %v3905_v25 = vand.u32 3, %v3901_v36  ;;  %v19327_v6 = vld [vmem:[#allocation45_spill] sm:$0xff]  ;;  %v15221_v22 = vpop.f32.mrf.mxu1 }
 0x436   : > { %v4207_v26 = vsub.s32 4, %v19320_v32  ;;  %v3811_v19 = vsel %vm3801_vm15, nan, %v3810_v60  ;;  %v3908_v49 = vxor.u32 2147483648, %v14970_v14  ;;  %v3911_v9 = vxor.u32 2147483648, %v14966_v4  ;;  %19331 = vst [vmem:[#allocation9_spill] sm:$0xff] %v15221_v22  ;;  %v19332_v60 = vld [vmem:[#allocation68_spill] sm:$0xff] }
 0x437   : > { %v4516_v7 = vsub.s32 4, %v19322_v40  ;;  %v15200_v39 = vmul.f32 %v15046_v54, %v3502_v30  ;;  %v15202_v27 = vand.u32 3, %v4004_v38  ;;  %v4011_v21 = vxor.u32 2147483648, %v14961_v37  ;;  %v15228_v38 = vpop.f32.mrf.mxu0 }
 0x438   : > { %vm19324_vm14 = vnez %v19240_v44  ;;  %v15208_v51 = vmul.f32 %v15054_v8, %v3708_v35  ;;  %v4014_v52 = vxor.u32 2147483648, %v19325_v57  ;;  %v4413_v31 = vsub.s32 4, %v19326_v41  ;;  %19334 = vst [vmem:[#allocation51_spill] sm:$0xff] %v15228_v38  ;;  %v19339_v35 = vld [vmem:[#allocation142_spill] sm:$0xff] }
 0x439   : > { %v4107_v11 = vsel %vm19324_vm14, 0, %v4105_v3  ;;  %vm19328_vm2 = vcmp.lt.s32.totalorder %v19327_v6, 0  ;;  %v15216_v54 = vmul.f32 %v15060_v0, %v3811_v19  ;;  %vm3907_vm0 = vcmp.eq.s32.totalorder %v3905_v25, 0  ;;  %v19335_v3 = vld [vmem:[#allocation29_spill] sm:$0xff] }
 0x43a   : > { %v4311_v29 = vsel %vm19328_vm2, %v4310_v33, %v19319_v34  ;;  %vm3910_vm9 = vcmp.eq.s32.totalorder %v3905_v25, 2  ;;  %vm19330_vm6 = vcmp.lt.s32.totalorder %v19329_v2, 0  ;;  %v3909_v8 = vsel %vm3907_vm0, %v14966_v4, %v3908_v49 }
 0x43b   : > { %v4208_v44 = vsel %vm19330_vm6, %v4207_v26, %v19320_v32  ;;  %v3912_v23 = vsel %vm3910_vm9, %v3911_v9, %v14970_v14  ;;  %v4111_v36 = vand.u32 3, %v4107_v11  ;;  %vm19333_vm4 = vcmp.lt.s32.totalorder %v19332_v60, 0  ;;  %v19337_v14 = vld [vmem:[#allocation80_spill] sm:$0xff]  ;;  %v15243_v26 = vpop.f32.mrf.mxu0 }
 0x43c   : > { %v4517_v30 = vsel %vm19333_vm4, %v4516_v7, %v19322_v40  ;;  %vm4010_vm13 = vcmp.eq.s32.totalorder %v15202_v27, 0  ;;  %vm4013_vm1 = vcmp.eq.s32.totalorder %v15202_v27, 2  ;;  %v4114_v0 = vxor.u32 2147483648, %v14975_v18  ;;  %v19341_v40 = vld [vmem:[#allocation84_spill] sm:$0xff] }
 0x43d   : > { %vm19336_vm3 = vnez %v19335_v3  ;;  %v15236_v4 = vsel %vm4010_vm13, %v19325_v57, %v4011_v21  ;;  %vm3906_vm11 = vcmp.lt.s32.totalorder %v3905_v25, 2  ;;  %vm19338_vm12 = vnez %v19337_v14  ;;  %v15249_v21 = vpop.f32.mrf.mxu1  ;;  %v19344_v25 = vld [vmem:[#allocation58_spill] sm:$0xff]  ;;  %v19348_v3 = vld [vmem:[#allocation83_spill] sm:$0xff] }
 0x43e   : > { %v4313_v34 = vsel %vm19336_vm3, 0, %v4311_v29  ;;  %v4210_v33 = vsel %vm19338_vm12, 0, %v4208_v44  ;;  %vm19340_vm8 = vcmp.lt.s32.totalorder %v19339_v35, 0  ;;  %v4015_v19 = vsel %vm4013_vm1, %v4014_v52, %v14961_v37  ;;  %19343 = vst [vmem:[#allocation48_spill] sm:$0xff] %v15249_v21  ;;  %v15252_v29 = vpop.f32.mrf.mxu0  ;;  %v19345_v52 = vld [vmem:[#allocation79_spill] sm:$0xff]  ;;  %v19347_v44 = vld [vmem:[#allocation62_spill] sm:$0xff] }
 0x43f   : > { %v4414_v32 = vsel %vm19340_vm8, %v4413_v31, %v19326_v41  ;;  %v3913_v49 = vsel %vm3906_vm11, %v3909_v8, %v3912_v23  ;;  %v4117_v9 = vxor.u32 2147483648, %v14973_v1  ;;  %vm19342_vm5 = vnez %v19341_v40  ;;  %v15260_v23 = vpop.f32.mrf.mxu1 }
 0x440   : > { %v4519_v7 = vsel %vm19342_vm5, 0, %v4517_v30  ;;  %vm4112_vm10 = vcmp.lt.s32.totalorder %v4111_v36, 2  ;;  %vm4113_vm7 = vcmp.eq.s32.totalorder %v4111_v36, 0  ;;  %v4217_v11 = vxor.u32 2147483648, %v19344_v25  ;;  %v15264_v40 = vpop.f32.mrf.mxu0 }
 0x441   : > { %v4317_v57 = vand.u32 3, %v4313_v34  ;;  %vm4009_vm15 = vcmp.lt.s32.totalorder %v15202_v27, 2  ;;  %vm3904_vm14 = vweird.f32 %v19230_v43  ;;  %v4214_v37 = vand.u32 3, %v4210_v33  ;;  %v19349_v33 = vld [vmem:[#allocation63_spill] sm:$0xff]  ;;  %v15270_v58 = vpop.f32.mrf.mxu1 }
 0x442   : > { %vm19346_vm2 = vnez %v19345_v52  ;;  %v4320_v31 = vxor.u32 2147483648, %v15000_v10  ;;  %v4323_v8 = vxor.u32 2147483648, %v19347_v44  ;;  %v4115_v30 = vsel %vm4113_vm7, %v14973_v1, %v4114_v0  ;;  %v19350_v52 = vld [vmem:[#allocation59_spill] sm:$0xff]  ;;  %v19351_v1 = vld [vmem:[#allocation52_spill] sm:$0xff] }
 0x443   : > { %v4416_v41 = vsel %vm19346_vm2, 0, %v4414_v32  ;;  %vm4116_vm0 = vcmp.eq.s32.totalorder %v4111_v36, 2  ;;  %v4220_v34 = vxor.u32 2147483648, %v19348_v3  ;;  %v4523_v14 = vand.u32 3, %v4519_v7  ;;  %v4727_v7 = vpop.f32.mrf.mxu0  ;;  %v15276_v56 = vpop.f32.mrf.mxu1 }
 0x444   : > { %v4118_v21 = vsel %vm4116_vm0, %v4117_v9, %v14975_v18  ;;  %v4423_v38 = vxor.u32 2147483648, %v19349_v33  ;;  %v4526_v32 = vxor.u32 2147483648, %v15004_v16  ;;  %v4529_v22 = vxor.u32 2147483648, %v19350_v52 }
 0x445   : > { %vm4007_vm9 = vweird.f32 %v19229_v12  ;;  %v4420_v15 = vand.u32 3, %v4416_v41  ;;  %v4426_v0 = vxor.u32 2147483648, %v19351_v1  ;;  %vm4319_vm6 = vcmp.eq.s32.totalorder %v4317_v57, 0  ;;  %v4731_v41 = vpop.f32.mrf.mxu0  ;;  %v4816_v13 = vpop.f32.mrf.mxu1 }
 0x446   : > { %vm4322_vm4 = vcmp.eq.s32.totalorder %v4317_v57, 2  ;;  %vm4216_vm13 = vcmp.eq.s32.totalorder %v4214_v37, 0  ;;  %vm4219_vm1 = vcmp.eq.s32.totalorder %v4214_v37, 2  ;;  %v4321_v18 = vsel %vm4319_vm6, %v19347_v44, %v4320_v31  ;;  %v4639_v31 = vpop.permute.xlu0 %4638 }
 0x447   : > { %v4324_v9 = vsel %vm4322_vm4, %v4323_v8, %v15000_v10  ;;  %v4218_v42 = vsel %vm4216_vm13, %v19348_v3, %v4217_v11  ;;  %v4221_v55 = vsel %vm4219_vm1, %v4220_v34, %v19344_v25  ;;  %vm4525_vm3 = vcmp.eq.s32.totalorder %v4523_v14, 0  ;;  %v4733_v44 = vpop.f32.mrf.mxu0 }
 0x448   : > { %vm4528_vm11 = vcmp.eq.s32.totalorder %v4523_v14, 2  ;;  %v4119_v48 = vsel %vm4112_vm10, %v4115_v30, %v4118_v21  ;;  %vm4318_vm12 = vcmp.lt.s32.totalorder %v4317_v57, 2  ;;  %v4527_v24 = vsel %vm4525_vm3, %v19350_v52, %v4526_v32  ;;  %v4820_v21 = vpop.f32.mrf.mxu1  ;;  %v4634_v57 = vpop.permute.xlu1 %4633 }
 0x449   : > { %v4530_v20 = vsel %vm4528_vm11, %v4529_v22, %v15004_v16  ;;  %vm4215_vm8 = vcmp.lt.s32.totalorder %v4214_v37, 2  ;;  %vm4422_vm5 = vcmp.eq.s32.totalorder %v4420_v15, 0  ;;  %vm4425_vm7 = vcmp.eq.s32.totalorder %v4420_v15, 2 }
 0x44a   : > { %v4325_v10 = vsel %vm4318_vm12, %v4321_v18, %v4324_v9  ;;  %v4222_v11 = vsel %vm4215_vm8, %v4218_v42, %v4221_v55  ;;  %v4424_v25 = vsel %vm4422_vm5, %v19351_v1, %v4423_v38  ;;  %v4427_v8 = vsel %vm4425_vm7, %v4426_v0, %v19349_v33  ;;  %v4737_v55 = vpop.f32.mrf.mxu0  ;;  %v4822_v27 = vpop.f32.mrf.mxu1 }
 0x44b   : > { %vm4524_vm2 = vcmp.lt.s32.totalorder %v4523_v14, 2  ;;  %v4016_v36 = vsel %vm4009_vm15, %v15236_v4, %v4015_v19  ;;  %v3914_v16 = vsel %vm3904_vm14, nan, %v3913_v49  ;;  %vm4316_vm10 = vweird.f32 %v19327_v6  ;;  %v4629_v30 = vpop.permute.xlu0 %4628 }
 0x44c   : > { %v4531_v22 = vsel %vm4524_vm2, %v4527_v24, %v4530_v20  ;;  %vm4110_vm0 = vweird.f32 %v19237_v47  ;;  %vm4213_vm6 = vweird.f32 %v19329_v2  ;;  %vm4421_vm4 = vcmp.lt.s32.totalorder %v4420_v15, 2  ;;  %v19352_v20 = vld [vmem:[#allocation31_spill] sm:$0xff]  ;;  %v4739_v47 = vpop.f32.mrf.mxu0  ;;  %v4826_v15 = vpop.f32.mrf.mxu1 }
 0x44d   : > { %v4326_v42 = vsel %vm4316_vm10, nan, %v4325_v10  ;;  %vm3183_vm13 = vweird.f32 %v19273_v61  ;;  %v4120_v38 = vsel %vm4110_vm0, nan, %v4119_v48  ;;  %v4223_v4 = vsel %vm4213_vm6, nan, %v4222_v11  ;;  %v4624_v0 = vpop.permute.xlu1 %4623  ;;  %v19359_v11 = vld [vmem:[#allocation78_spill] sm:$0xff]  ;;  %v19366_v61 = vld [vmem:[#allocation13_spill] sm:$0xff] }
 0x44e   : > { %v4428_v19 = vsel %vm4421_vm4, %v4424_v25, %v4427_v8  ;;  %vm4522_vm15 = vweird.f32 %v19332_v60  ;;  %v4017_v43 = vsel %vm4007_vm9, nan, %v4016_v36  ;;  %v4606_v24 = vmul.f32 %v19352_v20, %v3914_v16  ;;  %v4828_v1 = vpop.f32.mrf.mxu1 }
 0x44f   : > { %v4738_v6 = vadd.f32 %v4737_v55, %v4639_v31  ;;  %v4532_v49 = vsel %vm4522_vm15, nan, %v4531_v22  ;;  %v4734_v2 = vadd.f32 %v4733_v44, %v4634_v57  ;;  %vm4419_vm14 = vweird.f32 %v19339_v35 }
 0x450   : > { %v4610_v37 = vmul.f32 %v15109_v28, %v4326_v42  ;;  %v4740_v48 = vadd.f32 %v4739_v47, %v4639_v31  ;;  %v4732_v3 = vadd.f32 %v4731_v41, %v4634_v57  ;;  %v4608_v34 = vmul.f32 %v15088_v53, %v4120_v38  ;;  %v4852_v42 = vpop.permute.xlu0 %4851 }
 0x451   : > { %v4609_v60 = vmul.f32 %v15100_v62, %v4223_v4  ;;  %v4429_v12 = vsel %vm4419_vm14, nan, %v4428_v19  ;;  %v4728_v14 = vadd.f32 %v4727_v7, %v4629_v30  ;;  %v4827_v33 = vadd.f32 %v4826_v15, %v4639_v31 }
 0x452   : > { %v15302_v32 = vmul.f32 %v4740_v48, %v4610_v37  ;;  %v4612_v52 = vmul.f32 %v15129_v59, %v4532_v49  ;;  %v4726_v35 = vadd.f32 %v15264_v40, %v4629_v30  ;;  %v4823_v18 = vadd.f32 %v4822_v27, %v4634_v57 }
 0x453   : > { %v15306_v28 = vmul.f32 %v4738_v6, %v4609_v60  ;;  %v4829_v9 = vadd.f32 %v4828_v1, %v4639_v31  ;;  %v4722_v41 = vadd.f32 %v15252_v29, %v4624_v0  ;;  %v4821_v53 = vadd.f32 %v4820_v21, %v4634_v57  ;;  %v19379_v1 = vld [vmem:[#allocation106_spill] sm:$0xff] }
 0x454   : > { %19353 = vst [vmem:[#allocation10_spill] sm:$0xff] %v15302_v32  ;;  %v15309_v10 = vmul.f32 %v4734_v2, %v4606_v24  ;;  %v4611_v62 = vmul.f32 %v15103_v46, %v4429_v12  ;;  %4881 = vmatprep.subr.mxu0 %v15302_v32  ;;  %v4720_v7 = vadd.f32 %v15243_v26, %v4624_v0  ;;  %v19361_v26 = vld [vmem:[#allocation41_spill] sm:$0xff]  ;;  %vm19374_vm9 = vcmask 261120   ;;  %v15379_v38 = vpop.permute.xlu0 %5023 }
 0x455   : > { %19354 = vst [vmem:[#allocation7_spill] sm:$0xff] %v15306_v28  ;;  %v4817_v59 = vadd.f32 %v4816_v13, %v4629_v30  ;;  %v15315_v44 = vmul.f32 %v4732_v3, %v15216_v54  ;;  %v15317_v40 = vmul.f32 %v4829_v9, %v4612_v52  ;;  %4882 = vmatpush1.msra.mxu0 %v15306_v28  ;;  %v3193_v13 = vsel %vm3183_vm13, nan, %v19361_v26  ;;  %vm19376_vm1 = vmmov %vm19374_vm9  ;;  %v5003_v52 = vld [vmem:[%s18346_s7] sm:$0xff] }
 0x456   : > { %19355 = vst [vmem:[#allocation34_spill] sm:$0xff] %v15309_v10  ;;  %v4815_v31 = vadd.f32 %v15276_v56, %v4629_v30  ;;  %v15322_v29 = vmul.f32 %v4728_v14, %v15200_v39  ;;  %v4607_v25 = vmul.f32 %v19359_v11, %v4017_v43  ;;  %v15325_v46 = vmul.f32 %v4827_v33, %v4611_v62  ;;  %v19377_v43 = vld [vmem:[#allocation104_spill] sm:$0xff] }
 0x457   : > { %19356 = vst [vmem:[#allocation26_spill] sm:$0xff] %v15315_v44  ;;  %19357 = vst [vmem:[#allocation24_spill] sm:$0xff] %v15317_v40  ;;  %4883 = vmatprep.subr.mxu0 %v15309_v10  ;;  %v4811_v54 = vadd.f32 %v15270_v58, %v4624_v0  ;;  %v15333_v8 = vmul.f32 %v4726_v35, %v15178_v63  ;;  %v15335_v36 = vmul.f32 %v4823_v18, %v4608_v34  ;;  %v19368_v58 = vld [vmem:[#allocation22_spill] sm:$0xff]  ;;  %vm18744_vm11 = vcmask 1043456  }
 0x458   : > { %19358 = vst [vmem:[#allocation8_spill] sm:$0xff] %v15322_v29  ;;  %19360 = vst [vmem:[#allocation17_spill] sm:$0xff] %v15325_v46  ;;  %4952 = vmatprep.subr.mxu1 %v15317_v40  ;;  %4884 = vmatpush1.msra.mxu0 %v15315_v44  ;;  %v4809_v56 = vadd.f32 %v15260_v23, %v4624_v0  ;;  %v15341_v39 = vmul.f32 %v4722_v41, %v15122_v50  ;;  %v4847_v50 = vld [vmem:[%s18344_s5] sm:$0xf]  ;;  %v19370_v23 = vld [vmem:[#allocation65_spill] sm:$0xff]  ;;  %v15381_v27 = vpop.permute.xlu0 %5013  ;;  %vm18743_vm12 = vcmask 31744  }
 0x459   : > { %19362 = vst [vmem:[#allocation43_spill] sm:$0xff] %v15333_v8  ;;  %19363 = vst [vmem:[#allocation36_spill] sm:$0xff] %v15335_v36  ;;  %v15343_v21 = vmul.f32 %v4821_v53, %v4607_v25  ;;  %4953 = vmatpush1.msra.mxu1 %v15325_v46  ;;  %4885 = vmatprep.subr.mxu0 %v15322_v29  ;;  %v15348_v63 = vmul.f32 %v4720_v7, %v19366_v61  ;;  %v5004_v41 = vld [vmem:[%s18346_s7 + $0x8] sm:$0xff]  ;;  %v5005_v7 = vld [vmem:[%s18346_s7 + $0x10] sm:$0xff]  ;;  %v19382_v25 = vmov 1326507024  }
 0x45a   : > { %19364 = vst [vmem:[#allocation16_spill] sm:$0xff] %v15341_v39  ;;  %v4600_v16 = vmul.f32 %v19368_v58, %v15165_v17  ;;  %v15353_v22 = vmul.f32 %v4817_v59, %v15208_v51  ;;  %4954 = vmatprep.subr.mxu1 %v15335_v36  ;;  %4886 = vmatpush1.msra.mxu0 %v15333_v8  ;;  %v19384_v58 = vmov 2102212464   ;;  %v19396_v40 = vld [vmem:[#allocation115_spill] sm:$0xff] }
 0x45b   : > { %19365 = vst [vmem:[#allocation20_spill] sm:$0xff] %v15343_v21  ;;  %19367 = vst [vmem:[#allocation30_spill] sm:$0xff] %v15348_v63  ;;  %v4599_v57 = vmul.f32 %v19370_v23, %v3193_v13  ;;  %v15362_v55 = vmul.f32 %v4815_v31, %v15181_v5  ;;  %4955 = vmatpush1.msra.mxu1 %v15343_v21  ;;  %4887 = vmatprep.subr.mxu0 %v15341_v39  ;;  %v19375_v5 = vmov 0.0   ;;  %v19381_v31 = vmov 920167782  }
 0x45c   : > { %19369 = vst [vmem:[#allocation28_spill] sm:$0xff] %v15353_v22  ;;  %v15366_v17 = vmul.f32 %v4811_v54, %v4600_v16  ;;  %4956 = vmatprep.subr.mxu1 %v15353_v22  ;;  %4888 = vmatpush1.msra.mxu0 %v15348_v63  ;;  %v15383_v4 = vpop.permute.xlu0 %582  ;;  %v19385_v23 = vmov 2131351028  }
 0x45d   : > { %19371 = vst [vmem:[#allocation23_spill] sm:$0xff] %v15362_v55  ;;  %v15370_v51 = vmul.f32 %v4809_v56, %v4599_v57  ;;  %4957 = vmatpush1.msra.mxu1 %v15362_v55  ;;  %9082 = vmatmul.mubr.msk.f32.vlgmr.msra.gmra.mxu0 %vm19374_vm9, %v4847_v50  ;;  %v19383_v56 = vmov 2475754826  }
 0x45e   : > { %19372 = vst [vmem:[#allocation32_spill] sm:$0xff] %v15366_v17  ;;  %4958 = vmatprep.subr.mxu1 %v15366_v17  ;;  %5121 = vmatprep.mubr.f32.mxu0 %v19375_v5 }
 0x45f   : > { %19373 = vst [vmem:[#allocation25_spill] sm:$0xff] %v15370_v51  ;;  %4959 = vmatpush1.msra.mxu1 %v15370_v51 }
 0x460   : > { %9083 = vmatmul.mubr.msk.f32.vlgmr.msra.gmra.mxu1 %vm19376_vm1, %v4847_v50  ;;  %v15385_v19 = vpop.permute.xlu0 %572  ;;  %v5006_v50 = vld [vmem:[%s18346_s7 + $0x18] sm:$0xff] }
 0x461   : > { %5210 = vmatprep.mubr.f32.mxu1 %v19375_v5  ;;  %v15389_v20 = vadd.f32 %v19377_v43, %v15385_v19  ;;  %v15397_v0 = vadd.f32 %v19379_v1, %v15385_v19 }
 0x463   : > { %19378 = vst [vmem:[#allocation18_spill] sm:$0xff] %v15389_v20  ;;  %v5568_v24 = vand.u32 2139095040, %v15389_v20  ;;  %19380 = vst [vmem:[#allocation5_spill] sm:$0xff] %v15397_v0  ;;  %v5774_v53 = vand.u32 2139095040, %v15397_v0  ;;  %v18630_v13 = vand.u32 2147483647, %v15389_v20 }
 0x465   : > { %v5569_v6 = vshrl.u32 %v5568_v24, 23  ;;  %v5775_v59 = vshrl.u32 %v5774_v53, 23 }
 0x467   : > { %v9116_v47 = vadd.s32 4294967169, %v5569_v6  ;;  %v9124_v24 = vadd.s32 4294967169, %v5775_v59  ;;  %v19386_v6 = vmov 683565275  }
 0x469   : > { %v5575_v49 = vadd.s32 1, %v9116_v47 }
 0x46b   : > { %vm5576_vm3 = vcmp.gt.s32.totalorder %v5575_v49, 0 }
 0x46c   : > { %v5577_v3 = vsel %vm5576_vm3, %v5575_v49, 0 }
 0x46d   : > { %v5579_v35 = vand.u32 31, %v5577_v3  ;;  %v15426_v54 = vshrl.u32 %v5577_v3, 5  ;;  %v19387_v3 = vld [vmem:[#allocation109_spill] sm:$0xff] }
 0x46f   : > { %v15409_v62 = vsub.s32 32, %v5579_v35  ;;  %v5591_v16 = vshll.u32 %v19384_v58, %v5579_v35  ;;  %v5594_v43 = vshll.u32 %v19381_v31, %v5579_v35  ;;  %v5582_v47 = vshll.u32 %v19386_v6, %v5579_v35 }
 0x470   : > { %vm5600_vm8 = vcmp.lt.s32.totalorder %v15426_v54, 4  ;;  %vm5597_vm5 = vcmp.lt.s32.totalorder %v15426_v54, 1  ;;  %vm5599_vm7 = vcmp.lt.s32.totalorder %v15426_v54, 3  ;;  %vm5598_vm10 = vcmp.lt.s32.totalorder %v15426_v54, 2 }
 0x471   : > { %v5592_v11 = vshrl.u32 %v19381_v31, %v15409_v62  ;;  %v5595_v26 = vshrl.u32 %v19382_v25, %v15409_v62  ;;  %v5583_v61 = vshrl.u32 %v19383_v56, %v15409_v62  ;;  %v5586_v57 = vshrl.u32 %v19385_v23, %v15409_v62 }
 0x473   : > { %v5593_v49 = vor.u32 %v5592_v11, %v5591_v16 }
 0x51d   : > { %v4923_v2 = vpop.f32.mrf.mxu0 }
 0x51e   : > { %v4924_v15 = vadd.f32 %v4923_v2, %v4852_v42  ;;  %v5585_v2 = vshll.u32 %v19383_v56, %v5579_v35 }
 0x51f   : > { %v4925_v37 = vpop.f32.mrf.mxu0 }
 0x520   : > { %v4994_v48 = vpop.f32.mrf.mxu1  ;;  %v4926_v30 = vadd.f32 %v4925_v37, %v4852_v42  ;;  %v4999_v14 = vmax.f32 %v4924_v15, 0.0  ;;  %v5588_v15 = vshll.u32 %v19385_v23, %v5579_v35  ;;  %v5596_v37 = vor.u32 %v5595_v26, %v5594_v43 }
 0x521   : > { %v4995_v34 = vadd.f32 %v4994_v48, %v4852_v42  ;;  %v5572_v48 = vand.u32 8388607, %v18630_v13 }
 0x522   : > { %v5000_v60 = vmax.f32 %v4926_v30, 0.0  ;;  %v4996_v12 = vpop.f32.mrf.mxu1  ;;  %v5584_v30 = vor.u32 %v5583_v61, %v5582_v47 }
 0x523   : > { %v4997_v33 = vadd.f32 %v4996_v12, %v4852_v42  ;;  %v5001_v9 = vmax.f32 %v4995_v34, 0.0  ;;  %v5589_v42 = vshrl.u32 %v19384_v58, %v15409_v62  ;;  %v15450_v34 = vadd.f32 %v19387_v3, %v15385_v19 }
 0x524   : > { %9084 = vmatprep.subr.msk.mxu0 %vm18744_vm11, %v5000_v60  ;;  %v5587_v60 = vor.u32 %v5586_v57, %v5585_v2  ;;  %v5573_v35 = vor.u32 8388608, %v5572_v48 }
 0x525   : > { %v5002_v18 = vmax.f32 %v4997_v33, 0.0  ;;  %9085 = vmatpush1.msk.msra.mxu0 %vm18744_vm11, %v4999_v14  ;;  %19388 = vst [vmem:[#allocation6_spill] sm:$0xff] %v15450_v34  ;;  %v5590_v12 = vor.u32 %v5589_v42, %v5588_v15  ;;  %v5781_v14 = vadd.s32 1, %v9124_v24  ;;  %v5606_v33 = vsel %vm5600_vm8, %v5593_v49, 920167782 }
 0x526   : > { %9086 = vmatmul.mubr.msk.f32.vlgmr.msra.gmra.mxu0 %vm18743_vm12, %v5003_v52  ;;  %v5671_v1 = vand.u32 2139095040, %v15450_v34  ;;  %v5613_v61 = vshll.u32 %v5573_v35, 8  ;;  %v5581_v15 = vshrl.u32 %v19386_v6, %v15409_v62  ;;  %v18629_v62 = vand.u32 2147483647, %v15397_v0 }
 0x527   : > { %9090 = vmatprep.subr.msk.mxu1 %vm18744_vm11, %v5002_v18  ;;  %5127 = vmatprep.mubr.f32.mxu0 %v19375_v5  ;;  %v5605_v18 = vsel %vm5597_vm5, %v5584_v30, %v5587_v60  ;;  %vm5782_vm2 = vcmp.gt.s32.totalorder %v5781_v14, 0 }
 0x528   : > { %9091 = vmatpush1.msk.msra.mxu1 %vm18744_vm11, %v5001_v9  ;;  %v5607_v9 = vsel %vm5599_vm7, %v5590_v12, %v5606_v33  ;;  %v5783_v59 = vsel %vm5782_vm2, %v5781_v14, 0  ;;  %v5672_v11 = vshrl.u32 %v5671_v1, 23  ;;  %v5601_v3 = vsel %vm5597_vm5, %v5581_v15, %v5584_v30  ;;  %v15509_v1 = vpop.permute.xlu1 %5028 }
 0x529   : > { %9092 = vmatmul.mubr.msk.f32.vlgmr.msra.gmra.mxu1 %vm18743_vm12, %v5003_v52  ;;  %v5610_v52 = vsel %vm5600_vm8, %v5596_v37, 1326507024  ;;  %v5785_v57 = vand.u32 31, %v5783_v59  ;;  %v19389_v37 = vld [vmem:[#allocation110_spill] sm:$0xff]  ;;  %19391 = vst [vmem:[#allocation14_spill] sm:$0xff] %v15509_v1 }
 0x52a   : > { %5216 = vmatprep.mubr.f32.mxu1 %v19375_v5  ;;  %9087 = vmatmul.mubr.msk.f32.gmra.mxu0 %vm18743_vm12, %v5004_v41  ;;  %v5611_v53 = vsel %vm5599_vm7, %v5593_v49, %v5610_v52  ;;  %v9120_v24 = vadd.s32 4294967169, %v5672_v11  ;;  %v5602_v49 = vsel %vm5600_vm8, %v5590_v12, 2102212464  ;;  %v15491_v48 = vadd.f32 %v19389_v37, %v15385_v19 }
 0x52b   : > { %5133 = vmatprep.mubr.f32.mxu0 %v19375_v5  ;;  %v15483_v47 = vsub.s32 32, %v5785_v57  ;;  %v5603_v14 = vsel %vm5599_vm7, %v5587_v60, %v5602_v49  ;;  %v5797_v52 = vshll.u32 %v19384_v58, %v5785_v57  ;;  %v5800_v11 = vshll.u32 %v19381_v31, %v5785_v57 }
 0x52c   : > { %v5678_v2 = vadd.s32 1, %v9120_v24  ;;  %19390 = vst [vmem:[#allocation15_spill] sm:$0xff] %v15491_v48  ;;  %v5604_v35 = vsel %vm5598_vm10, %v5601_v3, %v5603_v14  ;;  %v5794_v24 = vshll.u32 %v19385_v23, %v5785_v57 }
 0x52d   : > { %9093 = vmatmul.mubr.msk.f32.gmra.mxu1 %vm18743_vm12, %v5004_v41  ;;  %v5609_v41 = vsel %vm5597_vm5, %v5587_v60, %v5590_v12  ;;  %v5798_v33 = vshrl.u32 %v19381_v31, %v15483_v47  ;;  %v5789_v19 = vshrl.u32 %v19383_v56, %v15483_v47  ;;  %v5801_v30 = vshrl.u32 %v19382_v25, %v15483_v47 }
 0x52e   : > { %5222 = vmatprep.mubr.f32.mxu1 %v19375_v5  ;;  %9088 = vmatmul.mubr.msk.f32.gmra.mxu0 %vm18743_vm12, %v5005_v7  ;;  %v5612_v26 = vsel %vm5598_vm10, %v5609_v41, %v5611_v53  ;;  %vm5679_vm6 = vcmp.gt.s32.totalorder %v5678_v2, 0  ;;  %v5877_v60 = vand.u32 2139095040, %v15491_v48  ;;  %v5795_v41 = vshrl.u32 %v19384_v58, %v15483_v47 }
 0x52f   : > { %5139 = vmatprep.mubr.f32.mxu0 %v19375_v5  ;;  %v15480_v42 = vmul.u32.u64.low %v5613_v61, %v5612_v26  ;;  %v15481_v43 = vmul.u32.u64.high %v5613_v61, %v5612_v26, %v15480_v42  ;;  %v5788_v53 = vshll.u32 %v19386_v6, %v5785_v57  ;;  %v5680_v26 = vsel %vm5679_vm6, %v5678_v2, 0 }
 0x530   : > { %v5791_v42 = vshll.u32 %v19383_v56, %v5785_v57  ;;  %v5620_v49 = vmul.u32 %v5613_v61, %v5604_v35  ;;  %v5802_v37 = vor.u32 %v5801_v30, %v5800_v11  ;;  %v5878_v3 = vshrl.u32 %v5877_v60, 23 }
 0x531   : > { %9094 = vmatmul.mubr.msk.f32.gmra.mxu1 %vm18743_vm12, %v5005_v7  ;;  %v5608_v7 = vsel %vm5598_vm10, %v5605_v18, %v5607_v9  ;;  %v15513_v18 = vshrl.u32 %v5783_v59, 5  ;;  %v5792_v9 = vshrl.u32 %v19385_v23, %v15483_v47  ;;  %v5778_v59 = vand.u32 8388607, %v18629_v62 }
 0x532   : > { %5228 = vmatprep.mubr.f32.mxu1 %v19375_v5  ;;  %9089 = vmatmul.mubr.msk.f32.gmra.mxu0 %vm18743_vm12, %v5006_v50  ;;  %v15529_v15 = vor.u32 %v5789_v19, %v5788_v53  ;;  %v5682_v2 = vand.u32 31, %v5680_v26  ;;  %v9128_v57 = vadd.s32 4294967169, %v5878_v3  ;;  %v18640_v3 = vand.u32 2147483647, %v15450_v34 }
 0x533   : > { %5447 = vmatprep.mubr.f32.mxu0 %v19375_v5  ;;  %v5793_v14 = vor.u32 %v5792_v9, %v5791_v42  ;;  %vm5806_vm4 = vcmp.lt.s32.totalorder %v15513_v18, 4  ;;  %vm5803_vm13 = vcmp.lt.s32.totalorder %v15513_v18, 1  ;;  %vm5805_vm15 = vcmp.lt.s32.totalorder %v15513_v18, 3 }
 0x534   : > { %v5779_v19 = vor.u32 8388608, %v5778_v59  ;;  %v15547_v35 = vsub.s32 32, %v5682_v2  ;;  %vm5804_vm14 = vcmp.lt.s32.totalorder %v15513_v18, 2  ;;  %v5675_v62 = vand.u32 8388607, %v18640_v3 }
 0x535   : > { %9095 = vmatmul.mubr.msk.f32.gmra.mxu1 %vm18743_vm12, %v5006_v50  ;;  %v15476_v16 = vmul.u32.u64.low %v5613_v61, %v5608_v7  ;;  %v15477_v50 = vmul.u32.u64.high %v5613_v61, %v5608_v7, %v15476_v16  ;;  %v5799_v7 = vor.u32 %v5798_v33, %v5797_v52  ;;  %v5796_v33 = vor.u32 %v5795_v41, %v5794_v24 }
 0x536   : > { %5524 = vmatprep.mubr.f32.mxu1 %v19375_v5  ;;  %v5816_v61 = vsel %vm5806_vm4, %v5802_v37, 1326507024  ;;  %v5811_v30 = vsel %vm5803_vm13, %v15529_v15, %v5793_v14  ;;  %v15559_v42 = vshll.u32 %v5779_v19, 8  ;;  %v5698_v24 = vshrl.u32 %v19382_v25, %v15547_v35 }
 0x537   : > { %vm5622_vm0 = vc.u32 %v15481_v43, %v15476_v16  ;;  %v5623_v12 = vadd.s32 1, %v15477_v50  ;;  %v5815_v41 = vsel %vm5803_vm13, %v5793_v14, %v5796_v33  ;;  %v5817_v53 = vsel %vm5805_vm15, %v5799_v7, %v5816_v61 }
 0x538   : > { %v5818_v37 = vsel %vm5804_vm14, %v5815_v41, %v5817_v53  ;;  %v5697_v19 = vshll.u32 %v19381_v31, %v5682_v2  ;;  %v5688_v13 = vshll.u32 %v19383_v56, %v5682_v2  ;;  %v5691_v45 = vshll.u32 %v19385_v23, %v5682_v2 }
 0x539   : > { %v5624_v54 = vsel %vm5622_vm0, %v5623_v12, %v15477_v50  ;;  %v5812_v50 = vsel %vm5806_vm4, %v5799_v7, 920167782  ;;  %v15536_v12 = vpop.permute.xlu1 %5018  ;;  %v5695_v7 = vshrl.u32 %v19381_v31, %v15547_v35  ;;  %v5808_v17 = vsel %vm5806_vm4, %v5796_v33, 2102212464 }
 0x53a   : > { %v15532_v52 = vadd.s32 %v5624_v54, %v5620_v49  ;;  %v5813_v60 = vsel %vm5805_vm15, %v5796_v33, %v5812_v50  ;;  %v5884_v54 = vadd.s32 1, %v9128_v57  ;;  %v15575_v57 = vshrl.u32 %v5680_v26, 5 }
 0x53b   : > { %v5814_v11 = vsel %vm5804_vm14, %v5811_v30, %v5813_v60  ;;  %v5689_v30 = vshrl.u32 %v19385_v23, %v15547_v35  ;;  %v5692_v60 = vshrl.u32 %v19384_v58, %v15547_v35  ;;  %v5699_v26 = vor.u32 %v5698_v24, %v5697_v19  ;;  %v19394_v24 = vld [vmem:[#allocation112_spill] sm:$0xff] }
 0x53c   : > { %v5626_v9 = vadd.s32 536870912, %v15532_v52  ;;  %v15571_v50 = vmul.u32.u64.low %v15559_v42, %v5814_v11  ;;  %v15572_v61 = vmul.u32.u64.high %v15559_v42, %v5814_v11, %v15571_v50  ;;  %vm5885_vm9 = vcmp.gt.s32.totalorder %v5884_v54, 0 }
 0x53d   : > { %v15557_v59 = vpop.permute.xlu1 %587  ;;  %v15584_v41 = vmul.u32.u64.low %v15559_v42, %v5818_v37  ;;  %v15585_v53 = vmul.u32.u64.high %v15559_v42, %v5818_v37, %v15584_v41  ;;  %v5686_v11 = vshrl.u32 %v19383_v56, %v15547_v35  ;;  %v5685_v37 = vshll.u32 %v19386_v6, %v5682_v2 }
 0x53e   : > { %19392 = vst [vmem:[#allocation11_spill] sm:$0xff] %v15557_v59  ;;  %v15563_v49 = vshrl.u32 %v5626_v9, 30  ;;  %v5694_v9 = vshll.u32 %v19384_v58, %v5682_v2  ;;  %v5886_v41 = vsel %vm5885_vm9, %v5884_v54, 0  ;;  %v5690_v55 = vor.u32 %v5689_v30, %v5688_v13 }
 0x53f   : > { %v5693_v63 = vor.u32 %v5692_v60, %v5691_v45  ;;  %vm5703_vm1 = vcmp.lt.s32.totalorder %v15575_v57, 4  ;;  %v5676_v22 = vor.u32 8388608, %v5675_v62  ;;  %v18643_v45 = vand.u32 2147483647, %v15491_v48 }
 0x540   : > { %19393 = vst [vmem:[#allocation3_spill] sm:$0xff] %v15563_v49  ;;  %v5696_v5 = vor.u32 %v5695_v7, %v5694_v9  ;;  %v5628_v3 = vshll.u32 %v15563_v49, 30  ;;  %v5787_v7 = vshrl.u32 %v19386_v6, %v15483_v47  ;;  %v5687_v9 = vor.u32 %v5686_v11, %v5685_v37 }
 0x541   : > { %v15593_v51 = vpop.permute.xlu1 %577  ;;  %v5713_v33 = vsel %vm5703_vm1, %v5699_v26, 1326507024  ;;  %v5888_v2 = vand.u32 31, %v5886_v41  ;;  %v5809_v30 = vsel %vm5805_vm15, %v5793_v14, %v5808_v17  ;;  %vm5700_vm3 = vcmp.lt.s32.totalorder %v15575_v57, 1 }
 0x542   : > { %v15601_v19 = vadd.f32 %v19394_v24, %v15593_v51  ;;  %v5709_v13 = vsel %vm5703_vm1, %v5696_v5, 920167782  ;;  %v5807_v54 = vsel %vm5803_vm13, %v5787_v7, %v15529_v15  ;;  %vm5702_vm8 = vcmp.lt.s32.totalorder %v15575_v57, 3 }
 0x543   : > { %v5829_v47 = vadd.s32 1, %v15572_v61  ;;  %v5712_v62 = vsel %vm5700_vm3, %v5690_v55, %v5693_v63  ;;  %v5714_v60 = vsel %vm5702_vm8, %v5696_v5, %v5713_v33  ;;  %v15625_v26 = vsub.s32 %v15532_v52, %v5628_v3 }
 0x544   : > { %19395 = vst [vmem:[#allocation27_spill] sm:$0xff] %v15601_v19  ;;  %v5980_v11 = vand.u32 2139095040, %v15601_v19  ;;  %vm5828_vm5 = vc.u32 %v15585_v53, %v15571_v50  ;;  %v5708_v17 = vsel %vm5700_vm3, %v5687_v9, %v5690_v55  ;;  %v5710_v15 = vsel %vm5702_vm8, %v5693_v63, %v5709_v13 }
 0x545   : > { %v5810_v14 = vsel %vm5804_vm14, %v5807_v54, %v5809_v30  ;;  %vm5701_vm7 = vcmp.lt.s32.totalorder %v15575_v57, 2  ;;  %v15636_v5 = vsub.s32 32, %v5888_v2  ;;  %v5830_v3 = vsel %vm5828_vm5, %v5829_v47, %v15572_v61 }
 0x546   : > { %v5715_v52 = vsel %vm5701_vm7, %v5712_v62, %v5714_v60  ;;  %v5711_v37 = vsel %vm5701_vm7, %v5708_v17, %v5710_v15  ;;  %v15643_v24 = vshll.u32 %v5676_v22, 8  ;;  %v5981_v7 = vshrl.u32 %v5980_v11, 23 }
 0x547   : > { %v5631_v33 = vsub.s32 0, %v15625_v26  ;;  %v5826_v18 = vmul.u32 %v15559_v42, %v5810_v14  ;;  %v5881_v13 = vand.u32 8388607, %v18643_v45  ;;  %v5901_v61 = vshrl.u32 %v19381_v31, %v15636_v5 }
 0x548   : > { %v15650_v54 = vmul.u32.u64.low %v15643_v24, %v5715_v52  ;;  %v15651_v30 = vmul.u32.u64.high %v15643_v24, %v5715_v52, %v15650_v54  ;;  %v5904_v47 = vshrl.u32 %v19382_v25, %v15636_v5  ;;  %v5900_v42 = vshll.u32 %v19384_v58, %v5888_v2 }
 0x549   : > { %v5831_v22 = vadd.s32 %v5830_v3, %v5826_v18  ;;  %v15658_v62 = vmul.u32.u64.low %v15643_v24, %v5711_v37  ;;  %v15659_v60 = vmul.u32.u64.high %v15643_v24, %v5711_v37, %v15658_v62  ;;  %v5892_v11 = vshrl.u32 %v19383_v56, %v15636_v5 }
 0x54a   : > { %v5895_v17 = vshrl.u32 %v19385_v23, %v15636_v5  ;;  %v5903_v15 = vshll.u32 %v19381_v31, %v5888_v2  ;;  %v9132_v14 = vadd.s32 4294967169, %v5981_v7  ;;  %v5684_v52 = vshrl.u32 %v19386_v6, %v15547_v35 }
 0x54b   : > { %v5705_v3 = vsel %vm5703_vm1, %v5693_v63, 2102212464  ;;  %v15672_v37 = vshrl.u32 %v5886_v41, 5  ;;  %v5898_v18 = vshrl.u32 %v19384_v58, %v15636_v5  ;;  %v5891_v54 = vshll.u32 %v19386_v6, %v5888_v2 }
 0x54c   : > { %v5894_v45 = vshll.u32 %v19383_v56, %v5888_v2  ;;  %v5902_v49 = vor.u32 %v5901_v61, %v5900_v42  ;;  %v5905_v48 = vor.u32 %v5904_v47, %v5903_v15  ;;  %v5832_v39 = vadd.s32 536870912, %v5831_v22 }
 0x54d   : > { %v5704_v7 = vsel %vm5700_vm3, %v5684_v52, %v5687_v9  ;;  %v5897_v35 = vshll.u32 %v19385_v23, %v5888_v2  ;;  %v5706_v63 = vsel %vm5702_vm8, %v5690_v55, %v5705_v3  ;;  %v5893_v41 = vor.u32 %v5892_v11, %v5891_v54 }
 0x54e   : > { %v5896_v21 = vor.u32 %v5895_v17, %v5894_v45  ;;  %v5987_v8 = vadd.s32 1, %v9132_v14  ;;  %vm5909_vm2 = vcmp.lt.s32.totalorder %v15672_v37, 4  ;;  %v15686_v29 = vadd.f32 %v19396_v40, %v15593_v51 }
 0x54f   : > { %v5899_v36 = vor.u32 %v5898_v18, %v5897_v35  ;;  %v9117_v61 = vmin.u32 %v5631_v33, %v15625_v26  ;;  %v5882_v47 = vor.u32 8388608, %v5881_v13  ;;  %v5915_v9 = vsel %vm5909_vm2, %v5902_v49, 920167782 }
 0x550   : > { %19397 = vst [vmem:[#allocation21_spill] sm:$0xff] %v15686_v29  ;;  %v5919_v2 = vsel %vm5909_vm2, %v5905_v48, 1326507024  ;;  %v15693_v55 = vshrl.u32 %v5832_v39, 30  ;;  %v5707_v45 = vsel %vm5701_vm7, %v5704_v7, %v5706_v63  ;;  %v5726_v42 = vadd.s32 1, %v15659_v60 }
 0x551   : > { %vm5906_vm10 = vcmp.lt.s32.totalorder %v15672_v37, 1  ;;  %vm5725_vm0 = vc.u32 %v15651_v30, %v15658_v62  ;;  %vm5908_vm6 = vcmp.lt.s32.totalorder %v15672_v37, 3  ;;  %vm5988_vm4 = vcmp.gt.s32.totalorder %v5987_v8, 0 }
 0x552   : > { %19398 = vst [vmem:[#allocation12_spill] sm:$0xff] %v15693_v55  ;;  %v5914_v40 = vsel %vm5906_vm10, %v5893_v41, %v5896_v21  ;;  %v5916_v39 = vsel %vm5908_vm6, %v5899_v36, %v5915_v9  ;;  %v5918_v48 = vsel %vm5906_vm10, %v5896_v21, %v5899_v36  ;;  %v5920_v57 = vsel %vm5908_vm6, %v5902_v49, %v5919_v2 }
 0x553   : > { %v6186_v33 = vand.u32 2139095040, %v15686_v29  ;;  %v5633_v13 = vclz %v9117_v61  ;;  %v5727_v11 = vsel %vm5725_vm0, %v5726_v42, %v15659_v60  ;;  %vm5907_vm13 = vcmp.lt.s32.totalorder %v15672_v37, 2 }
 0x554   : > { %v5989_v17 = vsel %vm5988_vm4, %v5987_v8, 0  ;;  %v5723_v15 = vmul.u32 %v15643_v24, %v5707_v45  ;;  %v5917_v14 = vsel %vm5907_vm13, %v5914_v40, %v5916_v39  ;;  %v5921_v52 = vsel %vm5907_vm13, %v5918_v48, %v5920_v57  ;;  %v19399_v40 = vld [vmem:[#allocation116_spill] sm:$0xff] }
 0x555   : > { %v5834_v3 = vshll.u32 %v15693_v55, 30  ;;  %v5922_v18 = vshll.u32 %v5882_v47, 8  ;;  %v6187_v49 = vshrl.u32 %v6186_v33, 23  ;;  %v9118_v54 = vadd.s32 4294967294, %v5633_v13 }
 0x556   : > { %v5728_v7 = vadd.s32 %v5727_v11, %v5723_v15  ;;  %v5991_v35 = vand.u32 31, %v5989_v17  ;;  %v5890_v47 = vshrl.u32 %v19386_v6, %v15636_v5  ;;  %v5911_v42 = vsel %vm5909_vm2, %v5899_v36, 2102212464 }
 0x557   : > { %v15719_v63 = vmul.u32.u64.low %v5922_v18, %v5921_v52  ;;  %v15720_v60 = vmul.u32.u64.high %v5922_v18, %v5921_v52, %v15719_v63  ;;  %v15722_v61 = vmul.u32.u64.low %v5922_v18, %v5917_v14  ;;  %v15723_v8 = vmul.u32.u64.high %v5922_v18, %v5917_v14, %v15722_v61 }
 0x558   : > { %v15726_v24 = vsub.s32 %v5831_v22, %v5834_v3  ;;  %v9140_v9 = vadd.s32 4294967169, %v6187_v49  ;;  %vm9119_vm15 = vcmp.lt.s32.totalorder %v9118_v54, 0  ;;  %v5729_v2 = vadd.s32 536870912, %v5728_v7 }
 0x559   : > { %v15728_v45 = vsub.s32 32, %v5991_v35  ;;  %v15736_v39 = vadd.f32 %v19399_v40, %v15593_v51  ;;  %v15738_v48 = vsel %vm9119_vm15, 0, %v9118_v54  ;;  %v5910_v13 = vsel %vm5906_vm10, %v5890_v47, %v5893_v41 }
 0x55a   : > { %v5837_v22 = vsub.s32 0, %v15726_v24  ;;  %v6193_v57 = vadd.s32 1, %v9140_v9  ;;  %v15741_v33 = vshrl.u32 %v5729_v2, 30  ;;  %v5912_v36 = vsel %vm5908_vm6, %v5896_v21, %v5911_v42 }
 0x55b   : > { %19400 = vst [vmem:[#allocation4_spill] sm:$0xff] %v15736_v39  ;;  %v6004_v5 = vshrl.u32 %v19381_v31, %v15728_v45  ;;  %vm5931_vm14 = vc.u32 %v15720_v60, %v15722_v61  ;;  %v5932_v15 = vadd.s32 1, %v15723_v8  ;;  %v6007_v14 = vshrl.u32 %v19382_v25, %v15728_v45 }
 0x55c   : > { %19401 = vst [vmem:[#allocation140_spill] sm:$0xff] %v15741_v33  ;;  %v15755_v52 = vshrl.u32 %v5989_v17, 5  ;;  %v5995_v41 = vshrl.u32 %v19383_v56, %v15728_v45  ;;  %v6003_v3 = vshll.u32 %v19384_v58, %v5991_v35  ;;  %v6083_v49 = vand.u32 2139095040, %v15736_v39 }
 0x55d   : > { %v5998_v21 = vshrl.u32 %v19385_v23, %v15728_v45  ;;  %v6001_v54 = vshrl.u32 %v19384_v58, %v15728_v45  ;;  %v6006_v63 = vshll.u32 %v19381_v31, %v5991_v35  ;;  %vm6194_vm9 = vcmp.gt.s32.totalorder %v6193_v57, 0 }
 0x55e   : > { %v9125_v9 = vmin.u32 %v5837_v22, %v15726_v24  ;;  %v5731_v17 = vshll.u32 %v15741_v33, 30  ;;  %v5913_v2 = vsel %vm5907_vm13, %v5910_v13, %v5912_v36  ;;  %v6005_v47 = vor.u32 %v6004_v5, %v6003_v3 }
 0x55f   : > { %v5994_v42 = vshll.u32 %v19386_v6, %v5991_v35  ;;  %v5997_v40 = vshll.u32 %v19383_v56, %v5991_v35  ;;  %v6000_v11 = vshll.u32 %v19385_v23, %v5991_v35  ;;  %v6008_v55 = vor.u32 %v6007_v14, %v6006_v63 }
 0x560   : > { %v5933_v46 = vsel %vm5931_vm14, %v5932_v15, %v15723_v8  ;;  %v19402_v22 = vand.u32 2147483647, %v15601_v19  ;;  %v6195_v33 = vsel %vm6194_vm9, %v6193_v57, 0  ;;  %v6084_v10 = vshrl.u32 %v6083_v49, 23 }
 0x561   : > { %v5996_v37 = vor.u32 %v5995_v41, %v5994_v42  ;;  %v5999_v13 = vor.u32 %v5998_v21, %v5997_v40  ;;  %v6002_v5 = vor.u32 %v6001_v54, %v6000_v11  ;;  %vm6012_vm1 = vcmp.lt.s32.totalorder %v15755_v52, 4 }
 0x562   : > { %v5984_v44 = vand.u32 8388607, %v19402_v22  ;;  %v5641_v36 = vsub.s32 4294967266, %v15738_v48  ;;  %v5839_v3 = vclz %v9125_v9  ;;  %v5929_v35 = vmul.u32 %v5922_v18, %v5913_v2 }
 0x563   : > { %v6018_v14 = vsel %vm6012_vm1, %v6005_v47, 920167782  ;;  %v15783_v63 = vsub.s32 %v5728_v7, %v5731_v17  ;;  %v6022_v8 = vsel %vm6012_vm1, %v6008_v55, 1326507024  ;;  %v6197_v15 = vand.u32 31, %v6195_v33 }
 0x564   : > { %v15787_v57 = vadd.s32 %v5933_v46, %v5929_v35  ;;  %vm6009_vm3 = vcmp.lt.s32.totalorder %v15755_v52, 1  ;;  %vm6011_vm8 = vcmp.lt.s32.totalorder %v15755_v52, 3  ;;  %v9136_v11 = vadd.s32 4294967169, %v6084_v10 }
 0x565   : > { %v5637_v41 = vsub.s32 32, %v15738_v48  ;;  %v5985_v49 = vor.u32 8388608, %v5984_v44  ;;  %v6017_v18 = vsel %vm6009_vm3, %v5996_v37, %v5999_v13  ;;  %v6019_v7 = vsel %vm6011_vm8, %v6002_v5, %v6018_v14 }
 0x566   : > { %v5642_v21 = vadd.s32 127, %v5641_v36  ;;  %v9126_v54 = vadd.s32 4294967294, %v5839_v3  ;;  %v6021_v46 = vsel %vm6009_vm3, %v5999_v13, %v6002_v5  ;;  %v6023_v55 = vsel %vm6011_vm8, %v6005_v47, %v6022_v8 }
 0x567   : > { %v5734_v9 = vsub.s32 0, %v15783_v63  ;;  %vm6010_vm5 = vcmp.lt.s32.totalorder %v15755_v52, 2  ;;  %v15802_v10 = vsub.s32 32, %v6197_v15  ;;  %v5621_v44 = vadd.s32 %v15476_v16, %v15481_v43 }
 0x568   : > { %v5935_v17 = vadd.s32 536870912, %v15787_v57  ;;  %v6020_v2 = vsel %vm6010_vm5, %v6017_v18, %v6019_v7  ;;  %v6090_v42 = vadd.s32 1, %v9136_v11  ;;  %v5638_v40 = vshll.u32 %v15625_v26, %v15738_v48 }
 0x569   : > { %v6024_v47 = vsel %vm6010_vm5, %v6021_v46, %v6023_v55  ;;  %v15813_v22 = vshll.u32 %v5985_v49, 8  ;;  %v5639_v36 = vshrl.u32 %v5621_v44, %v5637_v41  ;;  %v5643_v3 = vshll.u32 %v5642_v21, 23 }
 0x56a   : > { %vm9127_vm7 = vcmp.lt.s32.totalorder %v9126_v54, 0  ;;  %v18678_v35 = vand.u32 2147483647, %v15686_v29  ;;  %v9121_v16 = vmin.u32 %v5734_v9, %v15783_v63  ;;  %v6210_v26 = vshrl.u32 %v19381_v31, %v15802_v10 }
 0x56b   : > { %v15818_v43 = vmul.u32.u64.low %v15813_v22, %v6020_v2  ;;  %v15819_v14 = vmul.u32.u64.high %v15813_v22, %v6020_v2, %v15818_v43  ;;  %v15824_v48 = vshrl.u32 %v5935_v17, 30  ;;  %vm6091_vm2 = vcmp.gt.s32.totalorder %v6090_v42, 0 }
 0x56c   : > { %v15827_v8 = vmul.u32.u64.low %v15813_v22, %v6024_v47  ;;  %v15828_v11 = vmul.u32.u64.high %v15813_v22, %v6024_v47, %v15827_v8  ;;  %v5993_v41 = vshrl.u32 %v19386_v6, %v15728_v45  ;;  %v6201_v49 = vshrl.u32 %v19383_v56, %v15802_v10 }
 0x56d   : > { %19403 = vst [vmem:[#allocation136_spill] sm:$0xff] %v15824_v48  ;;  %v6209_v18 = vshll.u32 %v19384_v58, %v6197_v15  ;;  %v6213_v7 = vshrl.u32 %v19382_v25, %v15802_v10  ;;  %v6014_v21 = vsel %vm6012_vm1, %v6002_v5, 2102212464  ;;  %v15839_v46 = vshrl.u32 %v6195_v33, 5 }
 0x56e   : > { %v6204_v55 = vshrl.u32 %v19385_v23, %v15802_v10  ;;  %v6207_v9 = vshrl.u32 %v19384_v58, %v15802_v10  ;;  %v6200_v45 = vshll.u32 %v19386_v6, %v6197_v15  ;;  %v6212_v17 = vshll.u32 %v19381_v31, %v6197_v15 }
 0x56f   : > { %v6211_v44 = vor.u32 %v6210_v26, %v6209_v18  ;;  %v6092_v2 = vsel %vm6091_vm2, %v6090_v42, 0  ;;  %v5937_v47 = vshll.u32 %v15824_v48, 30  ;;  %v6190_v8 = vand.u32 8388607, %v18678_v35 }
 0x570   : > { %v6203_v33 = vshll.u32 %v19383_v56, %v6197_v15  ;;  %v6206_v5 = vshll.u32 %v19385_v23, %v6197_v15  ;;  %v6013_v19 = vsel %vm6009_vm3, %v5993_v41, %v5996_v37  ;;  %v6015_v32 = vsel %vm6011_vm8, %v5999_v13, %v6014_v21 }
 0x571   : > { %v15856_v28 = vor.u32 %v6201_v49, %v6200_v45  ;;  %v6214_v26 = vor.u32 %v6213_v7, %v6212_v17  ;;  %vm6218_vm10 = vcmp.lt.s32.totalorder %v15839_v46, 4  ;;  %v6094_v48 = vand.u32 31, %v6092_v2  ;;  %v19404_v17 = vld [vmem:[#allocation117_spill] sm:$0xff] }
 0x572   : > { %v15858_v18 = vor.u32 %v6204_v55, %v6203_v33  ;;  %v6208_v42 = vor.u32 %v6207_v9, %v6206_v5  ;;  %v15861_v35 = vor.u32 %v5639_v36, %v5638_v40  ;;  %v15863_v29 = vor.u32 4788187, %v5643_v3 }
 0x573   : > { %v15866_v15 = vsel %vm9127_vm7, 0, %v9126_v54  ;;  %v6224_v37 = vsel %vm6218_vm10, %v6211_v44, 920167782  ;;  %v5736_v13 = vclz %v9121_v16  ;;  %v15871_v41 = vsub.s32 %v15787_v57, %v5937_v47 }
 0x574   : > { %v6016_v49 = vsel %vm6010_vm5, %v6013_v19, %v6015_v32  ;;  %v6035_v7 = vadd.s32 1, %v15819_v14  ;;  %vm6034_vm0 = vc.u32 %v15828_v11, %v15818_v43  ;;  %vm6215_vm6 = vcmp.lt.s32.totalorder %v15839_v46, 1 }
 0x575   : > { %vm6217_vm4 = vcmp.lt.s32.totalorder %v15839_v46, 3  ;;  %v6228_v54 = vsel %vm6218_vm10, %v6214_v26, 1326507024  ;;  %v6191_v40 = vor.u32 8388608, %v6190_v8  ;;  %v6223_v57 = vsel %vm6215_vm6, %v15856_v28, %v15858_v18 }
 0x576   : > { %v6225_v32 = vsel %vm6217_vm4, %v6208_v42, %v6224_v37  ;;  %v15888_v19 = vsub.s32 32, %v6094_v48  ;;  %v6036_v3 = vsel %vm6034_vm0, %v6035_v7, %v15819_v14  ;;  %vm6216_vm13 = vcmp.lt.s32.totalorder %v15839_v46, 2 }
 0x577   : > { %v6227_v16 = vsel %vm6215_vm6, %v15858_v18, %v6208_v42  ;;  %v6229_v21 = vsel %vm6217_vm4, %v6211_v44, %v6228_v54  ;;  %v5847_v55 = vsub.s32 4294967266, %v15866_v15  ;;  %v6032_v9 = vmul.u32 %v15813_v22, %v6016_v49 }
 0x578   : > { %v6226_v45 = vsel %vm6216_vm13, %v6223_v57, %v6225_v32  ;;  %v15905_v47 = vadd.f32 %v19404_v17, %v15593_v51  ;;  %v9122_v14 = vadd.s32 4294967294, %v5736_v13  ;;  %v5940_v8 = vsub.s32 0, %v15871_v41 }
 0x579   : > { %v15908_v33 = vshll.u32 %v6191_v40, 8  ;;  %v6107_v5 = vshrl.u32 %v19381_v31, %v15888_v19  ;;  %v15912_v44 = vadd.s32 %v6036_v3, %v6032_v9  ;;  %v6230_v22 = vsel %vm6216_vm13, %v6227_v16, %v6229_v21 }
 0x57a   : > { %19405 = vst [vmem:[#allocation60_spill] sm:$0xff] %v15905_v47  ;;  %v6110_v37 = vshrl.u32 %v19382_v25, %v15888_v19  ;;  %v15924_v49 = vshrl.u32 %v6092_v2, 5  ;;  %v6106_v7 = vshll.u32 %v19384_v58, %v6094_v48  ;;  %v6098_v54 = vshrl.u32 %v19383_v56, %v15888_v19 }
 0x57b   : > { %v15920_v51 = vmul.u32.u64.low %v15908_v33, %v6226_v45  ;;  %v15921_v13 = vmul.u32.u64.high %v15908_v33, %v6226_v45, %v15920_v51  ;;  %v6101_v40 = vshrl.u32 %v19385_v23, %v15888_v19  ;;  %v6104_v57 = vshrl.u32 %v19384_v58, %v15888_v19 }
 0x57c   : > { %v6109_v32 = vshll.u32 %v19381_v31, %v6094_v48  ;;  %v15935_v3 = vmul.u32.u64.low %v15908_v33, %v6230_v22  ;;  %v15936_v16 = vmul.u32.u64.high %v15908_v33, %v6230_v22, %v15935_v3  ;;  %v6108_v21 = vor.u32 %v6107_v5, %v6106_v7 }
 0x57d   : > { %v6289_v2 = vand.u32 2139095040, %v15905_v47  ;;  %v6097_v9 = vshll.u32 %v19386_v6, %v6094_v48  ;;  %v6100_v45 = vshll.u32 %v19383_v56, %v6094_v48  ;;  %v6103_v17 = vshll.u32 %v19385_v23, %v6094_v48 }
 0x57e   : > { %v6111_v36 = vor.u32 %v6110_v37, %v6109_v32  ;;  %v5843_v52 = vsub.s32 32, %v15866_v15  ;;  %vm9123_vm15 = vcmp.lt.s32.totalorder %v9122_v14, 0  ;;  %v9129_v26 = vmin.u32 %v5940_v8, %v15871_v41 }
 0x57f   : > { %v19406_v59 = vand.u32 2147483647, %v15736_v39  ;;  %v15946_v22 = vor.u32 %v6098_v54, %v6097_v9  ;;  %v15948_v5 = vor.u32 %v6101_v40, %v6100_v45  ;;  %v6105_v7 = vor.u32 %v6104_v57, %v6103_v17 }
 0x580   : > { %vm6115_vm14 = vcmp.lt.s32.totalorder %v15924_v49, 4  ;;  %v6199_v3 = vshrl.u32 %v19386_v6, %v15802_v10  ;;  %v6220_v48 = vsel %vm6218_vm10, %v6208_v42, 2102212464  ;;  %v6290_v8 = vshrl.u32 %v6289_v2, 23 }
 0x581   : > { %v6087_v1 = vand.u32 8388607, %v19406_v59  ;;  %v6121_v37 = vsel %vm6115_vm14, %v6108_v21, 920167782  ;;  %v5848_v32 = vadd.s32 127, %v5847_v55  ;;  %v15957_v39 = vsel %vm9123_vm15, 0, %v9122_v14 }
 0x582   : > { %v6038_v59 = vadd.s32 536870912, %v15912_v44  ;;  %v6125_v54 = vsel %vm6115_vm14, %v6111_v36, 1326507024  ;;  %v5942_v40 = vclz %v9129_v26  ;;  %v6219_v10 = vsel %vm6215_vm6, %v6199_v3, %v15856_v28 }
 0x583   : > { %vm6112_vm9 = vcmp.lt.s32.totalorder %v15924_v49, 1  ;;  %vm6114_vm1 = vcmp.lt.s32.totalorder %v15924_v49, 3  ;;  %v6221_v42 = vsel %vm6217_vm4, %v15858_v18, %v6220_v48  ;;  %v6088_v55 = vor.u32 8388608, %v6087_v1 }
 0x584   : > { %v6120_v14 = vsel %vm6112_vm9, %v15946_v22, %v15948_v5  ;;  %v6122_v36 = vsel %vm6114_vm1, %v6105_v7, %v6121_v37  ;;  %v6241_v26 = vadd.s32 1, %v15921_v13  ;;  %v6124_v28 = vsel %vm6112_vm9, %v15948_v5, %v6105_v7 }
 0x585   : > { %v6126_v57 = vsel %vm6114_vm1, %v6108_v21, %v6125_v54  ;;  %v9144_v2 = vadd.s32 4294967169, %v6290_v8  ;;  %v5827_v1 = vadd.s32 %v15571_v50, %v15585_v53  ;;  %v15984_v18 = vshrl.u32 %v6038_v59, 30  ;;  %v19410_v8 = vld [vmem:[#allocation118_spill] sm:$0xff] }
 0x586   : > { %vm6240_vm3 = vc.u32 %v15936_v16, %v15920_v51  ;;  %vm6113_vm8 = vcmp.lt.s32.totalorder %v15924_v49, 2  ;;  %v19408_v9 = vand.u32 2147483647, %v15863_v29  ;;  %v19409_v45 = vcvt.s32.f32 %v15861_v35 }
 0x587   : > { %19407 = vst [vmem:[#allocation138_spill] sm:$0xff] %v15984_v18  ;;  %v5744_v3 = vsub.s32 4294967266, %v15957_v39  ;;  %v6222_v21 = vsel %vm6216_vm13, %v6219_v10, %v6221_v42  ;;  %v6123_v50 = vsel %vm6113_vm8, %v6120_v14, %v6122_v36  ;;  %v5845_v53 = vshrl.u32 %v5827_v1, %v5843_v52 }
 0x588   : > { %v5648_v17 = vmul.f32 %v19409_v45, %v19408_v9  ;;  %v6127_v48 = vsel %vm6113_vm8, %v6124_v28, %v6126_v57  ;;  %v16000_v37 = vshll.u32 %v6088_v55, 8  ;;  %v16004_v29 = vadd.f32 %v19410_v8, %v15383_v4 }
 0x589   : > { %v5849_v35 = vshll.u32 %v5848_v32, 23  ;;  %v9130_v59 = vadd.s32 4294967294, %v5942_v40  ;;  %v6242_v54 = vsel %vm6240_vm3, %v6241_v26, %v15921_v13  ;;  %v6296_v9 = vadd.s32 1, %v9144_v2 }
 0x58a   : > { %19411 = vst [vmem:[#allocation66_spill] sm:$0xff] %v16004_v29  ;;  %v6040_v46 = vshll.u32 %v15984_v18, 30  ;;  %v6238_v10 = vmul.u32 %v15908_v33, %v6222_v21  ;;  %v16010_v52 = vmul.u32.u64.low %v16000_v37, %v6123_v50  ;;  %v16011_v42 = vmul.u32.u64.high %v16000_v37, %v6123_v50, %v16010_v52 }
 0x58b   : > { %v5844_v55 = vshll.u32 %v15726_v24, %v15866_v15  ;;  %v5745_v14 = vadd.s32 127, %v5744_v3  ;;  %v16017_v36 = vmul.u32.u64.low %v16000_v37, %v6127_v48  ;;  %v16018_v32 = vmul.u32.u64.high %v16000_v37, %v6127_v48, %v16017_v36 }
 0x58c   : > { %19412 = vst [vmem:[#allocation98_spill] sm:$0xff] %v16010_v52  ;;  %v5649_v40 = vxor.u32 2147483648, %v5648_v17  ;;  %v6243_v13 = vadd.s32 %v6242_v54, %v6238_v10  ;;  %v6392_v26 = vand.u32 2139095040, %v16004_v29  ;;  %v5740_v33 = vsub.s32 32, %v15957_v39 }
 0x58d   : > { %19413 = vst [vmem:[#allocation134_spill] sm:$0xff] %v16018_v32  ;;  %v5846_v28 = vor.u32 %v5845_v53, %v5844_v55  ;;  %vm6297_vm5 = vcmp.gt.s32.totalorder %v6296_v9, 0  ;;  %v5850_v57 = vor.u32 4788187, %v5849_v35  ;;  %vm9131_vm7 = vcmp.lt.s32.totalorder %v9130_v59, 0 }
 0x58e   : > { %v16023_v2 = vsub.s32 %v15912_v44, %v6040_v46  ;;  %v6117_v24 = vsel %vm6115_vm14, %v6105_v7, 2102212464  ;;  %vm18750_vm2 = vcmp.lt.s32.totalorder %v15389_v20, 0  ;;  %v5724_v15 = vadd.s32 %v15658_v62, %v15651_v30 }
 0x58f   : > { %v5746_v1 = vshll.u32 %v5745_v14, 23  ;;  %v6096_v45 = vshrl.u32 %v19386_v6, %v15888_v19  ;;  %v5650_v3 = vsel %vm18750_vm2, %v5649_v40, %v5648_v17  ;;  %v6244_v21 = vadd.s32 536870912, %v6243_v13 }
 0x590   : > { %v6298_v50 = vsel %vm6297_vm5, %v6296_v9, 0  ;;  %v6393_v53 = vshrl.u32 %v6392_v26, 23  ;;  %v5742_v44 = vshrl.u32 %v5724_v15, %v5740_v33  ;;  %v16034_v48 = vsel %vm9131_vm7, 0, %v9130_v59 }
 0x591   : > { %v6116_v7 = vsel %vm6112_vm9, %v6096_v45, %v15946_v22  ;;  %v6118_v30 = vsel %vm6114_vm1, %v15948_v5, %v6117_v24  ;;  %v5851_v62 = vand.u32 2147483647, %v5850_v57  ;;  %v5853_v8 = vcvt.s32.f32 %v5846_v28 }
 0x592   : > { %v6043_v19 = vsub.s32 0, %v16023_v2  ;;  %v6138_v17 = vadd.s32 1, %v16011_v42  ;;  %v5741_v35 = vshll.u32 %v15783_v63, %v15957_v39  ;;  %v5747_v54 = vor.u32 4788187, %v5746_v1 }
 0x593   : > { %vm6137_vm10 = vc.u32 %v16018_v32, %v16010_v52  ;;  %v6300_v59 = vand.u32 31, %v6298_v50  ;;  %v5950_v22 = vsub.s32 4294967266, %v16034_v48  ;;  %v16049_v9 = vshrl.u32 %v6244_v21, 30  ;;  %v19467_v32 = vld [vmem:[#allocation24_spill] sm:$0xff] }
 0x594   : > { %v6119_v5 = vsel %vm6113_vm8, %v6116_v7, %v6118_v30  ;;  %v9148_v46 = vadd.s32 4294967169, %v6393_v53  ;;  %v19415_v10 = vand.u32 2147483647, %v15389_v20  ;;  %v19416_v55 = vmov 0 }
 0x595   : > { %19414 = vst [vmem:[#allocation139_spill] sm:$0xff] %v16049_v9  ;;  %v5743_v39 = vor.u32 %v5742_v44, %v5741_v35  ;;  %v5854_v14 = vmul.f32 %v5853_v8, %v5851_v62  ;;  %v9133_v36 = vmin.u32 %v6043_v19, %v16023_v2  ;;  %v6139_v40 = vsel %vm6137_vm10, %v6138_v17, %v16011_v42 }
 0x596   : > { %vm16055_vm0 = vcmp.le.f32.partialorder %v19415_v10, 0.7853982  ;;  %v5748_v49 = vand.u32 2147483647, %v5747_v54  ;;  %v5946_v26 = vsub.s32 32, %v16034_v48  ;;  %v6135_v28 = vmul.u32 %v16000_v37, %v6119_v5 }
 0x597   : > { %v19417_v55 = vsel %vm16055_vm0, 4294967295, %v19416_v55  ;;  %v16062_v63 = vsel %vm16055_vm0, %v15389_v20, %v5650_v3  ;;  %v16068_v33 = vsub.s32 32, %v6300_v59  ;;  %v5951_v57 = vadd.s32 127, %v5950_v22 }
 0x598   : > { %19418 = vst [vmem:[#allocation91_spill] sm:$0xff] %v19417_v55  ;;  %v6246_v24 = vshll.u32 %v16049_v9, 30  ;;  %v6399_v15 = vadd.s32 1, %v9148_v46  ;;  %v5750_v1 = vcvt.s32.f32 %v5743_v39  ;;  %v5930_v45 = vadd.s32 %v15722_v61, %v15720_v60 }
 0x599   : > { %v16073_v3 = vadd.s32 %v6139_v40, %v6135_v28  ;;  %9685 = vcosq.f32 %v16062_v63  ;;  %vm18749_vm6 = vcmp.lt.s32.totalorder %v15397_v0, 0  ;;  %v5855_v42 = vxor.u32 2147483648, %v5854_v14 }
 0x59a   : > { %v6045_v21 = vclz %v9133_v36  ;;  %v5751_v53 = vmul.f32 %v5750_v1, %v5748_v49  ;;  %v5947_v37 = vshll.u32 %v15871_v41, %v16034_v48  ;;  %v5948_v44 = vshrl.u32 %v5930_v45, %v5946_v26 }
 0x59b   : > { %v6313_v7 = vshrl.u32 %v19381_v31, %v16068_v33  ;;  %v5952_v30 = vshll.u32 %v5951_v57, 23  ;;  %v16081_v62 = vsub.s32 %v6243_v13, %v6246_v24  ;;  %v18685_v60 = vand.u32 2147483647, %v15905_v47  ;;  %v19425_v24 = vld [vmem:[#allocation119_spill] sm:$0xff] }
 0x59c   : > { %vm6400_vm4 = vcmp.gt.s32.totalorder %v6399_v15, 0  ;;  %v6141_v61 = vadd.s32 536870912, %v16073_v3  ;;  %v6304_v8 = vshrl.u32 %v19383_v56, %v16068_v33  ;;  %v6312_v19 = vshll.u32 %v19384_v58, %v6300_v59 }
 0x59d   : > { %19419 = vst [vmem:[#allocation90_spill] sm:$0xff] %v16081_v62  ;;  %v6316_v41 = vshrl.u32 %v19382_v25, %v16068_v33  ;;  %v19420_v48 = vand.u32 2147483647, %v15397_v0  ;;  %v19421_v17 = vmov 0  ;;  %vm18748_vm15 = vcmp.lt.s32.totalorder %v15450_v34, 0 }
 0x59e   : > { %v9134_v13 = vadd.s32 4294967294, %v6045_v21  ;;  %v16097_v35 = vshrl.u32 %v6298_v50, 5  ;;  %v6307_v54 = vshrl.u32 %v19385_v23, %v16068_v33  ;;  %v6310_v22 = vshrl.u32 %v19384_v58, %v16068_v33 }
 0x59f   : > { %vm16092_vm13 = vcmp.le.f32.partialorder %v19420_v48, 0.7853982  ;;  %v6303_v5 = vshll.u32 %v19386_v6, %v6300_v59  ;;  %v6314_v46 = vor.u32 %v6313_v7, %v6312_v19  ;;  %v6315_v10 = vshll.u32 %v19381_v31, %v6300_v59 }
 0x5a0   : > { %v19422_v17 = vsel %vm16092_vm13, 4294967295, %v19421_v17  ;;  %v6401_v39 = vsel %vm6400_vm4, %v6399_v15, 0  ;;  %v6249_v36 = vsub.s32 0, %v16081_v62  ;;  %v6293_v40 = vand.u32 8388607, %v18685_v60 }
 0x5a1   : > { %19423 = vst [vmem:[#allocation137_spill] sm:$0xff] %v19422_v17  ;;  %v6306_v50 = vshll.u32 %v19383_v56, %v6300_v59  ;;  %v6309_v49 = vshll.u32 %v19385_v23, %v6300_v59  ;;  %v16110_v26 = vshrl.u32 %v6141_v61, 30  ;;  %v16112_v28 = vor.u32 %v6304_v8, %v6303_v5 }
 0x5a2   : > { %v6317_v57 = vor.u32 %v6316_v41, %v6315_v10  ;;  %v16116_v1 = vadd.f32 %v19425_v24, %v15383_v4  ;;  %vm6321_vm14 = vcmp.lt.s32.totalorder %v16097_v35, 4  ;;  %v16123_v21 = vand.u32 31, %v6401_v39 }
 0x5a3   : > { %19424 = vst [vmem:[#allocation72_spill] sm:$0xff] %v16110_v26  ;;  %v16118_v45 = vor.u32 %v6307_v54, %v6306_v50  ;;  %v16120_v15 = vor.u32 %v6310_v22, %v6309_v49  ;;  %v5856_v59 = vsel %vm18749_vm6, %v5855_v42, %v5854_v14  ;;  %v5752_v7 = vxor.u32 2147483648, %v5751_v53 }
 0x5a4   : > { %19426 = vst [vmem:[#allocation108_spill] sm:$0xff] %v16116_v1  ;;  %v16127_v61 = vor.u32 %v5948_v44, %v5947_v37  ;;  %v6327_v8 = vsel %vm6321_vm14, %v6314_v46, 920167782  ;;  %v16131_v19 = vor.u32 4788187, %v5952_v30  ;;  %vm9135_vm9 = vcmp.lt.s32.totalorder %v9134_v13, 0 }
 0x5a5   : > { %v9141_v41 = vmin.u32 %v6249_v36, %v16081_v62  ;;  %v6294_v48 = vor.u32 8388608, %v6293_v40  ;;  %v6143_v54 = vshll.u32 %v16110_v26, 30  ;;  %vm6318_vm1 = vcmp.lt.s32.totalorder %v16097_v35, 1 }
 0x5a6   : > { %vm6320_vm3 = vcmp.lt.s32.totalorder %v16097_v35, 3  ;;  %v6331_v14 = vsel %vm6321_vm14, %v6317_v57, 1326507024  ;;  %v6326_v42 = vsel %vm6318_vm1, %v16112_v28, %v16118_v45  ;;  %v16147_v44 = vsub.s32 32, %v16123_v21  ;;  %v16150_v22 = vpop.eup %9685 }
 0x5a7   : > { %v6328_v37 = vsel %vm6320_vm3, %v16120_v15, %v6327_v8  ;;  %v6598_v30 = vand.u32 2139095040, %v16116_v1  ;;  %19427 = vst [vmem:[#allocation133_spill] sm:$0xff] %v16150_v22  ;;  %9687 = vsinq.f32 %v16062_v63  ;;  %v16156_v5 = vsel %vm16092_vm13, %v15397_v0, %v5856_v59 }
 0x5a8   : > { %19428 = vst [vmem:[#allocation111_spill] sm:$0xff] %v16156_v5  ;;  %v16160_v10 = vsel %vm18748_vm15, %v5752_v7, %v5751_v53  ;;  %v6033_v36 = vadd.s32 %v15818_v43, %v15828_v11  ;;  %v16165_v40 = vsel %vm9135_vm9, 0, %v9134_v13  ;;  %vm6319_vm8 = vcmp.lt.s32.totalorder %v16097_v35, 2 }
 0x5a9   : > { %19429 = vst [vmem:[#allocation64_spill] sm:$0xff] %v16160_v10  ;;  %v6330_v63 = vsel %vm6318_vm1, %v16118_v45, %v16120_v15  ;;  %v6332_v50 = vsel %vm6320_vm3, %v6314_v46, %v6331_v14  ;;  %v5954_v49 = vand.u32 2147483647, %v16131_v19  ;;  %v5956_v53 = vcvt.s32.f32 %v16127_v61 }
 0x5aa   : > { %v6251_v57 = vclz %v9141_v41  ;;  %v6329_v43 = vsel %vm6319_vm8, %v6326_v42, %v6328_v37  ;;  %v16179_v11 = vsub.s32 %v16073_v3, %v6143_v54  ;;  %v16181_v13 = vshll.u32 %v6294_v48, 8 }
 0x5ab   : > { %v6416_v24 = vshrl.u32 %v19381_v31, %v16147_v44  ;;  %v6599_v59 = vshrl.u32 %v6598_v30, 23  ;;  %v6049_v7 = vsub.s32 32, %v16165_v40  ;;  %v6053_v46 = vsub.s32 4294967266, %v16165_v40 }
 0x5ac   : > { %19430 = vst [vmem:[#allocation96_spill] sm:$0xff] %v16179_v11  ;;  %v6333_v61 = vsel %vm6319_vm8, %v6330_v63, %v6332_v50  ;;  %v16191_v19 = vmul.u32.u64.low %v16181_v13, %v6329_v43  ;;  %v16192_v41 = vmul.u32.u64.high %v16181_v13, %v6329_v43, %v16191_v19  ;;  %v6407_v3 = vshrl.u32 %v19383_v56, %v16147_v44 }
 0x5ad   : > { %v6415_v48 = vshll.u32 %v19384_v58, %v16123_v21  ;;  %v9142_v54 = vadd.s32 4294967294, %v6251_v57  ;;  %v16199_v14 = vshrl.u32 %v6401_v39, 5  ;;  %v6410_v42 = vshrl.u32 %v19385_v23, %v16147_v44 }
 0x5ae   : > { %19431 = vst [vmem:[#allocation74_spill] sm:$0xff] %v16191_v19  ;;  %v6413_v37 = vshrl.u32 %v19384_v58, %v16147_v44  ;;  %v6146_v30 = vsub.s32 0, %v16179_v11  ;;  %v6406_v63 = vshll.u32 %v19386_v6, %v16123_v21  ;;  %v9156_v43 = vadd.s32 4294967169, %v6599_v59 }
 0x5af   : > { %v6417_v50 = vor.u32 %v6416_v24, %v6415_v48  ;;  %v16209_v60 = vmul.u32.u64.low %v16181_v13, %v6333_v61  ;;  %v16210_v8 = vmul.u32.u64.high %v16181_v13, %v6333_v61, %v16209_v60  ;;  %v6409_v39 = vshll.u32 %v19383_v56, %v16123_v21  ;;  %v19434_v48 = vld [vmem:[#allocation120_spill] sm:$0xff] }
 0x5b0   : > { %v6412_v57 = vshll.u32 %v19385_v23, %v16123_v21  ;;  %v6051_v26 = vshrl.u32 %v6033_v36, %v6049_v7  ;;  %v6302_v9 = vshrl.u32 %v19386_v6, %v16068_v33  ;;  %v19433_v18 = vand.u32 2147483647, %v16004_v29 }
 0x5b1   : > { %19432 = vst [vmem:[#allocation113_spill] sm:$0xff] %v16210_v8  ;;  %v16220_v0 = vor.u32 %v6407_v3, %v6406_v63  ;;  %v16222_v24 = vor.u32 %v6410_v42, %v6409_v39  ;;  %v6419_v60 = vshrl.u32 %v19382_v25, %v16147_v44  ;;  %vm6424_vm5 = vcmp.lt.s32.totalorder %v16199_v14, 4 }
 0x5b2   : > { %v6396_v17 = vand.u32 8388607, %v19433_v18  ;;  %v6414_v59 = vor.u32 %v6413_v37, %v6412_v57  ;;  %v9137_v61 = vmin.u32 %v6146_v30, %v16179_v11  ;;  %v6323_v36 = vsel %vm6321_vm14, %v16120_v15, 2102212464 }
 0x5b3   : > { %v6430_v33 = vsel %vm6424_vm5, %v6417_v50, 920167782  ;;  %v6605_v18 = vadd.s32 1, %v9156_v43  ;;  %v6054_v7 = vadd.s32 127, %v6053_v46  ;;  %vm9143_vm7 = vcmp.lt.s32.totalorder %v9142_v54, 0 }
 0x5b4   : > { %v6418_v3 = vshll.u32 %v19381_v31, %v16123_v21  ;;  %v16237_v42 = vadd.f32 %v19434_v48, %v15383_v4  ;;  %v16239_v37 = vpop.eup %9687  ;;  %v6322_v30 = vsel %vm6318_vm1, %v6302_v9, %v16112_v28  ;;  %v6397_v15 = vor.u32 8388608, %v6396_v17 }
 0x5b5   : > { %19436 = vst [vmem:[#allocation124_spill] sm:$0xff] %v16239_v37  ;;  %vm6421_vm10 = vcmp.lt.s32.totalorder %v16199_v14, 1  ;;  %vm6423_vm4 = vcmp.lt.s32.totalorder %v16199_v14, 3  ;;  %v6324_v46 = vsel %vm6320_vm3, %v16118_v45, %v6323_v36  ;;  %v6050_v9 = vshll.u32 %v16023_v2, %v16165_v40 }
 0x5b6   : > { %19435 = vst [vmem:[#allocation114_spill] sm:$0xff] %v16237_v42  ;;  %v6420_v21 = vor.u32 %v6419_v60, %v6418_v3  ;;  %v6429_v63 = vsel %vm6421_vm10, %v16220_v0, %v16222_v24  ;;  %v6431_v43 = vsel %vm6423_vm4, %v6414_v59, %v6430_v33  ;;  %v6148_v17 = vclz %v9137_v61 }
 0x5b7   : > { %v6344_v28 = vadd.s32 1, %v16192_v41  ;;  %vm6606_vm14 = vcmp.gt.s32.totalorder %v6605_v18, 0  ;;  %v16259_v39 = vsel %vm9143_vm7, 0, %v9142_v54  ;;  %vm6343_vm9 = vc.u32 %v16210_v8, %v16191_v19 }
 0x5b8   : > { %19437 = vst [vmem:[#allocation128_spill] sm:$0xff] %v16259_v39  ;;  %vm6422_vm1 = vcmp.lt.s32.totalorder %v16199_v14, 2  ;;  %v6495_v45 = vand.u32 2139095040, %v16237_v42  ;;  %v16265_v57 = vmul.f32 %v5956_v53, %v5954_v49  ;;  %v16267_v60 = vor.u32 %v6051_v26, %v6050_v9 }
 0x5b9   : > { %v6325_v2 = vsel %vm6319_vm8, %v6322_v30, %v6324_v46  ;;  %v6432_v40 = vsel %vm6422_vm1, %v6429_v63, %v6431_v43  ;;  %v6055_v61 = vshll.u32 %v6054_v7, 23  ;;  %v6434_v54 = vsel %vm6424_vm5, %v6420_v21, 1326507024 }
 0x5ba   : > { %19438 = vst [vmem:[#allocation130_spill] sm:$0xff] %v16265_v57  ;;  %19439 = vst [vmem:[#allocation129_spill] sm:$0xff] %v16267_v60  ;;  %v16275_v36 = vshll.u32 %v6397_v15, 8  ;;  %v6607_v33 = vsel %vm6606_vm14, %v6605_v18, 0  ;;  %v6255_v3 = vsub.s32 32, %v16259_v39  ;;  %v9138_v48 = vadd.s32 4294967294, %v6148_v17 }
 0x5bb   : > { %v6345_v49 = vsel %vm6343_vm9, %v6344_v28, %v16192_v41  ;;  %v18695_v26 = vand.u32 2147483647, %v16116_v1  ;;  %v6341_v35 = vmul.u32 %v16181_v13, %v6325_v2  ;;  %v6496_v7 = vshrl.u32 %v6495_v45, 23  ;;  %v19454_v60 = vld [vmem:[#allocation11_spill] sm:$0xff] }
 0x5bc   : > { %v16282_v53 = vmul.u32.u64.low %v16275_v36, %v6432_v40  ;;  %v16283_v30 = vmul.u32.u64.high %v16275_v36, %v6432_v40, %v16282_v53  ;;  %v6259_v46 = vsub.s32 4294967266, %v16259_v39  ;;  %v6433_v18 = vsel %vm6421_vm10, %v16222_v24, %v6414_v59  ;;  %v19455_v57 = vld [vmem:[#allocation123_spill] sm:$0xff] }
 0x5bd   : > { %v6435_v15 = vsel %vm6423_vm4, %v6417_v50, %v6434_v54  ;;  %v6609_v41 = vand.u32 31, %v6607_v33  ;;  %v16292_v21 = vor.u32 4788187, %v6055_v61  ;;  %v6239_v63 = vadd.s32 %v15920_v51, %v15936_v16  ;;  %v19443_v50 = vld [vmem:[#allocation121_spill] sm:$0xff]  ;;  %v9926_v39 = vld [vmem:[%s10114_s27 + $0x60] sm:$0xff] }
 0x5be   : > { %19440 = vst [vmem:[#allocation132_spill] sm:$0xff] %v16282_v53  ;;  %v16297_v43 = vadd.s32 %v6345_v49, %v6341_v35  ;;  %vm9139_vm3 = vcmp.lt.s32.totalorder %v9138_v48, 0  ;;  %v6426_v9 = vsel %vm6424_vm5, %v6414_v59, 2102212464  ;;  %v16303_v17 = vand.u32 8388607, %v18695_v26 }
 0x5bf   : > { %19441 = vst [vmem:[#allocation131_spill] sm:$0xff] %v16292_v21  ;;  %v16307_v28 = vadd.f32 %v19443_v50, %v15383_v4  ;;  %v6405_v45 = vshrl.u32 %v19386_v6, %v16147_v44  ;;  %v16313_v51 = vsel %vm6422_vm1, %v6433_v18, %v6435_v15  ;;  %v18696_v16 = vand.u32 2147483647, %v16237_v42  ;;  %v19468_v21 = vld [vmem:[#allocation36_spill] sm:$0xff] }
 0x5c0   : > { %19442 = vst [vmem:[#allocation86_spill] sm:$0xff] %v16297_v43  ;;  %v9152_v2 = vadd.s32 4294967169, %v6496_v7  ;;  %v16318_v40 = vshrl.u32 %v6239_v63, %v6255_v3  ;;  %v16320_v61 = vadd.s32 127, %v6259_v46  ;;  %v16322_v54 = vsub.s32 32, %v6609_v41 }
 0x5c1   : > { %19444 = vst [vmem:[#allocation49_spill] sm:$0xff] %v16307_v28  ;;  %v16324_v4 = vsel %vm9139_vm3, 0, %v9138_v48  ;;  %v16327_v44 = vadd.s32 536870912, %v16297_v43  ;;  %v16332_v49 = vsel %vm6421_vm10, %v6405_v45, %v16220_v0  ;;  %v16337_v35 = vsel %vm6423_vm4, %v16222_v24, %v6426_v9  ;;  %v19472_v43 = vld [vmem:[#allocation28_spill] sm:$0xff] }
 0x5c2   : > { %19445 = vst [vmem:[#allocation93_spill] sm:$0xff] %v16318_v40  ;;  %19446 = vst [vmem:[#allocation97_spill] sm:$0xff] %v16320_v61  ;;  %v16341_v7 = vmul.u32.u64.low %v16275_v36, %v16313_v51  ;;  %v16342_v46 = vmul.u32.u64.high %v16275_v36, %v16313_v51, %v16341_v7  ;;  %v16348_v15 = vadd.s32 1, %v16283_v30  ;;  %v16350_v0 = vshrl.u32 %v6607_v33, 5 }
 0x5c3   : > { %19447 = vst [vmem:[#allocation122_spill] sm:$0xff] %v16324_v4  ;;  %v16354_v24 = vand.u32 8388607, %v18696_v16  ;;  %v16356_v63 = vadd.s32 1, %v9152_v2  ;;  %v6612_v50 = vshll.u32 %v19386_v6, %v6609_v41  ;;  %v6613_v45 = vshrl.u32 %v19383_v56, %v16322_v54 }
 0x5c4   : > { %19448 = vst [vmem:[#allocation69_spill] sm:$0xff] %v16342_v46  ;;  %v6615_v26 = vshll.u32 %v19383_v56, %v6609_v41  ;;  %v6616_v33 = vshrl.u32 %v19385_v23, %v16322_v54  ;;  %v6618_v16 = vshll.u32 %v19385_v23, %v6609_v41  ;;  %v6619_v2 = vshrl.u32 %v19384_v58, %v16322_v54 }
 0x5c5   : > { %v6621_v59 = vshll.u32 %v19384_v58, %v6609_v41  ;;  %v6622_v48 = vshrl.u32 %v19381_v31, %v16322_v54  ;;  %v6624_v37 = vshll.u32 %v19381_v31, %v6609_v41  ;;  %v6625_v55 = vshrl.u32 %v19382_v25, %v16322_v54 }
 0x5c6   : > { %v16376_v1 = vor.u32 %v6613_v45, %v6612_v50  ;;  %v16381_v8 = vor.u32 %v6619_v2, %v6618_v16  ;;  %vm6627_vm8 = vcmp.lt.s32.totalorder %v16350_v0, 1  ;;  %vm6629_vm5 = vcmp.lt.s32.totalorder %v16350_v0, 3 }
 0x5c7   : > { %v6623_v5 = vor.u32 %v6622_v48, %v6621_v59  ;;  %vm6503_vm7 = vcmp.gt.s32.totalorder %v16356_v63, 0  ;;  %v19449_v59 = vld [vmem:[#allocation14_spill] sm:$0xff]  ;;  %vm6630_vm10 = vcmp.lt.s32.totalorder %v16350_v0, 4  ;;  %vm6446_vm4 = vc.u32 %v16342_v46, %v16282_v53 }
 0x5c8   : > { %vm6628_vm14 = vcmp.lt.s32.totalorder %v16350_v0, 2  ;;  %v16498_v52 = vadd.f32 %v19455_v57, %v19454_v60 }
 0x5ca   : > { %19456 = vst [vmem:[#allocation76_spill] sm:$0xff] %v16498_v52 }
 0x5e6   : > { %v5123_v3 = vpop.f32.mrf.mxu0 }
 0x5e7   : > { %v5124_v18 = vadd.f32 %v5123_v3, %v15381_v27 }
 0x5e8   : > { %v5125_v9 = vpop.f32.mrf.mxu0 }
 0x5e9   : > { %v9096_v51 = vmul.f32 -1.442695, %v5124_v18  ;;  %v5212_v7 = vpop.f32.mrf.mxu1  ;;  %v5126_v3 = vadd.f32 %v5125_v9, %v15381_v27 }
 0x5ea   : > { %v5129_v13 = vpop.f32.mrf.mxu0 }
 0x5eb   : > { %v9097_v18 = vmul.f32 -1.442695, %v5126_v3  ;;  %v5214_v22 = vpop.f32.mrf.mxu1  ;;  %v5130_v9 = vadd.f32 %v5129_v13, %v15536_v12  ;;  %9689 = vpow2.f32 %v9096_v51  ;;  %v16379_v3 = vor.u32 %v6616_v33, %v6615_v26 }
 0x5ec   : > { %v5215_v20 = vadd.f32 %v5214_v22, %v15381_v27  ;;  %v5131_v42 = vpop.f32.mrf.mxu0  ;;  %v6626_v51 = vor.u32 %v6625_v55, %v6624_v37  ;;  %v5213_v55 = vadd.f32 %v5212_v7, %v15381_v27  ;;  %v6504_v7 = vsel %vm6503_vm7, %v16356_v63, 0 }
 0x5ed   : > { %9691 = vpow2.f32 %v9097_v18  ;;  %v9100_v29 = vmul.f32 -1.442695, %v5130_v9  ;;  %v5218_v47 = vpop.f32.mrf.mxu1  ;;  %v5132_v19 = vadd.f32 %v5131_v42, %v15536_v12 }
 0x5ee   : > { %v9099_v13 = vmul.f32 -1.442695, %v5215_v20  ;;  %v5219_v41 = vadd.f32 %v5218_v47, %v15536_v12  ;;  %v5135_v10 = vpop.f32.mrf.mxu0 }
 0x5ef   : > { %9693 = vpow2.f32 %v9100_v29  ;;  %v9101_v22 = vmul.f32 -1.442695, %v5132_v19  ;;  %v5220_v50 = vpop.f32.mrf.mxu1  ;;  %v5136_v45 = vadd.f32 %v5135_v10, %v15379_v38 }
 0x5f0   : > { %9695 = vpow2.f32 %v9099_v13  ;;  %v9102_v18 = vmul.f32 -1.442695, %v5219_v41  ;;  %v5221_v42 = vadd.f32 %v5220_v50, %v15536_v12  ;;  %v5137_v26 = vpop.f32.mrf.mxu0  ;;  %v6640_v13 = vsel %vm6630_vm10, %v6626_v51, 1326507024 }
 0x5f1   : > { %9697 = vpow2.f32 %v9101_v22  ;;  %v9104_v20 = vmul.f32 -1.442695, %v5136_v45  ;;  %v5224_v47 = vpop.f32.mrf.mxu1  ;;  %v5138_v16 = vadd.f32 %v5137_v26, %v15379_v38  ;;  %v6635_v26 = vsel %vm6627_vm8, %v16376_v1, %v16379_v3 }
 0x5f2   : > { %9699 = vpow2.f32 %v9102_v18  ;;  %v9103_v29 = vmul.f32 -1.442695, %v5221_v42  ;;  %v5225_v19 = vadd.f32 %v5224_v47, %v15379_v38  ;;  %v5141_v10 = vpop.f32.mrf.mxu0  ;;  %v9098_v18 = vmul.f32 -1.442695, %v5213_v55 }
 0x5f3   : > { %9701 = vpow2.f32 %v9104_v20  ;;  %v9105_v37 = vmul.f32 -1.442695, %v5138_v16  ;;  %v5226_v12 = vpop.f32.mrf.mxu1  ;;  %v5142_v48 = vadd.f32 %v5141_v10, %v19449_v59  ;;  %v6639_v16 = vsel %vm6627_vm8, %v16379_v3, %v16381_v8 }
 0x5f4   : > { %9703 = vpow2.f32 %v9103_v29  ;;  %v9106_v33 = vmul.f32 -1.442695, %v5225_v19  ;;  %v5227_v2 = vadd.f32 %v5226_v12, %v15379_v38  ;;  %v5143_v9 = vpop.f32.mrf.mxu0  ;;  %v6636_v38 = vsel %vm6630_vm10, %v6623_v5, 920167782 }
 0x5f5   : > { %9705 = vpow2.f32 %v9105_v37  ;;  %v9108_v41 = vmul.f32 -1.442695, %v5142_v48  ;;  %v5230_v22 = vpop.f32.mrf.mxu1  ;;  %v5144_v27 = vadd.f32 %v5143_v9, %v19449_v59  ;;  %v6641_v29 = vsel %vm6629_vm5, %v6623_v5, %v6640_v13 }
 0x5f6   : > { %9707 = vpow2.f32 %v9106_v33  ;;  %v9107_v50 = vmul.f32 -1.442695, %v5227_v2  ;;  %v5231_v45 = vadd.f32 %v5230_v22, %v19449_v59  ;;  %v16415_v19 = vand.u32 31, %v6504_v7 }
 0x5f7   : > { %9709 = vpow2.f32 %v9108_v41  ;;  %v9109_v42 = vmul.f32 -1.442695, %v5144_v27  ;;  %v5232_v51 = vpop.f32.mrf.mxu1  ;;  %v6637_v55 = vsel %vm6629_vm5, %v16381_v8, %v6636_v38  ;;  %v6701_v37 = vand.u32 2139095040, %v16307_v28 }
 0x5f8   : > { %9711 = vpow2.f32 %v9107_v50  ;;  %v9110_v20 = vmul.f32 -1.442695, %v5231_v45  ;;  %v5233_v63 = vadd.f32 %v5232_v51, %v19449_v59  ;;  %v9690_v47 = vpop.eup %9689  ;;  %v16422_v59 = vshrl.u32 %v16327_v44, 30 }
 0x5f9   : > { %9713 = vpow2.f32 %v9109_v42  ;;  %v16431_v48 = vsel %vm6422_vm1, %v16332_v49, %v16337_v35  ;;  %v16435_v33 = vsel %vm6628_vm14, %v6639_v16, %v6641_v29  ;;  %v5283_v2 = vadd.f32 1.0, %v9690_v47 }
 0x5fa   : > { %v9692_v10 = vpop.eup %9691  ;;  %9715 = vpow2.f32 %v9110_v20  ;;  %v9111_v12 = vmul.f32 -1.442695, %v5233_v63  ;;  %19450 = vst [vmem:[#allocation50_spill] sm:$0xff] %v16422_v59  ;;  %v16441_v9 = vsel %vm6628_vm14, %v6635_v26, %v6637_v55  ;;  %v19451_v13 = vor.u32 8388608, %v16303_v17 }
 0x5fb   : > { %9717 = vpow2.f32 %v9098_v18  ;;  %v16448_v14 = vsub.s32 32, %v16415_v19  ;;  %v5284_v49 = vadd.f32 1.0, %v9692_v10  ;;  %v16452_v22 = vsel %vm6446_vm4, %v16348_v15, %v16283_v30 }
 0x5fc   : > { %v9694_v5 = vpop.eup %9693  ;;  %9719 = vpow2.f32 %v9111_v12  ;;  %v16445_v41 = vshll.u32 %v19451_v13, 8  ;;  %v6702_v50 = vshrl.u32 %v6701_v37, 23  ;;  %v6611_v18 = vshrl.u32 %v19386_v6, %v16322_v54 }
 0x5fd   : > { %v16437_v44 = vpop.eup %9695  ;;  %v5287_v45 = vadd.f32 1.0, %v9694_v5  ;;  %v6632_v30 = vsel %vm6630_vm10, %v16381_v8, 2102212464  ;;  %9721 = vrcp.f32 %v5283_v2  ;;  %v16472_v63 = vshrl.u32 %v6504_v7, 5 }
 0x5fe   : > { %v9698_v35 = vpop.eup %9697  ;;  %v16459_v17 = vmul.u32.u64.low %v16445_v41, %v16435_v33  ;;  %v16460_v42 = vmul.u32.u64.high %v16445_v41, %v16435_v33, %v16459_v17  ;;  %v16468_v15 = vmul.u32.u64.low %v16445_v41, %v16441_v9  ;;  %v16469_v20 = vmul.u32.u64.high %v16445_v41, %v16441_v9, %v16468_v15 }
 0x5ff   : > { %v9700_v38 = vpop.eup %9699  ;;  %v5288_v51 = vadd.f32 1.0, %v9698_v35  ;;  %v6510_v47 = vshrl.u32 %v19383_v56, %v16448_v14  ;;  %9723 = vrcp.f32 %v5284_v49  ;;  %v6509_v10 = vshll.u32 %v19386_v6, %v16415_v19 }
 0x600   : > { %19452 = vst [vmem:[#allocation89_spill] sm:$0xff] %v16460_v42  ;;  %v9702_v26 = vpop.eup %9701  ;;  %19453 = vst [vmem:[#allocation73_spill] sm:$0xff] %v16468_v15  ;;  %v9160_v8 = vadd.s32 4294967169, %v6702_v50  ;;  %9725 = vrcp.f32 %v5287_v45  ;;  %v6512_v12 = vshll.u32 %v19383_v56, %v16415_v19  ;;  %v6513_v7 = vshrl.u32 %v19385_v23, %v16448_v14 }
 0x601   : > { %v9704_v54 = vpop.eup %9703  ;;  %v5291_v16 = vadd.f32 1.0, %v9702_v26  ;;  %9727 = vrcp.f32 %v5288_v51  ;;  %v6515_v2 = vshll.u32 %v19385_v23, %v16415_v19  ;;  %v6516_v9 = vshrl.u32 %v19384_v58, %v16448_v14 }
 0x602   : > { %v9706_v29 = vpop.eup %9705  ;;  %v5290_v55 = vadd.f32 1.0, %v9704_v54  ;;  %v6519_v13 = vshrl.u32 %v19381_v31, %v16448_v14  ;;  %v16488_v35 = vor.u32 %v6510_v47, %v6509_v10  ;;  %v6522_v50 = vshrl.u32 %v19382_v25, %v16448_v14 }
 0x603   : > { %v9708_v37 = vpop.eup %9707  ;;  %v5292_v5 = vadd.f32 1.0, %v9706_v29  ;;  %9729 = vrcp.f32 %v5291_v16  ;;  %v6518_v51 = vshll.u32 %v19384_v58, %v16415_v19  ;;  %v6708_v26 = vadd.s32 1, %v9160_v8 }
 0x604   : > { %v9710_v33 = vpop.eup %9709  ;;  %9731 = vrcp.f32 %v5290_v55  ;;  %v6521_v27 = vshll.u32 %v19381_v31, %v16415_v19  ;;  %v5293_v16 = vadd.f32 1.0, %v9708_v37  ;;  %v6514_v53 = vor.u32 %v6513_v7, %v6512_v12 }
 0x605   : > { %v9712_v49 = vpop.eup %9711  ;;  %v5295_v45 = vadd.f32 1.0, %v9710_v33  ;;  %9733 = vrcp.f32 %v5292_v5  ;;  %v6520_v46 = vor.u32 %v6519_v13, %v6518_v51  ;;  %v5289_v8 = vadd.f32 1.0, %v9700_v38 }
 0x606   : > { %v9714_v17 = vpop.eup %9713  ;;  %v5294_v54 = vadd.f32 1.0, %v9712_v49  ;;  %v6523_v11 = vor.u32 %v6522_v50, %v6521_v27  ;;  %vm6709_vm9 = vcmp.gt.s32.totalorder %v6708_v26, 0  ;;  %v5286_v5 = vadd.f32 1.0, %v16437_v44 }
 0x607   : > { %v9716_v29 = vpop.eup %9715  ;;  %9735 = vrcp.f32 %v5295_v45  ;;  %v5296_v47 = vadd.f32 1.0, %v9714_v17  ;;  %v6517_v37 = vor.u32 %v6516_v9, %v6515_v2  ;;  %vm6527_vm1 = vcmp.lt.s32.totalorder %v16472_v63, 4 }
 0x608   : > { %v9718_v10 = vpop.eup %9717  ;;  %9737 = vrcp.f32 %v5294_v54  ;;  %v5297_v55 = vadd.f32 1.0, %v9716_v29  ;;  %v6631_v27 = vsel %vm6627_vm8, %v6611_v18, %v16376_v1  ;;  %v6633_v57 = vsel %vm6629_vm5, %v16379_v3, %v6632_v30 }
 0x609   : > { %v9720_v33 = vpop.eup %9719  ;;  %9739 = vrcp.f32 %v5296_v47  ;;  %v5285_v12 = vadd.f32 1.0, %v9718_v10  ;;  %v6533_v38 = vsel %vm6527_vm1, %v6520_v46, 920167782  ;;  %vm6524_vm3 = vcmp.lt.s32.totalorder %v16472_v63, 1  ;;  %v19465_v47 = vld [vmem:[#allocation17_spill] sm:$0xff] }
 0x60a   : > { %9741 = vrcp.f32 %v5297_v55  ;;  %v5298_v19 = vadd.f32 1.0, %v9720_v33  ;;  %v16510_v44 = vpop.eup %9721  ;;  %v6537_v7 = vsel %vm6527_vm1, %v6523_v11, 1326507024  ;;  %v16516_v2 = vsel %vm6709_vm9, %v6708_v26, 0 }
 0x60b   : > { %9743 = vrcp.f32 %v5293_v16  ;;  %v6653_v18 = vadd.s32 1, %v16469_v20  ;;  %vm6526_vm8 = vcmp.lt.s32.totalorder %v16472_v63, 3  ;;  %v6804_v3 = vand.u32 2139095040, %v16498_v52 }
 0x60c   : > { %9745 = vrcp.f32 %v5298_v19  ;;  %v16518_v1 = vpop.eup %9723  ;;  %v6529_v9 = vsel %vm6527_vm1, %v6517_v37, 2102212464  ;;  %v6532_v11 = vsel %vm6524_vm3, %v16488_v35, %v6514_v53  ;;  %v6534_v13 = vsel %vm6526_vm8, %v6517_v37, %v6533_v38  ;;  %v19466_v19 = vld [vmem:[#allocation8_spill] sm:$0xff] }
 0x60d   : > { %9747 = vrcp.f32 %v5289_v8  ;;  %v9726_v30 = vpop.eup %9725  ;;  %v6508_v50 = vshrl.u32 %v19386_v6, %v16448_v14  ;;  %v6536_v45 = vsel %vm6524_vm3, %v6514_v53, %v6517_v37  ;;  %v6538_v17 = vsel %vm6526_vm8, %v6520_v46, %v6537_v7 }
 0x60e   : > { %9749 = vrcp.f32 %v5286_v5  ;;  %v9728_v49 = vpop.eup %9727  ;;  %v16537_v51 = vand.u32 31, %v16516_v2  ;;  %v6444_v54 = vmul.u32 %v16275_v36, %v16431_v48  ;;  %v16543_v29 = vsel %vm6628_vm14, %v6631_v27, %v6633_v57  ;;  %v19459_v57 = vld [vmem:[#allocation125_spill] sm:$0xff] }
 0x60f   : > { %9751 = vrcp.f32 %v5285_v12  ;;  %vm6652_vm5 = vc.u32 %v16460_v42, %v16468_v15  ;;  %vm6525_vm7 = vcmp.lt.s32.totalorder %v16472_v63, 2  ;;  %v6528_v46 = vsel %vm6524_vm3, %v6508_v50, %v16488_v35 }
 0x610   : > { %v9730_v26 = vpop.eup %9729  ;;  %v6530_v16 = vsel %vm6526_vm8, %v6514_v53, %v6529_v9  ;;  %v16555_v36 = vsel %vm6525_vm7, %v6532_v11, %v6534_v13  ;;  %v6805_v0 = vshrl.u32 %v6804_v3, 23  ;;  %v16559_v10 = vadd.s32 %v16452_v22, %v6444_v54  ;;  %v19461_v3 = vld [vmem:[#allocation7_spill] sm:$0xff]  ;;  %v19463_v54 = vld [vmem:[#allocation34_spill] sm:$0xff] }
 0x611   : > { %v9732_v14 = vpop.eup %9731  ;;  %v16563_v55 = vsel %vm6525_vm7, %v6536_v45, %v6538_v17  ;;  %v19457_v35 = vor.u32 8388608, %v16354_v24  ;;  %v16572_v5 = vsel %vm6652_vm5, %v6653_v18, %v16469_v20  ;;  %v16576_v22 = vsub.s32 32, %v16537_v51  ;;  %v19462_v45 = vld [vmem:[#allocation10_spill] sm:$0xff] }
 0x612   : > { %v9734_v48 = vpop.eup %9733  ;;  %v16580_v12 = vsel %vm6525_vm7, %v6528_v46, %v6530_v16  ;;  %v16590_v20 = vadd.f32 %v19459_v57, %v19454_v60  ;;  %v9164_v63 = vadd.s32 4294967169, %v6805_v0  ;;  %v16600_v13 = vshll.u32 %v19386_v6, %v16537_v51 }
 0x613   : > { %v16567_v33 = vshll.u32 %v19457_v35, 8  ;;  %v16604_v50 = vshll.u32 %v19383_v56, %v16537_v51  ;;  %v5340_v46 = vmul.f32 %v9734_v48, %v19463_v54  ;;  %v16614_v0 = vshrl.u32 %v19385_v23, %v16576_v22  ;;  %v19464_v35 = vld [vmem:[#allocation26_spill] sm:$0xff]  ;;  %v9925_v48 = vld [vmem:[%s10114_s27 + $0x68] sm:$0xff] }
 0x614   : > { %v9736_v53 = vpop.eup %9735  ;;  %19460 = vst [vmem:[#allocation102_spill] sm:$0xff] %v16590_v20  ;;  %v5336_v15 = vmul.f32 %v9728_v49, %v19466_v19  ;;  %v19470_v49 = vld [vmem:[#allocation20_spill] sm:$0xff]  ;;  %v5338_v59 = vmul.f32 %v9732_v14, %v19472_v43  ;;  %v9933_v14 = vld [vmem:[%s10114_s27 + $0x20] sm:$0xff]  ;;  %vm19480_vm14 = vcmask 261120  }
 0x615   : > { %v9738_v37 = vpop.eup %9737  ;;  %v16584_v24 = vmul.u32.u64.low %v16567_v33, %v16555_v36  ;;  %v16585_v27 = vmul.u32.u64.high %v16567_v33, %v16555_v36, %v16584_v24  ;;  %v16594_v7 = vmul.u32.u64.low %v16567_v33, %v16563_v55  ;;  %v16595_v18 = vmul.u32.u64.high %v16567_v33, %v16563_v55, %v16594_v7  ;;  %vm19481_vm1 = vmmov %vm19480_vm14 }
 0x616   : > { %v9740_v38 = vpop.eup %9739  ;;  %v5343_v9 = vmul.f32 %v9736_v53, %v19461_v3  ;;  %v16610_v36 = vshrl.u32 %v19383_v56, %v16576_v22  ;;  %v16618_v55 = vshll.u32 %v19385_v23, %v16537_v51  ;;  %v5339_v53 = vmul.f32 %v9730_v26, %v19464_v35  ;;  %v19469_v26 = vld [vmem:[#allocation43_spill] sm:$0xff]  ;;  %v19471_v56 = vld [vmem:[#allocation16_spill] sm:$0xff]  ;;  %vm19487_vm7 = vmmov %vm19481_vm1 }
 0x617   : > { %19458 = vst [vmem:[#allocation105_spill] sm:$0xff] %v16584_v24  ;;  %v9742_v11 = vpop.eup %9741  ;;  %v5344_v17 = vmul.f32 %v9740_v38, %v19462_v45  ;;  %v7010_v38 = vand.u32 2139095040, %v16590_v20  ;;  %v5342_v34 = vmul.f32 %v9738_v37, %v19468_v21  ;;  %v5335_v61 = vmul.f32 %v9726_v30, %v19469_v26  ;;  %v9929_v30 = vld [vmem:[%s10114_s27 + $0x40] sm:$0xff]  ;;  %v19473_v26 = vld [vmem:[#allocation30_spill] sm:$0xff] }
 0x618   : > { %v9744_v16 = vpop.eup %9743  ;;  %v5345_v8 = vmul.f32 %v9742_v11, %v19465_v47  ;;  %v5359_v62 = vadd.f32 %v9926_v39, %v5343_v9  ;;  %v9927_v11 = vld [vmem:[%s10114_s27 + $0x48] sm:$0xff]  ;;  %v9928_v39 = vld [vmem:[%s10114_s27 + $0x78] sm:$0xff]  ;;  %v5355_v9 = vadd.f32 %v9929_v30, %v5339_v53  ;;  %vm6549_vm4 = vc.u32 %v16595_v18, %v16584_v24 }
 0x619   : > { %v9746_v57 = vpop.eup %9745  ;;  %v5360_v7 = vadd.f32 %v9925_v48, %v5344_v17  ;;  %v6722_v17 = vshrl.u32 %v19384_v58, %v16576_v22  ;;  %v5356_v48 = vadd.f32 %v9927_v11, %v5340_v46  ;;  %v5341_v23 = vmul.f32 %v9744_v16, %v19470_v49  ;;  %v9930_v46 = vld [vmem:[%s10114_s27 + $0x70] sm:$0xff]  ;;  %v9931_v11 = vld [vmem:[%s10114_s27 + $0x28] sm:$0xff] }
 0x61a   : > { %v9748_v42 = vpop.eup %9747  ;;  %v5346_v40 = vmul.f32 %v9746_v57, %v19467_v32  ;;  %v5332_v57 = vmul.f32 %v16518_v1, %v19471_v56  ;;  %v7011_v19 = vshrl.u32 %v7010_v38, 23  ;;  %v5361_v16 = vadd.f32 %v9930_v46, %v5345_v8  ;;  %v19474_v56 = vld [vmem:[#allocation23_spill] sm:$0xff]  ;;  %v19475_v30 = vld [vmem:[#allocation32_spill] sm:$0xff] }
 0x61b   : > { %v9750_v4 = vpop.eup %9749  ;;  %5407 = vmatprep.subr.mxu0 %v5360_v7  ;;  %v5331_v7 = vmul.f32 %v16510_v44, %v19473_v26  ;;  %v5352_v1 = vadd.f32 %v9931_v11, %v5336_v15  ;;  %v5337_v49 = vmul.f32 %v9748_v42, %v19474_v56  ;;  %v5351_v53 = vadd.f32 %v9933_v14, %v5335_v61  ;;  %v9935_v42 = vld [vmem:[%s10114_s27 + $0x8] sm:$0xff]  ;;  %v9939_v14 = vld [vmem:[%s10114_s27 + $0x18] sm:$0xff] }
 0x61c   : > { %v9752_v20 = vpop.eup %9751  ;;  %v5362_v37 = vadd.f32 %v9928_v39, %v5346_v40  ;;  %5408 = vmatpush1.msra.mxu0 %v5359_v62  ;;  %v6811_v40 = vadd.s32 1, %v9164_v63  ;;  %v9932_v62 = vld [vmem:[%s10114_s27 + $0x58] sm:$0xff]  ;;  %v5334_v44 = vmul.f32 %v9750_v4, %v19475_v30  ;;  %v19476_v38 = vand.u32 2147483647, %v16307_v28 }
 0x61d   : > { %5409 = vmatprep.subr.mxu0 %v5356_v48  ;;  %v5358_v39 = vadd.f32 %v9932_v62, %v5342_v34  ;;  %v9934_v48 = vld [vmem:[%s10114_s27 + $0x50] sm:$0xff]  ;;  %v5348_v63 = vadd.f32 %v9935_v42, %v5332_v57  ;;  %v6725_v61 = vshrl.u32 %v19381_v31, %v16576_v22  ;;  %v9936_v4 = vld [vmem:[%s10114_s27 + $0x38] sm:$0xff]  ;;  %v9172_v57 = vadd.s32 4294967169, %v7011_v19 }
 0x61e   : > { %5484 = vmatprep.subr.mxu1 %v5362_v37  ;;  %5410 = vmatpush1.msra.mxu0 %v5355_v9  ;;  %v16648_v8 = vand.u32 8388607, %v19476_v38  ;;  %v5357_v15 = vadd.f32 %v9934_v48, %v5341_v23  ;;  %v19477_v37 = vld [vmem:[#allocation25_spill] sm:$0xff]  ;;  %v16654_v9 = vshrl.u32 %v16516_v2, 5  ;;  %v5354_v46 = vadd.f32 %v9936_v4, %v5338_v59  ;;  %v5363_v23 = vld [vmem:[%s18348_s9] sm:$0xff]  ;;  %v19478_v2 = vld [vmem:[#allocation126_spill] sm:$0xff] }
 0x61f   : > { %5485 = vmatpush1.msra.mxu1 %v5361_v16  ;;  %5411 = vmatprep.subr.mxu0 %v5352_v1  ;;  %v5333_v34 = vmul.f32 %v9752_v20, %v19477_v37  ;;  %v9937_v16 = vld [vmem:[%s10114_s27] sm:$0xff]  ;;  %v6724_v20 = vshll.u32 %v19384_v58, %v16537_v51  ;;  %v16667_v1 = vadd.f32 %v19478_v2, %v19454_v60  ;;  %v9938_v62 = vld [vmem:[%s10114_s27 + $0x30] sm:$0xff]  ;;  %vm6812_vm10 = vcmp.gt.s32.totalorder %v6811_v40, 0 }
 0x620   : > { %5486 = vmatprep.subr.mxu1 %v5358_v39  ;;  %5412 = vmatpush1.msra.mxu0 %v5351_v53  ;;  %v5347_v11 = vadd.f32 %v9937_v16, %v5331_v7  ;;  %v5353_v59 = vadd.f32 %v9938_v62, %v5337_v49  ;;  %v16671_v39 = vor.u32 %v6722_v17, %v16618_v55  ;;  %v6550_v19 = vadd.s32 1, %v16585_v27  ;;  %v9940_v38 = vld [vmem:[%s10114_s27 + $0x10] sm:$0xff]  ;;  %v19486_v16 = vld [vmem:[#allocation20_spill] sm:$0xff]  ;;  %v19490_v2 = vld [vmem:[#allocation43_spill] sm:$0xff] }
 0x621   : > { %19479 = vst [vmem:[#allocation55_spill] sm:$0xff] %v16667_v1  ;;  %5487 = vmatpush1.msra.mxu1 %v5357_v15  ;;  %5413 = vmatprep.subr.mxu0 %v5348_v63  ;;  %v6728_v7 = vshrl.u32 %v19382_v25, %v16576_v22  ;;  %v5350_v53 = vadd.f32 %v9939_v14, %v5334_v44  ;;  %v18736_v15 = vand.u32 2147483647, %v16498_v52  ;;  %vm6733_vm9 = vcmp.lt.s32.totalorder %v16654_v9, 4 }
 0x622   : > { %5488 = vmatprep.subr.mxu1 %v5354_v46  ;;  %5414 = vmatpush1.msra.mxu0 %v5347_v11  ;;  %v6717_v49 = vor.u32 %v16610_v36, %v16600_v13  ;;  %v5349_v55 = vadd.f32 %v9940_v38, %v5333_v34  ;;  %v6720_v17 = vor.u32 %v16614_v0, %v16604_v50  ;;  %v16691_v13 = vsel %vm6812_vm10, %v6811_v40, 0  ;;  %v19494_v38 = vld [vmem:[#allocation86_spill] sm:$0xff] }
 0x623   : > { %5489 = vmatpush1.msra.mxu1 %v5353_v59  ;;  %9112 = vmatmul.mubr.msk.f32.vlgmr.msra.gmra.mxu0 %vm19480_vm14, %v5363_v23  ;;  %v6726_v48 = vor.u32 %v6725_v61, %v6724_v20  ;;  %v6727_v44 = vshll.u32 %v19381_v31, %v16537_v51  ;;  %v7017_v36 = vadd.s32 1, %v9172_v57  ;;  %v6907_v42 = vand.u32 2139095040, %v16667_v1  ;;  %vm19499_vm14 = vmmov %vm19481_vm1 }
 0x624   : > { %5490 = vmatprep.subr.mxu1 %v5350_v53  ;;  %7359 = vmatprep.subr.mxu0 %v19462_v45  ;;  %v6706_v50 = vor.u32 8388608, %v16648_v8  ;;  %v6714_v51 = vshrl.u32 %v19386_v6, %v16576_v22  ;;  %v6735_v45 = vsel %vm6733_vm9, %v16671_v39, 2102212464  ;;  %v6547_v40 = vmul.u32 %v16567_v33, %v16580_v12  ;;  %v19482_v22 = vld [vmem:[#allocation127_spill] sm:$0xff]  ;;  %v19491_v53 = vld [vmem:[#allocation16_spill] sm:$0xff] }
 0x625   : > { %5491 = vmatpush1.msra.mxu1 %v5349_v55  ;;  %7360 = vmatpush1.msra.mxu0 %v19461_v3  ;;  %v6729_v0 = vor.u32 %v6728_v7, %v6727_v44  ;;  %v6551_v3 = vsel %vm6549_vm4, %v6550_v19, %v16585_v27  ;;  %vm6730_vm3 = vcmp.lt.s32.totalorder %v16654_v9, 1  ;;  %v16712_v8 = vadd.f32 %v19482_v22, %v19454_v60  ;;  %vm19488_vm4 = vmmov %vm19481_vm1  ;;  %v9180_v19 = vld [vmem:[%s18342_s3 + $0x20] sm:$0xff] }
 0x626   : > { %9114 = vmatmul.mubr.msk.f32.vlgmr.msra.gmra.mxu1 %vm19481_vm1, %v5363_v23  ;;  %7448 = vmatprep.subr.mxu1 %v19467_v32  ;;  %v5364_v32 = vld [vmem:[%s18348_s9 + $0x8] sm:$0xff]  ;;  %vm6732_vm8 = vcmp.lt.s32.totalorder %v16654_v9, 3  ;;  %v6734_v33 = vsel %vm6730_vm3, %v6714_v51, %v6717_v49  ;;  %v6808_v12 = vand.u32 8388607, %v18736_v15  ;;  %v16725_v27 = vand.u32 31, %v16691_v13 }
 0x627   : > { %19483 = vst [vmem:[#allocation92_spill] sm:$0xff] %v16712_v8  ;;  %7449 = vmatpush1.msra.mxu1 %v19465_v47  ;;  %7361 = vmatprep.subr.mxu0 %v19463_v54  ;;  %v19484_v60 = vmov 0.0   ;;  %v6736_v47 = vsel %vm6732_vm8, %v6720_v17, %v6735_v45  ;;  %v6739_v54 = vsel %vm6733_vm9, %v6726_v48, 920167782  ;;  %vm7018_vm5 = vcmp.gt.s32.totalorder %v7017_v36, 0 }
 0x628   : > { %7450 = vmatprep.subr.mxu1 %v19468_v21  ;;  %5453 = vmatprep.mubr.f32.mxu0 %v19484_v60  ;;  %v6908_v63 = vshrl.u32 %v6907_v42, 23  ;;  %v6450_v34 = vadd.s32 536870912, %v16559_v10  ;;  %v19485_v61 = vmul.u32 %v16445_v41, %v16543_v29  ;;  %v6743_v4 = vsel %vm6733_vm9, %v6729_v0, 1326507024  ;;  %v19489_v29 = vld [vmem:[#allocation8_spill] sm:$0xff]  ;;  %vm19500_vm9 = vmmov %vm19481_vm1 }
 0x629   : > { %5530 = vmatprep.mubr.f32.mxu1 %v19484_v60  ;;  %7362 = vmatpush1.msra.mxu0 %v19464_v35  ;;  %v16744_v46 = vshll.u32 %v6706_v50, 8  ;;  %v16748_v11 = vadd.s32 %v6551_v3, %v6547_v40  ;;  %vm6731_vm10 = vcmp.lt.s32.totalorder %v16654_v9, 2  ;;  %v6738_v35 = vsel %vm6730_vm3, %v6717_v49, %v6720_v17  ;;  %v9181_v9 = vld [vmem:[%s18342_s3 + $0x28] sm:$0xff] }
 0x62a   : > { %v16740_v21 = vadd.s32 %v16572_v5, %v19485_v61  ;;  %7451 = vmatpush1.msra.mxu1 %v19486_v16  ;;  %9113 = vmatmul.mubr.msk.f32.gmra.mxu0 %vm19487_vm7, %v5364_v32  ;;  %v7113_v41 = vand.u32 2139095040, %v16712_v8  ;;  %v16758_v5 = vsel %vm6731_vm10, %v6734_v33, %v6736_v47  ;;  %v6740_v23 = vsel %vm6732_vm8, %v16671_v39, %v6739_v54 }
 0x62b   : > { %9115 = vmatmul.mubr.msk.f32.gmra.mxu1 %vm19488_vm4, %v5364_v32  ;;  %7363 = vmatprep.subr.mxu0 %v19489_v29  ;;  %v6816_v20 = vsub.s32 32, %v16725_v27  ;;  %v16765_v57 = vsel %vm7018_vm5, %v7017_v36, 0  ;;  %v6742_v62 = vsel %vm6730_vm3, %v6720_v17, %v16671_v39  ;;  %v6744_v59 = vsel %vm6732_vm8, %v6726_v48, %v6743_v4  ;;  %v19496_v17 = vld [vmem:[#allocation102_spill] sm:$0xff]  ;;  %vm19501_vm8 = vmmov %vm19481_vm1 }
 0x62c   : > { %7452 = vmatprep.subr.mxu1 %v19472_v43  ;;  %7364 = vmatpush1.msra.mxu0 %v19490_v2  ;;  %v6809_v7 = vor.u32 8388608, %v6808_v12  ;;  %v9168_v14 = vadd.s32 4294967169, %v6908_v63  ;;  %v19492_v43 = vld [vmem:[#allocation50_spill] sm:$0xff]  ;;  %v16784_v44 = vshrl.u32 %v6450_v34, 30  ;;  %v16787_v39 = vadd.s32 536870912, %v16740_v21  ;;  %vm19502_vm4 = vmmov %vm19481_vm1 }
 0x62d   : > { %7453 = vmatpush1.msra.mxu1 %v19474_v56  ;;  %7365 = vmatprep.subr.mxu0 %v19491_v53  ;;  %v19493_v49 = vshll.u32 %v19492_v43, 30  ;;  %v18735_v48 = vand.u32 2147483647, %v19496_v17  ;;  %v16794_v56 = vsel %vm6731_vm10, %v6738_v35, %v6740_v23  ;;  %v16799_v42 = vand.u32 31, %v16765_v57 }
 0x62e   : > { %19495 = vst [vmem:[#allocation87_spill] sm:$0xff] %v16784_v44  ;;  %7454 = vmatprep.subr.mxu1 %v19475_v30  ;;  %7366 = vmatpush1.msra.mxu0 %v19473_v26  ;;  %v7114_v50 = vshrl.u32 %v7113_v41, 23  ;;  %v16804_v51 = vadd.s32 536870912, %v16748_v11  ;;  %v16808_v26 = vsel %vm6731_vm10, %v6742_v62, %v6744_v59  ;;  %v19497_v30 = vmov 2475754826   ;;  %v9182_v62 = vld [vmem:[%s18342_s3 + $0x30] sm:$0xff] }
 0x62f   : > { %v16782_v55 = vsub.s32 %v19494_v38, %v19493_v49  ;;  %7399 = vmatprep.mubr.f32.mxu0 %v19484_v60  ;;  %7455 = vmatpush1.msra.mxu1 %v19477_v37  ;;  %v6819_v0 = vshrl.u32 %v19497_v30, %v6816_v20  ;;  %v19498_v45 = vmov 2131351028   ;;  %v6828_v3 = vshrl.u32 %v19381_v31, %v6816_v20 }
 0x630   : > { %v6822_v40 = vshrl.u32 %v19498_v45, %v6816_v20  ;;  %7488 = vmatprep.mubr.f32.mxu1 %v19484_v60  ;;  %9188 = vmatmul.mubr.msk.f32.vlgmr.msra.gmra.mxu0 %vm19499_vm14, %v9180_v19  ;;  %v6831_v22 = vshrl.u32 %v19382_v25, %v6816_v20  ;;  %v16816_v37 = vshll.u32 %v6809_v7, 8  ;;  %v6914_v32 = vadd.s32 1, %v9168_v14  ;;  %vm19503_vm14 = vmmov %vm19481_vm1 }
 0x631   : > { %9192 = vmatmul.mubr.msk.f32.vlgmr.msra.gmra.mxu1 %vm19500_vm9, %v9180_v19  ;;  %7405 = vmatprep.mubr.f32.mxu0 %v19484_v60  ;;  %v16824_v33 = vshrl.u32 %v16691_v13, 5  ;;  %v6818_v12 = vshll.u32 %v19386_v6, %v16725_v27  ;;  %v6821_v47 = vshll.u32 %v19497_v30, %v16725_v27  ;;  %v6827_v54 = vshll.u32 %v19384_v58, %v16725_v27 }
 0x632   : > { %7494 = vmatprep.mubr.f32.mxu1 %v19484_v60  ;;  %v6825_v63 = vshrl.u32 %v19384_v58, %v6816_v20  ;;  %v6830_v34 = vshll.u32 %v19381_v31, %v16725_v27  ;;  %v16837_v61 = vsub.s32 32, %v16799_v42  ;;  %v9176_v13 = vadd.s32 4294967169, %v7114_v50 }
 0x633   : > { %v16841_v4 = vmul.u32.u64.low %v16744_v46, %v16808_v26  ;;  %v16842_v16 = vmul.u32.u64.high %v16744_v46, %v16808_v26, %v16841_v4  ;;  %v16845_v35 = vor.u32 %v6819_v0, %v6818_v12  ;;  %v16847_v41 = vor.u32 %v6822_v40, %v6821_v47  ;;  %v9183_v40 = vld [vmem:[%s18342_s3 + $0x38] sm:$0xff] }
 0x634   : > { %9189 = vmatmul.mubr.msk.f32.gmra.mxu0 %vm19481_vm1, %v9181_v9  ;;  %v6824_v29 = vshll.u32 %v19498_v45, %v16725_v27  ;;  %v6829_v23 = vor.u32 %v6828_v3, %v6827_v54  ;;  %v6832_v2 = vor.u32 %v6831_v22, %v6830_v34  ;;  %vm6915_vm3 = vcmp.gt.s32.totalorder %v6914_v32, 0 }
 0x635   : > { %9193 = vmatmul.mubr.msk.f32.gmra.mxu1 %vm19501_vm8, %v9181_v9  ;;  %7411 = vmatprep.mubr.f32.mxu0 %v19484_v60  ;;  %v16859_v59 = vmul.u32.u64.low %v16744_v46, %v16794_v56  ;;  %v16860_v7 = vmul.u32.u64.high %v16744_v46, %v16794_v56, %v16859_v59  ;;  %v6817_v14 = vshrl.u32 %v19386_v6, %v6816_v20  ;;  %v16866_v27 = vand.u32 8388607, %v18735_v48  ;;  %vm19504_vm8 = vmmov %vm19481_vm1 }
 0x636   : > { %7500 = vmatprep.mubr.f32.mxu1 %v19484_v60  ;;  %v16869_v53 = vor.u32 %v6825_v63, %v6824_v29  ;;  %vm6833_vm5 = vcmp.lt.s32.totalorder %v16824_v33, 1  ;;  %v7034_v19 = vshrl.u32 %v19381_v31, %v16837_v61  ;;  %v7120_v49 = vadd.s32 1, %v9176_v13 }
 0x637   : > { %vm6835_vm7 = vcmp.lt.s32.totalorder %v16824_v33, 3  ;;  %vm6836_vm10 = vcmp.lt.s32.totalorder %v16824_v33, 4  ;;  %v6841_v20 = vsel %vm6833_vm5, %v16845_v35, %v16847_v41  ;;  %v16880_v38 = vsel %vm6915_vm3, %v6914_v32, 0 }
 0x638   : > { %9190 = vmatmul.mubr.msk.f32.gmra.mxu0 %vm19502_vm4, %v9182_v62  ;;  %v6842_v56 = vsel %vm6836_vm10, %v6829_v23, 920167782  ;;  %v6846_v50 = vsel %vm6836_vm10, %v6832_v2, 1326507024  ;;  %v7025_v26 = vshrl.u32 %v19497_v30, %v16837_v61  ;;  %v7033_v0 = vshll.u32 %v19384_v58, %v16799_v42 }
 0x639   : > { %9194 = vmatmul.mubr.msk.f32.gmra.mxu1 %vm19503_vm14, %v9182_v62  ;;  %7417 = vmatprep.mubr.f32.mxu0 %v19484_v60  ;;  %v16897_v3 = vshrl.u32 %v16765_v57, 5  ;;  %v7024_v22 = vshll.u32 %v19386_v6, %v16799_v42  ;;  %v7028_v32 = vshrl.u32 %v19498_v45, %v16837_v61  ;;  %v7031_v9 = vshrl.u32 %v19384_v58, %v16837_v61 }
 0x63a   : > { %7506 = vmatprep.mubr.f32.mxu1 %v19484_v60  ;;  %v7035_v12 = vor.u32 %v7034_v19, %v7033_v0  ;;  %v7037_v47 = vshrl.u32 %v19382_v25, %v16837_v61  ;;  %v6918_v54 = vand.u32 31, %v16880_v38  ;;  %vm7121_vm9 = vcmp.gt.s32.totalorder %v7120_v49, 0 }
 0x63b   : > { %v6845_v57 = vsel %vm6833_vm5, %v16847_v41, %v16869_v53  ;;  %v6847_v63 = vsel %vm6835_vm7, %v6829_v23, %v6846_v50  ;;  %v7027_v34 = vshll.u32 %v19497_v30, %v16799_v42  ;;  %v7030_v13 = vshll.u32 %v19498_v45, %v16799_v42 }
 0x63c   : > { %9191 = vmatmul.mubr.msk.f32.gmra.mxu0 %vm19481_vm1, %v9183_v40  ;;  %vm6834_vm3 = vcmp.lt.s32.totalorder %v16824_v33, 2  ;;  %v6843_v4 = vsel %vm6835_vm7, %v16869_v53, %v6842_v56  ;;  %v16924_v29 = vor.u32 %v7025_v26, %v7024_v22  ;;  %v7036_v2 = vshll.u32 %v19381_v31, %v16799_v42 }
 0x63d   : > { %9195 = vmatmul.mubr.msk.f32.gmra.mxu1 %vm19504_vm8, %v9183_v40  ;;  %7605 = vmatprep.mubr.f32.mxu0 %v19484_v60  ;;  %v16930_v23 = vor.u32 %v7028_v32, %v7027_v34  ;;  %v16932_v62 = vor.u32 %v7031_v9, %v7030_v13  ;;  %vm7042_vm4 = vcmp.lt.s32.totalorder %v16897_v3, 4  ;;  %v7122_v19 = vsel %vm7121_vm9, %v7120_v49, 0 }
 0x63e   : > { %7676 = vmatprep.mubr.f32.mxu1 %v19484_v60  ;;  %v16939_v56 = vsel %vm6834_vm3, %v6845_v57, %v6847_v63  ;;  %v7038_v50 = vor.u32 %v7037_v47, %v7036_v2  ;;  %v7048_v42 = vsel %vm7042_vm4, %v7035_v12, 920167782  ;;  %v16943_v26 = vsub.s32 32, %v6918_v54 }
 0x63f   : > { %v16946_v0 = vadd.s32 1, %v16860_v7  ;;  %v16950_v40 = vsel %vm6834_vm3, %v6841_v20, %v6843_v4  ;;  %v7015_v49 = vor.u32 8388608, %v16866_v27  ;;  %v18734_v22 = vand.u32 2147483647, %v16667_v1 }
 0x640   : > { %v16957_v32 = vsel %vm6833_vm5, %v6817_v14, %v16845_v35  ;;  %vm7039_vm14 = vcmp.lt.s32.totalorder %v16897_v3, 1  ;;  %vm7041_vm9 = vcmp.lt.s32.totalorder %v16897_v3, 3  ;;  %v7124_v9 = vand.u32 31, %v7122_v19 }
 0x641   : > { %v16963_v47 = vmul.u32.u64.low %v16816_v37, %v16939_v56  ;;  %v16964_v57 = vmul.u32.u64.high %v16816_v37, %v16939_v56, %v16963_v47  ;;  %v7047_v27 = vsel %vm7039_vm14, %v16924_v29, %v16930_v23  ;;  %v7049_v35 = vsel %vm7041_vm9, %v16932_v62, %v7048_v42 }
 0x642   : > { %v16976_v14 = vmul.u32.u64.low %v16816_v37, %v16950_v40  ;;  %v16977_v20 = vmul.u32.u64.high %v16816_v37, %v16950_v40, %v16976_v14  ;;  %v7052_v63 = vsel %vm7042_vm4, %v7038_v50, 1326507024  ;;  %v6931_v34 = vshrl.u32 %v19381_v31, %v16943_v26 }
 0x643   : > { %vm7040_vm5 = vcmp.lt.s32.totalorder %v16897_v3, 2  ;;  %v7051_v13 = vsel %vm7039_vm14, %v16930_v23, %v16932_v62  ;;  %v16989_v4 = vshll.u32 %v7015_v49, 8  ;;  %v6911_v2 = vand.u32 8388607, %v18734_v22 }
 0x644   : > { %v16995_v56 = vsel %vm7040_vm5, %v7047_v27, %v7049_v35  ;;  %v6930_v50 = vshll.u32 %v19384_v58, %v6918_v54  ;;  %v6934_v42 = vshrl.u32 %v19382_v25, %v16943_v26  ;;  %v17000_v40 = vsub.s32 32, %v7124_v9 }
 0x645   : > { %v7053_v47 = vsel %vm7041_vm9, %v7035_v12, %v7052_v63  ;;  %v17005_v49 = vshrl.u32 %v16880_v38, 5  ;;  %v6922_v22 = vshrl.u32 %v19497_v30, %v16943_v26  ;;  %v6925_v27 = vshrl.u32 %v19498_v45, %v16943_v26 }
 0x646   : > { %v6928_v35 = vshrl.u32 %v19384_v58, %v16943_v26  ;;  %v6932_v48 = vor.u32 %v6931_v34, %v6930_v50  ;;  %v6933_v15 = vshll.u32 %v19381_v31, %v6918_v54  ;;  %v6921_v38 = vshll.u32 %v19386_v6, %v6918_v54 }
 0x647   : > { %v17017_v12 = vmul.u32.u64.low %v16989_v4, %v16995_v56  ;;  %v17018_v63 = vmul.u32.u64.high %v16989_v4, %v16995_v56, %v17017_v12  ;;  %v6924_v60 = vshll.u32 %v19497_v30, %v6918_v54  ;;  %v7054_v43 = vsel %vm7040_vm5, %v7051_v13, %v7053_v47 }
 0x648   : > { %v6927_v1 = vshll.u32 %v19498_v45, %v6918_v54  ;;  %v6935_v34 = vor.u32 %v6934_v42, %v6933_v15  ;;  %v7137_v50 = vshrl.u32 %v19381_v31, %v17000_v40  ;;  %v17028_v36 = vor.u32 %v6922_v22, %v6921_v38 }
 0x649   : > { %v17030_v17 = vor.u32 %v6925_v27, %v6924_v60  ;;  %vm6939_vm1 = vcmp.lt.s32.totalorder %v17005_v49, 4  ;;  %v7140_v56 = vshrl.u32 %v19382_v25, %v17000_v40  ;;  %v17039_v47 = vshrl.u32 %v7122_v19, 5 }
 0x64a   : > { %v17035_v52 = vor.u32 %v6928_v35, %v6927_v1  ;;  %v6945_v13 = vsel %vm6939_vm1, %v6932_v48, 920167782  ;;  %v7136_v15 = vshll.u32 %v19384_v58, %v7124_v9  ;;  %vm6755_vm8 = vc.u32 %v16842_v16, %v16859_v59 }
 0x64b   : > { %v7128_v60 = vshrl.u32 %v19497_v30, %v17000_v40  ;;  %v7131_v54 = vshrl.u32 %v19498_v45, %v17000_v40  ;;  %v7134_v25 = vshrl.u32 %v19384_v58, %v17000_v40  ;;  %v7139_v1 = vshll.u32 %v19381_v31, %v7124_v9 }
 0x64c   : > { %vm6936_vm12 = vcmp.lt.s32.totalorder %v17005_v49, 1  ;;  %vm6938_vm11 = vcmp.lt.s32.totalorder %v17005_v49, 3  ;;  %v6949_v19 = vsel %vm6939_vm1, %v6935_v34, 1326507024  ;;  %v7138_v22 = vor.u32 %v7137_v50, %v7136_v15 }
 0x64d   : > { %v7127_v42 = vshll.u32 %v19386_v6, %v7124_v9  ;;  %v7130_v27 = vshll.u32 %v19497_v30, %v7124_v9  ;;  %v7133_v35 = vshll.u32 %v19498_v45, %v7124_v9  ;;  %v7141_v38 = vor.u32 %v7140_v56, %v7139_v1 }
 0x64e   : > { %v6912_v28 = vor.u32 8388608, %v6911_v2  ;;  %v6944_v31 = vsel %vm6936_vm12, %v17028_v36, %v17030_v17  ;;  %v6946_v58 = vsel %vm6938_vm11, %v17035_v52, %v6945_v13  ;;  %v19505_v34 = vand.u32 2147483647, %v16712_v8 }
 0x64f   : > { %v17067_v15 = vor.u32 %v7128_v60, %v7127_v42  ;;  %v17069_v24 = vor.u32 %v7131_v54, %v7130_v27  ;;  %v7135_v30 = vor.u32 %v7134_v25, %v7133_v35  ;;  %vm7145_vm15 = vcmp.lt.s32.totalorder %v17039_v47, 4 }
 0x650   : > { %v7117_v50 = vand.u32 8388607, %v19505_v34  ;;  %v6838_v45 = vsel %vm6836_vm10, %v16869_v53, 2102212464  ;;  %v6948_v9 = vsel %vm6936_vm12, %v17030_v17, %v17035_v52  ;;  %v6950_v2 = vsel %vm6938_vm11, %v6932_v48, %v6949_v19 }
 0x651   : > { %v7151_v56 = vsel %vm7145_vm15, %v7138_v22, 920167782  ;;  %v17084_v13 = vmul.u32.u64.low %v16989_v4, %v7054_v43  ;;  %v17085_v60 = vmul.u32.u64.high %v16989_v4, %v7054_v43, %v17084_v13  ;;  %vm6937_vm6 = vcmp.lt.s32.totalorder %v17005_v49, 2 }
 0x652   : > { %v7155_v53 = vsel %vm7145_vm15, %v7141_v38, 1326507024  ;;  %v6947_v54 = vsel %vm6937_vm6, %v6944_v31, %v6946_v58  ;;  %v17092_v25 = vshll.u32 %v6912_v28, 8  ;;  %vm7142_vm10 = vcmp.lt.s32.totalorder %v17039_v47, 1 }
 0x653   : > { %vm7144_vm2 = vcmp.lt.s32.totalorder %v17039_v47, 3  ;;  %v6951_v48 = vsel %vm6937_vm6, %v6948_v9, %v6950_v2  ;;  %v7118_v1 = vor.u32 8388608, %v7117_v50  ;;  %v7150_v43 = vsel %vm7142_vm10, %v17067_v15, %v17069_v24 }
 0x654   : > { %v7152_v19 = vsel %vm7144_vm2, %v7135_v30, %v7151_v56  ;;  %v6839_v28 = vsel %vm6835_vm7, %v16847_v41, %v6838_v45  ;;  %v7044_v42 = vsel %vm7042_vm4, %v16932_v62, 2102212464  ;;  %v7154_v27 = vsel %vm7142_vm10, %v17069_v24, %v7135_v30 }
 0x655   : > { %v7156_v35 = vsel %vm7144_vm2, %v7138_v22, %v7155_v53  ;;  %v7023_v38 = vshrl.u32 %v19386_v6, %v16837_v61  ;;  %v17118_v31 = vmul.u32.u64.low %v17092_v25, %v6947_v54  ;;  %v17119_v58 = vmul.u32.u64.high %v17092_v25, %v6947_v54, %v17118_v31  ;;  %v19506_v54 = vld [vmem:[#allocation122_spill] sm:$0xff] }
 0x656   : > { %vm7143_vm7 = vcmp.lt.s32.totalorder %v17039_v47, 2  ;;  %v6757_v41 = vsel %vm6755_vm8, %v16946_v0, %v16860_v7  ;;  %v17129_v62 = vmul.u32.u64.low %v17092_v25, %v6951_v48  ;;  %v17130_v34 = vmul.u32.u64.high %v17092_v25, %v6951_v48, %v17129_v62 }
 0x657   : > { %v7153_v61 = vsel %vm7143_vm7, %v7150_v43, %v7152_v19  ;;  %v7043_v22 = vsel %vm7039_vm14, %v7023_v38, %v16924_v29  ;;  %v7045_v50 = vsel %vm7041_vm9, %v16930_v23, %v7044_v42  ;;  %v7157_v45 = vsel %vm7143_vm7, %v7154_v27, %v7156_v35 }
 0x658   : > { %v17142_v9 = vshll.u32 %v7118_v1, 8  ;;  %v6840_v7 = vsel %vm6834_vm3, %v16957_v32, %v6839_v28  ;;  %vm6858_vm4 = vc.u32 %v16964_v57, %v16976_v14  ;;  %v6859_v0 = vadd.s32 1, %v16977_v20 }
 0x659   : > { %v7065_v29 = vadd.s32 1, %v17018_v63  ;;  %vm7064_vm14 = vc.u32 %v17085_v60, %v17017_v12  ;;  %v6941_v23 = vsel %vm6939_vm1, %v17035_v52, 2102212464  ;;  %v7046_v33 = vsel %vm7040_vm5, %v7043_v22, %v7045_v50 }
 0x65a   : > { %v17157_v2 = vmul.u32.u64.low %v17142_v9, %v7153_v61  ;;  %v17158_v56 = vmul.u32.u64.high %v17142_v9, %v7153_v61, %v17157_v2  ;;  %v6920_v32 = vshrl.u32 %v19386_v6, %v16943_v26  ;;  %v6156_v48 = vsub.s32 4294967266, %v19506_v54 }
 0x65b   : > { %v17166_v13 = vmul.u32.u64.low %v17142_v9, %v7157_v45  ;;  %v17167_v53 = vmul.u32.u64.high %v17142_v9, %v7157_v45, %v17166_v13  ;;  %v6352_v1 = vsub.s32 0, %v16782_v55  ;;  %v6452_v52 = vshll.u32 %v16784_v44, 30 }
 0x65c   : > { %v19507_v43 = vmul.u32 %v16744_v46, %v16758_v5  ;;  %v6860_v3 = vsel %vm6858_vm4, %v6859_v0, %v16977_v20  ;;  %v7066_v28 = vsel %vm7064_vm14, %v7065_v29, %v17018_v63  ;;  %v6940_v26 = vsel %vm6936_vm12, %v6920_v32, %v17028_v36 }
 0x65d   : > { %v6942_v42 = vsel %vm6938_vm11, %v17030_v17, %v6941_v23  ;;  %v6856_v27 = vmul.u32 %v16816_v37, %v6840_v7  ;;  %v7062_v35 = vmul.u32 %v16989_v4, %v7046_v33  ;;  %v6962_v46 = vadd.s32 1, %v17119_v58  ;;  %v19512_v7 = vld [vmem:[#allocation6_spill] sm:$0xff]  ;;  %v19516_v23 = vld [vmem:[#allocation131_spill] sm:$0xff] }
 0x65e   : > { %v17175_v19 = vadd.s32 %v6757_v41, %v19507_v43  ;;  %v7147_v5 = vsel %vm7145_vm15, %v7135_v30, 2102212464  ;;  %v17191_v20 = vshrl.u32 %v16787_v39, 30  ;;  %v17194_v63 = vshrl.u32 %v16804_v51, 30  ;;  %v19510_v39 = vld [vmem:[#allocation97_spill] sm:$0xff] }
 0x65f   : > { %vm6961_vm12 = vc.u32 %v17130_v34, %v17118_v31  ;;  %v7126_v17 = vshrl.u32 %v19386_v6, %v17000_v40  ;;  %v17201_v37 = vadd.s32 %v6860_v3, %v6856_v27  ;;  %v17203_v4 = vadd.s32 %v7066_v28, %v7062_v35  ;;  %v19521_v43 = vld [vmem:[#allocation93_spill] sm:$0xff] }
 0x660   : > { %19508 = vst [vmem:[#allocation81_spill] sm:$0xff] %v17191_v20  ;;  %19509 = vst [vmem:[#allocation94_spill] sm:$0xff] %v17194_v63  ;;  %v6759_v36 = vadd.s32 536870912, %v17175_v19  ;;  %v6943_v30 = vsel %vm6937_vm6, %v6940_v26, %v6942_v42  ;;  %v6261_v38 = vshll.u32 %v19510_v39, 23  ;;  %v17209_v51 = vsub.s32 %v16559_v10, %v6452_v52  ;;  %v19519_v52 = vld [vmem:[#allocation128_spill] sm:$0xff]  ;;  %v19522_v26 = vld [vmem:[#allocation134_spill] sm:$0xff] }
 0x661   : > { %v7146_v41 = vsel %vm7142_vm10, %v7126_v17, %v17067_v15  ;;  %v7148_v6 = vsel %vm7144_vm2, %v17069_v24, %v7147_v5  ;;  %v6157_v40 = vadd.s32 127, %v6156_v48  ;;  %v9145_v62 = vmin.u32 %v6352_v1, %v16782_v55  ;;  %v19517_v48 = vld [vmem:[#allocation15_spill] sm:$0xff]  ;;  %v19518_v1 = vld [vmem:[#allocation90_spill] sm:$0xff] }
 0x662   : > { %v6963_v61 = vsel %vm6961_vm12, %v6962_v46, %v17119_v58  ;;  %v7168_v49 = vadd.s32 1, %v17158_v56  ;;  %v6658_v22 = vshll.u32 %v17191_v20, 30  ;;  %v6555_v10 = vshll.u32 %v17194_v63, 30  ;;  %v19523_v42 = vld [vmem:[#allocation98_spill] sm:$0xff] }
 0x663   : > { %v6959_v50 = vmul.u32 %v17092_v25, %v6943_v30  ;;  %vm7167_vm11 = vc.u32 %v17167_v53, %v17157_v2  ;;  %v17225_v15 = vshrl.u32 %v6759_v36, 30  ;;  %v6862_v24 = vadd.s32 536870912, %v17201_v37 }
 0x664   : > { %v7068_v45 = vadd.s32 536870912, %v17203_v4  ;;  %v7149_v58 = vsel %vm7143_vm7, %v7146_v41, %v7148_v6  ;;  %v19513_v0 = vand.u32 2147483647, %v19512_v7  ;;  %v6057_v25 = vand.u32 2147483647, %v19516_v23 }
 0x665   : > { %19511 = vst [vmem:[#allocation107_spill] sm:$0xff] %v17225_v15  ;;  %v6152_v33 = vsub.s32 32, %v19506_v54  ;;  %v6455_v32 = vsub.s32 0, %v17209_v51  ;;  %v17240_v13 = vadd.s32 %v6963_v61, %v6959_v50  ;;  %vm18782_vm6 = vcmp.lt.s32.totalorder %v19517_v48, 0  ;;  %v19530_v61 = vld [vmem:[#allocation130_spill] sm:$0xff] }
 0x666   : > { %vm17233_vm2 = vcmp.le.f32.partialorder %v19513_v0, 0.7853982  ;;  %v19520_v47 = vshll.u32 %v19518_v1, %v19519_v52  ;;  %v6262_v28 = vor.u32 4788187, %v6261_v38  ;;  %v6136_v27 = vadd.s32 %v19523_v42, %v19522_v26 }
 0x667   : > { %v7169_v35 = vsel %vm7167_vm11, %v7168_v49, %v17158_v56  ;;  %v6158_v46 = vshll.u32 %v6157_v40, 23  ;;  %v17251_v5 = vsub.s32 %v16740_v21, %v6658_v22  ;;  %v17254_v17 = vsub.s32 %v16748_v11, %v6555_v10  ;;  %v19529_v21 = vld [vmem:[#allocation27_spill] sm:$0xff]  ;;  %v19531_v22 = vld [vmem:[#allocation129_spill] sm:$0xff] }
 0x668   : > { %v6258_v3 = vor.u32 %v19521_v43, %v19520_v47  ;;  %v7165_v36 = vmul.u32 %v17142_v9, %v7149_v58  ;;  %v6354_v30 = vclz %v9145_v62  ;;  %v6761_v39 = vshll.u32 %v17225_v15, 30  ;;  %v19533_v58 = vld [vmem:[#allocation96_spill] sm:$0xff] }
 0x669   : > { %v17258_v41 = vshrl.u32 %v6862_v24, 30  ;;  %v17260_v38 = vshrl.u32 %v7068_v45, 30  ;;  %v19526_v6 = vand.u32 2147483647, %v19517_v48  ;;  %vm18779_vm3 = vcmp.lt.s32.totalorder %v19529_v21, 0 }
 0x66a   : > { %v6154_v40 = vshrl.u32 %v6136_v27, %v6152_v33  ;;  %v9149_v11 = vmin.u32 %v6455_v32, %v17209_v51  ;;  %v6965_v9 = vadd.s32 536870912, %v17240_v13  ;;  %v17271_v62 = vadd.s32 %v7169_v35, %v7165_v36  ;;  %v19538_v27 = vld [vmem:[#allocation111_spill] sm:$0xff] }
 0x66b   : > { %19524 = vst [vmem:[#allocation103_spill] sm:$0xff] %v17258_v41  ;;  %19525 = vst [vmem:[#allocation135_spill] sm:$0xff] %v17260_v38  ;;  %vm17264_vm15 = vcmp.le.f32.partialorder %v19526_v6, 0.7853982  ;;  %v5958_v49 = vxor.u32 2147483648, %v19530_v61  ;;  %v19532_v10 = vcvt.s32.f32 %v19531_v22  ;;  %v6265_v45 = vcvt.s32.f32 %v6258_v3 }
 0x66c   : > { %v6263_v24 = vand.u32 2147483647, %v6262_v28  ;;  %v6153_v0 = vshll.u32 %v19533_v58, %v19506_v54  ;;  %v6159_v23 = vor.u32 4788187, %v6158_v46  ;;  %v6661_v1 = vsub.s32 0, %v17251_v5 }
 0x66d   : > { %v6060_v50 = vmul.f32 %v19532_v10, %v6057_v25  ;;  %v6558_v33 = vsub.s32 0, %v17254_v17  ;;  %v9146_v32 = vadd.s32 4294967294, %v6354_v30  ;;  %v17281_v52 = vsub.s32 %v17175_v19, %v6761_v39  ;;  %v19539_v19 = vld [vmem:[#allocation64_spill] sm:$0xff]  ;;  %v19540_v10 = vld [vmem:[#allocation21_spill] sm:$0xff] }
 0x66e   : > { %v6864_v47 = vshll.u32 %v17258_v41, 30  ;;  %v7070_v43 = vshll.u32 %v17260_v38, 30  ;;  %v19534_v25 = vand.u32 2147483647, %v19529_v21  ;;  %v6155_v54 = vor.u32 %v6154_v40, %v6153_v0 }
 0x66f   : > { %v6457_v28 = vclz %v9149_v11  ;;  %v17291_v26 = vshrl.u32 %v6965_v9, 30  ;;  %v7171_v42 = vadd.s32 536870912, %v17271_v62  ;;  %9753 = vcosq.f32 %v19538_v27 }
 0x670   : > { %vm17287_vm9 = vcmp.le.f32.partialorder %v19534_v25, 0.7853982  ;;  %v5756_v35 = vsel %vm17233_vm2, %v19512_v7, %v19539_v19  ;;  %v6061_v46 = vxor.u32 2147483648, %v6060_v50  ;;  %v6266_v36 = vmul.f32 %v6265_v45, %v6263_v24  ;;  %v19646_v45 = vld [vmem:[#allocation4_spill] sm:$0xff] }
 0x671   : > { %19537 = vst [vmem:[#allocation33_spill] sm:$0xff] %v17291_v26  ;;  %v5959_v30 = vsel %vm18782_vm6, %v5958_v49, %v19530_v61  ;;  %v6160_v39 = vand.u32 2147483647, %v6159_v23  ;;  %v9157_v6 = vmin.u32 %v6661_v1, %v17251_v5  ;;  %v9153_v40 = vmin.u32 %v6558_v33, %v17254_v17 }
 0x672   : > { %vm9147_vm5 = vcmp.lt.s32.totalorder %v9146_v32, 0  ;;  %v6764_v11 = vsub.s32 0, %v17281_v52  ;;  %v17306_v9 = vsub.s32 %v17201_v37, %v6864_v47  ;;  %v17309_v22 = vsub.s32 %v17203_v4, %v7070_v43 }
 0x673   : > { %v19541_v24 = vand.u32 2147483647, %v19540_v10  ;;  %v6162_v61 = vcvt.s32.f32 %v6155_v54  ;;  %v9150_v49 = vadd.s32 4294967294, %v6457_v28  ;;  %v6967_v58 = vshll.u32 %v17291_v26, 30 }
 0x674   : > { %v17318_v0 = vshrl.u32 %v7171_v42, 30  ;;  %9755 = vsinq.f32 %v19538_v27  ;;  %v5962_v37 = vsel %vm17264_vm15, %v19517_v48, %v5959_v30  ;;  %v6062_v4 = vsel %vm18779_vm3, %v6061_v46, %v6060_v50 }
 0x675   : > { %vm17313_vm1 = vcmp.le.f32.partialorder %v19541_v24, 0.7853982  ;;  %v6267_v23 = vxor.u32 2147483648, %v6266_v36  ;;  %v6163_v1 = vmul.f32 %v6162_v61, %v6160_v39  ;;  %v17326_v33 = vsel %vm9147_vm5, 0, %v9146_v32 }
 0x676   : > { %19544 = vst [vmem:[#allocation141_spill] sm:$0xff] %v17318_v0  ;;  %v6663_v47 = vclz %v9157_v6  ;;  %v6560_v43 = vclz %v9153_v40  ;;  %9757 = vcosq.f32 %v5756_v35  ;;  %v9161_v25 = vmin.u32 %v6764_v11, %v17281_v52  ;;  %v19545_v11 = vld [vmem:[#allocation4_spill] sm:$0xff] }
 0x677   : > { %v6867_v54 = vsub.s32 0, %v17306_v9  ;;  %v7073_v28 = vsub.s32 0, %v17309_v22  ;;  %9759 = vsinq.f32 %v5756_v35  ;;  %vm9151_vm8 = vcmp.lt.s32.totalorder %v9150_v49, 0 }
 0x678   : > { %v17332_v42 = vsub.s32 %v17240_v13, %v6967_v58  ;;  %v7173_v50 = vshll.u32 %v17318_v0, 30  ;;  %9761 = vcosq.f32 %v5962_v37  ;;  %v6065_v32 = vsel %vm17287_vm9, %v19529_v21, %v6062_v4 }
 0x679   : > { %vm18777_vm10 = vcmp.lt.s32.totalorder %v19540_v10, 0  ;;  %v6362_v27 = vsub.s32 4294967266, %v17326_v33  ;;  %v6164_v46 = vxor.u32 2147483648, %v6163_v1  ;;  %v9158_v35 = vadd.s32 4294967294, %v6663_v47 }
 0x67a   : > { %v6268_v19 = vsel %vm18777_vm10, %v6267_v23, %v6266_v36  ;;  %v9154_v30 = vadd.s32 4294967294, %v6560_v43  ;;  %v17342_v39 = vsel %vm9151_vm8, 0, %v9150_v49  ;;  %v6766_v13 = vclz %v9161_v25 }
 0x67b   : > { %v9165_v6 = vmin.u32 %v6867_v54, %v17306_v9  ;;  %v9173_v40 = vmin.u32 %v7073_v28, %v17309_v22  ;;  %9763 = vsinq.f32 %v5962_v37  ;;  %vm18776_vm7 = vcmp.lt.s32.totalorder %v19545_v11, 0  ;;  %v19550_v28 = vld [vmem:[#allocation113_spill] sm:$0xff] }
 0x67c   : > { %v6970_v24 = vsub.s32 0, %v17332_v42  ;;  %v17349_v61 = vsub.s32 %v17271_v62, %v7173_v50  ;;  %9765 = vcosq.f32 %v6065_v32  ;;  %v6271_v36 = vsel %vm17313_vm1, %v19540_v10, %v6268_v19  ;;  %v17360_v37 = vpop.eup %9753  ;;  %v19551_v50 = vld [vmem:[#allocation74_spill] sm:$0xff] }
 0x67d   : > { %v19546_v49 = vand.u32 2147483647, %v19545_v11  ;;  %v19547_v58 = vmov 0  ;;  %v6363_v4 = vadd.s32 127, %v6362_v27  ;;  %v6358_v23 = vsub.s32 32, %v17326_v33 }
 0x67e   : > { %v6465_v47 = vsub.s32 4294967266, %v17342_v39  ;;  %vm9159_vm14 = vcmp.lt.s32.totalorder %v9158_v35, 0  ;;  %vm9155_vm12 = vcmp.lt.s32.totalorder %v9154_v30, 0  ;;  %v6165_v62 = vsel %vm18776_vm7, %v6164_v46, %v6163_v1 }
 0x67f   : > { %vm17356_vm4 = vcmp.le.f32.partialorder %v19546_v49, 0.7853982  ;;  %v9162_v43 = vadd.s32 4294967294, %v6766_v13  ;;  %v6869_v25 = vclz %v9165_v6  ;;  %v7075_v54 = vclz %v9173_v40 }
 0x680   : > { %v19548_v58 = vsel %vm17356_vm4, 4294967295, %v19547_v58  ;;  %9767 = vsinq.f32 %v6065_v32  ;;  %v6342_v19 = vadd.s32 %v19551_v50, %v19550_v28  ;;  %v9169_v27 = vmin.u32 %v6970_v24, %v17332_v42 }
 0x681   : > { %19549 = vst [vmem:[#allocation99_spill] sm:$0xff] %v19548_v58  ;;  %v7176_v49 = vsub.s32 0, %v17349_v61  ;;  %9769 = vcosq.f32 %v6271_v36  ;;  %v6364_v0 = vshll.u32 %v6363_v4, 23  ;;  %v17370_v26 = vsel %vm9159_vm14, 0, %v9158_v35  ;;  %v17374_v41 = vpop.eup %9755 }
 0x682   : > { %v17372_v38 = vsel %vm9155_vm12, 0, %v9154_v30  ;;  %v6168_v1 = vsel %vm17356_vm4, %v19545_v11, %v6165_v62  ;;  %v6359_v32 = vshll.u32 %v16782_v55, %v17326_v33  ;;  %v6360_v46 = vshrl.u32 %v6342_v19, %v6358_v23  ;;  %v19552_v33 = vld [vmem:[#allocation69_spill] sm:$0xff]  ;;  %v19553_v23 = vld [vmem:[#allocation132_spill] sm:$0xff] }
 0x683   : > { %v6466_v13 = vadd.s32 127, %v6465_v47  ;;  %v6461_v6 = vsub.s32 32, %v17342_v39  ;;  %vm9163_vm11 = vcmp.lt.s32.totalorder %v9162_v43, 0  ;;  %v9166_v40 = vadd.s32 4294967294, %v6869_v25  ;;  %v17382_v35 = vpop.eup %9757 }
 0x684   : > { %v9174_v24 = vadd.s32 4294967294, %v7075_v54  ;;  %v6671_v30 = vsub.s32 4294967266, %v17370_v26  ;;  %v6568_v4 = vsub.s32 4294967266, %v17372_v38  ;;  %v6972_v28 = vclz %v9169_v27  ;;  %v17387_v62 = vpop.eup %9759 }
 0x685   : > { %v9177_v50 = vmin.u32 %v7176_v49, %v17349_v61  ;;  %9771 = vsinq.f32 %v6271_v36  ;;  %v6365_v55 = vor.u32 4788187, %v6364_v0  ;;  %v6445_v47 = vadd.s32 %v19553_v23, %v19552_v33  ;;  %v17391_v19 = vpop.eup %9761 }
 0x686   : > { %19554 = vst [vmem:[#allocation44_spill] sm:$0xff] %v17391_v19  ;;  %9773 = vcosq.f32 %v6168_v1  ;;  %v6361_v25 = vor.u32 %v6360_v46, %v6359_v32  ;;  %v6467_v54 = vshll.u32 %v6466_v13, 23  ;;  %v17394_v15 = vsel %vm9163_vm11, 0, %v9162_v43  ;;  %v19555_v32 = vld [vmem:[#allocation89_spill] sm:$0xff] }
 0x687   : > { %v6463_v63 = vshrl.u32 %v6445_v47, %v6461_v6  ;;  %v6667_v27 = vsub.s32 32, %v17370_v26  ;;  %vm9167_vm5 = vcmp.lt.s32.totalorder %v9166_v40, 0  ;;  %vm9175_vm8 = vcmp.lt.s32.totalorder %v9174_v24, 0  ;;  %v19556_v46 = vld [vmem:[#allocation73_spill] sm:$0xff] }
 0x688   : > { %v6672_v49 = vadd.s32 127, %v6671_v30  ;;  %v6569_v20 = vadd.s32 127, %v6568_v4  ;;  %v9170_v36 = vadd.s32 4294967294, %v6972_v28  ;;  %v7178_v0 = vclz %v9177_v50  ;;  %v17397_v44 = vpop.eup %9763  ;;  %v19558_v19 = vld [vmem:[#allocation105_spill] sm:$0xff] }
 0x689   : > { %v6366_v33 = vand.u32 2147483647, %v6365_v55  ;;  %v6462_v23 = vshll.u32 %v17209_v51, %v17342_v39  ;;  %v6651_v13 = vadd.s32 %v19556_v46, %v19555_v32  ;;  %v6774_v43 = vsub.s32 4294967266, %v17394_v15  ;;  %v17404_v6 = vpop.eup %9765 }
 0x68a   : > { %19557 = vst [vmem:[#allocation77_spill] sm:$0xff] %v17404_v6  ;;  %v6468_v47 = vor.u32 4788187, %v6467_v54  ;;  %v6564_v58 = vsub.s32 32, %v17372_v38  ;;  %v17407_v30 = vsel %vm9167_vm5, 0, %v9166_v40  ;;  %v17409_v4 = vsel %vm9175_vm8, 0, %v9174_v24 }
 0x68b   : > { %v6368_v28 = vcvt.s32.f32 %v6361_v25  ;;  %v6464_v50 = vor.u32 %v6463_v63, %v6462_v23  ;;  %v6669_v55 = vshrl.u32 %v6651_v13, %v6667_v27  ;;  %v6548_v51 = vadd.s32 %v19558_v19, %v16595_v18  ;;  %v19559_v63 = vld [vmem:[#allocation60_spill] sm:$0xff] }
 0x68c   : > { %v6673_v39 = vshll.u32 %v6672_v49, 23  ;;  %v6570_v11 = vshll.u32 %v6569_v20, 23  ;;  %vm9171_vm14 = vcmp.lt.s32.totalorder %v9170_v36, 0  ;;  %v9178_v32 = vadd.s32 4294967294, %v7178_v0 }
 0x68d   : > { %v17413_v46 = vpop.eup %9767  ;;  %v6668_v54 = vshll.u32 %v17251_v5, %v17370_v26  ;;  %v6775_v6 = vadd.s32 127, %v6774_v43  ;;  %v6877_v40 = vsub.s32 4294967266, %v17407_v30  ;;  %v7083_v24 = vsub.s32 4294967266, %v17409_v4 }
 0x68e   : > { %v17419_v25 = vpop.eup %9769  ;;  %9775 = vsinq.f32 %v6168_v1  ;;  %vm18773_vm12 = vcmp.lt.s32.totalorder %v19559_v63, 0  ;;  %v6369_v18 = vmul.f32 %v6368_v28, %v6366_v33  ;;  %v6469_v19 = vand.u32 2147483647, %v6468_v47 }
 0x68f   : > { %v6566_v20 = vshrl.u32 %v6548_v51, %v6564_v58  ;;  %v6471_v27 = vcvt.s32.f32 %v6464_v50  ;;  %v6670_v49 = vor.u32 %v6669_v55, %v6668_v54  ;;  %v6770_v0 = vsub.s32 32, %v17394_v15  ;;  %v19563_v55 = vld [vmem:[#allocation66_spill] sm:$0xff] }
 0x690   : > { %v17424_v23 = vsel %vm9171_vm14, 0, %v9170_v36  ;;  %v6674_v5 = vor.u32 4788187, %v6673_v39  ;;  %v6565_v26 = vshll.u32 %v17254_v17, %v17372_v38  ;;  %v6571_v13 = vor.u32 4788187, %v6570_v11 }
 0x691   : > { %vm9179_vm11 = vcmp.lt.s32.totalorder %v9178_v32, 0  ;;  %v6754_v1 = vadd.s32 %v16859_v59, %v16842_v16  ;;  %v6776_v43 = vshll.u32 %v6775_v6, 23  ;;  %v6878_v33 = vadd.s32 127, %v6877_v40 }
 0x692   : > { %v7084_v47 = vadd.s32 127, %v7083_v24  ;;  %v17430_v58 = vpop.eup %9771  ;;  %v19560_v28 = vand.u32 2147483647, %v19559_v63  ;;  %v6370_v36 = vxor.u32 2147483648, %v6369_v18  ;;  %vm18772_vm8 = vcmp.lt.s32.totalorder %v19563_v55, 0 }
 0x693   : > { %v6472_v17 = vmul.f32 %v6471_v27, %v6469_v19  ;;  %v6567_v38 = vor.u32 %v6566_v20, %v6565_v26  ;;  %v6980_v11 = vsub.s32 4294967266, %v17424_v23  ;;  %v17440_v51 = vpop.eup %9773  ;;  %v6677_v16 = vcvt.s32.f32 %v6670_v49 }
 0x694   : > { %vm17434_vm5 = vcmp.le.f32.partialorder %v19560_v28, 0.7853982  ;;  %19564 = vst [vmem:[#allocation100_spill] sm:$0xff] %v17440_v51  ;;  %v6772_v59 = vshrl.u32 %v6754_v1, %v6770_v0  ;;  %v6873_v6 = vsub.s32 32, %v17407_v30  ;;  %v17444_v39 = vsel %vm9179_vm11, 0, %v9178_v32 }
 0x695   : > { %v6675_v54 = vand.u32 2147483647, %v6674_v5  ;;  %v6572_v40 = vand.u32 2147483647, %v6571_v13  ;;  %v6857_v24 = vadd.s32 %v16976_v14, %v16964_v57  ;;  %v7079_v28 = vsub.s32 32, %v17409_v4 }
 0x696   : > { %v6771_v19 = vshll.u32 %v17281_v52, %v17394_v15  ;;  %v6777_v20 = vor.u32 4788187, %v6776_v43  ;;  %v6879_v27 = vshll.u32 %v6878_v33, 23  ;;  %v7085_v26 = vshll.u32 %v7084_v47, 23 }
 0x697   : > { %v6574_v49 = vcvt.s32.f32 %v6567_v38  ;;  %v7063_v0 = vadd.s32 %v17017_v12, %v17085_v60  ;;  %v6981_v1 = vadd.s32 127, %v6980_v11  ;;  %v7186_v32 = vsub.s32 4294967266, %v17444_v39 }
 0x698   : > { %v6371_v5 = vsel %vm18773_vm12, %v6370_v36, %v6369_v18  ;;  %v19565_v57 = vand.u32 2147483647, %v19563_v55  ;;  %v6473_v15 = vxor.u32 2147483648, %v6472_v17  ;;  %v6773_v52 = vor.u32 %v6772_v59, %v6771_v19 }
 0x699   : > { %v6875_v13 = vshrl.u32 %v6857_v24, %v6873_v6  ;;  %v6678_v43 = vmul.f32 %v6677_v16, %v6675_v54  ;;  %v6575_v33 = vmul.f32 %v6574_v49, %v6572_v40  ;;  %v7081_v47 = vshrl.u32 %v7063_v0, %v7079_v28  ;;  %v19569_v0 = vld [vmem:[#allocation114_spill] sm:$0xff] }
 0x69a   : > { %vm17458_vm14 = vcmp.le.f32.partialorder %v19565_v57, 0.7853982  ;;  %v6976_v12 = vsub.s32 32, %v17424_v23  ;;  %v6778_v60 = vand.u32 2147483647, %v6777_v20  ;;  %v6874_v38 = vshll.u32 %v17306_v9, %v17407_v30 }
 0x69b   : > { %v6880_v11 = vor.u32 4788187, %v6879_v27  ;;  %v7086_v18 = vor.u32 4788187, %v7085_v26  ;;  %v7080_v36 = vshll.u32 %v17309_v22, %v17409_v4  ;;  %v6960_v57 = vadd.s32 %v17118_v31, %v17130_v34  ;;  %v17469_v6 = vpop.eup %9775 }
 0x69c   : > { %v6982_v51 = vshll.u32 %v6981_v1, 23  ;;  %v7187_v59 = vadd.s32 127, %v7186_v32  ;;  %v6374_v16 = vsel %vm17434_vm5, %v19559_v63, %v6371_v5  ;;  %v6474_v54 = vsel %vm18772_vm8, %v6473_v15, %v6472_v17  ;;  %v19568_v17 = vld [vmem:[#allocation108_spill] sm:$0xff] }
 0x69d   : > { %v6780_v9 = vcvt.s32.f32 %v6773_v52  ;;  %v6876_v30 = vor.u32 %v6875_v13, %v6874_v38  ;;  %v6679_v40 = vxor.u32 2147483648, %v6678_v43  ;;  %v7082_v24 = vor.u32 %v7081_v47, %v7080_v36 }
 0x69e   : > { %v6978_v28 = vshrl.u32 %v6960_v57, %v6976_v12  ;;  %v7182_v22 = vsub.s32 32, %v17444_v39  ;;  %v6576_v4 = vxor.u32 2147483648, %v6575_v33  ;;  %v6881_v34 = vand.u32 2147483647, %v6880_v11  ;;  %v19576_v57 = vld [vmem:[#allocation49_spill] sm:$0xff] }
 0x69f   : > { %v6781_v31 = vmul.f32 %v6780_v9, %v6778_v60  ;;  %v7087_v19 = vand.u32 2147483647, %v7086_v18  ;;  %v6977_v20 = vshll.u32 %v17332_v42, %v17424_v23  ;;  %v6983_v27 = vor.u32 4788187, %v6982_v51  ;;  %v17492_v60 = vpop.permute.xlu0 %642 }
 0x6a0   : > { %v7166_v26 = vadd.s32 %v17157_v2, %v17167_v53  ;;  %v7188_v49 = vshll.u32 %v7187_v59, 23  ;;  %9777 = vcosq.f32 %v6374_v16  ;;  %vm18775_vm11 = vcmp.lt.s32.totalorder %v19568_v17, 0 }
 0x6a1   : > { %vm18774_vm8 = vcmp.lt.s32.totalorder %v19569_v0, 0  ;;  %v6883_v1 = vcvt.s32.f32 %v6876_v30  ;;  %v6477_v32 = vsel %vm17458_vm14, %v19563_v55, %v6474_v54  ;;  %v7089_v5 = vcvt.s32.f32 %v7082_v24 }
 0x6a2   : > { %v6979_v15 = vor.u32 %v6978_v28, %v6977_v20  ;;  %v7184_v52 = vshrl.u32 %v7166_v26, %v7182_v22  ;;  %v6680_v42 = vsel %vm18775_vm11, %v6679_v40, %v6678_v43  ;;  %v6577_v2 = vsel %vm18774_vm8, %v6576_v4, %v6575_v33  ;;  %v19581_v28 = vld [vmem:[#allocation76_spill] sm:$0xff]  ;;  %v19582_v20 = vld [vmem:[#allocation102_spill] sm:$0xff] }
 0x6a3   : > { %v6782_v53 = vxor.u32 2147483648, %v6781_v31  ;;  %v6884_v23 = vmul.f32 %v6883_v1, %v6881_v34  ;;  %v7090_v51 = vmul.f32 %v7089_v5, %v7087_v19  ;;  %v6984_v13 = vand.u32 2147483647, %v6983_v27  ;;  %v633_v4 = vpop.permute.xlu0 %632  ;;  %v17522_v34 = vpop.permute.xlu1 %647  ;;  %v19583_v1 = vld [vmem:[#allocation71_spill] sm:$0xff] }
 0x6a4   : > { %v7183_v47 = vshll.u32 %v17349_v61, %v17444_v39  ;;  %v7189_v12 = vor.u32 4788187, %v7188_v49  ;;  %9779 = vsinq.f32 %v6374_v16  ;;  %v19570_v38 = vand.u32 2147483647, %v19568_v17 }
 0x6a5   : > { %v19573_v43 = vand.u32 2147483647, %v19569_v0  ;;  %9781 = vcosq.f32 %v6477_v32  ;;  %v6986_v39 = vcvt.s32.f32 %v6979_v15  ;;  %vm18778_vm11 = vcmp.lt.s32.totalorder %v19576_v57, 0 }
 0x6a6   : > { %vm17496_vm12 = vcmp.le.f32.partialorder %v19570_v38, 0.7853982  ;;  %v7185_v18 = vor.u32 %v7184_v52, %v7183_v47  ;;  %9783 = vsinq.f32 %v6477_v32  ;;  %v6885_v59 = vxor.u32 2147483648, %v6884_v23  ;;  %v19593_v47 = vld [vmem:[#allocation55_spill] sm:$0xff] }
 0x6a7   : > { %vm17502_vm8 = vcmp.le.f32.partialorder %v19573_v43, 0.7853982  ;;  %v6683_v61 = vsel %vm17496_vm12, %v19568_v17, %v6680_v42  ;;  %v6783_v16 = vsel %vm18778_vm11, %v6782_v53, %v6781_v31  ;;  %v7091_v54 = vxor.u32 2147483648, %v7090_v51 }
 0x6a8   : > { %v6580_v36 = vsel %vm17502_vm8, %v19569_v0, %v6577_v2  ;;  %v6987_v9 = vmul.f32 %v6986_v39, %v6984_v13  ;;  %v7190_v30 = vand.u32 2147483647, %v7189_v12  ;;  %9785 = vcosq.f32 %v6683_v61  ;;  %v19594_v12 = vld [vmem:[#allocation53_spill] sm:$0xff] }
 0x6a9   : > { %9787 = vsinq.f32 %v6683_v61  ;;  %v19577_v40 = vand.u32 2147483647, %v19576_v57  ;;  %v19578_v24 = vmov 0  ;;  %vm18781_vm10 = vcmp.lt.s32.totalorder %v19581_v28, 0 }
 0x6aa   : > { %v7192_v22 = vcvt.s32.f32 %v7185_v18  ;;  %9789 = vcosq.f32 %v6580_v36  ;;  %v6886_v19 = vsel %vm18781_vm10, %v6885_v59, %v6884_v23  ;;  %vm18780_vm11 = vcmp.lt.s32.totalorder %v19582_v20, 0  ;;  %v19592_v23 = vld [vmem:[#allocation56_spill] sm:$0xff]  ;;  %v19595_v18 = vld [vmem:[#allocation19_spill] sm:$0xff]  ;;  %v638_v59 = vpop.permute.xlu1 %637 }
 0x6ab   : > { %vm17517_vm7 = vcmp.le.f32.partialorder %v19577_v40, 0.7853982  ;;  %v7092_v27 = vsel %vm18780_vm11, %v7091_v54, %v7090_v51  ;;  %v6988_v26 = vxor.u32 2147483648, %v6987_v9  ;;  %v910_v32 = vadd.f32 %v19583_v1, %v633_v4 }
 0x6ac   : > { %v19579_v24 = vsel %vm17517_vm7, 4294967295, %v19578_v24  ;;  %v6786_v31 = vsel %vm17517_vm7, %v19576_v57, %v6783_v16  ;;  %v7193_v49 = vmul.f32 %v7192_v22, %v7190_v30  ;;  %9791 = vsinq.f32 %v6580_v36  ;;  %v19600_v22 = vld [vmem:[#allocation54_spill] sm:$0xff] }
 0x6ad   : > { %19580 = vst [vmem:[#allocation75_spill] sm:$0xff] %v19579_v24  ;;  %v19584_v5 = vand.u32 2147483647, %v19581_v28  ;;  %v19585_v15 = vmov 0  ;;  %v17539_v52 = vpop.eup %9777  ;;  %9793 = vcosq.f32 %v6786_v31  ;;  %v19588_v2 = vand.u32 2147483647, %v19582_v20 }
 0x6ae   : > { %v19589_v53 = vmov 0  ;;  %v1119_v51 = vadd.f32 %v19592_v23, %v633_v4  ;;  %9795 = vsinq.f32 %v6786_v31  ;;  %vm18784_vm10 = vcmp.lt.s32.totalorder %v19593_v47, 0 }
 0x6af   : > { %vm17535_vm3 = vcmp.le.f32.partialorder %v19584_v5, 0.7853982  ;;  %vm17546_vm11 = vcmp.le.f32.partialorder %v19588_v2, 0.7853982  ;;  %v912_v38 = vadd.f32 %v19594_v12, %v633_v4  ;;  %v6989_v43 = vsel %vm18784_vm10, %v6988_v26, %v6987_v9  ;;  %v19602_v2 = vld [vmem:[#allocation57_spill] sm:$0xff] }
 0x6b0   : > { %v19586_v15 = vsel %vm17535_vm3, 4294967295, %v19585_v15  ;;  %v6889_v42 = vsel %vm17535_vm3, %v19581_v28, %v6886_v19  ;;  %v19590_v53 = vsel %vm17546_vm11, 4294967295, %v19589_v53  ;;  %v7095_v13 = vsel %vm17546_vm11, %v19582_v20, %v7092_v27  ;;  %v19601_v27 = vld [vmem:[#allocation61_spill] sm:$0xff]  ;;  %v19614_v28 = vld [vmem:[#allocation3_spill] sm:$0xff] }
 0x6b1   : > { %19587 = vst [vmem:[#allocation42_spill] sm:$0xff] %v19586_v15  ;;  %19591 = vst [vmem:[#allocation67_spill] sm:$0xff] %v19590_v53  ;;  %v7194_v61 = vxor.u32 2147483648, %v7193_v49  ;;  %v7213_v39 = vmul.f32 %v910_v32, %v910_v32  ;;  %v1121_v36 = vadd.f32 %v19595_v18, %v633_v4  ;;  %9797 = vcosq.f32 %v6889_v42  ;;  %v17565_v30 = vpop.eup %9779  ;;  %v19610_v53 = vld [vmem:[#allocation46_spill] sm:$0xff] }
 0x6b2   : > { %v19596_v16 = vand.u32 2147483647, %v19593_v47  ;;  %v19597_v54 = vmov 0  ;;  %9799 = vsinq.f32 %v6889_v42  ;;  %vm18796_vm11 = vcmp.lt.s32.totalorder %v16712_v8, 0  ;;  %v17569_v31 = vpop.eup %9781 }
 0x6b3   : > { %v7215_v40 = vmul.f32 %v1119_v51, %v1119_v51  ;;  %v916_v9 = vadd.f32 %v19600_v22, %v638_v59  ;;  %9801 = vcosq.f32 %v7095_v13  ;;  %v7214_v19 = vmul.f32 %v912_v38, %v912_v38  ;;  %v17575_v1 = vpop.eup %9783  ;;  %v19603_v51 = vld [vmem:[#allocation37_spill] sm:$0xff] }
 0x6b4   : > { %vm17561_vm6 = vcmp.le.f32.partialorder %v19596_v16, 0.7853982  ;;  %v1125_v26 = vadd.f32 %v19601_v27, %v638_v59  ;;  %v7195_v32 = vsel %vm18796_vm11, %v7194_v61, %v7193_v49  ;;  %v7229_v5 = vsub.f32 0.0, %v7213_v39  ;;  %v19608_v39 = vld [vmem:[#allocation35_spill] sm:$0xff] }
 0x6b5   : > { %v19598_v54 = vsel %vm17561_vm6, 4294967295, %v19597_v54  ;;  %v6992_v4 = vsel %vm17561_vm6, %v19593_v47, %v6989_v43  ;;  %v7216_v42 = vmul.f32 %v1121_v36, %v1121_v36  ;;  %v918_v23 = vadd.f32 %v19602_v2, %v638_v59  ;;  %v17581_v18 = vpop.eup %9785 }
 0x6b6   : > { %19599 = vst [vmem:[#allocation85_spill] sm:$0xff] %v19598_v54  ;;  %9803 = vsinq.f32 %v7095_v13  ;;  %v1127_v12 = vadd.f32 %v19603_v51, %v638_v59  ;;  %v19604_v43 = vand.u32 2147483647, %v16712_v8  ;;  %v19605_v38 = vmov 0  ;;  %v17589_v27 = vpop.eup %9787  ;;  %v19609_v54 = vld [vmem:[#allocation47_spill] sm:$0xff] }
 0x6b7   : > { %9805 = vcosq.f32 %v6992_v4  ;;  %v7231_v16 = vsub.f32 0.0, %v7215_v40  ;;  %v7217_v22 = vmul.f32 %v916_v9, %v916_v9  ;;  %v7230_v13 = vsub.f32 0.0, %v7214_v19  ;;  %v17596_v59 = vpop.eup %9789 }
 0x6b8   : > { %vm17585_vm10 = vcmp.le.f32.partialorder %v19604_v43, 0.7853982  ;;  %v7219_v61 = vmul.f32 %v1125_v26, %v1125_v26  ;;  %v922_v36 = vadd.f32 %v19608_v39, %v17492_v60  ;;  %v7245_v2 = vmul.f32 1.442695, %v7229_v5 }
 0x6b9   : > { %v19606_v38 = vsel %vm17585_vm10, 4294967295, %v19605_v38  ;;  %v7198_v49 = vsel %vm17585_vm10, %v16712_v8, %v7195_v32  ;;  %v7232_v51 = vsub.f32 0.0, %v7216_v42  ;;  %v7218_v43 = vmul.f32 %v918_v23, %v918_v23  ;;  %v19611_v32 = vld [vmem:[#allocation40_spill] sm:$0xff] }
 0x6ba   : > { %19607 = vst [vmem:[#allocation101_spill] sm:$0xff] %v19606_v38  ;;  %v1131_v40 = vadd.f32 %v19609_v54, %v17492_v60  ;;  %9807 = vsinq.f32 %v6992_v4  ;;  %v7220_v9 = vmul.f32 %v1127_v12, %v1127_v12  ;;  %v924_v15 = vadd.f32 %v19610_v53, %v17492_v60  ;;  %v17602_v38 = vpop.eup %9791 }
 0x6bb   : > { %9809 = vcosq.f32 %v7198_v49  ;;  %v7249_v19 = vmul.f32 1.442695, %v7231_v16  ;;  %v7233_v26 = vsub.f32 0.0, %v7217_v22  ;;  %v1133_v39 = vadd.f32 %v19611_v32, %v17492_v60  ;;  %v17606_v8 = vpop.eup %9793  ;;  %v19613_v16 = vld [vmem:[#allocation39_spill] sm:$0xff] }
 0x6bc   : > { %19612 = vst [vmem:[#allocation95_spill] sm:$0xff] %v17606_v8  ;;  %9811 = vsinq.f32 %v7198_v49  ;;  %v7247_v5 = vmul.f32 1.442695, %v7230_v13  ;;  %v7235_v42 = vsub.f32 0.0, %v7219_v61  ;;  %v7221_v23 = vmul.f32 %v922_v36, %v922_v36  ;;  %v17608_v54 = vpop.eup %9795  ;;  %v19616_v61 = vld [vmem:[#allocation9_spill] sm:$0xff] }
 0x6bd   : > { %9813 = vpow2.f32 %v7245_v2  ;;  %v7251_v4 = vmul.f32 1.442695, %v7232_v51  ;;  %v7234_v12 = vsub.f32 0.0, %v7218_v43  ;;  %v7223_v53 = vmul.f32 %v1131_v40, %v1131_v40 }
 0x6be   : > { %v7236_v47 = vsub.f32 0.0, %v7220_v9  ;;  %v7222_v20 = vmul.f32 %v924_v15, %v924_v15  ;;  %v928_v22 = vadd.f32 %v19613_v16, %v17522_v34  ;;  %v5651_v24 = vsub.s32 4, %v19614_v28  ;;  %v17613_v60 = vpop.eup %9797  ;;  %v19618_v15 = vld [vmem:[#allocation51_spill] sm:$0xff] }
 0x6bf   : > { %19615 = vst [vmem:[#allocation38_spill] sm:$0xff] %v17613_v60  ;;  %9815 = vpow2.f32 %v7249_v19  ;;  %v7253_v49 = vmul.f32 1.442695, %v7233_v26  ;;  %v7224_v13 = vmul.f32 %v1133_v39, %v1133_v39  ;;  %v1137_v36 = vadd.f32 %v19616_v61, %v17522_v34  ;;  %v17617_v32 = vpop.eup %9799  ;;  %v19620_v39 = vld [vmem:[#allocation18_spill] sm:$0xff] }
 0x6c0   : > { %19617 = vst [vmem:[#allocation82_spill] sm:$0xff] %v17617_v32  ;;  %9817 = vpow2.f32 %v7247_v5  ;;  %v7257_v2 = vmul.f32 1.442695, %v7235_v42  ;;  %v7237_v51 = vsub.f32 0.0, %v7221_v23  ;;  %v930_v43 = vadd.f32 %v19618_v15, %v17522_v34  ;;  %v17621_v40 = vpop.eup %9801  ;;  %v19622_v23 = vld [vmem:[#allocation48_spill] sm:$0xff] }
 0x6c1   : > { %19619 = vst [vmem:[#allocation88_spill] sm:$0xff] %v17621_v40  ;;  %9819 = vpow2.f32 %v7251_v4  ;;  %v7255_v9 = vmul.f32 1.442695, %v7234_v12  ;;  %v7239_v16 = vsub.f32 0.0, %v7223_v53  ;;  %v7259_v60 = vmul.f32 1.442695, %v7236_v47 }
 0x6c2   : > { %v7238_v19 = vsub.f32 0.0, %v7222_v20  ;;  %v7225_v26 = vmul.f32 %v928_v22, %v928_v22  ;;  %vm19621_vm11 = vcmp.lt.s32.totalorder %v19620_v39, 0  ;;  %9821 = vpow2.f32 %v7253_v49  ;;  %v19625_v22 = vld [vmem:[#allocation12_spill] sm:$0xff] }
 0x6c3   : > { %v5652_v61 = vsel %vm19621_vm11, %v5651_v24, %v19614_v28  ;;  %v17626_v8 = vpop.eup %9803  ;;  %v7240_v5 = vsub.f32 0.0, %v7224_v13  ;;  %v7227_v42 = vmul.f32 %v1137_v36, %v1137_v36  ;;  %v1139_v15 = vadd.f32 %v19622_v23, %v17522_v34  ;;  %v19627_v23 = vld [vmem:[#allocation140_spill] sm:$0xff] }
 0x6c4   : > { %v17630_v32 = vpop.eup %9805  ;;  %9823 = vpow2.f32 %v7257_v2  ;;  %v7261_v4 = vmul.f32 1.442695, %v7237_v51  ;;  %v7226_v12 = vmul.f32 %v930_v43, %v930_v43  ;;  %v7265_v20 = vmul.f32 1.442695, %v7239_v16 }
 0x6c5   : > { %19623 = vst [vmem:[#allocation45_spill] sm:$0xff] %v17630_v32  ;;  %9825 = vpow2.f32 %v7255_v9  ;;  %v5654_v53 = vsel %vm16055_vm0, 0, %v5652_v61  ;;  %v7263_v24 = vmul.f32 1.442695, %v7238_v19  ;;  %v7241_v28 = vsub.f32 0.0, %v7225_v26  ;;  %v19631_v19 = vld [vmem:[#allocation133_spill] sm:$0xff] }
 0x6c6   : > { %9827 = vpow2.f32 %v7259_v60  ;;  %v5857_v49 = vsub.s32 4, %v19625_v22  ;;  %v7267_v36 = vmul.f32 1.442695, %v7240_v5  ;;  %v7243_v40 = vsub.f32 0.0, %v7227_v42  ;;  %v19630_v60 = vld [vmem:[#allocation124_spill] sm:$0xff]  ;;  %v19632_v5 = vld [vmem:[#allocation5_spill] sm:$0xff] }
 0x6c7   : > { %v17635_v13 = vpop.eup %9807  ;;  %v7228_v34 = vmul.f32 %v1139_v15, %v1139_v15  ;;  %v5754_v32 = vsub.s32 4, %v19627_v23  ;;  %9829 = vpow2.f32 %v7261_v4  ;;  %v7242_v51 = vsub.f32 0.0, %v7226_v12 }
 0x6c8   : > { %19626 = vst [vmem:[#allocation70_spill] sm:$0xff] %v17635_v13  ;;  %v17638_v2 = vpop.eup %9809  ;;  %v5658_v43 = vand.u32 3, %v5654_v53  ;;  %9831 = vpow2.f32 %v7265_v20  ;;  %v5661_v16 = vxor.u32 2147483648, %v19630_v60  ;;  %v5664_v26 = vxor.u32 2147483648, %v19631_v19  ;;  %v19636_v53 = vld [vmem:[#allocation136_spill] sm:$0xff] }
 0x6c9   : > { %19628 = vst [vmem:[#allocation68_spill] sm:$0xff] %v17638_v2  ;;  %v17640_v9 = vpop.eup %9811  ;;  %9833 = vpow2.f32 %v7263_v24  ;;  %v7269_v47 = vmul.f32 1.442695, %v7241_v28  ;;  %vm19633_vm0 = vcmp.lt.s32.totalorder %v19632_v5, 0  ;;  %v7273_v15 = vmul.f32 1.442695, %v7243_v40 }
 0x6ca   : > { %19629 = vst [vmem:[#allocation29_spill] sm:$0xff] %v17640_v9  ;;  %v9814_v61 = vpop.eup %9813  ;;  %v5858_v42 = vsel %vm19633_vm0, %v5857_v49, %v19625_v22  ;;  %9835 = vpow2.f32 %v7267_v36  ;;  %v7244_v2 = vsub.f32 0.0, %v7228_v34  ;;  %vm19634_vm11 = vcmp.lt.s32.totalorder %v19512_v7, 0  ;;  %v19638_v36 = vld [vmem:[#allocation138_spill] sm:$0xff] }
 0x6cb   : > { %v5755_v4 = vsel %vm19634_vm11, %v5754_v32, %v19627_v23  ;;  %v7271_v20 = vmul.f32 1.442695, %v7242_v51  ;;  %vm5660_vm10 = vcmp.eq.s32.totalorder %v5658_v43, 0  ;;  %vm5663_vm6 = vcmp.eq.s32.totalorder %v5658_v43, 2  ;;  %v19640_v23 = vld [vmem:[#allocation139_spill] sm:$0xff] }
 0x6cc   : > { %v17650_v12 = vpop.eup %9815  ;;  %v5960_v9 = vsub.s32 4, %v19636_v53  ;;  %v5662_v28 = vsel %vm5660_vm10, %v19631_v19, %v5661_v16  ;;  %v5665_v22 = vsel %vm5663_vm6, %v5664_v26, %v19630_v60  ;;  %v5860_v40 = vsel %vm16092_vm13, 0, %v5858_v42 }
 0x6cd   : > { %19635 = vst [vmem:[#allocation80_spill] sm:$0xff] %v17650_v12  ;;  %v17653_v24 = vpop.eup %9817  ;;  %v6063_v34 = vsub.s32 4, %v19638_v36  ;;  %9837 = vpow2.f32 %v7269_v47  ;;  %v5757_v32 = vsel %vm17233_vm2, 0, %v5755_v4  ;;  %v6269_v51 = vsub.s32 4, %v19640_v23 }
 0x6ce   : > { %v17660_v5 = vpop.eup %9819  ;;  %9839 = vpow2.f32 %v7273_v15  ;;  %v7275_v12 = vmul.f32 1.442695, %v7244_v2  ;;  %vm5659_vm0 = vcmp.lt.s32.totalorder %v5658_v43, 2  ;;  %v5864_v16 = vand.u32 3, %v5860_v40 }
 0x6cf   : > { %19639 = vst [vmem:[#allocation142_spill] sm:$0xff] %v17660_v5  ;;  %v17665_v13 = vpop.eup %9821  ;;  %9841 = vpow2.f32 %v7271_v20  ;;  %v5666_v60 = vsel %vm5659_vm0, %v5662_v28, %v5665_v22  ;;  %vm19641_vm13 = vcmp.lt.s32.totalorder %v19517_v48, 0  ;;  %vm5657_vm6 = vweird.f32 %v19620_v39  ;;  %v19644_v28 = vld [vmem:[#allocation72_spill] sm:$0xff] }
 0x6d0   : > { %v5961_v19 = vsel %vm19641_vm13, %v5960_v9, %v19636_v53  ;;  %v5867_v29 = vxor.u32 2147483648, %v17374_v41  ;;  %v5761_v47 = vand.u32 3, %v5757_v32  ;;  %vm19642_vm2 = vcmp.lt.s32.totalorder %v19529_v21, 0 }
 0x6d1   : > { %v17670_v26 = vpop.eup %9823  ;;  %v6064_v2 = vsel %vm19642_vm2, %v6063_v34, %v19638_v36  ;;  %v5870_v42 = vxor.u32 2147483648, %v17360_v37  ;;  %v5764_v15 = vxor.u32 2147483648, %v17387_v62  ;;  %v5767_v4 = vxor.u32 2147483648, %v17382_v35 }
 0x6d2   : > { %v17677_v43 = vpop.eup %9825  ;;  %vm19643_vm10 = vcmp.lt.s32.totalorder %v19540_v10, 0  ;;  %9843 = vpow2.f32 %v7275_v12  ;;  %v5667_v20 = vsel %vm5657_vm6, nan, %v5666_v60  ;;  %v5963_v53 = vsel %vm17264_vm15, 0, %v5961_v19 }
 0x6d3   : > { %v6270_v9 = vsel %vm19643_vm10, %v6269_v51, %v19640_v23  ;;  %v17685_v39 = vpop.eup %9827  ;;  %v6166_v22 = vsub.s32 4, %v19644_v28  ;;  %vm5865_vm11 = vcmp.lt.s32.totalorder %v5864_v16, 2  ;;  %vm5866_vm0 = vcmp.eq.s32.totalorder %v5864_v16, 0 }
 0x6d4   : > { %vm5869_vm13 = vcmp.eq.s32.totalorder %v5864_v16, 2  ;;  %v6066_v49 = vsel %vm17287_vm9, 0, %v6064_v2  ;;  %v17692_v40 = vpop.eup %9829  ;;  %v5868_v36 = vsel %vm5866_vm0, %v17360_v37, %v5867_v29  ;;  %vm5763_vm2 = vcmp.eq.s32.totalorder %v5761_v47, 0  ;;  %v19654_v16 = vld [vmem:[#allocation87_spill] sm:$0xff] }
 0x6d5   : > { %vm5766_vm10 = vcmp.eq.s32.totalorder %v5761_v47, 2  ;;  %v6272_v12 = vsel %vm17313_vm1, 0, %v6270_v9  ;;  %v17697_v34 = vpop.eup %9831  ;;  %v5871_v56 = vsel %vm5869_vm13, %v5870_v42, %v17374_v41  ;;  %vm5760_vm15 = vweird.f32 %v19512_v7  ;;  %v19648_v41 = vld [vmem:[#allocation44_spill] sm:$0xff] }
 0x6d6   : > { %v5765_v32 = vsel %vm5763_vm2, %v17382_v35, %v5764_v15  ;;  %v5768_v3 = vsel %vm5766_vm10, %v5767_v4, %v17387_v62  ;;  %v5967_v23 = vand.u32 3, %v5963_v53  ;;  %v17703_v51 = vpop.eup %9833  ;;  %v17705_v60 = vmul.f32 %v9814_v61, %v5667_v20  ;;  %v19650_v4 = vld [vmem:[#allocation77_spill] sm:$0xff] }
 0x6d7   : > { %v5970_v37 = vxor.u32 2147483648, %v17397_v44  ;;  %v6070_v19 = vand.u32 3, %v6066_v49  ;;  %vm19647_vm9 = vcmp.lt.s32.totalorder %v19646_v45, 0  ;;  %v17711_v2 = vpop.eup %9835  ;;  %vm5762_vm1 = vcmp.lt.s32.totalorder %v5761_v47, 2  ;;  %v19652_v47 = vld [vmem:[#allocation50_spill] sm:$0xff] }
 0x6d8   : > { %19645 = vst [vmem:[#allocation84_spill] sm:$0xff] %v17705_v60  ;;  %v6167_v29 = vsel %vm19647_vm9, %v6166_v22, %v19644_v28  ;;  %v5973_v42 = vxor.u32 2147483648, %v19648_v41  ;;  %v6073_v35 = vxor.u32 2147483648, %v17413_v46  ;;  %v6276_v62 = vand.u32 3, %v6272_v12 }
 0x6d9   : > { %v17716_v15 = vsel %vm5865_vm11, %v5868_v36, %v5871_v56  ;;  %v5769_v61 = vsel %vm5762_vm1, %v5765_v32, %v5768_v3  ;;  %v6076_v9 = vxor.u32 2147483648, %v19650_v4  ;;  %v6279_v20 = vxor.u32 2147483648, %v17430_v58 }
 0x6da   : > { %19649 = vst [vmem:[#allocation58_spill] sm:$0xff] %v17716_v15  ;;  %vm5969_vm6 = vcmp.eq.s32.totalorder %v5967_v23, 0  ;;  %v6282_v53 = vxor.u32 2147483648, %v17419_v25  ;;  %v6169_v22 = vsel %vm17356_vm4, 0, %v6167_v29  ;;  %v6372_v49 = vsub.s32 4, %v19652_v47  ;;  %v17724_v60 = vpop.eup %9837 }
 0x6db   : > { %19653 = vst [vmem:[#allocation79_spill] sm:$0xff] %v17724_v60  ;;  %v5971_v12 = vsel %vm5969_vm6, %v19648_v41, %v5970_v37  ;;  %vm5972_vm0 = vcmp.eq.s32.totalorder %v5967_v23, 2  ;;  %vm6072_vm11 = vcmp.eq.s32.totalorder %v6070_v19, 0  ;;  %v6475_v36 = vsub.s32 4, %v19654_v16  ;;  %v17728_v56 = vpop.eup %9839  ;;  %v19656_v60 = vld [vmem:[#allocation100_spill] sm:$0xff] }
 0x6dc   : > { %19655 = vst [vmem:[#allocation62_spill] sm:$0xff] %v17728_v56  ;;  %v5974_v32 = vsel %vm5972_vm0, %v5973_v42, %v17397_v44  ;;  %v6074_v3 = vsel %vm6072_vm11, %v19650_v4, %v6073_v35  ;;  %vm6075_vm13 = vcmp.eq.s32.totalorder %v6070_v19, 2  ;;  %vm6278_vm2 = vcmp.eq.s32.totalorder %v6276_v62, 0  ;;  %v17732_v28 = vpop.eup %9841  ;;  %v19659_v4 = vld [vmem:[#allocation81_spill] sm:$0xff] }
 0x6dd   : > { %v6077_v29 = vsel %vm6075_vm13, %v6076_v9, %v17413_v46  ;;  %v6280_v5 = vsel %vm6278_vm2, %v17419_v25, %v6279_v20  ;;  %vm6281_vm4 = vcmp.eq.s32.totalorder %v6276_v62, 2  ;;  %v6173_v37 = vand.u32 3, %v6169_v22 }
 0x6de   : > { %v6283_v41 = vsel %vm6281_vm4, %v6282_v53, %v17430_v58  ;;  %v6176_v15 = vxor.u32 2147483648, %v17469_v6  ;;  %v6179_v56 = vxor.u32 2147483648, %v19656_v60  ;;  %vm19657_vm10 = vcmp.lt.s32.totalorder %v19559_v63, 0  ;;  %v19660_v53 = vld [vmem:[#allocation94_spill] sm:$0xff] }
 0x6df   : > { %v6373_v44 = vsel %vm19657_vm10, %v6372_v49, %v19652_v47  ;;  %v5770_v42 = vsel %vm5760_vm15, nan, %v5769_v61  ;;  %vm5968_vm9 = vcmp.lt.s32.totalorder %v5967_v23, 2  ;;  %vm6071_vm1 = vcmp.lt.s32.totalorder %v6070_v19, 2  ;;  %v17747_v25 = vpop.eup %9843 }
 0x6e0   : > { %vm19658_vm6 = vcmp.lt.s32.totalorder %v19563_v55, 0  ;;  %v5975_v58 = vsel %vm5968_vm9, %v5971_v12, %v5974_v32  ;;  %v6078_v35 = vsel %vm6071_vm1, %v6074_v3, %v6077_v29  ;;  %vm6277_vm0 = vcmp.lt.s32.totalorder %v6276_v62, 2 }
 0x6e1   : > { %v6476_v46 = vsel %vm19658_vm6, %v6475_v36, %v19654_v16  ;;  %v6681_v9 = vsub.s32 4, %v19659_v4  ;;  %v6284_v20 = vsel %vm6277_vm0, %v6280_v5, %v6283_v41  ;;  %vm6175_vm11 = vcmp.eq.s32.totalorder %v6173_v37, 0  ;;  %v19663_v16 = vld [vmem:[#allocation107_spill] sm:$0xff] }
 0x6e2   : > { %vm6178_vm13 = vcmp.eq.s32.totalorder %v6173_v37, 2  ;;  %v6375_v7 = vsel %vm17434_vm5, 0, %v6373_v44  ;;  %v6177_v23 = vsel %vm6175_vm11, %v19656_v60, %v6176_v15  ;;  %v6478_v61 = vsel %vm17458_vm14, 0, %v6476_v46 }
 0x6e3   : > { %v6180_v19 = vsel %vm6178_vm13, %v6179_v56, %v17469_v6  ;;  %v6578_v22 = vsub.s32 4, %v19660_v53  ;;  %v17758_v47 = vmul.f32 %v17653_v24, %v5770_v42  ;;  %vm5966_vm15 = vweird.f32 %v19517_v48  ;;  %v17787_v29 = vpop.f32.mrf.mxu0  ;;  %v19665_v42 = vld [vmem:[#allocation103_spill] sm:$0xff] }
 0x6e4   : > { %vm6069_vm2 = vweird.f32 %v19529_v21  ;;  %vm6275_vm4 = vweird.f32 %v19540_v10  ;;  %vm6174_vm5 = vcmp.lt.s32.totalorder %v6173_v37, 2  ;;  %v6379_v5 = vand.u32 3, %v6375_v7  ;;  %v19668_v7 = vld [vmem:[#allocation33_spill] sm:$0xff] }
 0x6e5   : > { %v6079_v50 = vsel %vm6069_vm2, nan, %v6078_v35  ;;  %vm19661_vm10 = vcmp.lt.s32.totalorder %v19568_v17, 0  ;;  %v17766_v14 = vsel %vm5966_vm15, nan, %v5975_v58  ;;  %v6285_v60 = vsel %vm6275_vm4, nan, %v6284_v20  ;;  %v17803_v33 = vpop.f32.mrf.mxu0 }
 0x6e6   : > { %v6682_v6 = vsel %vm19661_vm10, %v6681_v9, %v19659_v4  ;;  %v6181_v62 = vsel %vm6174_vm5, %v6177_v23, %v6180_v19  ;;  %v6482_v15 = vand.u32 3, %v6478_v61  ;;  %v6382_v24 = vxor.u32 2147483648, %v17565_v30  ;;  %v17801_v58 = vpop.f32.mrf.mxu1 }
 0x6e7   : > { %v6385_v48 = vxor.u32 2147483648, %v17539_v52  ;;  %v6485_v21 = vxor.u32 2147483648, %v17575_v1  ;;  %vm19662_vm14 = vcmp.lt.s32.totalorder %v19569_v0, 0  ;;  %v17775_v49 = vmul.f32 %v17665_v13, %v6079_v50  ;;  %19666 = vst [vmem:[#allocation83_spill] sm:$0xff] %v17801_v58 }
 0x6e8   : > { %v6579_v10 = vsel %vm19662_vm14, %v6578_v22, %v19660_v53  ;;  %vm6172_vm9 = vweird.f32 %v19646_v45  ;;  %v6684_v12 = vsel %vm17496_vm12, 0, %v6682_v6  ;;  %v6784_v36 = vsub.s32 4, %v19663_v16  ;;  %v17811_v19 = vpop.f32.mrf.mxu1  ;;  %v19670_v22 = vld [vmem:[#allocation141_spill] sm:$0xff] }
 0x6e9   : > { %v17782_v56 = vmul.f32 %v17670_v26, %v6285_v60  ;;  %v17784_v32 = vsel %vm6172_vm9, nan, %v6181_v62  ;;  %vm6380_vm1 = vcmp.lt.s32.totalorder %v6379_v5, 2  ;;  %v6488_v3 = vxor.u32 2147483648, %v17569_v31  ;;  %v19671_v62 = vld [vmem:[#allocation76_spill] sm:$0xff] }
 0x6ea   : > { %vm6378_vm6 = vweird.f32 %v19559_v63  ;;  %vm6381_vm0 = vcmp.eq.s32.totalorder %v6379_v5, 0  ;;  %vm6384_vm11 = vcmp.eq.s32.totalorder %v6379_v5, 2  ;;  %vm6481_vm13 = vweird.f32 %v19563_v55  ;;  %v19673_v5 = vld [vmem:[#allocation102_spill] sm:$0xff]  ;;  %v19683_v63 = vld [vmem:[#allocation67_spill] sm:$0xff] }
 0x6eb   : > { %vm6484_vm15 = vcmp.eq.s32.totalorder %v6482_v15, 0  ;;  %v6581_v11 = vsel %vm17502_vm8, 0, %v6579_v10  ;;  %v6383_v13 = vsel %vm6381_vm0, %v17539_v52, %v6382_v24  ;;  %v6386_v26 = vsel %vm6384_vm11, %v6385_v48, %v17565_v30  ;;  %v17821_v24 = vpop.f32.mrf.mxu0  ;;  %v17827_v10 = vpop.f32.mrf.mxu1 }
 0x6ec   : > { %v6486_v45 = vsel %vm6484_vm15, %v17569_v31, %v6485_v21  ;;  %v6688_v37 = vand.u32 3, %v6684_v12  ;;  %vm6487_vm12 = vcmp.eq.s32.totalorder %v6482_v15, 2  ;;  %v6691_v41 = vxor.u32 2147483648, %v17589_v27  ;;  %v19667_v31 = vld [vmem:[#allocation135_spill] sm:$0xff]  ;;  %19675 = vst [vmem:[#allocation63_spill] sm:$0xff] %v17827_v10 }
 0x6ed   : > { %vm19664_vm2 = vcmp.lt.s32.totalorder %v19576_v57, 0  ;;  %v6887_v46 = vsub.s32 4, %v19665_v42  ;;  %v6489_v52 = vsel %vm6487_vm12, %v6488_v3, %v17575_v1  ;;  %v6694_v30 = vxor.u32 2147483648, %v17581_v18 }
 0x6ee   : > { %v6785_v44 = vsel %vm19664_vm2, %v6784_v36, %v19663_v16  ;;  %v6585_v35 = vand.u32 3, %v6581_v11  ;;  %v7093_v4 = vsub.s32 4, %v19667_v31  ;;  %vm6483_vm8 = vcmp.lt.s32.totalorder %v6482_v15, 2  ;;  %v19676_v36 = vld [vmem:[#allocation55_spill] sm:$0xff]  ;;  %v17836_v11 = vpop.f32.mrf.mxu0 }
 0x6ef   : > { %v6588_v9 = vxor.u32 2147483648, %v17602_v38  ;;  %v6591_v20 = vxor.u32 2147483648, %v17596_v59  ;;  %v6990_v23 = vsub.s32 4, %v19668_v7  ;;  %v6387_v61 = vsel %vm6380_vm1, %v6383_v13, %v6386_v26  ;;  %19678 = vst [vmem:[#allocation59_spill] sm:$0xff] %v17836_v11  ;;  %v19694_v26 = vld [vmem:[#allocation45_spill] sm:$0xff] }
 0x6f0   : > { %vm6690_vm4 = vcmp.eq.s32.totalorder %v6688_v37, 0  ;;  %v6787_v1 = vsel %vm17517_vm7, 0, %v6785_v44  ;;  %v7196_v50 = vsub.s32 4, %v19670_v22  ;;  %v6490_v6 = vsel %vm6483_vm8, %v6486_v45, %v6489_v52  ;;  %v19685_v52 = vld [vmem:[#allocation95_spill] sm:$0xff] }
 0x6f1   : > { %v6692_v60 = vsel %vm6690_vm4, %v17581_v18, %v6691_v41  ;;  %vm6693_vm5 = vcmp.eq.s32.totalorder %v6688_v37, 2  ;;  %vm19672_vm10 = vcmp.lt.s32.totalorder %v19671_v62, 0  ;;  %vm6587_vm14 = vcmp.eq.s32.totalorder %v6585_v35, 0  ;;  %v17851_v41 = vpop.f32.mrf.mxu1 }
 0x6f2   : > { %v6888_v15 = vsel %vm19672_vm10, %v6887_v46, %v19665_v42  ;;  %v6695_v48 = vsel %vm6693_vm5, %v6694_v30, %v17589_v27  ;;  %vm6590_vm9 = vcmp.eq.s32.totalorder %v6585_v35, 2  ;;  %vm19674_vm1 = vcmp.lt.s32.totalorder %v19673_v5, 0  ;;  %19682 = vst [vmem:[#allocation52_spill] sm:$0xff] %v17851_v41 }
 0x6f3   : > { %v7094_v21 = vsel %vm19674_vm1, %v7093_v4, %v19667_v31  ;;  %v6589_v12 = vsel %vm6587_vm14, %v17596_v59, %v6588_v9  ;;  %v6592_v18 = vsel %vm6590_vm9, %v6591_v20, %v17602_v38  ;;  %v17831_v16 = vand.u32 3, %v6787_v1  ;;  %v19680_v38 = vld [vmem:[#allocation92_spill] sm:$0xff]  ;;  %v19686_v31 = vld [vmem:[#allocation85_spill] sm:$0xff]  ;;  %v19688_v20 = vld [vmem:[#allocation82_spill] sm:$0xff] }
 0x6f4   : > { %vm19677_vm7 = vcmp.lt.s32.totalorder %v19676_v36, 0  ;;  %v17840_v27 = vsel %vm6378_vm6, nan, %v6387_v61  ;;  %v17844_v13 = vsel %vm6481_vm13, nan, %v6490_v6  ;;  %v6890_v59 = vsel %vm17535_vm3, 0, %v6888_v15  ;;  %v19691_v61 = vld [vmem:[#allocation38_spill] sm:$0xff] }
 0x6f5   : > { %v6991_v3 = vsel %vm19677_vm7, %v6990_v23, %v19668_v7  ;;  %vm19681_vm0 = vcmp.lt.s32.totalorder %v19680_v38, 0  ;;  %vm6689_vm11 = vcmp.lt.s32.totalorder %v6688_v37, 2  ;;  %vm6586_vm15 = vcmp.lt.s32.totalorder %v6585_v35, 2  ;;  %v19689_v23 = vld [vmem:[#allocation101_spill] sm:$0xff]  ;;  %v17863_v35 = vpop.f32.mrf.mxu0 }
 0x6f6   : > { %v7197_v45 = vsel %vm19681_vm0, %v7196_v50, %v19670_v22  ;;  %v6794_v44 = vxor.u32 2147483648, %v17608_v54  ;;  %vm19684_vm6 = vnez %v19683_v63  ;;  %v6696_v46 = vsel %vm6689_vm11, %v6692_v60, %v6695_v48  ;;  %v17869_v22 = vpop.f32.mrf.mxu1  ;;  %v19692_v60 = vld [vmem:[#allocation88_spill] sm:$0xff] }
 0x6f7   : > { %v7096_v42 = vsel %vm19684_vm6, 0, %v7094_v21  ;;  %v6593_v55 = vsel %vm6586_vm15, %v6589_v12, %v6592_v18  ;;  %v6797_v30 = vxor.u32 2147483648, %v19685_v52  ;;  %vm19687_vm13 = vnez %v19686_v31  ;;  %v17875_v21 = vpop.f32.mrf.mxu0  ;;  %v19693_v18 = vld [vmem:[#allocation70_spill] sm:$0xff] }
 0x6f8   : > { %v6993_v4 = vsel %vm19687_vm13, 0, %v6991_v3  ;;  %vm6792_vm3 = vcmp.lt.s32.totalorder %v17831_v16, 2  ;;  %v6894_v9 = vand.u32 3, %v6890_v59  ;;  %v6897_v7 = vxor.u32 2147483648, %v19688_v20  ;;  %v17880_v63 = vpop.f32.mrf.mxu1 }
 0x6f9   : > { %vm19690_vm12 = vnez %v19689_v23  ;;  %vm6687_vm2 = vweird.f32 %v19568_v17  ;;  %vm6793_vm8 = vcmp.eq.s32.totalorder %v17831_v16, 0  ;;  %vm6796_vm4 = vcmp.eq.s32.totalorder %v17831_v16, 2  ;;  %v17884_v23 = vpop.f32.mrf.mxu0  ;;  %v19697_v16 = vld [vmem:[#allocation5_spill] sm:$0xff] }
 0x6fa   : > { %v7199_v37 = vsel %vm19690_vm12, 0, %v7197_v45  ;;  %v6900_v53 = vxor.u32 2147483648, %v19691_v61  ;;  %v7100_v1 = vand.u32 3, %v7096_v42  ;;  %vm6584_vm5 = vweird.f32 %v19569_v0  ;;  %v19695_v42 = vld [vmem:[#allocation29_spill] sm:$0xff] }
 0x6fb   : > { %v6795_v50 = vsel %vm6793_vm8, %v19685_v52, %v6794_v44  ;;  %v7103_v6 = vxor.u32 2147483648, %v17626_v8  ;;  %v7106_v15 = vxor.u32 2147483648, %v19692_v60  ;;  %v6997_v48 = vand.u32 3, %v6993_v4  ;;  %v19696_v52 = vld [vmem:[#allocation68_spill] sm:$0xff]  ;;  %v7409_v58 = vpop.f32.mrf.mxu0 }
 0x6fc   : > { %v6798_v12 = vsel %vm6796_vm4, %v6797_v30, %v17608_v54  ;;  %v7000_v3 = vxor.u32 2147483648, %v19693_v18  ;;  %v7003_v59 = vxor.u32 2147483648, %v19694_v26  ;;  %v7203_v45 = vand.u32 3, %v7199_v37  ;;  %v17888_v54 = vpop.f32.mrf.mxu1 }
 0x6fd   : > { %vm6896_vm10 = vcmp.eq.s32.totalorder %v6894_v9, 0  ;;  %vm6899_vm14 = vcmp.eq.s32.totalorder %v6894_v9, 2  ;;  %v7206_v44 = vxor.u32 2147483648, %v19695_v42  ;;  %v7209_v31 = vxor.u32 2147483648, %v19696_v52 }
 0x6fe   : > { %v6898_v4 = vsel %vm6896_vm10, %v19691_v61, %v6897_v7  ;;  %v6901_v10 = vsel %vm6899_vm14, %v6900_v53, %v19688_v20  ;;  %vm7102_vm9 = vcmp.eq.s32.totalorder %v7100_v1, 0  ;;  %vm7105_vm1 = vcmp.eq.s32.totalorder %v7100_v1, 2  ;;  %v7498_v7 = vpop.f32.mrf.mxu1  ;;  %v7413_v53 = vpop.f32.mrf.mxu0 }
 0x6ff   : > { %v7104_v30 = vsel %vm7102_vm9, %v19692_v60, %v7103_v6  ;;  %v7107_v37 = vsel %vm7105_vm1, %v7106_v15, %v17626_v8  ;;  %vm6999_vm7 = vcmp.eq.s32.totalorder %v6997_v48, 0  ;;  %vm7002_vm0 = vcmp.eq.s32.totalorder %v6997_v48, 2  ;;  %v7316_v15 = vpop.permute.xlu0 %7315 }
 0x700   : > { %v7001_v41 = vsel %vm6999_vm7, %v19694_v26, %v7000_v3  ;;  %v7004_v11 = vsel %vm7002_vm0, %v7003_v59, %v19693_v18  ;;  %vm7205_vm11 = vcmp.eq.s32.totalorder %v7203_v45, 0  ;;  %vm7208_vm15 = vcmp.eq.s32.totalorder %v7203_v45, 2  ;;  %v7502_v3 = vpop.f32.mrf.mxu1  ;;  %v7415_v59 = vpop.f32.mrf.mxu0 }
 0x701   : > { %vm6895_vm6 = vcmp.lt.s32.totalorder %v6894_v9, 2  ;;  %vm7101_vm13 = vcmp.lt.s32.totalorder %v7100_v1, 2  ;;  %v7207_v20 = vsel %vm7205_vm11, %v19696_v52, %v7206_v44  ;;  %v7210_v61 = vsel %vm7208_vm15, %v7209_v31, %v19695_v42  ;;  %v7321_v1 = vpop.permute.xlu1 %7320  ;;  %v19698_v42 = vld [vmem:[#allocation79_spill] sm:$0xff]  ;;  %v19699_v44 = vld [vmem:[#allocation62_spill] sm:$0xff] }
 0x702   : > { %v6799_v8 = vsel %vm6792_vm3, %v6795_v50, %v6798_v12  ;;  %v6902_v6 = vsel %vm6895_vm6, %v6898_v4, %v6901_v10  ;;  %v7108_v60 = vsel %vm7101_vm13, %v7104_v30, %v7107_v37  ;;  %vm6998_vm12 = vcmp.lt.s32.totalorder %v6997_v48, 2  ;;  %v7504_v17 = vpop.f32.mrf.mxu1 }
 0x703   : > { %v6697_v18 = vsel %vm6687_vm2, nan, %v6696_v46  ;;  %vm6790_vm8 = vweird.f32 %v19576_v57  ;;  %v7005_v9 = vsel %vm6998_vm12, %v7001_v41, %v7004_v11  ;;  %vm7204_vm4 = vcmp.lt.s32.totalorder %v7203_v45, 2  ;;  %v7419_v11 = vpop.f32.mrf.mxu0 }
 0x704   : > { %v6594_v26 = vsel %vm6584_vm5, nan, %v6593_v55  ;;  %vm6893_vm10 = vweird.f32 %v19671_v62  ;;  %vm7099_vm3 = vweird.f32 %v19673_v5  ;;  %v7211_v10 = vsel %vm7204_vm4, %v7207_v20, %v7210_v61  ;;  %v7508_v12 = vpop.f32.mrf.mxu1 }
 0x705   : > { %vm5863_vm14 = vweird.f32 %v19697_v16  ;;  %v6800_v50 = vsel %vm6790_vm8, nan, %v6799_v8  ;;  %v6903_v46 = vsel %vm6893_vm10, nan, %v6902_v6  ;;  %v7109_v48 = vsel %vm7099_vm3, nan, %v7108_v60 }
 0x706   : > { %vm6996_vm2 = vweird.f32 %v19676_v36  ;;  %v7282_v57 = vmul.f32 %v17677_v43, %v17784_v32  ;;  %v7284_v0 = vmul.f32 %v17685_v39, %v17840_v27  ;;  %vm7202_vm5 = vweird.f32 %v19680_v38  ;;  %v7421_v27 = vpop.f32.mrf.mxu0 }
 0x707   : > { %v7006_v41 = vsel %vm6996_vm2, nan, %v7005_v9  ;;  %v7285_v62 = vmul.f32 %v17692_v40, %v17844_v13  ;;  %v7287_v5 = vmul.f32 %v17697_v34, %v6697_v18  ;;  %v7286_v55 = vmul.f32 %v17703_v51, %v6594_v26  ;;  %v7510_v40 = vpop.f32.mrf.mxu1  ;;  %v7306_v13 = vpop.permute.xlu0 %7305 }
 0x708   : > { %v7212_v45 = vsel %vm7202_vm5, nan, %v7211_v10  ;;  %v7288_v36 = vmul.f32 %v17711_v2, %v6800_v50  ;;  %v7289_v43 = vmul.f32 %v19698_v42, %v6903_v46  ;;  %v7420_v32 = vadd.f32 %v7419_v11, %v7321_v1  ;;  %v7311_v34 = vpop.permute.xlu1 %7310 }
 0x709   : > { %v7291_v39 = vmul.f32 %v19699_v44, %v7109_v48  ;;  %v7416_v52 = vadd.f32 %v7415_v59, %v7316_v15  ;;  %v7509_v31 = vadd.f32 %v7508_v12, %v7321_v1  ;;  %v7290_v38 = vmul.f32 %v17732_v28, %v7006_v41  ;;  %v9200_v44 = vld [vmem:[%s18346_s7 + $0x20] sm:$0xff] }
 0x70a   : > { %v7422_v4 = vadd.f32 %v7421_v27, %v7321_v1  ;;  %v7414_v30 = vadd.f32 %v7413_v53, %v7316_v15  ;;  %v7505_v51 = vadd.f32 %v7504_v17, %v7316_v15  ;;  %v7292_v37 = vmul.f32 %v17747_v25, %v7212_v45  ;;  %v9201_v27 = vld [vmem:[%s18346_s7 + $0x28] sm:$0xff] }
 0x70b   : > { %v7511_v20 = vadd.f32 %v7510_v40, %v7321_v1  ;;  %v7402_v2 = vadd.f32 %v17863_v35, %v7306_v13  ;;  %v7410_v61 = vadd.f32 %v7409_v58, %v7311_v34  ;;  %v7503_v8 = vadd.f32 %v7502_v3, %v7316_v15  ;;  %v19700_v58 = vld [vmem:[#allocation58_spill] sm:$0xff] }
 0x70c   : > { %v17922_v6 = vmul.f32 %v7422_v4, %v7290_v38  ;;  %v7408_v60 = vadd.f32 %v17884_v23, %v7311_v34  ;;  %v7499_v18 = vadd.f32 %v7498_v7, %v7311_v34  ;;  %v17925_v9 = vmul.f32 %v7420_v32, %v7289_v43  ;;  %v7536_v11 = vpop.permute.xlu1 %7535  ;;  %v7715_v4 = vpop.permute.xlu0 %7714 }
 0x70d   : > { %v17927_v28 = vmul.f32 %v7511_v20, %v7292_v37  ;;  %v7404_v26 = vadd.f32 %v17875_v21, %v7306_v13  ;;  %v7497_v53 = vadd.f32 %v17888_v54, %v7311_v34  ;;  %v17931_v59 = vmul.f32 %v7416_v52, %v7286_v55  ;;  %v9202_v52 = vld [vmem:[%s18346_s7 + $0x30] sm:$0xff] }
 0x70e   : > { %v17933_v25 = vmul.f32 %v7509_v31, %v7291_v39  ;;  %7565 = vmatprep.subr.mxu0 %v17922_v6  ;;  %v5873_v35 = vsel %vm5863_vm14, nan, %v19700_v58  ;;  %v7493_v23 = vadd.f32 %v17880_v63, %v7306_v13  ;;  %v17940_v7 = vmul.f32 %v7414_v30, %v7285_v62  ;;  %v19701_v63 = vld [vmem:[#allocation142_spill] sm:$0xff] }
 0x70f   : > { %v17942_v15 = vmul.f32 %v7505_v51, %v7288_v36  ;;  %7636 = vmatprep.subr.mxu1 %v17927_v28  ;;  %7566 = vmatpush1.msra.mxu0 %v17925_v9  ;;  %v7491_v21 = vadd.f32 %v17869_v22, %v7306_v13  ;;  %v17947_v54 = vmul.f32 %v7410_v61, %v7282_v57  ;;  %v19702_v22 = vld [vmem:[#allocation80_spill] sm:$0xff]  ;;  %vm19704_vm9 = vcmask 261120   ;;  %v9203_v31 = vld [vmem:[%s18346_s7 + $0x38] sm:$0xff] }
 0x710   : > { %v17949_v3 = vmul.f32 %v7503_v8, %v7287_v5  ;;  %7637 = vmatpush1.msra.mxu1 %v17933_v25  ;;  %7567 = vmatprep.subr.mxu0 %v17931_v59  ;;  %v7280_v1 = vmul.f32 %v19701_v63, %v17766_v14  ;;  %v17956_v10 = vmul.f32 %v7408_v60, %v17775_v49  ;;  %v19703_v14 = vld [vmem:[#allocation84_spill] sm:$0xff]  ;;  %vm19705_vm1 = vmmov %vm19704_vm9  ;;  %vm19707_vm7 = vcmask 1043456   ;;  %v7710_v38 = vpop.permute.xlu1 %7709  ;;  %v7705_v8 = vpop.permute.xlu0 %7704 }
 0x711   : > { %v17958_v16 = vmul.f32 %v7499_v18, %v7284_v0  ;;  %7638 = vmatprep.subr.mxu1 %v17942_v15  ;;  %7568 = vmatpush1.msra.mxu0 %v17940_v7  ;;  %v7279_v50 = vmul.f32 %v19702_v22, %v5873_v35  ;;  %v17964_v17 = vmul.f32 %v7404_v26, %v17758_v47  ;;  %v9196_v47 = vld [vmem:[%s18344_s5 + $0x4] sm:$0xf]  ;;  %vm19708_vm0 = vmmov %vm19707_vm7  ;;  %vm19711_vm6 = vcmask 31744  }
 0x712   : > { %v17967_v46 = vmul.f32 %v7497_v53, %v17782_v56  ;;  %7639 = vmatpush1.msra.mxu1 %v17949_v3  ;;  %7569 = vmatprep.subr.mxu0 %v17947_v54  ;;  %v17972_v49 = vmul.f32 %v7402_v2, %v19703_v14  ;;  %v17974_v48 = vmul.f32 %v7493_v23, %v7280_v1  ;;  %v19706_v56 = vmov 0.0   ;;  %vm19709_vm11 = vmmov %vm19708_vm0 }
 0x713   : > { %7640 = vmatprep.subr.mxu1 %v17958_v16  ;;  %7570 = vmatpush1.msra.mxu0 %v17956_v10  ;;  %v17981_v57 = vmul.f32 %v7491_v21, %v7279_v50  ;;  %vm19710_vm15 = vmmov %vm19708_vm0 }
 0x714   : > { %7641 = vmatpush1.msra.mxu1 %v17967_v46  ;;  %7571 = vmatprep.subr.mxu0 %v17964_v17  ;;  %vm19712_vm13 = vmmov %vm19711_vm6  ;;  %v7700_v40 = vpop.permute.xlu1 %7699 }
 0x715   : > { %7642 = vmatprep.subr.mxu1 %v17974_v48  ;;  %7572 = vmatpush1.msra.mxu0 %v17972_v49  ;;  %vm19713_vm12 = vmmov %vm19711_vm6 }
 0x716   : > { %7643 = vmatpush1.msra.mxu1 %v17981_v57  ;;  %9198 = vmatmul.mubr.msk.f32.vlgmr.msra.gmra.mxu0 %vm19704_vm9, %v9196_v47  ;;  %vm19714_vm8 = vmmov %vm19711_vm6 }
 0x717   : > { %9199 = vmatmul.mubr.msk.f32.vlgmr.msra.gmra.mxu1 %vm19705_vm1, %v9196_v47  ;;  %7805 = vmatprep.mubr.f32.mxu0 %v19706_v56  ;;  %vm19715_vm4 = vmmov %vm19711_vm6 }
 0x718   : > { %7894 = vmatprep.mubr.f32.mxu1 %v19706_v56  ;;  %vm19716_vm10 = vmmov %vm19715_vm4 }
 0x719   : > { %vm19717_vm3 = vmmov %vm19715_vm4 }
 0x71a   : > { %vm19718_vm14 = vmmov %vm19717_vm3 }
 0x71b   : > { %vm19719_vm2 = vmmov %vm19705_vm1 }
 0x71c   : > { %vm19720_vm5 = vmmov %vm19705_vm1 }
 0x71d   : > { %vm19721_vm9 = vmmov %vm19705_vm1 }
 0x7d6   : > { %v7607_v0 = vpop.f32.mrf.mxu0 }
 0x7d7   : > { %v7678_v41 = vpop.f32.mrf.mxu1  ;;  %v7608_v62 = vadd.f32 %v7607_v0, %v7536_v11 }
 0x7d8   : > { %v7609_v5 = vpop.f32.mrf.mxu0  ;;  %v7679_v55 = vadd.f32 %v7678_v41, %v7536_v11 }
 0x7d9   : > { %v7610_v12 = vadd.f32 %v7609_v5, %v7536_v11  ;;  %v7680_v45 = vpop.f32.mrf.mxu1  ;;  %v7683_v43 = vmax.f32 %v7608_v62, 0.0 }
 0x7da   : > { %v7681_v36 = vadd.f32 %v7680_v45, %v7536_v11  ;;  %v7685_v39 = vmax.f32 %v7679_v55, 0.0 }
 0x7db   : > { %v7684_v42 = vmax.f32 %v7610_v12, 0.0 }
 0x7dc   : > { %v7686_v32 = vmax.f32 %v7681_v36, 0.0 }
 0x7dd   : > { %9208 = vmatprep.subr.msk.mxu0 %vm19707_vm7, %v7684_v42 }
 0x7de   : > { %9214 = vmatprep.subr.msk.mxu1 %vm19708_vm0, %v7686_v32  ;;  %9209 = vmatpush1.msk.msra.mxu0 %vm19709_vm11, %v7683_v43 }
 0x7df   : > { %9215 = vmatpush1.msk.msra.mxu1 %vm19710_vm15, %v7685_v39  ;;  %9210 = vmatmul.mubr.msk.f32.vlgmr.msra.gmra.mxu0 %vm19711_vm6, %v9200_v44 }
 0x7e0   : > { %9216 = vmatmul.mubr.msk.f32.vlgmr.msra.gmra.mxu1 %vm19712_vm13, %v9200_v44  ;;  %7811 = vmatprep.mubr.f32.mxu0 %v19706_v56 }
 0x7e1   : > { %7900 = vmatprep.mubr.f32.mxu1 %v19706_v56 }
 0x7e3   : > { %9211 = vmatmul.mubr.msk.f32.gmra.mxu0 %vm19713_vm12, %v9201_v27 }
 0x7e4   : > { %9217 = vmatmul.mubr.msk.f32.gmra.mxu1 %vm19714_vm8, %v9201_v27  ;;  %7817 = vmatprep.mubr.f32.mxu0 %v19706_v56 }
 0x7e5   : > { %7906 = vmatprep.mubr.f32.mxu1 %v19706_v56 }
 0x7e7   : > { %9212 = vmatmul.mubr.msk.f32.gmra.mxu0 %vm19715_vm4, %v9202_v52 }
 0x7e8   : > { %9218 = vmatmul.mubr.msk.f32.gmra.mxu1 %vm19716_vm10, %v9202_v52  ;;  %7823 = vmatprep.mubr.f32.mxu0 %v19706_v56 }
 0x7e9   : > { %7912 = vmatprep.mubr.f32.mxu1 %v19706_v56 }
 0x7eb   : > { %9213 = vmatmul.mubr.msk.f32.gmra.mxu0 %vm19717_vm3, %v9203_v31 }
 0x7ec   : > { %9219 = vmatmul.mubr.msk.f32.gmra.mxu1 %vm19718_vm14, %v9203_v31  ;;  %8133 = vmatprep.mubr.f32.mxu0 %v19706_v56  ;;  %vm8252_vm14 = vcmask 130048  }
 0x7ed   : > { %8210 = vmatprep.mubr.f32.mxu1 %v19706_v56 }
 0x89f   : > { %v7807_v13 = vpop.f32.mrf.mxu0 }
 0x8a0   : > { %v7808_v34 = vadd.f32 %v7807_v13, %v7700_v40  ;;  %v7896_v30 = vpop.f32.mrf.mxu1 }
 0x8a1   : > { %v7897_v51 = vadd.f32 %v7896_v30, %v7700_v40  ;;  %v7809_v37 = vpop.f32.mrf.mxu0 }
 0x8a2   : > { %v9220_v20 = vmul.f32 -1.442695, %v7808_v34  ;;  %v7810_v2 = vadd.f32 %v7809_v37, %v7700_v40  ;;  %v7898_v61 = vpop.f32.mrf.mxu1 }
 0x8a3   : > { %v9222_v60 = vmul.f32 -1.442695, %v7897_v51  ;;  %v7899_v18 = vadd.f32 %v7898_v61, %v7700_v40  ;;  %v7813_v26 = vpop.f32.mrf.mxu0 }
 0x8a4   : > { %9845 = vpow2.f32 %v9220_v20  ;;  %v9221_v53 = vmul.f32 -1.442695, %v7810_v2  ;;  %v7814_v58 = vadd.f32 %v7813_v26, %v7705_v8  ;;  %v7902_v35 = vpop.f32.mrf.mxu1 }
 0x8a5   : > { %9847 = vpow2.f32 %v9222_v60  ;;  %v9223_v23 = vmul.f32 -1.442695, %v7899_v18  ;;  %v7903_v21 = vadd.f32 %v7902_v35, %v7705_v8  ;;  %v7815_v63 = vpop.f32.mrf.mxu0 }
 0x8a6   : > { %9849 = vpow2.f32 %v9221_v53  ;;  %v9224_v1 = vmul.f32 -1.442695, %v7814_v58  ;;  %v7816_v22 = vadd.f32 %v7815_v63, %v7705_v8  ;;  %v7904_v50 = vpop.f32.mrf.mxu1 }
 0x8a7   : > { %9851 = vpow2.f32 %v9223_v23  ;;  %v9226_v14 = vmul.f32 -1.442695, %v7903_v21  ;;  %v7905_v47 = vadd.f32 %v7904_v50, %v7705_v8  ;;  %v7819_v0 = vpop.f32.mrf.mxu0 }
 0x8a8   : > { %9853 = vpow2.f32 %v9224_v1  ;;  %v9225_v11 = vmul.f32 -1.442695, %v7816_v22  ;;  %v7820_v41 = vadd.f32 %v7819_v0, %v7710_v38  ;;  %v7908_v62 = vpop.f32.mrf.mxu1 }
 0x8a9   : > { %9855 = vpow2.f32 %v9226_v14  ;;  %v9227_v5 = vmul.f32 -1.442695, %v7905_v47  ;;  %v7909_v55 = vadd.f32 %v7908_v62, %v7710_v38  ;;  %v7821_v12 = vpop.f32.mrf.mxu0 }
 0x8aa   : > { %9857 = vpow2.f32 %v9225_v11  ;;  %v9228_v45 = vmul.f32 -1.442695, %v7820_v41  ;;  %v7822_v36 = vadd.f32 %v7821_v12, %v7710_v38  ;;  %v7910_v42 = vpop.f32.mrf.mxu1 }
 0x8ab   : > { %9859 = vpow2.f32 %v9227_v5  ;;  %v9230_v43 = vmul.f32 -1.442695, %v7909_v55  ;;  %v7911_v32 = vadd.f32 %v7910_v42, %v7710_v38  ;;  %v7825_v44 = vpop.f32.mrf.mxu0 }
 0x8ac   : > { %9861 = vpow2.f32 %v9228_v45  ;;  %v9229_v39 = vmul.f32 -1.442695, %v7822_v36  ;;  %v7826_v27 = vadd.f32 %v7825_v44, %v7715_v4  ;;  %v7914_v52 = vpop.f32.mrf.mxu1 }
 0x8ad   : > { %9863 = vpow2.f32 %v9230_v43  ;;  %v9231_v31 = vmul.f32 -1.442695, %v7911_v32  ;;  %v7915_v40 = vadd.f32 %v7914_v52, %v7715_v4  ;;  %v7827_v13 = vpop.f32.mrf.mxu0 }
 0x8ae   : > { %9865 = vpow2.f32 %v9229_v39  ;;  %v9232_v34 = vmul.f32 -1.442695, %v7826_v27  ;;  %v7828_v30 = vadd.f32 %v7827_v13, %v7715_v4  ;;  %v7916_v51 = vpop.f32.mrf.mxu1 }
 0x8af   : > { %9867 = vpow2.f32 %v9231_v31  ;;  %v9234_v37 = vmul.f32 -1.442695, %v7915_v40  ;;  %v7917_v20 = vadd.f32 %v7916_v51, %v7715_v4 }
 0x8b0   : > { %9869 = vpow2.f32 %v9232_v34  ;;  %v9233_v2 = vmul.f32 -1.442695, %v7828_v30 }
 0x8b1   : > { %v9846_v61 = vpop.eup %9845  ;;  %9871 = vpow2.f32 %v9234_v37  ;;  %v9235_v38 = vmul.f32 -1.442695, %v7917_v20 }
 0x8b2   : > { %v9848_v8 = vpop.eup %9847  ;;  %9873 = vpow2.f32 %v9233_v2  ;;  %v7967_v18 = vadd.f32 1.0, %v9846_v61 }
 0x8b3   : > { %v9850_v60 = vpop.eup %9849  ;;  %9875 = vpow2.f32 %v9235_v38  ;;  %v7969_v27 = vadd.f32 1.0, %v9848_v8 }
 0x8b4   : > { %v9852_v26 = vpop.eup %9851  ;;  %v7968_v53 = vadd.f32 1.0, %v9850_v60  ;;  %9877 = vrcp.f32 %v7967_v18 }
 0x8b5   : > { %v9854_v58 = vpop.eup %9853  ;;  %v7970_v44 = vadd.f32 1.0, %v9852_v26 }
 0x8b6   : > { %v9856_v35 = vpop.eup %9855  ;;  %v7971_v23 = vadd.f32 1.0, %v9854_v58  ;;  %9879 = vrcp.f32 %v7968_v53 }
 0x8b7   : > { %v9858_v21 = vpop.eup %9857  ;;  %v7973_v43 = vadd.f32 1.0, %v9856_v35 }
 0x8b8   : > { %v9860_v63 = vpop.eup %9859  ;;  %v7972_v4 = vadd.f32 1.0, %v9858_v21  ;;  %9881 = vrcp.f32 %v7971_v23 }
 0x8b9   : > { %v9862_v1 = vpop.eup %9861  ;;  %v7974_v22 = vadd.f32 1.0, %v9860_v63 }
 0x8ba   : > { %v9864_v50 = vpop.eup %9863  ;;  %9883 = vrcp.f32 %v7972_v4  ;;  %v7975_v14 = vadd.f32 1.0, %v9862_v1 }
 0x8bb   : > { %v9866_v47 = vpop.eup %9865  ;;  %9885 = vrcp.f32 %v7974_v22  ;;  %v7977_v0 = vadd.f32 1.0, %v9864_v50 }
 0x8bc   : > { %v9868_v11 = vpop.eup %9867  ;;  %9887 = vrcp.f32 %v7975_v14  ;;  %v7976_v41 = vadd.f32 1.0, %v9866_v47  ;;  %v9944_v47 = vld [vmem:[%s10114_s27 + $0x70] sm:$0xff] }
 0x8bd   : > { %v9870_v62 = vpop.eup %9869  ;;  %9889 = vrcp.f32 %v7977_v0  ;;  %v7978_v5 = vadd.f32 1.0, %v9868_v11 }
 0x8be   : > { %v9872_v55 = vpop.eup %9871  ;;  %9891 = vrcp.f32 %v7976_v41  ;;  %v7979_v12 = vadd.f32 1.0, %v9870_v62  ;;  %v9946_v41 = vld [vmem:[%s10114_s27 + $0x58] sm:$0xff] }
 0x8bf   : > { %v9874_v45 = vpop.eup %9873  ;;  %9893 = vrcp.f32 %v7978_v5  ;;  %v7981_v36 = vadd.f32 1.0, %v9872_v55  ;;  %v9948_v55 = vld [vmem:[%s10114_s27 + $0x50] sm:$0xff] }
 0x8c0   : > { %v9876_v42 = vpop.eup %9875  ;;  %9895 = vrcp.f32 %v7979_v12  ;;  %v7980_v32 = vadd.f32 1.0, %v9874_v45  ;;  %v9949_v45 = vld [vmem:[%s10114_s27 + $0x28] sm:$0xff] }
 0x8c1   : > { %9897 = vrcp.f32 %v7981_v36  ;;  %v7982_v39 = vadd.f32 1.0, %v9876_v42  ;;  %v9878_v52 = vpop.eup %9877  ;;  %v9950_v36 = vld [vmem:[%s10114_s27 + $0x38] sm:$0xff] }
 0x8c2   : > { %9899 = vrcp.f32 %v7980_v32 }
 0x8c3   : > { %9901 = vrcp.f32 %v7982_v39  ;;  %v9880_v31 = vpop.eup %9879  ;;  %v9953_v39 = vld [vmem:[%s10114_s27 + $0x8] sm:$0xff] }
 0x8c4   : > { %9903 = vrcp.f32 %v7973_v43  ;;  %v8016_v11 = vmul.f32 %v9880_v31, %v17964_v17  ;;  %v9951_v43 = vld [vmem:[%s10114_s27 + $0x20] sm:$0xff] }
 0x8c5   : > { %9905 = vrcp.f32 %v7970_v44  ;;  %v9882_v40 = vpop.eup %9881 }
 0x8c6   : > { %9907 = vrcp.f32 %v7969_v27  ;;  %v8032_v27 = vadd.f32 %v9953_v39, %v8016_v11 }
 0x8c7   : > { %v9884_v13 = vpop.eup %9883 }
 0x8c8   : > { %v9886_v34 = vpop.eup %9885 }
 0x8c9   : > { %v9888_v30 = vpop.eup %9887  ;;  %v8022_v14 = vmul.f32 %v9886_v34, %v17958_v16  ;;  %v9947_v16 = vld [vmem:[%s10114_s27 + $0x40] sm:$0xff]  ;;  %v9956_v34 = vld [vmem:[%s10114_s27 + $0x10] sm:$0xff] }
 0x8ca   : > { %v9890_v51 = vpop.eup %9889  ;;  %v8023_v21 = vmul.f32 %v9888_v30, %v17940_v7  ;;  %v8019_v7 = vmul.f32 %v9882_v40, %v17956_v10  ;;  %v9955_v40 = vld [vmem:[%s10114_s27] sm:$0xff] }
 0x8cb   : > { %v9892_v37 = vpop.eup %9891  ;;  %v8025_v1 = vmul.f32 %v9890_v51, %v17949_v3  ;;  %v9945_v3 = vld [vmem:[%s10114_s27 + $0x48] sm:$0xff]  ;;  %v8038_v42 = vadd.f32 %v9950_v36, %v8022_v14  ;;  %v9237_v51 = vld [vmem:[%s18348_s9 + $0x18] sm:$0xff] }
 0x8cc   : > { %v9894_v20 = vpop.eup %9893  ;;  %v8024_v53 = vmul.f32 %v9892_v37, %v17931_v59  ;;  %v9942_v59 = vld [vmem:[%s10114_s27 + $0x78] sm:$0xff]  ;;  %v8039_v5 = vadd.f32 %v9947_v16, %v8023_v21  ;;  %v8035_v32 = vadd.f32 %v9951_v43, %v8019_v7  ;;  %v8056_v37 = vpop.permute.xlu1 %8055  ;;  %v19723_v21 = vld [vmem:[#allocation52_spill] sm:$0xff] }
 0x8cd   : > { %v9896_v2 = vpop.eup %9895  ;;  %v8026_v23 = vmul.f32 %v9894_v20, %v17942_v15  ;;  %v8041_v12 = vadd.f32 %v9948_v55, %v8025_v1  ;;  %v8061_v20 = vpop.permute.xlu0 %8060 }
 0x8ce   : > { %v9898_v61 = vpop.eup %9897  ;;  %v8027_v8 = vmul.f32 %v9896_v2, %v17925_v9  ;;  %v9941_v9 = vld [vmem:[%s10114_s27 + $0x68] sm:$0xff] }
 0x8cf   : > { %v9900_v38 = vpop.eup %9899  ;;  %v8029_v26 = vmul.f32 %v9898_v61, %v17933_v25  ;;  %v8015_v25 = vmul.f32 %v9878_v52, %v17972_v49  ;;  %v8042_v62 = vadd.f32 %v9946_v41, %v8026_v23  ;;  %v9954_v52 = vld [vmem:[%s10114_s27 + $0x18] sm:$0xff] }
 0x8d0   : > { %v9902_v60 = vpop.eup %9901  ;;  %v8028_v18 = vmul.f32 %v9900_v38, %v17922_v6  ;;  %v8020_v6 = vmul.f32 %v9884_v13, %v17947_v54  ;;  %v8040_v54 = vadd.f32 %v9945_v3, %v8024_v53  ;;  %v9236_v13 = vld [vmem:[%s18348_s9 + $0x10] sm:$0xff]  ;;  %v5370_v2 = vpop.permute.xlu1 %5369 }
 0x8d1   : > { %v9904_v58 = vpop.eup %9903  ;;  %v8030_v35 = vmul.f32 %v9902_v60, %v17927_v28  ;;  %v9943_v28 = vld [vmem:[%s10114_s27 + $0x60] sm:$0xff]  ;;  %v8045_v0 = vadd.f32 %v9944_v47, %v8029_v26  ;;  %v18071_v61 = vadd.f32 %v17787_v29, %v5370_v2  ;;  %v18074_v60 = vadd.f32 %v17803_v33, %v5370_v2 }
 0x8d2   : > { %v9906_v63 = vpop.eup %9905  ;;  %v8044_v4 = vadd.f32 %v9941_v9, %v8028_v18  ;;  %v8043_v15 = vadd.f32 %v9943_v28, %v8027_v8  ;;  %v8021_v49 = vmul.f32 %v9904_v58, %v17967_v46  ;;  %v8036_v46 = vadd.f32 %v9949_v45, %v8020_v6  ;;  %v5375_v8 = vpop.permute.xlu0 %5374  ;;  %v19722_v58 = vld [vmem:[#allocation59_spill] sm:$0xff] }
 0x8d3   : > { %v9908_v22 = vpop.eup %9907  ;;  %v8046_v50 = vadd.f32 %v9942_v59, %v8030_v35  ;;  %v8018_v10 = vmul.f32 %v9906_v63, %v17974_v48  ;;  %v9952_v48 = vld [vmem:[%s10114_s27 + $0x30] sm:$0xff]  ;;  %v18077_v18 = vadd.f32 %v17811_v19, %v5370_v2  ;;  %v18080_v53 = vadd.f32 %v17821_v24, %v5375_v8  ;;  %v19724_v33 = vld [vmem:[#allocation83_spill] sm:$0xff] }
 0x8d4   : > { %8093 = vmatprep.subr.mxu0 %v8044_v4  ;;  %v8017_v17 = vmul.f32 %v9908_v22, %v17981_v57  ;;  %v8037_v44 = vadd.f32 %v9952_v48, %v8021_v49  ;;  %v8031_v57 = vadd.f32 %v9955_v40, %v8015_v25  ;;  %v18083_v35 = vadd.f32 %v19722_v58, %v5375_v8  ;;  %v19725_v22 = vld [vmem:[#allocation63_spill] sm:$0xff] }
 0x8d5   : > { %8170 = vmatprep.subr.mxu1 %v8046_v50  ;;  %8094 = vmatpush1.msra.mxu0 %v8043_v15  ;;  %v8034_v31 = vadd.f32 %v9954_v52, %v8018_v10  ;;  %v18086_v63 = vadd.f32 %v19723_v21, %v5375_v8  ;;  %v18089_v4 = vmul.f32 0.01, %v18071_v61  ;;  %v18092_v1 = vadd.f32 %v19724_v33, %v5370_v2 }
 0x8d6   : > { %8171 = vmatpush1.msra.mxu1 %v8045_v0  ;;  %8095 = vmatprep.subr.mxu0 %v8040_v54  ;;  %v8033_v30 = vadd.f32 %v9956_v34, %v8017_v17  ;;  %v18095_v24 = vmul.f32 0.01, %v18074_v60  ;;  %v18098_v25 = vmul.f32 0.01, %v18077_v18  ;;  %v18101_v59 = vadd.f32 %v19725_v22, %v5375_v8  ;;  %v5561_v8 = vld [vmem:[%s18350_s11] sm:$0xff] }
 0x8d7   : > { %8172 = vmatprep.subr.mxu1 %v8042_v62  ;;  %8096 = vmatpush1.msra.mxu0 %v8039_v5  ;;  %vm5541_vm7 = vcmp.gt.f32.partialorder %v18080_v53, 0.0  ;;  %v5550_v15 = vmul.f32 0.01, %v18083_v35  ;;  %v5552_v0 = vmul.f32 0.01, %v18086_v63  ;;  %vm5542_vm10 = vcmp.gt.f32.partialorder %v18083_v35, 0.0 }
 0x8d8   : > { %8173 = vmatpush1.msra.mxu1 %v8041_v12  ;;  %8097 = vmatprep.subr.mxu0 %v8036_v46  ;;  %vm5544_vm3 = vcmp.gt.f32.partialorder %v18086_v63, 0.0  ;;  %v5551_v48 = vmul.f32 0.01, %v18101_v59  ;;  %v5547_v40 = vmul.f32 0.01, %v18092_v1 }
 0x8d9   : > { %8174 = vmatprep.subr.mxu1 %v8038_v42  ;;  %8098 = vmatpush1.msra.mxu0 %v8035_v32  ;;  %v5549_v42 = vmul.f32 0.01, %v18080_v53 }
 0x8da   : > { %8175 = vmatpush1.msra.mxu1 %v8037_v44  ;;  %8099 = vmatprep.subr.mxu0 %v8032_v27  ;;  %v9244_v27 = vld [vmem:[%s18350_s11 + $0x20] sm:$0xff] }
 0x8db   : > { %8176 = vmatprep.subr.mxu1 %v8034_v31  ;;  %8100 = vmatpush1.msra.mxu0 %v8031_v57  ;;  %v5558_v31 = vsel %vm5542_vm10, %v18083_v35, %v5550_v15  ;;  %v5560_v57 = vsel %vm5544_vm3, %v18086_v63, %v5552_v0 }
 0x8dc   : > { %8177 = vmatpush1.msra.mxu1 %v8033_v30  ;;  %9240 = vmatmul.mubr.msk.f32.vlgmr.msra.gmra.mxu0 %vm19719_vm2, %v9236_v13  ;;  %vm5543_vm2 = vcmp.gt.f32.partialorder %v18101_v59, 0.0 }
 0x8dd   : > { %9242 = vmatmul.mubr.msk.f32.vlgmr.msra.gmra.mxu1 %vm19720_vm5, %v9236_v13  ;;  %8139 = vmatprep.mubr.f32.mxu0 %v19706_v56  ;;  %vm5538_vm5 = vcmp.gt.f32.partialorder %v18074_v60, 0.0  ;;  %v5557_v13 = vsel %vm5541_vm7, %v18080_v53, %v5549_v42  ;;  %v5559_v34 = vsel %vm5543_vm2, %v18101_v59, %v5551_v48  ;;  %vm19726_vm7 = vcmask 261120  }
 0x8de   : > { %8216 = vmatprep.mubr.f32.mxu1 %v19706_v56  ;;  %v5554_v30 = vsel %vm5538_vm5, %v18074_v60, %v18095_v24  ;;  %v5562_v60 = vld [vmem:[%s18350_s11 + $0x8] sm:$0xff] }
 0x8e0   : > { %9241 = vmatmul.mubr.msk.f32.gmra.mxu0 %vm19721_vm9, %v9237_v51  ;;  %vm5537_vm9 = vcmp.gt.f32.partialorder %v18071_v61, 0.0 }
 0x8e1   : > { %9243 = vmatmul.mubr.msk.f32.gmra.mxu1 %vm19705_vm1, %v9237_v51  ;;  %8329 = vmatprep.mubr.f32.mxu0 %v19706_v56  ;;  %vm5540_vm1 = vcmp.gt.f32.partialorder %v18077_v18, 0.0 }
 0x8e2   : > { %8418 = vmatprep.mubr.f32.mxu1 %v19706_v56  ;;  %v5556_v51 = vsel %vm5540_vm1, %v18077_v18, %v18098_v25  ;;  %v5563_v18 = vld [vmem:[%s18350_s11 + $0x10] sm:$0xff] }
 0x99c   : > { %v8135_v38 = vpop.f32.mrf.mxu0 }
 0x99d   : > { %v8212_v26 = vpop.f32.mrf.mxu1  ;;  %v8136_v29 = vadd.f32 %v8135_v38, %v8056_v37  ;;  %v9247_v38 = vld [vmem:[%s18350_s11 + $0x38] sm:$0xff] }
 0x99e   : > { %v8137_v23 = vpop.f32.mrf.mxu0  ;;  %v8213_v54 = vadd.f32 %v8212_v26, %v8056_v37  ;;  %v5564_v26 = vld [vmem:[%s18350_s11 + $0x18] sm:$0xff] }
 0x99f   : > { %v8214_v9 = vpop.f32.mrf.mxu1  ;;  %v8138_v19 = vadd.f32 %v8137_v23, %v8056_v37  ;;  %v8231_v3 = vmul.f32 0.01, %v8136_v29  ;;  %vm8223_vm12 = vcmp.gt.f32.partialorder %v8136_v29, 0.0 }
 0x9a0   : > { %v8141_v6 = vpop.f32.mrf.mxu0  ;;  %v8215_v14 = vadd.f32 %v8214_v9, %v8056_v37  ;;  %v8233_v45 = vmul.f32 0.01, %v8213_v54  ;;  %vm8225_vm4 = vcmp.gt.f32.partialorder %v8213_v54, 0.0  ;;  %v5553_v37 = vsel %vm5537_vm9, %v18071_v61, %v18089_v4  ;;  %v9246_v61 = vld [vmem:[%s18350_s11 + $0x30] sm:$0xff] }
 0x9a1   : > { %v8142_v50 = vadd.f32 %v8141_v6, %v8061_v20  ;;  %v8218_v28 = vpop.f32.mrf.mxu1  ;;  %v8232_v41 = vmul.f32 0.01, %v8138_v19  ;;  %vm8224_vm0 = vcmp.gt.f32.partialorder %v8138_v19, 0.0  ;;  %v8239_v39 = vsel %vm8223_vm12, %v8136_v29, %v8231_v3 }
 0x9a2   : > { %v8219_v7 = vadd.f32 %v8218_v28, %v8061_v20  ;;  %v8143_v47 = vpop.f32.mrf.mxu0  ;;  %v8234_v55 = vmul.f32 0.01, %v8215_v14  ;;  %vm8226_vm8 = vcmp.gt.f32.partialorder %v8215_v14, 0.0  ;;  %v8241_v52 = vsel %vm8225_vm4, %v8213_v54, %v8233_v45 }
 0x9a3   : > { %v8144_v49 = vadd.f32 %v8143_v47, %v8061_v20  ;;  %v8220_v11 = vpop.f32.mrf.mxu1  ;;  %v8235_v62 = vmul.f32 0.01, %v8142_v50  ;;  %vm8227_vm11 = vcmp.gt.f32.partialorder %v8142_v50, 0.0  ;;  %v8240_v32 = vsel %vm8224_vm0, %v8138_v19, %v8232_v41 }
 0x9a4   : > { %v8221_v16 = vadd.f32 %v8220_v11, %v8061_v20  ;;  %v8237_v5 = vmul.f32 0.01, %v8219_v7  ;;  %vm8229_vm6 = vcmp.gt.f32.partialorder %v8219_v7, 0.0  ;;  %v8242_v44 = vsel %vm8226_vm8, %v8215_v14, %v8234_v55  ;;  %v9245_v20 = vld [vmem:[%s18350_s11 + $0x28] sm:$0xff] }
 0x9a5   : > { %v8236_v10 = vmul.f32 0.01, %v8144_v49  ;;  %vm8228_vm15 = vcmp.gt.f32.partialorder %v8144_v49, 0.0  ;;  %v8243_v36 = vsel %vm8227_vm11, %v8142_v50, %v8235_v62  ;;  %vm5539_vm0 = vcmp.gt.f32.partialorder %v18092_v1, 0.0  ;;  %vm19727_vm11 = vmmov %vm19726_vm7 }
 0x9a6   : > { %v8238_v12 = vmul.f32 0.01, %v8221_v16  ;;  %vm8230_vm13 = vcmp.gt.f32.partialorder %v8221_v16, 0.0  ;;  %v8245_v43 = vsel %vm8229_vm6, %v8219_v7, %v8237_v5  ;;  %v5555_v2 = vsel %vm5539_vm0, %v18092_v1, %v5547_v40  ;;  %vm19729_vm6 = vmmov %vm19726_vm7 }
 0x9a7   : > { %v8244_v46 = vsel %vm8228_vm15, %v8144_v49, %v8236_v10  ;;  %vm19728_vm15 = vmmov %vm19726_vm7 }
 0x9a8   : > { %8293 = vmatprep.subr.mxu0 %v8244_v46  ;;  %v8246_v17 = vsel %vm8230_vm13, %v8221_v16, %v8238_v12  ;;  %vm19730_vm13 = vmmov %vm19729_vm6 }
 0x9a9   : > { %8382 = vmatprep.subr.mxu1 %v8246_v17  ;;  %8294 = vmatpush1.msra.mxu0 %v8243_v36  ;;  %vm19731_vm12 = vmmov %vm19729_vm6 }
 0x9aa   : > { %8383 = vmatpush1.msra.mxu1 %v8245_v43  ;;  %8295 = vmatprep.subr.mxu0 %v8240_v32  ;;  %vm19732_vm8 = vmmov %vm19729_vm6 }
 0x9ab   : > { %8384 = vmatprep.subr.mxu1 %v8242_v44  ;;  %8296 = vmatpush1.msra.mxu0 %v8239_v39  ;;  %vm19733_vm4 = vmmov %vm19729_vm6 }
 0x9ac   : > { %8385 = vmatpush1.msra.mxu1 %v8241_v52  ;;  %8483 = vmatprep.subr.mxu0 %v5558_v31  ;;  %vm19734_vm10 = vmmov %vm19733_vm4 }
 0x9ad   : > { %8572 = vmatprep.subr.mxu1 %v5560_v57  ;;  %9248 = vmatmul.mubr.msk.f32.vlgmr.msra.gmra.mxu0 %vm8252_vm14, %v9244_v27  ;;  %vm19735_vm3 = vmmov %vm19733_vm4 }
 0x9ae   : > { %9252 = vmatmul.mubr.msk.f32.vlgmr.msra.gmra.mxu1 %vm8252_vm14, %v9244_v27  ;;  %8484 = vmatpush1.msra.mxu0 %v5557_v13  ;;  %vm19737_vm2 = vmmov %vm19735_vm3 }
 0x9af   : > { %8573 = vmatpush1.msra.mxu1 %v5559_v34  ;;  %8485 = vmatprep.subr.mxu0 %v5554_v30  ;;  %vm19738_vm5 = vmmov %vm19737_vm2 }
 0x9b0   : > { %8574 = vmatprep.subr.mxu1 %v5556_v51  ;;  %8486 = vmatpush1.msra.mxu0 %v5553_v37  ;;  %vm19739_vm9 = vmmov %vm19737_vm2 }
 0x9b1   : > { %8575 = vmatpush1.msra.mxu1 %v5555_v2  ;;  %8335 = vmatprep.mubr.f32.mxu0 %v19706_v56  ;;  %vm19740_vm1 = vmmov %vm19737_vm2 }
 0x9b2   : > { %9249 = vmatmul.mubr.msk.f32.gmra.mxu0 %vm8252_vm14, %v9245_v20  ;;  %8424 = vmatprep.mubr.f32.mxu1 %v19706_v56  ;;  %vm19741_vm0 = vmmov %vm19740_vm1 }
 0x9b3   : > { %8341 = vmatprep.mubr.f32.mxu0 %v19706_v56  ;;  %9253 = vmatmul.mubr.msk.f32.gmra.mxu1 %vm8252_vm14, %v9245_v20 }
 0x9b4   : > { %8430 = vmatprep.mubr.f32.mxu1 %v19706_v56 }
 0x9b6   : > { %9250 = vmatmul.mubr.msk.f32.gmra.mxu0 %vm8252_vm14, %v9246_v61 }
 0x9b7   : > { %8347 = vmatprep.mubr.f32.mxu0 %v19706_v56  ;;  %9254 = vmatmul.mubr.msk.f32.gmra.mxu1 %vm8252_vm14, %v9246_v61 }
 0x9b8   : > { %8436 = vmatprep.mubr.f32.mxu1 %v19706_v56 }
 0x9ba   : > { %9251 = vmatmul.mubr.msk.f32.gmra.mxu0 %vm8252_vm14, %v9247_v38 }
 0x9bb   : > { %8519 = vmatprep.mubr.f32.mxu0 %v19706_v56  ;;  %9255 = vmatmul.mubr.msk.f32.gmra.mxu1 %vm8252_vm14, %v9247_v38 }
 0x9bc   : > { %8608 = vmatprep.mubr.f32.mxu1 %v19706_v56 }
 0x9be   : > { %9256 = vmatmul.mubr.msk.f32.vlgmr.msra.gmra.mxu0 %vm8252_vm14, %v5561_v8 }
 0x9bf   : > { %8525 = vmatprep.mubr.f32.mxu0 %v19706_v56  ;;  %9260 = vmatmul.mubr.msk.f32.vlgmr.msra.gmra.mxu1 %vm8252_vm14, %v5561_v8 }
 0x9c0   : > { %8614 = vmatprep.mubr.f32.mxu1 %v19706_v56 }
 0x9c2   : > { %9257 = vmatmul.mubr.msk.f32.gmra.mxu0 %vm8252_vm14, %v5562_v60 }
 0x9c3   : > { %8531 = vmatprep.mubr.f32.mxu0 %v19706_v56  ;;  %9261 = vmatmul.mubr.msk.f32.gmra.mxu1 %vm8252_vm14, %v5562_v60 }
 0x9c4   : > { %8620 = vmatprep.mubr.f32.mxu1 %v19706_v56 }
 0x9c6   : > { %9258 = vmatmul.mubr.msk.f32.gmra.mxu0 %vm8252_vm14, %v5563_v18 }
 0x9c7   : > { %8537 = vmatprep.mubr.f32.mxu0 %v19706_v56  ;;  %9262 = vmatmul.mubr.msk.f32.gmra.mxu1 %vm8252_vm14, %v5563_v18 }
 0x9c8   : > { %8626 = vmatprep.mubr.f32.mxu1 %v19706_v56 }
 0x9ca   : > { %9259 = vmatmul.mubr.msk.f32.gmra.mxu0 %vm8252_vm14, %v5564_v26 }
 0x9cb   : > { %9263 = vmatmul.mubr.msk.f32.gmra.mxu1 %vm8252_vm14, %v5564_v26  ;;  %vm19736_vm14 = vmmov %vm19735_vm3 }
 0xa6d   : > { %v8331_v53 = vpop.f32.mrf.mxu0 }
 0xa6e   : > { %v8420_v7 = vpop.f32.mrf.mxu1 }
 0xa6f   : > { %v8333_v58 = vpop.f32.mrf.mxu0 }
 0xa70   : > { %v8422_v3 = vpop.f32.mrf.mxu1 }
 0xa72   : > { %v8337_v35 = vpop.f32.mrf.mxu0 }
 0xa73   : > { %v8426_v54 = vpop.f32.mrf.mxu1 }
 0xa74   : > { %v8339_v23 = vpop.f32.mrf.mxu0 }
 0xa75   : > { %v8428_v49 = vpop.f32.mrf.mxu1 }
 0xa76   : > { %v8343_v21 = vpop.f32.mrf.mxu0 }
 0xa77   : > { %v8432_v11 = vpop.f32.mrf.mxu1 }
 0xa78   : > { %v8345_v63 = vpop.f32.mrf.mxu0 }
 0xa79   : > { %v8434_v41 = vpop.f32.mrf.mxu1 }
 0xa7a   : > { %v8349_v29 = vpop.f32.mrf.mxu0 }
 0xa7b   : > { %v8438_v62 = vpop.f32.mrf.mxu1 }
 0xa7c   : > { %v8351_v9 = vpop.f32.mrf.mxu0 }
 0xa7d   : > { %v8440_v16 = vpop.f32.mrf.mxu1 }
 0xa7e   : > { %v8521_v4 = vpop.f32.mrf.mxu0 }
 0xa7f   : > { %v8522_v33 = vadd.f32 %v8521_v4, %v8331_v53  ;;  %v8610_v5 = vpop.f32.mrf.mxu1 }
 0xa80   : > { %v8523_v1 = vpop.f32.mrf.mxu0  ;;  %v8611_v46 = vadd.f32 %v8610_v5, %v8420_v7 }
 0xa81   : > { %v8524_v19 = vadd.f32 %v8523_v1, %v8333_v58  ;;  %8633 = vxpose.xlu0.b32.start [1/4] (short) %v8522_v33, 128  ;;  %v8612_v10 = vpop.f32.mrf.mxu1 }
 0xa82   : > { %v8527_v6 = vpop.f32.mrf.mxu0  ;;  %v8613_v17 = vadd.f32 %v8612_v10, %v8422_v3 }
 0xa83   : > { %v8528_v24 = vadd.f32 %v8527_v6, %v8337_v35  ;;  %8665 = vxpose.xlu1.b32.start [1/4] (short) %v8524_v19, 128  ;;  %v8616_v55 = vpop.f32.mrf.mxu1 }
 0xa84   : > { %v8529_v56 = vpop.f32.mrf.mxu0  ;;  %v8617_v42 = vadd.f32 %v8616_v55, %v8426_v54 }
 0xa85   : > { %v8530_v25 = vadd.f32 %v8529_v56, %v8339_v23  ;;  %8634 = vxpose.xlu0.b32.cont [2/4] (short) %v8528_v24, 128  ;;  %v8618_v12 = vpop.f32.mrf.mxu1 }
 0xa86   : > { %v8533_v22 = vpop.f32.mrf.mxu0  ;;  %v8619_v43 = vadd.f32 %v8618_v12, %v8428_v49 }
 0xa87   : > { %v8534_v59 = vadd.f32 %v8533_v22, %v8343_v21  ;;  %8666 = vxpose.xlu1.b32.cont [2/4] (short) %v8530_v25, 128  ;;  %v8622_v45 = vpop.f32.mrf.mxu1 }
 0xa88   : > { %v8535_v50 = vpop.f32.mrf.mxu0  ;;  %v8623_v48 = vadd.f32 %v8622_v45, %v8432_v11 }
 0xa89   : > { %v8536_v28 = vadd.f32 %v8535_v50, %v8345_v63  ;;  %8635 = vxpose.xlu0.b32.cont [3/4] (short) %v8534_v59, 128  ;;  %v8624_v36 = vpop.f32.mrf.mxu1 }
 0xa8a   : > { %v8539_v15 = vpop.f32.mrf.mxu0  ;;  %v8625_v44 = vadd.f32 %v8624_v36, %v8434_v41 }
 0xa8b   : > { %v8540_v14 = vadd.f32 %v8539_v15, %v8349_v29  ;;  %8667 = vxpose.xlu1.b32.cont [3/4] (short) %v8536_v28, 128  ;;  %v8628_v32 = vpop.f32.mrf.mxu1 }
 0xa8c   : > { %v8541_v47 = vpop.f32.mrf.mxu0  ;;  %v8629_v27 = vadd.f32 %v8628_v32, %v8438_v62 }
 0xa8d   : > { %v8542_v0 = vadd.f32 %v8541_v47, %v8351_v9  ;;  %8636 = vxpose.xlu0.b32.end [4/4] (short) %v8540_v14, 128  ;;  %v8630_v39 = vpop.f32.mrf.mxu1 }
 0xa8e   : > { %v8631_v52 = vadd.f32 %v8630_v39, %v8440_v16 }
 0xa8f   : > { %8668 = vxpose.xlu1.b32.end [4/4] (short) %v8542_v0, 128 }
 0xabe   : > { %8697 = vxpose.xlu0.b32.start [1/4] (short) %v8611_v46, 128 }
 0xac0   : > { %8729 = vxpose.xlu1.b32.start [1/4] (short) %v8613_v17, 128 }
 0xac2   : > { %8698 = vxpose.xlu0.b32.cont [2/4] (short) %v8617_v42, 128 }
 0xac4   : > { %8730 = vxpose.xlu1.b32.cont [2/4] (short) %v8619_v43, 128 }
 0xac6   : > { %8699 = vxpose.xlu0.b32.cont [3/4] (short) %v8623_v48, 128 }
 0xac8   : > { %8731 = vxpose.xlu1.b32.cont [3/4] (short) %v8625_v44, 128 }
 0xaca   : > { %8700 = vxpose.xlu0.b32.end [4/4] (short) %v8629_v27, 128 }
 0xacc   : > { %8732 = vxpose.xlu1.b32.end [4/4] (short) %v8631_v52, 128 }
 0xafd   : > { %v8649_v31 = vpop.trf.xlu0 }
 0xafe   : > { %8761 = vst.msk [vmem:[%s18199_s18] sm:$0xff] %vm19726_vm7, %v8649_v31  ;;  %vm19742_vm7 = vmmov %vm19741_vm0 }
 0xaff   : > { %v8681_v40 = vpop.trf.xlu1 }
 0xb00   : > { %8777 = vst.msk [vmem:[%s18199_s18 + $0x80] sm:$0xff] %vm19727_vm11, %v8681_v40  ;;  %vm19743_vm11 = vmmov %vm19741_vm0 }
 0xb01   : > { %v8650_v57 = vpop.trf.xlu0 }
 0xb02   : > { %8762 = vst.msk [vmem:[%s18199_s18 + $0x8] sm:$0xff] %vm19728_vm15, %v8650_v57  ;;  %vm19744_vm15 = vmmov %vm19741_vm0 }
 0xb03   : > { %v8682_v13 = vpop.trf.xlu1 }
 0xb04   : > { %8778 = vst.msk [vmem:[%s18199_s18 + $0x88] sm:$0xff] %vm19729_vm6, %v8682_v13  ;;  %vm19745_vm6 = vmmov %vm19741_vm0 }
 0xb05   : > { %v8651_v34 = vpop.trf.xlu0 }
 0xb06   : > { %8763 = vst.msk [vmem:[%s18199_s18 + $0x10] sm:$0xff] %vm19730_vm13, %v8651_v34  ;;  %vm19746_vm13 = vmmov %vm19741_vm0 }
 0xb07   : > { %v8683_v30 = vpop.trf.xlu1 }
 0xb08   : > { %8779 = vst.msk [vmem:[%s18199_s18 + $0x90] sm:$0xff] %vm19731_vm12, %v8683_v30  ;;  %vm19747_vm12 = vmmov %vm19741_vm0 }
 0xb09   : > { %v8652_v51 = vpop.trf.xlu0 }
 0xb0a   : > { %8764 = vst.msk [vmem:[%s18199_s18 + $0x18] sm:$0xff] %vm19732_vm8, %v8652_v51  ;;  %vm19748_vm8 = vmmov %vm19741_vm0 }
 0xb0b   : > { %v8684_v37 = vpop.trf.xlu1 }
 0xb0c   : > { %8780 = vst.msk [vmem:[%s18199_s18 + $0x98] sm:$0xff] %vm19733_vm4, %v8684_v37  ;;  %vm19749_vm4 = vmmov %vm19741_vm0 }
 0xb0d   : > { %v8653_v20 = vpop.trf.xlu0 }
 0xb0e   : > { %8765 = vst.msk [vmem:[%s18199_s18 + $0x20] sm:$0xff] %vm19734_vm10, %v8653_v20  ;;  %vm19750_vm10 = vmmov %vm19741_vm0 }
 0xb0f   : > { %v8685_v2 = vpop.trf.xlu1 }
 0xb10   : > { %8781 = vst.msk [vmem:[%s18199_s18 + $0xa0] sm:$0xff] %vm19735_vm3, %v8685_v2  ;;  %vm19751_vm3 = vmmov %vm19741_vm0 }
 0xb11   : > { %v8654_v61 = vpop.trf.xlu0 }
 0xb12   : > { %8766 = vst.msk [vmem:[%s18199_s18 + $0x28] sm:$0xff] %vm19736_vm14, %v8654_v61  ;;  %vm19752_vm14 = vmmov %vm19741_vm0 }
 0xb13   : > { %v8686_v38 = vpop.trf.xlu1 }
 0xb14   : > { %8782 = vst.msk [vmem:[%s18199_s18 + $0xa8] sm:$0xff] %vm19737_vm2, %v8686_v38  ;;  %vm19753_vm2 = vmmov %vm19741_vm0 }
 0xb15   : > { %v8655_v8 = vpop.trf.xlu0 }
 0xb16   : > { %8767 = vst.msk [vmem:[%s18199_s18 + $0x30] sm:$0xff] %vm19738_vm5, %v8655_v8  ;;  %vm19754_vm5 = vmmov %vm19741_vm0 }
 0xb17   : > { %v8687_v60 = vpop.trf.xlu1 }
 0xb18   : > { %8783 = vst.msk [vmem:[%s18199_s18 + $0xb0] sm:$0xff] %vm19739_vm9, %v8687_v60  ;;  %vm19755_vm9 = vmmov %vm19741_vm0 }
 0xb19   : > { %v8656_v18 = vpop.trf.xlu0 }
 0xb1a   : > { %8768 = vst.msk [vmem:[%s18199_s18 + $0x38] sm:$0xff] %vm19740_vm1, %v8656_v18  ;;  %vm19756_vm1 = vmmov %vm19741_vm0 }
 0xb1b   : > { %v8688_v26 = vpop.trf.xlu1 }
 0xb1c   : > { %8784 = vst.msk [vmem:[%s18199_s18 + $0xb8] sm:$0xff] %vm19741_vm0, %v8688_v26 }
 0xb1d   : > { %v8657_v53 = vpop.trf.xlu0 }
 0xb1e   : > { %8769 = vst.msk [vmem:[%s18199_s18 + $0x40] sm:$0xff] %vm19742_vm7, %v8657_v53  ;;  %vm19757_vm7 = vmmov %vm19741_vm0 }
 0xb1f   : > { %v8689_v58 = vpop.trf.xlu1 }
 0xb20   : > { %8785 = vst.msk [vmem:[%s18199_s18 + $0xc0] sm:$0xff] %vm19743_vm11, %v8689_v58  ;;  %vm19758_vm11 = vmmov %vm19741_vm0 }
 0xb21   : > { %v8658_v35 = vpop.trf.xlu0 }
 0xb22   : > { %8770 = vst.msk [vmem:[%s18199_s18 + $0x48] sm:$0xff] %vm19744_vm15, %v8658_v35  ;;  %vm19759_vm15 = vmmov %vm19741_vm0 }
 0xb23   : > { %v8690_v23 = vpop.trf.xlu1 }
 0xb24   : > { %8786 = vst.msk [vmem:[%s18199_s18 + $0xc8] sm:$0xff] %vm19745_vm6, %v8690_v23  ;;  %vm19760_vm6 = vmmov %vm19741_vm0 }
 0xb25   : > { %v8659_v21 = vpop.trf.xlu0 }
 0xb26   : > { %8771 = vst.msk [vmem:[%s18199_s18 + $0x50] sm:$0xff] %vm19746_vm13, %v8659_v21  ;;  %vm19761_vm13 = vmmov %vm19741_vm0 }
 0xb27   : > { %v8691_v63 = vpop.trf.xlu1 }
 0xb28   : > { %8787 = vst.msk [vmem:[%s18199_s18 + $0xd0] sm:$0xff] %vm19747_vm12, %v8691_v63  ;;  %vm19762_vm12 = vmmov %vm19741_vm0 }
 0xb29   : > { %v8660_v29 = vpop.trf.xlu0 }
 0xb2a   : > { %8772 = vst.msk [vmem:[%s18199_s18 + $0x58] sm:$0xff] %vm19748_vm8, %v8660_v29  ;;  %vm19763_vm8 = vmmov %vm19741_vm0 }
 0xb2b   : > { %v8692_v9 = vpop.trf.xlu1 }
 0xb2c   : > { %8788 = vst.msk [vmem:[%s18199_s18 + $0xd8] sm:$0xff] %vm19749_vm4, %v8692_v9  ;;  %vm19764_vm4 = vmmov %vm19741_vm0 }
 0xb2d   : > { %v8661_v4 = vpop.trf.xlu0 }
 0xb2e   : > { %8773 = vst.msk [vmem:[%s18199_s18 + $0x60] sm:$0xff] %vm19750_vm10, %v8661_v4  ;;  %vm19765_vm10 = vmmov %vm19741_vm0 }
 0xb2f   : > { %v8693_v33 = vpop.trf.xlu1 }
 0xb30   : > { %8789 = vst.msk [vmem:[%s18199_s18 + $0xe0] sm:$0xff] %vm19751_vm3, %v8693_v33  ;;  %vm19766_vm3 = vmmov %vm19741_vm0 }
 0xb31   : > { %v8662_v1 = vpop.trf.xlu0 }
 0xb32   : > { %8774 = vst.msk [vmem:[%s18199_s18 + $0x68] sm:$0xff] %vm19752_vm14, %v8662_v1  ;;  %vm19767_vm14 = vmmov %vm19741_vm0 }
 0xb33   : > { %v8694_v19 = vpop.trf.xlu1 }
 0xb34   : > { %8790 = vst.msk [vmem:[%s18199_s18 + $0xe8] sm:$0xff] %vm19753_vm2, %v8694_v19  ;;  %vm19768_vm2 = vmmov %vm19741_vm0 }
 0xb35   : > { %v8663_v6 = vpop.trf.xlu0 }
 0xb36   : > { %8775 = vst.msk [vmem:[%s18199_s18 + $0x70] sm:$0xff] %vm19754_vm5, %v8663_v6  ;;  %vm19769_vm5 = vmmov %vm19741_vm0 }
 0xb37   : > { %v8695_v24 = vpop.trf.xlu1 }
 0xb38   : > { %8791 = vst.msk [vmem:[%s18199_s18 + $0xf0] sm:$0xff] %vm19755_vm9, %v8695_v24  ;;  %vm19770_vm9 = vmmov %vm19741_vm0 }
 0xb39   : > { %v8664_v56 = vpop.trf.xlu0 }
 0xb3a   : > { %8776 = vst.msk [vmem:[%s18199_s18 + $0x78] sm:$0xff] %vm19756_vm1, %v8664_v56  ;;  %vm19771_vm1 = vmmov %vm19741_vm0 }
 0xb3b   : > { %v8696_v25 = vpop.trf.xlu1 }
 0xb3c   : > { %8792 = vst.msk [vmem:[%s18199_s18 + $0xf8] sm:$0xff] %vm19741_vm0, %v8696_v25 }
 0xb3d   : > { %v8713_v22 = vpop.trf.xlu0 }
 0xb3e   : > { %8793 = vst.msk [vmem:[%s18199_s18 + $0x100] sm:$0xff] %vm19757_vm7, %v8713_v22  ;;  %vm19772_vm7 = vmmov %vm19741_vm0 }
 0xb3f   : > { %v8745_v59 = vpop.trf.xlu1 }
 0xb40   : > { %8809 = vst.msk [vmem:[%s18199_s18 + $0x180] sm:$0xff] %vm19758_vm11, %v8745_v59  ;;  %vm19773_vm11 = vmmov %vm19741_vm0 }
 0xb41   : > { %v8714_v50 = vpop.trf.xlu0 }
 0xb42   : > { %8794 = vst.msk [vmem:[%s18199_s18 + $0x108] sm:$0xff] %vm19759_vm15, %v8714_v50  ;;  %vm19774_vm15 = vmmov %vm19741_vm0 }
 0xb43   : > { %v8746_v28 = vpop.trf.xlu1 }
 0xb44   : > { %8810 = vst.msk [vmem:[%s18199_s18 + $0x188] sm:$0xff] %vm19760_vm6, %v8746_v28  ;;  %vm19775_vm6 = vmmov %vm19741_vm0 }
 0xb45   : > { %v8715_v15 = vpop.trf.xlu0 }
 0xb46   : > { %8795 = vst.msk [vmem:[%s18199_s18 + $0x110] sm:$0xff] %vm19761_vm13, %v8715_v15  ;;  %vm19776_vm13 = vmmov %vm19741_vm0 }
 0xb47   : > { %v8747_v14 = vpop.trf.xlu1 }
 0xb48   : > { %8811 = vst.msk [vmem:[%s18199_s18 + $0x190] sm:$0xff] %vm19762_vm12, %v8747_v14  ;;  %vm19777_vm12 = vmmov %vm19741_vm0 }
 0xb49   : > { %v8716_v7 = vpop.trf.xlu0 }
 0xb4a   : > { %8796 = vst.msk [vmem:[%s18199_s18 + $0x118] sm:$0xff] %vm19763_vm8, %v8716_v7  ;;  %vm19778_vm8 = vmmov %vm19741_vm0 }
 0xb4b   : > { %v8748_v47 = vpop.trf.xlu1 }
 0xb4c   : > { %8812 = vst.msk [vmem:[%s18199_s18 + $0x198] sm:$0xff] %vm19764_vm4, %v8748_v47  ;;  %vm19779_vm4 = vmmov %vm19741_vm0 }
 0xb4d   : > { %v8717_v0 = vpop.trf.xlu0 }
 0xb4e   : > { %8797 = vst.msk [vmem:[%s18199_s18 + $0x120] sm:$0xff] %vm19765_vm10, %v8717_v0  ;;  %vm19780_vm10 = vmmov %vm19741_vm0 }
 0xb4f   : > { %v8749_v3 = vpop.trf.xlu1 }
 0xb50   : > { %8813 = vst.msk [vmem:[%s18199_s18 + $0x1a0] sm:$0xff] %vm19766_vm3, %v8749_v3  ;;  %vm19781_vm3 = vmmov %vm19741_vm0 }
 0xb51   : > { %v8718_v54 = vpop.trf.xlu0 }
 0xb52   : > { %8798 = vst.msk [vmem:[%s18199_s18 + $0x128] sm:$0xff] %vm19767_vm14, %v8718_v54  ;;  %vm19782_vm14 = vmmov %vm19741_vm0 }
 0xb53   : > { %v8750_v49 = vpop.trf.xlu1 }
 0xb54   : > { %8814 = vst.msk [vmem:[%s18199_s18 + $0x1a8] sm:$0xff] %vm19768_vm2, %v8750_v49  ;;  %vm19783_vm2 = vmmov %vm19741_vm0 }
 0xb55   : > { %v8719_v11 = vpop.trf.xlu0 }
 0xb56   : > { %8799 = vst.msk [vmem:[%s18199_s18 + $0x130] sm:$0xff] %vm19769_vm5, %v8719_v11  ;;  %vm19784_vm5 = vmmov %vm19741_vm0 }
 0xb57   : > { %v8751_v41 = vpop.trf.xlu1 }
 0xb58   : > { %8815 = vst.msk [vmem:[%s18199_s18 + $0x1b0] sm:$0xff] %vm19770_vm9, %v8751_v41  ;;  %vm19785_vm9 = vmmov %vm19741_vm0 }
 0xb59   : > { %v8720_v62 = vpop.trf.xlu0 }
 0xb5a   : > { %8800 = vst.msk [vmem:[%s18199_s18 + $0x138] sm:$0xff] %vm19771_vm1, %v8720_v62  ;;  %vm19786_vm1 = vmmov %vm19741_vm0 }
 0xb5b   : > { %v8752_v16 = vpop.trf.xlu1 }
 0xb5c   : > { %8816 = vst.msk [vmem:[%s18199_s18 + $0x1b8] sm:$0xff] %vm19741_vm0, %v8752_v16 }
 0xb5d   : > { %v8721_v5 = vpop.trf.xlu0 }
 0xb5e   : > { %8801 = vst.msk [vmem:[%s18199_s18 + $0x140] sm:$0xff] %vm19772_vm7, %v8721_v5 }
 0xb5f   : > { %v8753_v10 = vpop.trf.xlu1 }
 0xb60   : > { %8817 = vst.msk [vmem:[%s18199_s18 + $0x1c0] sm:$0xff] %vm19773_vm11, %v8753_v10 }
 0xb61   : > { %v8722_v55 = vpop.trf.xlu0 }
 0xb62   : > { %8802 = vst.msk [vmem:[%s18199_s18 + $0x148] sm:$0xff] %vm19774_vm15, %v8722_v55 }
 0xb63   : > { %v8754_v12 = vpop.trf.xlu1 }
 0xb64   : > { %8818 = vst.msk [vmem:[%s18199_s18 + $0x1c8] sm:$0xff] %vm19775_vm6, %v8754_v12 }
 0xb65   : > { %v8723_v45 = vpop.trf.xlu0 }
 0xb66   : > { %8803 = vst.msk [vmem:[%s18199_s18 + $0x150] sm:$0xff] %vm19776_vm13, %v8723_v45 }
 0xb67   : > { %v8755_v46 = vpop.trf.xlu1 }
 0xb68   : > { %8819 = vst.msk [vmem:[%s18199_s18 + $0x1d0] sm:$0xff] %vm19777_vm12, %v8755_v46 }
 0xb69   : > { %v8724_v17 = vpop.trf.xlu0 }
 0xb6a   : > { %8804 = vst.msk [vmem:[%s18199_s18 + $0x158] sm:$0xff] %vm19778_vm8, %v8724_v17 }
 0xb6b   : > { %v8756_v36 = vpop.trf.xlu1 }
 0xb6c   : > { %8820 = vst.msk [vmem:[%s18199_s18 + $0x1d8] sm:$0xff] %vm19779_vm4, %v8756_v36 }
 0xb6d   : > { %v8725_v42 = vpop.trf.xlu0 }
 0xb6e   : > { %8805 = vst.msk [vmem:[%s18199_s18 + $0x160] sm:$0xff] %vm19780_vm10, %v8725_v42 }
 0xb6f   : > { %v8757_v43 = vpop.trf.xlu1 }
 0xb70   : > { %8821 = vst.msk [vmem:[%s18199_s18 + $0x1e0] sm:$0xff] %vm19781_vm3, %v8757_v43 }
 0xb71   : > { %v8726_v32 = vpop.trf.xlu0 }
 0xb72   : > { %8806 = vst.msk [vmem:[%s18199_s18 + $0x168] sm:$0xff] %vm19782_vm14, %v8726_v32 }
 0xb73   : > { %v8758_v48 = vpop.trf.xlu1 }
 0xb74   : > { %8822 = vst.msk [vmem:[%s18199_s18 + $0x1e8] sm:$0xff] %vm19783_vm2, %v8758_v48 }
 0xb75   : > { %v8727_v44 = vpop.trf.xlu0 }
 0xb76   : > { %8807 = vst.msk [vmem:[%s18199_s18 + $0x170] sm:$0xff] %vm19784_vm5, %v8727_v44 }
 0xb77   : > { %v8759_v39 = vpop.trf.xlu1 }
 0xb78   : > { %8823 = vst.msk [vmem:[%s18199_s18 + $0x1f0] sm:$0xff] %vm19785_vm9, %v8759_v39 }
 0xb79   : > { %v8728_v27 = vpop.trf.xlu0 }
 0xb7a   : > { %8808 = vst.msk [vmem:[%s18199_s18 + $0x178] sm:$0xff] %vm19786_vm1, %v8728_v27 }
 0xb7b   : > { %v8760_v52 = vpop.trf.xlu1 }
 0xb7c   : > { %8824 = vst.msk [vmem:[%s18199_s18 + $0x1f8] sm:$0xff] %vm19741_vm0, %v8760_v52 }
 0xb7d PF: > { %p19_p9 = scmp.ge.s32.totalorder %s10071_s25, 4   ;;  %s19787_s21 = smov %s9975_s22 }
 0xb7e   : > { %s19788_s22 = smov %s10080_s28  ;;  %s19789_s23 = smov %s10071_s25 }
 0xb7f   :  { %21 = sbr.rel (!%p19_p9) target bundleno = 2 (0x2), region = 135 }

</bundles_post_ra>
